<compile_context>
chip_gen: v7x
topology: tpu7x:2x2x1
jax: 0.10.0
libtpu: 0.0.40
codegen_flags: <defaults>
</compile_context>

<pallas_src>
import functools
import math

import jax
import jax.numpy as jnp
from jax.experimental import pallas as pl
from jax.experimental.pallas import tpu as pltpu


# ----------------------------- Pallas kernel ---------------------------------
def _conv_gemm_kernel(w_ref, x_ref, b_ref, o_ref, *, apply_relu):
    """One lane-dense GEMM tile: o[Cout, tm] = W[Cout, K] @ X[K, tm] + b, (ReLU)."""
    acc = jnp.dot(w_ref[...], x_ref[...], preferred_element_type=jnp.float32)
    acc = acc + b_ref[...]                      # (Cout, 1) broadcasts across lanes
    if apply_relu:
        acc = jnp.maximum(acc, 0.0)
    o_ref[...] = acc.astype(o_ref.dtype)


def _pick_tm(M, bytes_per_col, *, cap=4096, tile_budget=2 * 1024 * 1024):
    """Largest multiple-of-128 divisor of M with K*tm*itemsize <= budget; prefer
    >=2 grid steps so v7x megacore can split the (parallel) M axis."""
    best = 128
    t = 128
    while t <= min(M, cap):
        if M % t == 0 and t * bytes_per_col <= tile_budget:
            best = t
        t += 128
    if best == M and (M // 2) % 128 == 0:
        best = M // 2
    return best


def _gemm(w_t, x_k, bias, apply_relu):
    """w_t: [Cout, K] bf16, x_k: [K, M] bf16, bias: [Cout] f32 -> [Cout, M] f32."""
    Cout, K = w_t.shape
    M = x_k.shape[1]
    tm = _pick_tm(M, K * x_k.dtype.itemsize)

    kern = functools.partial(_conv_gemm_kernel, apply_relu=apply_relu)
    return pl.pallas_call(
        kern,
        out_shape=jax.ShapeDtypeStruct((Cout, M), jnp.float32),
        grid_spec=pltpu.PrefetchScalarGridSpec(
            num_scalar_prefetch=0,
            grid=(M // tm,),
            in_specs=[
                pl.BlockSpec((Cout, K), lambda m: (0, 0)),   # weights: resident
                pl.BlockSpec((K, tm), lambda m: (0, m)),     # im2col: streamed
                pl.BlockSpec((Cout, 1), lambda m: (0, 0)),   # bias: resident
            ],
            out_specs=pl.BlockSpec((Cout, tm), lambda m: (0, m)),
        ),
        compiler_params=pltpu.CompilerParams(
            dimension_semantics=("parallel",),
            vmem_limit_bytes=32 * 1024 * 1024),
    )(w_t, x_k, bias.reshape(Cout, 1).astype(jnp.float32))


# ------------------------ conv / pool / upsample glue -------------------------
def conv3d(x, w, b, *, dilation=1, relu=True):
    """x: [Cin, N, D, H, W]; w: [k, k, k, Cin, Cout] (k in {1,3}); 'same' output."""
    Cin, N, D, H, W = x.shape
    k = w.shape[0]
    Cout = w.shape[-1]
    M = N * D * H * W

    # Tiny deep levels -> plain XLA (review item: Pallas grid overhead dominates).
    use_pallas = (M % 128 == 0) and (M >= 512)
    dt = jnp.bfloat16 if use_pallas else jnp.float32
    xc = x.astype(dt)

    if k == 3:
        p = dilation
        xp = jnp.pad(xc, ((0, 0), (0, 0), (p, p), (p, p), (p, p)))
        taps = [
            xp[:, :, a * dilation:a * dilation + D,
               bb * dilation:bb * dilation + H,
               c * dilation:c * dilation + W]
            for a in range(3) for bb in range(3) for c in range(3)
        ]
        x_k = jnp.concatenate(taps, axis=0).reshape(27 * Cin, M)   # [K, M]
    else:
        x_k = xc.reshape(Cin, M)

    # (k,k,k,Cin) row-major flatten == (tap-major, then channel) == x_k row order.
    w_t = w.reshape(k ** 3 * Cin, Cout).T.astype(dt)               # [Cout, K]

    if use_pallas:
        out = _gemm(w_t, x_k, b, relu)
    else:
        out = jnp.dot(w_t, x_k, preferred_element_type=jnp.float32) + b[:, None]
        if relu:
            out = jnp.maximum(out, 0.0)
    return out.reshape(Cout, N, D, H, W)


def maxpool3d_2(x):
    # TODO(synk): kept as plain-JAX reshape+max (tiny reduction, not the hot path).
    C, N, D, H, W = x.shape
    x = x.reshape(C, N, D // 2, 2, H // 2, 2, W // 2, 2)
    return x.max(axis=(3, 5, 7))


def _lin_interp_axis(x, axis, out_size):
    in_size = x.shape[axis]
    if out_size == 1 or in_size == 1:
        idx = jnp.zeros((out_size,), jnp.int32)
        return jnp.take(x, idx, axis=axis)
    src = jnp.arange(out_size, dtype=jnp.float32) * (in_size - 1) / (out_size - 1)
    lo = jnp.clip(jnp.floor(src).astype(jnp.int32), 0, in_size - 2)
    frac = src - lo.astype(jnp.float32)
    xl = jnp.take(x, lo, axis=axis)
    xh = jnp.take(x, lo + 1, axis=axis)
    shape = [1] * x.ndim
    shape[axis] = out_size
    frac = frac.reshape(shape)
    return xl * (1.0 - frac) + xh * frac


def upsample_trilinear2x(x):
    # torch.nn.Upsample(scale_factor=2, mode='trilinear', align_corners=True)
    C, N, D, H, W = x.shape
    x = _lin_interp_axis(x, 2, 2 * D)
    x = _lin_interp_axis(x, 3, 2 * H)
    x = _lin_interp_axis(x, 4, 2 * W)
    return x


# ------------------------------- parameters ----------------------------------
def _init_conv(key, cin, cout, k):
    kw, kb = jax.random.split(key)
    fan_out = cout * k ** 3
    std = math.sqrt(2.0 / fan_out)                    # kaiming_normal_, fan_out, relu
    w = std * jax.random.normal(kw, (k, k, k, cin, cout), jnp.float32)
    fan_in = cin * k ** 3
    bound = 1.0 / math.sqrt(fan_in)                   # PyTorch default bias init
    b = jax.random.uniform(kb, (cout,), jnp.float32, -bound, bound)
    return w, b


def init_unet_params(key, inplanes, num_classes, width):
    feats = [width * 2 ** i for i in range(4)]
    specs = {
        "encoder1": (inplanes, feats[0] // 2, feats[0]),
        "encoder2": (feats[0], feats[1] // 2, feats[1]),
        "encoder3": (feats[1], feats[2] // 2, feats[2]),
        "encoder4": (feats[2], feats[3] // 2, feats[3]),
        "bottom":   (feats[3], feats[3], feats[3]),
        "decoder3": (feats[2] * 2, feats[2], feats[1]),
        "decoder2": (feats[1] * 2, feats[1], feats[0]),
        "decoder1": (feats[0] * 2, feats[0], feats[0] // 2),
    }
    keys = jax.random.split(key, 2 * len(specs) + 2)
    params, i = {}, 0
    for name, (cin, cmid, cout) in specs.items():
        params[name] = {
            "conv1": _init_conv(keys[i], cin, cmid, 3),
            "conv2": _init_conv(keys[i + 1], cmid, cout, 3),
        }
        i += 2
    params["bottom_2"] = {"conv1": _init_conv(keys[i], feats[3] * 2, feats[2], 3)}
    params["outconv"] = _init_conv(keys[i + 1], feats[0] // 2, num_classes, 1)
    return params


# --------------------------------- forward -----------------------------------
def _ublock(x, p, dilation=(1, 1)):
    w1, b1 = p["conv1"]
    w2, b2 = p["conv2"]
    x = conv3d(x, w1, b1, dilation=dilation[0], relu=True)   # ConvBnRelu1 (norm=None)
    x = conv3d(x, w2, b2, dilation=dilation[1], relu=True)   # ConvBnRelu2
    return x                                                  # Dropout(p=0) is identity


def unet_forward(params, x_ncdhw):
    x = jnp.transpose(x_ncdhw, (1, 0, 2, 3, 4))               # NCDHW -> [C, N, D, H, W]
    down1 = _ublock(x, params["encoder1"])
    down2 = _ublock(maxpool3d_2(down1), params["encoder2"])
    down3 = _ublock(maxpool3d_2(down2), params["encoder3"])
    down4 = _ublock(maxpool3d_2(down3), params["encoder4"])
    bottom = _ublock(down4, params["bottom"], dilation=(2, 2))
    wb, bb = params["bottom_2"]["conv1"]
    bottom_2 = conv3d(jnp.concatenate([down4, bottom], axis=0), wb, bb, relu=True)
    up3 = _ublock(jnp.concatenate([down3, upsample_trilinear2x(bottom_2)], axis=0),
                  params["decoder3"])
    up2 = _ublock(jnp.concatenate([down2, upsample_trilinear2x(up3)], axis=0),
                  params["decoder2"])
    up1 = _ublock(jnp.concatenate([down1, upsample_trilinear2x(up2)], axis=0),
                  params["decoder1"])
    wo, bo = params["outconv"]
    out = conv3d(up1, wo, bo, relu=False)                     # conv1x1, no activation
    return jnp.transpose(out, (1, 0, 2, 3, 4))                # [C, N, D, H, W] -> NCDHW


# ----------------------------------- main -------------------------------------
if __name__ == "__main__":
    key = jax.random.PRNGKey(0)
    kx, kp = jax.random.split(key)

    N, Cin, S = 2, 4, 16            # batch, input channels, cubic spatial size
    num_classes, width = 3, 4       # Unet(inplanes=4, num_classes=3, width=4)

    x = jax.random.normal(kx, (N, Cin, S, S, S), jnp.float32)
    params = init_unet_params(kp, Cin, num_classes, width)

    out = jax.jit(unet_forward)(params, x)
    out = jax.block_until_ready(out)
    assert out.shape == (N, num_classes, S, S, S), out.shape
    print("KERNEL_OK")
</pallas_src>

<mosaic_0001>
module attributes {stable_mosaic.version = 11 : i64} {
  func.func @_conv_gemm_kernel(%arg0: i32, %arg1: memref<2x108xbf16, #tpu.memory_space<vmem>>, %arg2: memref<108x4096xbf16, #tpu.memory_space<vmem>>, %arg3: memref<2x1xf32, #tpu.memory_space<vmem>>, %arg4: memref<2x4096xf32, #tpu.memory_space<vmem>>) attributes {dimension_semantics = [#tpu.dimension_semantics<parallel>], iteration_bounds = array<i64: 2>, scalar_prefetch = 0 : i64, scratch_operands = 0 : i64, tpu.core_type = #tpu.core_type<tc>, window_params = [{pipeline_mode = #tpu.pipeline_mode<synchronous>, transform_indices = @transform_0, window_bounds = array<i64: 2, 108>}, {transform_indices = @transform_1, window_bounds = array<i64: 108, 4096>}, {pipeline_mode = #tpu.pipeline_mode<synchronous>, transform_indices = @transform_2, window_bounds = array<i64: 2, 1>}, {transform_indices = @transform_3, window_bounds = array<i64: 2, 4096>}]} {
    %c0 = arith.constant 0 : index
    %c0_0 = arith.constant 0 : index
    %0 = vector.load %arg1[%c0, %c0_0] : memref<2x108xbf16, #tpu.memory_space<vmem>>, vector<2x108xbf16>
    %c0_1 = arith.constant 0 : index
    %c0_2 = arith.constant 0 : index
    %1 = vector.load %arg2[%c0_1, %c0_2] : memref<108x4096xbf16, #tpu.memory_space<vmem>>, vector<108x4096xbf16>
    %cst = arith.constant dense<0.000000e+00> : vector<2x4096xf32>
    %2 = tpu.matmul %0, %1, %cst {dimension_numbers = #tpu.dot_dimension_numbers<[1], [0], [0], [1], [0, 0, 1, 1], [], []>} : vector<2x108xbf16>, vector<108x4096xbf16>, vector<2x4096xf32> -> vector<2x4096xf32>
    %c0_3 = arith.constant 0 : index
    %c0_4 = arith.constant 0 : index
    %3 = vector.load %arg3[%c0_3, %c0_4] : memref<2x1xf32, #tpu.memory_space<vmem>>, vector<2x1xf32>
    %4 = vector.broadcast %3 : vector<2x1xf32> to vector<2x4096xf32>
    %5 = arith.addf %2, %4 : vector<2x4096xf32>
    %cst_5 = arith.constant 0.000000e+00 : f32
    %6 = vector.broadcast %cst_5 : f32 to vector<2x4096xf32>
    %7 = arith.maximumf %5, %6 : vector<2x4096xf32>
    %c0_6 = arith.constant 0 : index
    %c0_7 = arith.constant 0 : index
    %8 = vector.load %arg4[%c0_6, %c0_7] : memref<2x4096xf32, #tpu.memory_space<vmem>>, vector<2x4096xf32>
    tpu.vector_store %arg4[%c0_6, %c0_7], %7 {strides = array<i32>} : memref<2x4096xf32, #tpu.memory_space<vmem>>, vector<2x4096xf32>,
    return
  }
  func.func @transform_0(%arg0: i32) -> (i32, i32) {
    %c0_i32 = arith.constant 0 : i32
    %c0_i32_0 = arith.constant 0 : i32
    %c0_i32_1 = arith.constant 0 : i32
    return %c0_i32, %c0_i32_0 : i32, i32
  }
  func.func @transform_1(%arg0: i32) -> (i32, i32) {
    %c0_i32 = arith.constant 0 : i32
    %c0_i32_0 = arith.constant 0 : i32
    return %c0_i32, %arg0 : i32, i32
  }
  func.func @transform_2(%arg0: i32) -> (i32, i32) {
    %c0_i32 = arith.constant 0 : i32
    %c0_i32_0 = arith.constant 0 : i32
    %c0_i32_1 = arith.constant 0 : i32
    return %c0_i32, %c0_i32_0 : i32, i32
  }
  func.func @transform_3(%arg0: i32) -> (i32, i32) {
    %c0_i32 = arith.constant 0 : i32
    %c0_i32_0 = arith.constant 0 : i32
    return %c0_i32, %arg0 : i32, i32
  }
}

module attributes {stable_mosaic.version = 11 : i64} {
  func.func @_conv_gemm_kernel(%arg0: i32, %arg1: memref<4x54xbf16, #tpu.memory_space<vmem>>, %arg2: memref<54x4096xbf16, #tpu.memory_space<vmem>>, %arg3: memref<4x1xf32, #tpu.memory_space<vmem>>, %arg4: memref<4x4096xf32, #tpu.memory_space<vmem>>) attributes {dimension_semantics = [#tpu.dimension_semantics<parallel>], iteration_bounds = array<i64: 2>, scalar_prefetch = 0 : i64, scratch_operands = 0 : i64, tpu.core_type = #tpu.core_type<tc>, window_params = [{pipeline_mode = #tpu.pipeline_mode<synchronous>, transform_indices = @transform_0, window_bounds = array<i64: 4, 54>}, {transform_indices = @transform_1, window_bounds = array<i64: 54, 4096>}, {pipeline_mode = #tpu.pipeline_mode<synchronous>, transform_indices = @transform_2, window_bounds = array<i64: 4, 1>}, {transform_indices = @transform_3, window_bounds = array<i64: 4, 4096>}]} {
    %c0 = arith.constant 0 : index
    %c0_0 = arith.constant 0 : index
    %0 = vector.load %arg1[%c0, %c0_0] : memref<4x54xbf16, #tpu.memory_space<vmem>>, vector<4x54xbf16>
    %c0_1 = arith.constant 0 : index
    %c0_2 = arith.constant 0 : index
    %1 = vector.load %arg2[%c0_1, %c0_2] : memref<54x4096xbf16, #tpu.memory_space<vmem>>, vector<54x4096xbf16>
    %cst = arith.constant dense<0.000000e+00> : vector<4x4096xf32>
    %2 = tpu.matmul %0, %1, %cst {dimension_numbers = #tpu.dot_dimension_numbers<[1], [0], [0], [1], [0, 0, 1, 1], [], []>} : vector<4x54xbf16>, vector<54x4096xbf16>, vector<4x4096xf32> -> vector<4x4096xf32>
    %c0_3 = arith.constant 0 : index
    %c0_4 = arith.constant 0 : index
    %3 = vector.load %arg3[%c0_3, %c0_4] : memref<4x1xf32, #tpu.memory_space<vmem>>, vector<4x1xf32>
    %4 = vector.broadcast %3 : vector<4x1xf32> to vector<4x4096xf32>
    %5 = arith.addf %2, %4 : vector<4x4096xf32>
    %cst_5 = arith.constant 0.000000e+00 : f32
    %6 = vector.broadcast %cst_5 : f32 to vector<4x4096xf32>
    %7 = arith.maximumf %5, %6 : vector<4x4096xf32>
    %c0_6 = arith.constant 0 : index
    %c0_7 = arith.constant 0 : index
    %8 = vector.load %arg4[%c0_6, %c0_7] : memref<4x4096xf32, #tpu.memory_space<vmem>>, vector<4x4096xf32>
    tpu.vector_store %arg4[%c0_6, %c0_7], %7 {strides = array<i32>} : memref<4x4096xf32, #tpu.memory_space<vmem>>, vector<4x4096xf32>,
    return
  }
  func.func @transform_0(%arg0: i32) -> (i32, i32) {
    %c0_i32 = arith.constant 0 : i32
    %c0_i32_0 = arith.constant 0 : i32
    %c0_i32_1 = arith.constant 0 : i32
    return %c0_i32, %c0_i32_0 : i32, i32
  }
  func.func @transform_1(%arg0: i32) -> (i32, i32) {
    %c0_i32 = arith.constant 0 : i32
    %c0_i32_0 = arith.constant 0 : i32
    return %c0_i32, %arg0 : i32, i32
  }
  func.func @transform_2(%arg0: i32) -> (i32, i32) {
    %c0_i32 = arith.constant 0 : i32
    %c0_i32_0 = arith.constant 0 : i32
    %c0_i32_1 = arith.constant 0 : i32
    return %c0_i32, %c0_i32_0 : i32, i32
  }
  func.func @transform_3(%arg0: i32) -> (i32, i32) {
    %c0_i32 = arith.constant 0 : i32
    %c0_i32_0 = arith.constant 0 : i32
    return %c0_i32, %arg0 : i32, i32
  }
}

module attributes {stable_mosaic.version = 11 : i64} {
  func.func @_conv_gemm_kernel(%arg0: i32, %arg1: memref<4x108xbf16, #tpu.memory_space<vmem>>, %arg2: memref<108x512xbf16, #tpu.memory_space<vmem>>, %arg3: memref<4x1xf32, #tpu.memory_space<vmem>>, %arg4: memref<4x512xf32, #tpu.memory_space<vmem>>) attributes {dimension_semantics = [#tpu.dimension_semantics<parallel>], iteration_bounds = array<i64: 2>, scalar_prefetch = 0 : i64, scratch_operands = 0 : i64, tpu.core_type = #tpu.core_type<tc>, window_params = [{pipeline_mode = #tpu.pipeline_mode<synchronous>, transform_indices = @transform_0, window_bounds = array<i64: 4, 108>}, {transform_indices = @transform_1, window_bounds = array<i64: 108, 512>}, {pipeline_mode = #tpu.pipeline_mode<synchronous>, transform_indices = @transform_2, window_bounds = array<i64: 4, 1>}, {transform_indices = @transform_3, window_bounds = array<i64: 4, 512>}]} {
    %c0 = arith.constant 0 : index
    %c0_0 = arith.constant 0 : index
    %0 = vector.load %arg1[%c0, %c0_0] : memref<4x108xbf16, #tpu.memory_space<vmem>>, vector<4x108xbf16>
    %c0_1 = arith.constant 0 : index
    %c0_2 = arith.constant 0 : index
    %1 = vector.load %arg2[%c0_1, %c0_2] : memref<108x512xbf16, #tpu.memory_space<vmem>>, vector<108x512xbf16>
    %cst = arith.constant dense<0.000000e+00> : vector<4x512xf32>
    %2 = tpu.matmul %0, %1, %cst {dimension_numbers = #tpu.dot_dimension_numbers<[1], [0], [0], [1], [0, 0, 1, 1], [], []>} : vector<4x108xbf16>, vector<108x512xbf16>, vector<4x512xf32> -> vector<4x512xf32>
    %c0_3 = arith.constant 0 : index
    %c0_4 = arith.constant 0 : index
    %3 = vector.load %arg3[%c0_3, %c0_4] : memref<4x1xf32, #tpu.memory_space<vmem>>, vector<4x1xf32>
    %4 = vector.broadcast %3 : vector<4x1xf32> to vector<4x512xf32>
    %5 = arith.addf %2, %4 : vector<4x512xf32>
    %cst_5 = arith.constant 0.000000e+00 : f32
    %6 = vector.broadcast %cst_5 : f32 to vector<4x512xf32>
    %7 = arith.maximumf %5, %6 : vector<4x512xf32>
    %c0_6 = arith.constant 0 : index
    %c0_7 = arith.constant 0 : index
    %8 = vector.load %arg4[%c0_6, %c0_7] : memref<4x512xf32, #tpu.memory_space<vmem>>, vector<4x512xf32>
    tpu.vector_store %arg4[%c0_6, %c0_7], %7 {strides = array<i32>} : memref<4x512xf32, #tpu.memory_space<vmem>>, vector<4x512xf32>,
    return
  }
  func.func @transform_0(%arg0: i32) -> (i32, i32) {
    %c0_i32 = arith.constant 0 : i32
    %c0_i32_0 = arith.constant 0 : i32
    %c0_i32_1 = arith.constant 0 : i32
    return %c0_i32, %c0_i32_0 : i32, i32
  }
  func.func @transform_1(%arg0: i32) -> (i32, i32) {
    %c0_i32 = arith.constant 0 : i32
    %c0_i32_0 = arith.constant 0 : i32
    return %c0_i32, %arg0 : i32, i32
  }
  func.func @transform_2(%arg0: i32) -> (i32, i32) {
    %c0_i32 = arith.constant 0 : i32
    %c0_i32_0 = arith.constant 0 : i32
    %c0_i32_1 = arith.constant 0 : i32
    return %c0_i32, %c0_i32_0 : i32, i32
  }
  func.func @transform_3(%arg0: i32) -> (i32, i32) {
    %c0_i32 = arith.constant 0 : i32
    %c0_i32_0 = arith.constant 0 : i32
    return %c0_i32, %arg0 : i32, i32
  }
}

module attributes {stable_mosaic.version = 11 : i64} {
  func.func @_conv_gemm_kernel(%arg0: i32, %arg1: memref<8x108xbf16, #tpu.memory_space<vmem>>, %arg2: memref<108x512xbf16, #tpu.memory_space<vmem>>, %arg3: memref<8x1xf32, #tpu.memory_space<vmem>>, %arg4: memref<8x512xf32, #tpu.memory_space<vmem>>) attributes {dimension_semantics = [#tpu.dimension_semantics<parallel>], iteration_bounds = array<i64: 2>, scalar_prefetch = 0 : i64, scratch_operands = 0 : i64, tpu.core_type = #tpu.core_type<tc>, window_params = [{pipeline_mode = #tpu.pipeline_mode<synchronous>, transform_indices = @transform_0, window_bounds = array<i64: 8, 108>}, {transform_indices = @transform_1, window_bounds = array<i64: 108, 512>}, {pipeline_mode = #tpu.pipeline_mode<synchronous>, transform_indices = @transform_2, window_bounds = array<i64: 8, 1>}, {transform_indices = @transform_3, window_bounds = array<i64: 8, 512>}]} {
    %c0 = arith.constant 0 : index
    %c0_0 = arith.constant 0 : index
    %0 = vector.load %arg1[%c0, %c0_0] : memref<8x108xbf16, #tpu.memory_space<vmem>>, vector<8x108xbf16>
    %c0_1 = arith.constant 0 : index
    %c0_2 = arith.constant 0 : index
    %1 = vector.load %arg2[%c0_1, %c0_2] : memref<108x512xbf16, #tpu.memory_space<vmem>>, vector<108x512xbf16>
    %cst = arith.constant dense<0.000000e+00> : vector<8x512xf32>
    %2 = tpu.matmul %0, %1, %cst {dimension_numbers = #tpu.dot_dimension_numbers<[1], [0], [0], [1], [0, 0, 1, 1], [], []>} : vector<8x108xbf16>, vector<108x512xbf16>, vector<8x512xf32> -> vector<8x512xf32>
    %c0_3 = arith.constant 0 : index
    %c0_4 = arith.constant 0 : index
    %3 = vector.load %arg3[%c0_3, %c0_4] : memref<8x1xf32, #tpu.memory_space<vmem>>, vector<8x1xf32>
    %4 = vector.broadcast %3 : vector<8x1xf32> to vector<8x512xf32>
    %5 = arith.addf %2, %4 : vector<8x512xf32>
    %cst_5 = arith.constant 0.000000e+00 : f32
    %6 = vector.broadcast %cst_5 : f32 to vector<8x512xf32>
    %7 = arith.maximumf %5, %6 : vector<8x512xf32>
    %c0_6 = arith.constant 0 : index
    %c0_7 = arith.constant 0 : index
    %8 = vector.load %arg4[%c0_6, %c0_7] : memref<8x512xf32, #tpu.memory_space<vmem>>, vector<8x512xf32>
    tpu.vector_store %arg4[%c0_6, %c0_7], %7 {strides = array<i32>} : memref<8x512xf32, #tpu.memory_space<vmem>>, vector<8x512xf32>,
    return
  }
  func.func @transform_0(%arg0: i32) -> (i32, i32) {
    %c0_i32 = arith.constant 0 : i32
    %c0_i32_0 = arith.constant 0 : i32
    %c0_i32_1 = arith.constant 0 : i32
    return %c0_i32, %c0_i32_0 : i32, i32
  }
  func.func @transform_1(%arg0: i32) -> (i32, i32) {
    %c0_i32 = arith.constant 0 : i32
    %c0_i32_0 = arith.constant 0 : i32
    return %c0_i32, %arg0 : i32, i32
  }
  func.func @transform_2(%arg0: i32) -> (i32, i32) {
    %c0_i32 = arith.constant 0 : i32
    %c0_i32_0 = arith.constant 0 : i32
    %c0_i32_1 = arith.constant 0 : i32
    return %c0_i32, %c0_i32_0 : i32, i32
  }
  func.func @transform_3(%arg0: i32) -> (i32, i32) {
    %c0_i32 = arith.constant 0 : i32
    %c0_i32_0 = arith.constant 0 : i32
    return %c0_i32, %arg0 : i32, i32
  }
}

module attributes {stable_mosaic.version = 11 : i64} {
  func.func @_conv_gemm_kernel(%arg0: i32, %arg1: memref<8x432xbf16, #tpu.memory_space<vmem>>, %arg2: memref<432x512xbf16, #tpu.memory_space<vmem>>, %arg3: memref<8x1xf32, #tpu.memory_space<vmem>>, %arg4: memref<8x512xf32, #tpu.memory_space<vmem>>) attributes {dimension_semantics = [#tpu.dimension_semantics<parallel>], iteration_bounds = array<i64: 2>, scalar_prefetch = 0 : i64, scratch_operands = 0 : i64, tpu.core_type = #tpu.core_type<tc>, window_params = [{pipeline_mode = #tpu.pipeline_mode<synchronous>, transform_indices = @transform_0, window_bounds = array<i64: 8, 432>}, {transform_indices = @transform_1, window_bounds = array<i64: 432, 512>}, {pipeline_mode = #tpu.pipeline_mode<synchronous>, transform_indices = @transform_2, window_bounds = array<i64: 8, 1>}, {transform_indices = @transform_3, window_bounds = array<i64: 8, 512>}]} {
    %c0 = arith.constant 0 : index
    %c0_0 = arith.constant 0 : index
    %0 = vector.load %arg1[%c0, %c0_0] : memref<8x432xbf16, #tpu.memory_space<vmem>>, vector<8x432xbf16>
    %c0_1 = arith.constant 0 : index
    %c0_2 = arith.constant 0 : index
    %1 = vector.load %arg2[%c0_1, %c0_2] : memref<432x512xbf16, #tpu.memory_space<vmem>>, vector<432x512xbf16>
    %cst = arith.constant dense<0.000000e+00> : vector<8x512xf32>
    %2 = tpu.matmul %0, %1, %cst {dimension_numbers = #tpu.dot_dimension_numbers<[1], [0], [0], [1], [0, 0, 1, 1], [], []>} : vector<8x432xbf16>, vector<432x512xbf16>, vector<8x512xf32> -> vector<8x512xf32>
    %c0_3 = arith.constant 0 : index
    %c0_4 = arith.constant 0 : index
    %3 = vector.load %arg3[%c0_3, %c0_4] : memref<8x1xf32, #tpu.memory_space<vmem>>, vector<8x1xf32>
    %4 = vector.broadcast %3 : vector<8x1xf32> to vector<8x512xf32>
    %5 = arith.addf %2, %4 : vector<8x512xf32>
    %cst_5 = arith.constant 0.000000e+00 : f32
    %6 = vector.broadcast %cst_5 : f32 to vector<8x512xf32>
    %7 = arith.maximumf %5, %6 : vector<8x512xf32>
    %c0_6 = arith.constant 0 : index
    %c0_7 = arith.constant 0 : index
    %8 = vector.load %arg4[%c0_6, %c0_7] : memref<8x512xf32, #tpu.memory_space<vmem>>, vector<8x512xf32>
    tpu.vector_store %arg4[%c0_6, %c0_7], %7 {strides = array<i32>} : memref<8x512xf32, #tpu.memory_space<vmem>>, vector<8x512xf32>,
    return
  }
  func.func @transform_0(%arg0: i32) -> (i32, i32) {
    %c0_i32 = arith.constant 0 : i32
    %c0_i32_0 = arith.constant 0 : i32
    %c0_i32_1 = arith.constant 0 : i32
    return %c0_i32, %c0_i32_0 : i32, i32
  }
  func.func @transform_1(%arg0: i32) -> (i32, i32) {
    %c0_i32 = arith.constant 0 : i32
    %c0_i32_0 = arith.constant 0 : i32
    return %c0_i32, %arg0 : i32, i32
  }
  func.func @transform_2(%arg0: i32) -> (i32, i32) {
    %c0_i32 = arith.constant 0 : i32
    %c0_i32_0 = arith.constant 0 : i32
    %c0_i32_1 = arith.constant 0 : i32
    return %c0_i32, %c0_i32_0 : i32, i32
  }
  func.func @transform_3(%arg0: i32) -> (i32, i32) {
    %c0_i32 = arith.constant 0 : i32
    %c0_i32_0 = arith.constant 0 : i32
    return %c0_i32, %arg0 : i32, i32
  }
}

module attributes {stable_mosaic.version = 11 : i64} {
  func.func @_conv_gemm_kernel(%arg0: i32, %arg1: memref<4x216xbf16, #tpu.memory_space<vmem>>, %arg2: memref<216x512xbf16, #tpu.memory_space<vmem>>, %arg3: memref<4x1xf32, #tpu.memory_space<vmem>>, %arg4: memref<4x512xf32, #tpu.memory_space<vmem>>) attributes {dimension_semantics = [#tpu.dimension_semantics<parallel>], iteration_bounds = array<i64: 2>, scalar_prefetch = 0 : i64, scratch_operands = 0 : i64, tpu.core_type = #tpu.core_type<tc>, window_params = [{pipeline_mode = #tpu.pipeline_mode<synchronous>, transform_indices = @transform_0, window_bounds = array<i64: 4, 216>}, {transform_indices = @transform_1, window_bounds = array<i64: 216, 512>}, {pipeline_mode = #tpu.pipeline_mode<synchronous>, transform_indices = @transform_2, window_bounds = array<i64: 4, 1>}, {transform_indices = @transform_3, window_bounds = array<i64: 4, 512>}]} {
    %c0 = arith.constant 0 : index
    %c0_0 = arith.constant 0 : index
    %0 = vector.load %arg1[%c0, %c0_0] : memref<4x216xbf16, #tpu.memory_space<vmem>>, vector<4x216xbf16>
    %c0_1 = arith.constant 0 : index
    %c0_2 = arith.constant 0 : index
    %1 = vector.load %arg2[%c0_1, %c0_2] : memref<216x512xbf16, #tpu.memory_space<vmem>>, vector<216x512xbf16>
    %cst = arith.constant dense<0.000000e+00> : vector<4x512xf32>
    %2 = tpu.matmul %0, %1, %cst {dimension_numbers = #tpu.dot_dimension_numbers<[1], [0], [0], [1], [0, 0, 1, 1], [], []>} : vector<4x216xbf16>, vector<216x512xbf16>, vector<4x512xf32> -> vector<4x512xf32>
    %c0_3 = arith.constant 0 : index
    %c0_4 = arith.constant 0 : index
    %3 = vector.load %arg3[%c0_3, %c0_4] : memref<4x1xf32, #tpu.memory_space<vmem>>, vector<4x1xf32>
    %4 = vector.broadcast %3 : vector<4x1xf32> to vector<4x512xf32>
    %5 = arith.addf %2, %4 : vector<4x512xf32>
    %cst_5 = arith.constant 0.000000e+00 : f32
    %6 = vector.broadcast %cst_5 : f32 to vector<4x512xf32>
    %7 = arith.maximumf %5, %6 : vector<4x512xf32>
    %c0_6 = arith.constant 0 : index
    %c0_7 = arith.constant 0 : index
    %8 = vector.load %arg4[%c0_6, %c0_7] : memref<4x512xf32, #tpu.memory_space<vmem>>, vector<4x512xf32>
    tpu.vector_store %arg4[%c0_6, %c0_7], %7 {strides = array<i32>} : memref<4x512xf32, #tpu.memory_space<vmem>>, vector<4x512xf32>,
    return
  }
  func.func @transform_0(%arg0: i32) -> (i32, i32) {
    %c0_i32 = arith.constant 0 : i32
    %c0_i32_0 = arith.constant 0 : i32
    %c0_i32_1 = arith.constant 0 : i32
    return %c0_i32, %c0_i32_0 : i32, i32
  }
  func.func @transform_1(%arg0: i32) -> (i32, i32) {
    %c0_i32 = arith.constant 0 : i32
    %c0_i32_0 = arith.constant 0 : i32
    return %c0_i32, %arg0 : i32, i32
  }
  func.func @transform_2(%arg0: i32) -> (i32, i32) {
    %c0_i32 = arith.constant 0 : i32
    %c0_i32_0 = arith.constant 0 : i32
    %c0_i32_1 = arith.constant 0 : i32
    return %c0_i32, %c0_i32_0 : i32, i32
  }
  func.func @transform_3(%arg0: i32) -> (i32, i32) {
    %c0_i32 = arith.constant 0 : i32
    %c0_i32_0 = arith.constant 0 : i32
    return %c0_i32, %arg0 : i32, i32
  }
}

module attributes {stable_mosaic.version = 11 : i64} {
  func.func @_conv_gemm_kernel(%arg0: i32, %arg1: memref<4x216xbf16, #tpu.memory_space<vmem>>, %arg2: memref<216x4096xbf16, #tpu.memory_space<vmem>>, %arg3: memref<4x1xf32, #tpu.memory_space<vmem>>, %arg4: memref<4x4096xf32, #tpu.memory_space<vmem>>) attributes {dimension_semantics = [#tpu.dimension_semantics<parallel>], iteration_bounds = array<i64: 2>, scalar_prefetch = 0 : i64, scratch_operands = 0 : i64, tpu.core_type = #tpu.core_type<tc>, window_params = [{pipeline_mode = #tpu.pipeline_mode<synchronous>, transform_indices = @transform_0, window_bounds = array<i64: 4, 216>}, {transform_indices = @transform_1, window_bounds = array<i64: 216, 4096>}, {pipeline_mode = #tpu.pipeline_mode<synchronous>, transform_indices = @transform_2, window_bounds = array<i64: 4, 1>}, {transform_indices = @transform_3, window_bounds = array<i64: 4, 4096>}]} {
    %c0 = arith.constant 0 : index
    %c0_0 = arith.constant 0 : index
    %0 = vector.load %arg1[%c0, %c0_0] : memref<4x216xbf16, #tpu.memory_space<vmem>>, vector<4x216xbf16>
    %c0_1 = arith.constant 0 : index
    %c0_2 = arith.constant 0 : index
    %1 = vector.load %arg2[%c0_1, %c0_2] : memref<216x4096xbf16, #tpu.memory_space<vmem>>, vector<216x4096xbf16>
    %cst = arith.constant dense<0.000000e+00> : vector<4x4096xf32>
    %2 = tpu.matmul %0, %1, %cst {dimension_numbers = #tpu.dot_dimension_numbers<[1], [0], [0], [1], [0, 0, 1, 1], [], []>} : vector<4x216xbf16>, vector<216x4096xbf16>, vector<4x4096xf32> -> vector<4x4096xf32>
    %c0_3 = arith.constant 0 : index
    %c0_4 = arith.constant 0 : index
    %3 = vector.load %arg3[%c0_3, %c0_4] : memref<4x1xf32, #tpu.memory_space<vmem>>, vector<4x1xf32>
    %4 = vector.broadcast %3 : vector<4x1xf32> to vector<4x4096xf32>
    %5 = arith.addf %2, %4 : vector<4x4096xf32>
    %cst_5 = arith.constant 0.000000e+00 : f32
    %6 = vector.broadcast %cst_5 : f32 to vector<4x4096xf32>
    %7 = arith.maximumf %5, %6 : vector<4x4096xf32>
    %c0_6 = arith.constant 0 : index
    %c0_7 = arith.constant 0 : index
    %8 = vector.load %arg4[%c0_6, %c0_7] : memref<4x4096xf32, #tpu.memory_space<vmem>>, vector<4x4096xf32>
    tpu.vector_store %arg4[%c0_6, %c0_7], %7 {strides = array<i32>} : memref<4x4096xf32, #tpu.memory_space<vmem>>, vector<4x4096xf32>,
    return
  }
  func.func @transform_0(%arg0: i32) -> (i32, i32) {
    %c0_i32 = arith.constant 0 : i32
    %c0_i32_0 = arith.constant 0 : i32
    %c0_i32_1 = arith.constant 0 : i32
    return %c0_i32, %c0_i32_0 : i32, i32
  }
  func.func @transform_1(%arg0: i32) -> (i32, i32) {
    %c0_i32 = arith.constant 0 : i32
    %c0_i32_0 = arith.constant 0 : i32
    return %c0_i32, %arg0 : i32, i32
  }
  func.func @transform_2(%arg0: i32) -> (i32, i32) {
    %c0_i32 = arith.constant 0 : i32
    %c0_i32_0 = arith.constant 0 : i32
    %c0_i32_1 = arith.constant 0 : i32
    return %c0_i32, %c0_i32_0 : i32, i32
  }
  func.func @transform_3(%arg0: i32) -> (i32, i32) {
    %c0_i32 = arith.constant 0 : i32
    %c0_i32_0 = arith.constant 0 : i32
    return %c0_i32, %arg0 : i32, i32
  }
}

module attributes {stable_mosaic.version = 11 : i64} {
  func.func @_conv_gemm_kernel(%arg0: i32, %arg1: memref<3x2xbf16, #tpu.memory_space<vmem>>, %arg2: memref<2x4096xbf16, #tpu.memory_space<vmem>>, %arg3: memref<3x1xf32, #tpu.memory_space<vmem>>, %arg4: memref<3x4096xf32, #tpu.memory_space<vmem>>) attributes {dimension_semantics = [#tpu.dimension_semantics<parallel>], iteration_bounds = array<i64: 2>, scalar_prefetch = 0 : i64, scratch_operands = 0 : i64, tpu.core_type = #tpu.core_type<tc>, window_params = [{pipeline_mode = #tpu.pipeline_mode<synchronous>, transform_indices = @transform_0, window_bounds = array<i64: 3, 2>}, {transform_indices = @transform_1, window_bounds = array<i64: 2, 4096>}, {pipeline_mode = #tpu.pipeline_mode<synchronous>, transform_indices = @transform_2, window_bounds = array<i64: 3, 1>}, {transform_indices = @transform_3, window_bounds = array<i64: 3, 4096>}]} {
    %c0 = arith.constant 0 : index
    %c0_0 = arith.constant 0 : index
    %0 = vector.load %arg1[%c0, %c0_0] : memref<3x2xbf16, #tpu.memory_space<vmem>>, vector<3x2xbf16>
    %c0_1 = arith.constant 0 : index
    %c0_2 = arith.constant 0 : index
    %1 = vector.load %arg2[%c0_1, %c0_2] : memref<2x4096xbf16, #tpu.memory_space<vmem>>, vector<2x4096xbf16>
    %cst = arith.constant dense<0.000000e+00> : vector<3x4096xf32>
    %2 = tpu.matmul %0, %1, %cst {dimension_numbers = #tpu.dot_dimension_numbers<[1], [0], [0], [1], [0, 0, 1, 1], [], []>} : vector<3x2xbf16>, vector<2x4096xbf16>, vector<3x4096xf32> -> vector<3x4096xf32>
    %c0_3 = arith.constant 0 : index
    %c0_4 = arith.constant 0 : index
    %3 = vector.load %arg3[%c0_3, %c0_4] : memref<3x1xf32, #tpu.memory_space<vmem>>, vector<3x1xf32>
    %4 = vector.broadcast %3 : vector<3x1xf32> to vector<3x4096xf32>
    %5 = arith.addf %2, %4 : vector<3x4096xf32>
    %c0_5 = arith.constant 0 : index
    %c0_6 = arith.constant 0 : index
    %6 = vector.load %arg4[%c0_5, %c0_6] : memref<3x4096xf32, #tpu.memory_space<vmem>>, vector<3x4096xf32>
    tpu.vector_store %arg4[%c0_5, %c0_6], %5 {strides = array<i32>} : memref<3x4096xf32, #tpu.memory_space<vmem>>, vector<3x4096xf32>,
    return
  }
  func.func @transform_0(%arg0: i32) -> (i32, i32) {
    %c0_i32 = arith.constant 0 : i32
    %c0_i32_0 = arith.constant 0 : i32
    %c0_i32_1 = arith.constant 0 : i32
    return %c0_i32, %c0_i32_0 : i32, i32
  }
  func.func @transform_1(%arg0: i32) -> (i32, i32) {
    %c0_i32 = arith.constant 0 : i32
    %c0_i32_0 = arith.constant 0 : i32
    return %c0_i32, %arg0 : i32, i32
  }
  func.func @transform_2(%arg0: i32) -> (i32, i32) {
    %c0_i32 = arith.constant 0 : i32
    %c0_i32_0 = arith.constant 0 : i32
    %c0_i32_1 = arith.constant 0 : i32
    return %c0_i32, %c0_i32_0 : i32, i32
  }
  func.func @transform_3(%arg0: i32) -> (i32, i32) {
    %c0_i32 = arith.constant 0 : i32
    %c0_i32_0 = arith.constant 0 : i32
    return %c0_i32, %arg0 : i32, i32
  }
}

</mosaic_0001>

<bundles_post_ra>
// kernel: unet_forward.9
= control target key start
LH: loop header
LB: loop body
LE: loop exit
PB: predicated region body
PF: predicated region fallthrough
CT: control target
= control target key end

     0   :  { %s3338_s12 = smov 0   ;;  %s3340_s13 = smov 0   ;;  %s4224_s0 = inlined_call_operand.vmem [shape: bf16[2,108], index: 0, kind: input, shape index: {}]   ;;  %s4225_s1 = inlined_call_operand.vmem [shape: bf16[108,8192], index: 1, kind: input, shape index: {}]   ;;  %s4226_s2 = inlined_call_operand.vmem [shape: f32[2,1], index: 2, kind: input, shape index: {}]   ;;  %s4227_s3 = inlined_call_operand.vmem [shape: f32[2,8192], index: 3, kind: output, shape index: {}]  }
   0x1   :  { %s3342_s14 = smov 0  }
   0x2 LB: > { %s2994_s15 = sadd.s32 4294967295, %s3314_s14   ;;  %s3355_s16 = sadd.s32 1, %s3314_s14   ;;  %s3314_s14 = sphi %s3342_s14, %s4230_s14   ;;  %s3310_s13 = sphi %s3340_s13, %s4229_s13   ;;  %s3306_s12 = sphi %s3338_s12, %s4228_s12  }
   0x3   : > { %s38_s17 = ssub.s32 %s3314_s14, %s3355_s16  ;;  %s41_s18 = sadd.s32 1, %s3310_s13 }
   0x4   : > { %p39_p0 = scmp.eq.s32.totalorder %s38_s17, 0  ;;  %p48_p1 = scmp.ne.s32.totalorder %s3310_s13, %s3306_s12 }
   0x5   : > { %p49_p2 = scmp.eq.s32.totalorder %s3314_s14, 0  ;;  %p2997_p4 = scmp.ge.s32.totalorder %s3314_s14, 2 }
   0x6   : > { %s3364_s19 = scalar_select %p39_p0, %s3310_s13, %s41_s18  }
   0x7   : > { %p50_p3 = por %p49_p2, %p48_p1  ;;  %127 = sbr.rel (%p2997_p4) target bundleno = 131 (0x83), region = 24 }
   0xe   : > { %130 = sbr.rel (!%p50_p3) target bundleno = 131 (0x83), region = 28  ;;  %s132_s20 = sand.u32 (%p50_p3), 1, %s3310_s13  }
   0xf   : > { %s3261_s21 = sshll.u32 (%p50_p3), %s3314_s14, 7  ;;  %s3262_s22 = smul.u32 (%p50_p3), 1792, %s132_s20 }
  0x10   : > { %s3372_s25 = scalar_lea.vmem (%p50_p3), %s4225_s1, %s3261_s21 }
  0x11   : > { %v150_v0 = vld [vmem:[%s3372_s25] sm:$0xff] (%p50_p3)  ;;  %v152_v1 = vld [vmem:[%s3372_s25 + $0x8] sm:$0xff] (%p50_p3)  ;;  %v154_v2 = vld [vmem:[%s3372_s25 + $0x10] sm:$0xff] (%p50_p3)  ;;  %s3380_s26 = scalar_lea.vmem (%p50_p3), [#allocation2], %s3262_s22 }
  0x12   : > { %v156_v3 = vld [vmem:[%s3372_s25 + $0x18] sm:$0xff] (%p50_p3)  ;;  %v158_v4 = vld [vmem:[%s3372_s25 + $0x20] sm:$0xff] (%p50_p3)  ;;  %v160_v5 = vld [vmem:[%s3372_s25 + $0x28] sm:$0xff] (%p50_p3)  ;;  %151 = vst [vmem:[%s3380_s26] sm:$0xff] (%p50_p3), %v150_v0 }
  0x13   : > { %153 = vst [vmem:[%s3380_s26 + $0x8] sm:$0xff] (%p50_p3), %v152_v1  ;;  %155 = vst [vmem:[%s3380_s26 + $0x10] sm:$0xff] (%p50_p3), %v154_v2  ;;  %v162_v6 = vld [vmem:[%s3372_s25 + $0x30] sm:$0xff] (%p50_p3)  ;;  %v164_v7 = vld [vmem:[%s3372_s25 + $0x38] sm:$0xff] (%p50_p3) }
  0x14   : > { %157 = vst [vmem:[%s3380_s26 + $0x18] sm:$0xff] (%p50_p3), %v156_v3  ;;  %159 = vst [vmem:[%s3380_s26 + $0x20] sm:$0xff] (%p50_p3), %v158_v4  ;;  %v166_v8 = vld [vmem:[%s3372_s25 + $0x40] sm:$0xff] (%p50_p3)  ;;  %v168_v9 = vld [vmem:[%s3372_s25 + $0x48] sm:$0xff] (%p50_p3) }
  0x15   : > { %161 = vst [vmem:[%s3380_s26 + $0x28] sm:$0xff] %v160_v5  ;;  %163 = vst [vmem:[%s3380_s26 + $0x30] sm:$0xff] %v162_v6  ;;  %v170_v10 = vld [vmem:[%s3372_s25 + $0x50] sm:$0xff]  ;;  %v172_v11 = vld [vmem:[%s3372_s25 + $0x58] sm:$0xff] }
  0x16   : > { %165 = vst [vmem:[%s3380_s26 + $0x38] sm:$0xff] %v164_v7  ;;  %167 = vst [vmem:[%s3380_s26 + $0x40] sm:$0xff] %v166_v8  ;;  %v174_v12 = vld [vmem:[%s3372_s25 + $0x60] sm:$0xff]  ;;  %v176_v13 = vld [vmem:[%s3372_s25 + $0x68] sm:$0xff] }
  0x17   : > { %169 = vst [vmem:[%s3380_s26 + $0x48] sm:$0xff] %v168_v9  ;;  %171 = vst [vmem:[%s3380_s26 + $0x50] sm:$0xff] %v170_v10  ;;  %v178_v14 = vld [vmem:[%s3372_s25 + $0x70] sm:$0xff]  ;;  %v180_v15 = vld [vmem:[%s3372_s25 + $0x78] sm:$0xff] }
  0x18   : > { %173 = vst [vmem:[%s3380_s26 + $0x58] sm:$0xff] %v172_v11  ;;  %175 = vst [vmem:[%s3380_s26 + $0x60] sm:$0xff] %v174_v12  ;;  %v182_v16 = vld [vmem:[%s3372_s25 + $0x100] sm:$0xff]  ;;  %v184_v17 = vld [vmem:[%s3372_s25 + $0x108] sm:$0xff] }
  0x19   : > { %177 = vst [vmem:[%s3380_s26 + $0x68] sm:$0xff] %v176_v13  ;;  %179 = vst [vmem:[%s3380_s26 + $0x70] sm:$0xff] %v178_v14  ;;  %v186_v18 = vld [vmem:[%s3372_s25 + $0x110] sm:$0xff]  ;;  %v188_v19 = vld [vmem:[%s3372_s25 + $0x118] sm:$0xff] }
  0x1a   : > { %181 = vst [vmem:[%s3380_s26 + $0x78] sm:$0xff] %v180_v15  ;;  %183 = vst [vmem:[%s3380_s26 + $0x80] sm:$0xff] %v182_v16  ;;  %v190_v20 = vld [vmem:[%s3372_s25 + $0x120] sm:$0xff]  ;;  %v192_v21 = vld [vmem:[%s3372_s25 + $0x128] sm:$0xff] }
  0x1b   : > { %185 = vst [vmem:[%s3380_s26 + $0x88] sm:$0xff] %v184_v17  ;;  %187 = vst [vmem:[%s3380_s26 + $0x90] sm:$0xff] %v186_v18  ;;  %v194_v22 = vld [vmem:[%s3372_s25 + $0x130] sm:$0xff]  ;;  %v196_v23 = vld [vmem:[%s3372_s25 + $0x138] sm:$0xff] }
  0x1c   : > { %189 = vst [vmem:[%s3380_s26 + $0x98] sm:$0xff] %v188_v19  ;;  %191 = vst [vmem:[%s3380_s26 + $0xa0] sm:$0xff] %v190_v20  ;;  %v198_v24 = vld [vmem:[%s3372_s25 + $0x140] sm:$0xff]  ;;  %v200_v25 = vld [vmem:[%s3372_s25 + $0x148] sm:$0xff] }
  0x1d   : > { %193 = vst [vmem:[%s3380_s26 + $0xa8] sm:$0xff] %v192_v21  ;;  %195 = vst [vmem:[%s3380_s26 + $0xb0] sm:$0xff] %v194_v22  ;;  %v202_v26 = vld [vmem:[%s3372_s25 + $0x150] sm:$0xff]  ;;  %v204_v27 = vld [vmem:[%s3372_s25 + $0x158] sm:$0xff] }
  0x1e   : > { %197 = vst [vmem:[%s3380_s26 + $0xb8] sm:$0xff] %v196_v23  ;;  %199 = vst [vmem:[%s3380_s26 + $0xc0] sm:$0xff] %v198_v24  ;;  %v206_v28 = vld [vmem:[%s3372_s25 + $0x160] sm:$0xff]  ;;  %v208_v29 = vld [vmem:[%s3372_s25 + $0x168] sm:$0xff] }
  0x1f   : > { %201 = vst [vmem:[%s3380_s26 + $0xc8] sm:$0xff] %v200_v25  ;;  %203 = vst [vmem:[%s3380_s26 + $0xd0] sm:$0xff] %v202_v26  ;;  %v210_v30 = vld [vmem:[%s3372_s25 + $0x170] sm:$0xff]  ;;  %v212_v31 = vld [vmem:[%s3372_s25 + $0x178] sm:$0xff] }
  0x20   : > { %205 = vst [vmem:[%s3380_s26 + $0xd8] sm:$0xff] %v204_v27  ;;  %207 = vst [vmem:[%s3380_s26 + $0xe0] sm:$0xff] %v206_v28  ;;  %v214_v32 = vld [vmem:[%s3372_s25 + $0x200] sm:$0xff]  ;;  %v216_v33 = vld [vmem:[%s3372_s25 + $0x208] sm:$0xff] }
  0x21   : > { %209 = vst [vmem:[%s3380_s26 + $0xe8] sm:$0xff] %v208_v29  ;;  %211 = vst [vmem:[%s3380_s26 + $0xf0] sm:$0xff] %v210_v30  ;;  %v218_v34 = vld [vmem:[%s3372_s25 + $0x210] sm:$0xff]  ;;  %v220_v35 = vld [vmem:[%s3372_s25 + $0x218] sm:$0xff] }
  0x22   : > { %213 = vst [vmem:[%s3380_s26 + $0xf8] sm:$0xff] %v212_v31  ;;  %215 = vst [vmem:[%s3380_s26 + $0x100] sm:$0xff] %v214_v32  ;;  %v222_v36 = vld [vmem:[%s3372_s25 + $0x220] sm:$0xff]  ;;  %v224_v37 = vld [vmem:[%s3372_s25 + $0x228] sm:$0xff] }
  0x23   : > { %217 = vst [vmem:[%s3380_s26 + $0x108] sm:$0xff] %v216_v33  ;;  %219 = vst [vmem:[%s3380_s26 + $0x110] sm:$0xff] %v218_v34  ;;  %v226_v38 = vld [vmem:[%s3372_s25 + $0x230] sm:$0xff]  ;;  %v228_v39 = vld [vmem:[%s3372_s25 + $0x238] sm:$0xff] }
  0x24   : > { %221 = vst [vmem:[%s3380_s26 + $0x118] sm:$0xff] %v220_v35  ;;  %223 = vst [vmem:[%s3380_s26 + $0x120] sm:$0xff] %v222_v36  ;;  %v230_v40 = vld [vmem:[%s3372_s25 + $0x240] sm:$0xff]  ;;  %v232_v41 = vld [vmem:[%s3372_s25 + $0x248] sm:$0xff] }
  0x25   : > { %225 = vst [vmem:[%s3380_s26 + $0x128] sm:$0xff] %v224_v37  ;;  %227 = vst [vmem:[%s3380_s26 + $0x130] sm:$0xff] %v226_v38  ;;  %v234_v42 = vld [vmem:[%s3372_s25 + $0x250] sm:$0xff]  ;;  %v236_v43 = vld [vmem:[%s3372_s25 + $0x258] sm:$0xff] }
  0x26   : > { %229 = vst [vmem:[%s3380_s26 + $0x138] sm:$0xff] %v228_v39  ;;  %231 = vst [vmem:[%s3380_s26 + $0x140] sm:$0xff] %v230_v40  ;;  %v238_v44 = vld [vmem:[%s3372_s25 + $0x260] sm:$0xff]  ;;  %v240_v45 = vld [vmem:[%s3372_s25 + $0x268] sm:$0xff] }
  0x27   : > { %233 = vst [vmem:[%s3380_s26 + $0x148] sm:$0xff] %v232_v41  ;;  %235 = vst [vmem:[%s3380_s26 + $0x150] sm:$0xff] %v234_v42  ;;  %v242_v46 = vld [vmem:[%s3372_s25 + $0x270] sm:$0xff]  ;;  %v244_v47 = vld [vmem:[%s3372_s25 + $0x278] sm:$0xff] }
  0x28   : > { %237 = vst [vmem:[%s3380_s26 + $0x158] sm:$0xff] %v236_v43  ;;  %239 = vst [vmem:[%s3380_s26 + $0x160] sm:$0xff] %v238_v44  ;;  %v246_v48 = vld [vmem:[%s3372_s25 + $0x300] sm:$0xff]  ;;  %v248_v49 = vld [vmem:[%s3372_s25 + $0x308] sm:$0xff] }
  0x29   : > { %241 = vst [vmem:[%s3380_s26 + $0x168] sm:$0xff] %v240_v45  ;;  %243 = vst [vmem:[%s3380_s26 + $0x170] sm:$0xff] %v242_v46  ;;  %v250_v50 = vld [vmem:[%s3372_s25 + $0x310] sm:$0xff]  ;;  %v252_v51 = vld [vmem:[%s3372_s25 + $0x318] sm:$0xff] }
  0x2a   : > { %245 = vst [vmem:[%s3380_s26 + $0x178] sm:$0xff] %v244_v47  ;;  %247 = vst [vmem:[%s3380_s26 + $0x180] sm:$0xff] %v246_v48  ;;  %v254_v52 = vld [vmem:[%s3372_s25 + $0x320] sm:$0xff]  ;;  %v256_v53 = vld [vmem:[%s3372_s25 + $0x328] sm:$0xff] }
  0x2b   : > { %249 = vst [vmem:[%s3380_s26 + $0x188] sm:$0xff] %v248_v49  ;;  %251 = vst [vmem:[%s3380_s26 + $0x190] sm:$0xff] %v250_v50  ;;  %v258_v54 = vld [vmem:[%s3372_s25 + $0x330] sm:$0xff]  ;;  %v260_v55 = vld [vmem:[%s3372_s25 + $0x338] sm:$0xff] }
  0x2c   : > { %253 = vst [vmem:[%s3380_s26 + $0x198] sm:$0xff] %v252_v51  ;;  %255 = vst [vmem:[%s3380_s26 + $0x1a0] sm:$0xff] %v254_v52  ;;  %v262_v56 = vld [vmem:[%s3372_s25 + $0x340] sm:$0xff]  ;;  %v264_v57 = vld [vmem:[%s3372_s25 + $0x348] sm:$0xff] }
  0x2d   : > { %257 = vst [vmem:[%s3380_s26 + $0x1a8] sm:$0xff] %v256_v53  ;;  %259 = vst [vmem:[%s3380_s26 + $0x1b0] sm:$0xff] %v258_v54  ;;  %v266_v58 = vld [vmem:[%s3372_s25 + $0x350] sm:$0xff]  ;;  %v268_v59 = vld [vmem:[%s3372_s25 + $0x358] sm:$0xff] }
  0x2e   : > { %261 = vst [vmem:[%s3380_s26 + $0x1b8] sm:$0xff] %v260_v55  ;;  %263 = vst [vmem:[%s3380_s26 + $0x1c0] sm:$0xff] %v262_v56  ;;  %v270_v60 = vld [vmem:[%s3372_s25 + $0x360] sm:$0xff]  ;;  %v272_v61 = vld [vmem:[%s3372_s25 + $0x368] sm:$0xff] }
  0x2f   : > { %265 = vst [vmem:[%s3380_s26 + $0x1c8] sm:$0xff] %v264_v57  ;;  %267 = vst [vmem:[%s3380_s26 + $0x1d0] sm:$0xff] %v266_v58  ;;  %v274_v62 = vld [vmem:[%s3372_s25 + $0x370] sm:$0xff]  ;;  %v276_v63 = vld [vmem:[%s3372_s25 + $0x378] sm:$0xff] }
  0x30   : > { %269 = vst [vmem:[%s3380_s26 + $0x1d8] sm:$0xff] %v268_v59  ;;  %271 = vst [vmem:[%s3380_s26 + $0x1e0] sm:$0xff] %v270_v60  ;;  %v278_v0 = vld [vmem:[%s3372_s25 + $0x400] sm:$0xff]  ;;  %v280_v1 = vld [vmem:[%s3372_s25 + $0x408] sm:$0xff] }
  0x31   : > { %273 = vst [vmem:[%s3380_s26 + $0x1e8] sm:$0xff] %v272_v61  ;;  %275 = vst [vmem:[%s3380_s26 + $0x1f0] sm:$0xff] %v274_v62  ;;  %v282_v2 = vld [vmem:[%s3372_s25 + $0x410] sm:$0xff]  ;;  %v284_v3 = vld [vmem:[%s3372_s25 + $0x418] sm:$0xff] }
  0x32   : > { %277 = vst [vmem:[%s3380_s26 + $0x1f8] sm:$0xff] %v276_v63  ;;  %279 = vst [vmem:[%s3380_s26 + $0x200] sm:$0xff] %v278_v0  ;;  %v286_v4 = vld [vmem:[%s3372_s25 + $0x420] sm:$0xff]  ;;  %v288_v5 = vld [vmem:[%s3372_s25 + $0x428] sm:$0xff] }
  0x33   : > { %281 = vst [vmem:[%s3380_s26 + $0x208] sm:$0xff] %v280_v1  ;;  %283 = vst [vmem:[%s3380_s26 + $0x210] sm:$0xff] %v282_v2  ;;  %v290_v6 = vld [vmem:[%s3372_s25 + $0x430] sm:$0xff]  ;;  %v292_v7 = vld [vmem:[%s3372_s25 + $0x438] sm:$0xff] }
  0x34   : > { %285 = vst [vmem:[%s3380_s26 + $0x218] sm:$0xff] %v284_v3  ;;  %287 = vst [vmem:[%s3380_s26 + $0x220] sm:$0xff] %v286_v4  ;;  %v294_v8 = vld [vmem:[%s3372_s25 + $0x440] sm:$0xff]  ;;  %v296_v9 = vld [vmem:[%s3372_s25 + $0x448] sm:$0xff] }
  0x35   : > { %289 = vst [vmem:[%s3380_s26 + $0x228] sm:$0xff] %v288_v5  ;;  %291 = vst [vmem:[%s3380_s26 + $0x230] sm:$0xff] %v290_v6  ;;  %v298_v10 = vld [vmem:[%s3372_s25 + $0x450] sm:$0xff]  ;;  %v300_v11 = vld [vmem:[%s3372_s25 + $0x458] sm:$0xff] }
  0x36   : > { %293 = vst [vmem:[%s3380_s26 + $0x238] sm:$0xff] %v292_v7  ;;  %295 = vst [vmem:[%s3380_s26 + $0x240] sm:$0xff] %v294_v8  ;;  %v302_v12 = vld [vmem:[%s3372_s25 + $0x460] sm:$0xff]  ;;  %v304_v13 = vld [vmem:[%s3372_s25 + $0x468] sm:$0xff] }
  0x37   : > { %297 = vst [vmem:[%s3380_s26 + $0x248] sm:$0xff] %v296_v9  ;;  %299 = vst [vmem:[%s3380_s26 + $0x250] sm:$0xff] %v298_v10  ;;  %v306_v14 = vld [vmem:[%s3372_s25 + $0x470] sm:$0xff]  ;;  %v308_v15 = vld [vmem:[%s3372_s25 + $0x478] sm:$0xff] }
  0x38   : > { %301 = vst [vmem:[%s3380_s26 + $0x258] sm:$0xff] %v300_v11  ;;  %303 = vst [vmem:[%s3380_s26 + $0x260] sm:$0xff] %v302_v12  ;;  %v310_v16 = vld [vmem:[%s3372_s25 + $0x500] sm:$0xff]  ;;  %v312_v17 = vld [vmem:[%s3372_s25 + $0x508] sm:$0xff] }
  0x39   : > { %305 = vst [vmem:[%s3380_s26 + $0x268] sm:$0xff] %v304_v13  ;;  %307 = vst [vmem:[%s3380_s26 + $0x270] sm:$0xff] %v306_v14  ;;  %v314_v18 = vld [vmem:[%s3372_s25 + $0x510] sm:$0xff]  ;;  %v316_v19 = vld [vmem:[%s3372_s25 + $0x518] sm:$0xff] }
  0x3a   : > { %309 = vst [vmem:[%s3380_s26 + $0x278] sm:$0xff] %v308_v15  ;;  %311 = vst [vmem:[%s3380_s26 + $0x280] sm:$0xff] %v310_v16  ;;  %v318_v20 = vld [vmem:[%s3372_s25 + $0x520] sm:$0xff]  ;;  %v320_v21 = vld [vmem:[%s3372_s25 + $0x528] sm:$0xff] }
  0x3b   : > { %313 = vst [vmem:[%s3380_s26 + $0x288] sm:$0xff] %v312_v17  ;;  %315 = vst [vmem:[%s3380_s26 + $0x290] sm:$0xff] %v314_v18  ;;  %v322_v22 = vld [vmem:[%s3372_s25 + $0x530] sm:$0xff]  ;;  %v324_v23 = vld [vmem:[%s3372_s25 + $0x538] sm:$0xff] }
  0x3c   : > { %317 = vst [vmem:[%s3380_s26 + $0x298] sm:$0xff] %v316_v19  ;;  %319 = vst [vmem:[%s3380_s26 + $0x2a0] sm:$0xff] %v318_v20  ;;  %v326_v24 = vld [vmem:[%s3372_s25 + $0x540] sm:$0xff]  ;;  %v328_v25 = vld [vmem:[%s3372_s25 + $0x548] sm:$0xff] }
  0x3d   : > { %321 = vst [vmem:[%s3380_s26 + $0x2a8] sm:$0xff] %v320_v21  ;;  %323 = vst [vmem:[%s3380_s26 + $0x2b0] sm:$0xff] %v322_v22  ;;  %v330_v26 = vld [vmem:[%s3372_s25 + $0x550] sm:$0xff]  ;;  %v332_v27 = vld [vmem:[%s3372_s25 + $0x558] sm:$0xff] }
  0x3e   : > { %325 = vst [vmem:[%s3380_s26 + $0x2b8] sm:$0xff] %v324_v23  ;;  %327 = vst [vmem:[%s3380_s26 + $0x2c0] sm:$0xff] %v326_v24  ;;  %v334_v28 = vld [vmem:[%s3372_s25 + $0x560] sm:$0xff]  ;;  %v336_v29 = vld [vmem:[%s3372_s25 + $0x568] sm:$0xff] }
  0x3f   : > { %329 = vst [vmem:[%s3380_s26 + $0x2c8] sm:$0xff] %v328_v25  ;;  %331 = vst [vmem:[%s3380_s26 + $0x2d0] sm:$0xff] %v330_v26  ;;  %v338_v30 = vld [vmem:[%s3372_s25 + $0x570] sm:$0xff]  ;;  %v340_v31 = vld [vmem:[%s3372_s25 + $0x578] sm:$0xff] }
  0x40   : > { %333 = vst [vmem:[%s3380_s26 + $0x2d8] sm:$0xff] %v332_v27  ;;  %335 = vst [vmem:[%s3380_s26 + $0x2e0] sm:$0xff] %v334_v28  ;;  %v342_v32 = vld [vmem:[%s3372_s25 + $0x600] sm:$0xff]  ;;  %v344_v33 = vld [vmem:[%s3372_s25 + $0x608] sm:$0xff] }
  0x41   : > { %337 = vst [vmem:[%s3380_s26 + $0x2e8] sm:$0xff] %v336_v29  ;;  %339 = vst [vmem:[%s3380_s26 + $0x2f0] sm:$0xff] %v338_v30  ;;  %v346_v34 = vld [vmem:[%s3372_s25 + $0x610] sm:$0xff]  ;;  %v348_v35 = vld [vmem:[%s3372_s25 + $0x618] sm:$0xff] }
  0x42   : > { %341 = vst [vmem:[%s3380_s26 + $0x2f8] sm:$0xff] %v340_v31  ;;  %343 = vst [vmem:[%s3380_s26 + $0x300] sm:$0xff] %v342_v32  ;;  %v350_v36 = vld [vmem:[%s3372_s25 + $0x620] sm:$0xff]  ;;  %v352_v37 = vld [vmem:[%s3372_s25 + $0x628] sm:$0xff] }
  0x43   : > { %345 = vst [vmem:[%s3380_s26 + $0x308] sm:$0xff] %v344_v33  ;;  %347 = vst [vmem:[%s3380_s26 + $0x310] sm:$0xff] %v346_v34  ;;  %v354_v38 = vld [vmem:[%s3372_s25 + $0x630] sm:$0xff]  ;;  %v356_v39 = vld [vmem:[%s3372_s25 + $0x638] sm:$0xff] }
  0x44   : > { %349 = vst [vmem:[%s3380_s26 + $0x318] sm:$0xff] %v348_v35  ;;  %351 = vst [vmem:[%s3380_s26 + $0x320] sm:$0xff] %v350_v36  ;;  %v358_v40 = vld [vmem:[%s3372_s25 + $0x640] sm:$0xff]  ;;  %v360_v41 = vld [vmem:[%s3372_s25 + $0x648] sm:$0xff] }
  0x45   : > { %353 = vst [vmem:[%s3380_s26 + $0x328] sm:$0xff] %v352_v37  ;;  %355 = vst [vmem:[%s3380_s26 + $0x330] sm:$0xff] %v354_v38  ;;  %v362_v42 = vld [vmem:[%s3372_s25 + $0x650] sm:$0xff]  ;;  %v364_v43 = vld [vmem:[%s3372_s25 + $0x658] sm:$0xff] }
  0x46   : > { %357 = vst [vmem:[%s3380_s26 + $0x338] sm:$0xff] %v356_v39  ;;  %359 = vst [vmem:[%s3380_s26 + $0x340] sm:$0xff] %v358_v40  ;;  %v366_v44 = vld [vmem:[%s3372_s25 + $0x660] sm:$0xff]  ;;  %v368_v45 = vld [vmem:[%s3372_s25 + $0x668] sm:$0xff] }
  0x47   : > { %361 = vst [vmem:[%s3380_s26 + $0x348] sm:$0xff] %v360_v41  ;;  %363 = vst [vmem:[%s3380_s26 + $0x350] sm:$0xff] %v362_v42  ;;  %v370_v46 = vld [vmem:[%s3372_s25 + $0x670] sm:$0xff]  ;;  %v372_v47 = vld [vmem:[%s3372_s25 + $0x678] sm:$0xff] }
  0x48   : > { %365 = vst [vmem:[%s3380_s26 + $0x358] sm:$0xff] %v364_v43  ;;  %367 = vst [vmem:[%s3380_s26 + $0x360] sm:$0xff] %v366_v44  ;;  %v374_v48 = vld [vmem:[%s3372_s25 + $0x700] sm:$0xff]  ;;  %v376_v49 = vld [vmem:[%s3372_s25 + $0x708] sm:$0xff] }
  0x49   : > { %369 = vst [vmem:[%s3380_s26 + $0x368] sm:$0xff] %v368_v45  ;;  %371 = vst [vmem:[%s3380_s26 + $0x370] sm:$0xff] %v370_v46  ;;  %v378_v50 = vld [vmem:[%s3372_s25 + $0x710] sm:$0xff]  ;;  %v380_v51 = vld [vmem:[%s3372_s25 + $0x718] sm:$0xff] }
  0x4a   : > { %373 = vst [vmem:[%s3380_s26 + $0x378] sm:$0xff] %v372_v47  ;;  %375 = vst [vmem:[%s3380_s26 + $0x380] sm:$0xff] %v374_v48  ;;  %v382_v52 = vld [vmem:[%s3372_s25 + $0x720] sm:$0xff]  ;;  %v384_v53 = vld [vmem:[%s3372_s25 + $0x728] sm:$0xff] }
  0x4b   : > { %377 = vst [vmem:[%s3380_s26 + $0x388] sm:$0xff] %v376_v49  ;;  %379 = vst [vmem:[%s3380_s26 + $0x390] sm:$0xff] %v378_v50  ;;  %v386_v54 = vld [vmem:[%s3372_s25 + $0x730] sm:$0xff]  ;;  %v388_v55 = vld [vmem:[%s3372_s25 + $0x738] sm:$0xff] }
  0x4c   : > { %381 = vst [vmem:[%s3380_s26 + $0x398] sm:$0xff] %v380_v51  ;;  %383 = vst [vmem:[%s3380_s26 + $0x3a0] sm:$0xff] %v382_v52  ;;  %v390_v56 = vld [vmem:[%s3372_s25 + $0x740] sm:$0xff]  ;;  %v392_v57 = vld [vmem:[%s3372_s25 + $0x748] sm:$0xff] }
  0x4d   : > { %385 = vst [vmem:[%s3380_s26 + $0x3a8] sm:$0xff] %v384_v53  ;;  %387 = vst [vmem:[%s3380_s26 + $0x3b0] sm:$0xff] %v386_v54  ;;  %v394_v58 = vld [vmem:[%s3372_s25 + $0x750] sm:$0xff]  ;;  %v396_v59 = vld [vmem:[%s3372_s25 + $0x758] sm:$0xff] }
  0x4e   : > { %389 = vst [vmem:[%s3380_s26 + $0x3b8] sm:$0xff] %v388_v55  ;;  %391 = vst [vmem:[%s3380_s26 + $0x3c0] sm:$0xff] %v390_v56  ;;  %v398_v60 = vld [vmem:[%s3372_s25 + $0x760] sm:$0xff]  ;;  %v400_v61 = vld [vmem:[%s3372_s25 + $0x768] sm:$0xff] }
  0x4f   : > { %393 = vst [vmem:[%s3380_s26 + $0x3c8] sm:$0xff] %v392_v57  ;;  %395 = vst [vmem:[%s3380_s26 + $0x3d0] sm:$0xff] %v394_v58  ;;  %v402_v62 = vld [vmem:[%s3372_s25 + $0x770] sm:$0xff]  ;;  %v404_v63 = vld [vmem:[%s3372_s25 + $0x778] sm:$0xff] }
  0x50   : > { %397 = vst [vmem:[%s3380_s26 + $0x3d8] sm:$0xff] %v396_v59  ;;  %399 = vst [vmem:[%s3380_s26 + $0x3e0] sm:$0xff] %v398_v60  ;;  %v406_v0 = vld [vmem:[%s3372_s25 + $0x800] sm:$0xff]  ;;  %v408_v1 = vld [vmem:[%s3372_s25 + $0x808] sm:$0xff] }
  0x51   : > { %401 = vst [vmem:[%s3380_s26 + $0x3e8] sm:$0xff] %v400_v61  ;;  %403 = vst [vmem:[%s3380_s26 + $0x3f0] sm:$0xff] %v402_v62  ;;  %v410_v2 = vld [vmem:[%s3372_s25 + $0x810] sm:$0xff]  ;;  %v412_v3 = vld [vmem:[%s3372_s25 + $0x818] sm:$0xff] }
  0x52   : > { %405 = vst [vmem:[%s3380_s26 + $0x3f8] sm:$0xff] %v404_v63  ;;  %407 = vst [vmem:[%s3380_s26 + $0x400] sm:$0xff] %v406_v0  ;;  %v414_v4 = vld [vmem:[%s3372_s25 + $0x820] sm:$0xff]  ;;  %v416_v5 = vld [vmem:[%s3372_s25 + $0x828] sm:$0xff] }
  0x53   : > { %409 = vst [vmem:[%s3380_s26 + $0x408] sm:$0xff] %v408_v1  ;;  %411 = vst [vmem:[%s3380_s26 + $0x410] sm:$0xff] %v410_v2  ;;  %v418_v6 = vld [vmem:[%s3372_s25 + $0x830] sm:$0xff]  ;;  %v420_v7 = vld [vmem:[%s3372_s25 + $0x838] sm:$0xff] }
  0x54   : > { %413 = vst [vmem:[%s3380_s26 + $0x418] sm:$0xff] %v412_v3  ;;  %415 = vst [vmem:[%s3380_s26 + $0x420] sm:$0xff] %v414_v4  ;;  %v422_v8 = vld [vmem:[%s3372_s25 + $0x840] sm:$0xff]  ;;  %v424_v9 = vld [vmem:[%s3372_s25 + $0x848] sm:$0xff] }
  0x55   : > { %417 = vst [vmem:[%s3380_s26 + $0x428] sm:$0xff] %v416_v5  ;;  %419 = vst [vmem:[%s3380_s26 + $0x430] sm:$0xff] %v418_v6  ;;  %v426_v10 = vld [vmem:[%s3372_s25 + $0x850] sm:$0xff]  ;;  %v428_v11 = vld [vmem:[%s3372_s25 + $0x858] sm:$0xff] }
  0x56   : > { %421 = vst [vmem:[%s3380_s26 + $0x438] sm:$0xff] %v420_v7  ;;  %423 = vst [vmem:[%s3380_s26 + $0x440] sm:$0xff] %v422_v8  ;;  %v430_v12 = vld [vmem:[%s3372_s25 + $0x860] sm:$0xff]  ;;  %v432_v13 = vld [vmem:[%s3372_s25 + $0x868] sm:$0xff] }
  0x57   : > { %425 = vst [vmem:[%s3380_s26 + $0x448] sm:$0xff] %v424_v9  ;;  %427 = vst [vmem:[%s3380_s26 + $0x450] sm:$0xff] %v426_v10  ;;  %v434_v14 = vld [vmem:[%s3372_s25 + $0x870] sm:$0xff]  ;;  %v436_v15 = vld [vmem:[%s3372_s25 + $0x878] sm:$0xff] }
  0x58   : > { %429 = vst [vmem:[%s3380_s26 + $0x458] sm:$0xff] %v428_v11  ;;  %431 = vst [vmem:[%s3380_s26 + $0x460] sm:$0xff] %v430_v12  ;;  %v438_v16 = vld [vmem:[%s3372_s25 + $0x900] sm:$0xff]  ;;  %v440_v17 = vld [vmem:[%s3372_s25 + $0x908] sm:$0xff] }
  0x59   : > { %433 = vst [vmem:[%s3380_s26 + $0x468] sm:$0xff] %v432_v13  ;;  %435 = vst [vmem:[%s3380_s26 + $0x470] sm:$0xff] %v434_v14  ;;  %v442_v18 = vld [vmem:[%s3372_s25 + $0x910] sm:$0xff]  ;;  %v444_v19 = vld [vmem:[%s3372_s25 + $0x918] sm:$0xff] }
  0x5a   : > { %437 = vst [vmem:[%s3380_s26 + $0x478] sm:$0xff] %v436_v15  ;;  %439 = vst [vmem:[%s3380_s26 + $0x480] sm:$0xff] %v438_v16  ;;  %v446_v20 = vld [vmem:[%s3372_s25 + $0x920] sm:$0xff]  ;;  %v448_v21 = vld [vmem:[%s3372_s25 + $0x928] sm:$0xff] }
  0x5b   : > { %441 = vst [vmem:[%s3380_s26 + $0x488] sm:$0xff] %v440_v17  ;;  %443 = vst [vmem:[%s3380_s26 + $0x490] sm:$0xff] %v442_v18  ;;  %v450_v22 = vld [vmem:[%s3372_s25 + $0x930] sm:$0xff]  ;;  %v452_v23 = vld [vmem:[%s3372_s25 + $0x938] sm:$0xff] }
  0x5c   : > { %445 = vst [vmem:[%s3380_s26 + $0x498] sm:$0xff] %v444_v19  ;;  %447 = vst [vmem:[%s3380_s26 + $0x4a0] sm:$0xff] %v446_v20  ;;  %v454_v24 = vld [vmem:[%s3372_s25 + $0x940] sm:$0xff]  ;;  %v456_v25 = vld [vmem:[%s3372_s25 + $0x948] sm:$0xff] }
  0x5d   : > { %449 = vst [vmem:[%s3380_s26 + $0x4a8] sm:$0xff] %v448_v21  ;;  %451 = vst [vmem:[%s3380_s26 + $0x4b0] sm:$0xff] %v450_v22  ;;  %v458_v26 = vld [vmem:[%s3372_s25 + $0x950] sm:$0xff]  ;;  %v460_v27 = vld [vmem:[%s3372_s25 + $0x958] sm:$0xff] }
  0x5e   : > { %453 = vst [vmem:[%s3380_s26 + $0x4b8] sm:$0xff] %v452_v23  ;;  %455 = vst [vmem:[%s3380_s26 + $0x4c0] sm:$0xff] %v454_v24  ;;  %v462_v28 = vld [vmem:[%s3372_s25 + $0x960] sm:$0xff]  ;;  %v464_v29 = vld [vmem:[%s3372_s25 + $0x968] sm:$0xff] }
  0x5f   : > { %457 = vst [vmem:[%s3380_s26 + $0x4c8] sm:$0xff] %v456_v25  ;;  %459 = vst [vmem:[%s3380_s26 + $0x4d0] sm:$0xff] %v458_v26  ;;  %v466_v30 = vld [vmem:[%s3372_s25 + $0x970] sm:$0xff]  ;;  %v468_v31 = vld [vmem:[%s3372_s25 + $0x978] sm:$0xff] }
  0x60   : > { %461 = vst [vmem:[%s3380_s26 + $0x4d8] sm:$0xff] %v460_v27  ;;  %463 = vst [vmem:[%s3380_s26 + $0x4e0] sm:$0xff] %v462_v28  ;;  %v470_v32 = vld [vmem:[%s3372_s25 + $0xa00] sm:$0xff]  ;;  %v472_v33 = vld [vmem:[%s3372_s25 + $0xa08] sm:$0xff] }
  0x61   : > { %465 = vst [vmem:[%s3380_s26 + $0x4e8] sm:$0xff] %v464_v29  ;;  %467 = vst [vmem:[%s3380_s26 + $0x4f0] sm:$0xff] %v466_v30  ;;  %v474_v34 = vld [vmem:[%s3372_s25 + $0xa10] sm:$0xff]  ;;  %v476_v35 = vld [vmem:[%s3372_s25 + $0xa18] sm:$0xff] }
  0x62   : > { %469 = vst [vmem:[%s3380_s26 + $0x4f8] sm:$0xff] %v468_v31  ;;  %471 = vst [vmem:[%s3380_s26 + $0x500] sm:$0xff] %v470_v32  ;;  %v478_v36 = vld [vmem:[%s3372_s25 + $0xa20] sm:$0xff]  ;;  %v480_v37 = vld [vmem:[%s3372_s25 + $0xa28] sm:$0xff] }
  0x63   : > { %473 = vst [vmem:[%s3380_s26 + $0x508] sm:$0xff] %v472_v33  ;;  %475 = vst [vmem:[%s3380_s26 + $0x510] sm:$0xff] %v474_v34  ;;  %v482_v38 = vld [vmem:[%s3372_s25 + $0xa30] sm:$0xff]  ;;  %v484_v39 = vld [vmem:[%s3372_s25 + $0xa38] sm:$0xff] }
  0x64   : > { %477 = vst [vmem:[%s3380_s26 + $0x518] sm:$0xff] %v476_v35  ;;  %479 = vst [vmem:[%s3380_s26 + $0x520] sm:$0xff] %v478_v36  ;;  %v486_v40 = vld [vmem:[%s3372_s25 + $0xa40] sm:$0xff]  ;;  %v488_v41 = vld [vmem:[%s3372_s25 + $0xa48] sm:$0xff] }
  0x65   : > { %481 = vst [vmem:[%s3380_s26 + $0x528] sm:$0xff] %v480_v37  ;;  %483 = vst [vmem:[%s3380_s26 + $0x530] sm:$0xff] %v482_v38  ;;  %v490_v42 = vld [vmem:[%s3372_s25 + $0xa50] sm:$0xff]  ;;  %v492_v43 = vld [vmem:[%s3372_s25 + $0xa58] sm:$0xff] }
  0x66   : > { %485 = vst [vmem:[%s3380_s26 + $0x538] sm:$0xff] %v484_v39  ;;  %487 = vst [vmem:[%s3380_s26 + $0x540] sm:$0xff] %v486_v40  ;;  %v494_v44 = vld [vmem:[%s3372_s25 + $0xa60] sm:$0xff]  ;;  %v496_v45 = vld [vmem:[%s3372_s25 + $0xa68] sm:$0xff] }
  0x67   : > { %489 = vst [vmem:[%s3380_s26 + $0x548] sm:$0xff] %v488_v41  ;;  %491 = vst [vmem:[%s3380_s26 + $0x550] sm:$0xff] %v490_v42  ;;  %v498_v46 = vld [vmem:[%s3372_s25 + $0xa70] sm:$0xff]  ;;  %v500_v47 = vld [vmem:[%s3372_s25 + $0xa78] sm:$0xff] }
  0x68   : > { %493 = vst [vmem:[%s3380_s26 + $0x558] sm:$0xff] %v492_v43  ;;  %495 = vst [vmem:[%s3380_s26 + $0x560] sm:$0xff] %v494_v44  ;;  %v502_v48 = vld [vmem:[%s3372_s25 + $0xb00] sm:$0xff]  ;;  %v504_v49 = vld [vmem:[%s3372_s25 + $0xb08] sm:$0xff] }
  0x69   : > { %497 = vst [vmem:[%s3380_s26 + $0x568] sm:$0xff] %v496_v45  ;;  %499 = vst [vmem:[%s3380_s26 + $0x570] sm:$0xff] %v498_v46  ;;  %v506_v50 = vld [vmem:[%s3372_s25 + $0xb10] sm:$0xff]  ;;  %v508_v51 = vld [vmem:[%s3372_s25 + $0xb18] sm:$0xff] }
  0x6a   : > { %501 = vst [vmem:[%s3380_s26 + $0x578] sm:$0xff] %v500_v47  ;;  %503 = vst [vmem:[%s3380_s26 + $0x580] sm:$0xff] %v502_v48  ;;  %v510_v52 = vld [vmem:[%s3372_s25 + $0xb20] sm:$0xff]  ;;  %v512_v53 = vld [vmem:[%s3372_s25 + $0xb28] sm:$0xff] }
  0x6b   : > { %505 = vst [vmem:[%s3380_s26 + $0x588] sm:$0xff] %v504_v49  ;;  %507 = vst [vmem:[%s3380_s26 + $0x590] sm:$0xff] %v506_v50  ;;  %v514_v54 = vld [vmem:[%s3372_s25 + $0xb30] sm:$0xff]  ;;  %v516_v55 = vld [vmem:[%s3372_s25 + $0xb38] sm:$0xff] }
  0x6c   : > { %509 = vst [vmem:[%s3380_s26 + $0x598] sm:$0xff] %v508_v51  ;;  %511 = vst [vmem:[%s3380_s26 + $0x5a0] sm:$0xff] %v510_v52  ;;  %v518_v56 = vld [vmem:[%s3372_s25 + $0xb40] sm:$0xff]  ;;  %v520_v57 = vld [vmem:[%s3372_s25 + $0xb48] sm:$0xff] }
  0x6d   : > { %513 = vst [vmem:[%s3380_s26 + $0x5a8] sm:$0xff] %v512_v53  ;;  %515 = vst [vmem:[%s3380_s26 + $0x5b0] sm:$0xff] %v514_v54  ;;  %v522_v58 = vld [vmem:[%s3372_s25 + $0xb50] sm:$0xff]  ;;  %v524_v59 = vld [vmem:[%s3372_s25 + $0xb58] sm:$0xff] }
  0x6e   : > { %517 = vst [vmem:[%s3380_s26 + $0x5b8] sm:$0xff] %v516_v55  ;;  %519 = vst [vmem:[%s3380_s26 + $0x5c0] sm:$0xff] %v518_v56  ;;  %v526_v60 = vld [vmem:[%s3372_s25 + $0xb60] sm:$0xff]  ;;  %v528_v61 = vld [vmem:[%s3372_s25 + $0xb68] sm:$0xff] }
  0x6f   : > { %521 = vst [vmem:[%s3380_s26 + $0x5c8] sm:$0xff] %v520_v57  ;;  %523 = vst [vmem:[%s3380_s26 + $0x5d0] sm:$0xff] %v522_v58  ;;  %v530_v62 = vld [vmem:[%s3372_s25 + $0xb70] sm:$0xff]  ;;  %v532_v63 = vld [vmem:[%s3372_s25 + $0xb78] sm:$0xff] }
  0x70   : > { %525 = vst [vmem:[%s3380_s26 + $0x5d8] sm:$0xff] %v524_v59  ;;  %527 = vst [vmem:[%s3380_s26 + $0x5e0] sm:$0xff] %v526_v60  ;;  %v534_v0 = vld [vmem:[%s3372_s25 + $0xc00] sm:$0xff]  ;;  %v536_v1 = vld [vmem:[%s3372_s25 + $0xc08] sm:$0xff] }
  0x71   : > { %529 = vst [vmem:[%s3380_s26 + $0x5e8] sm:$0xff] %v528_v61  ;;  %531 = vst [vmem:[%s3380_s26 + $0x5f0] sm:$0xff] %v530_v62  ;;  %v538_v2 = vld [vmem:[%s3372_s25 + $0xc10] sm:$0xff]  ;;  %v540_v3 = vld [vmem:[%s3372_s25 + $0xc18] sm:$0xff] }
  0x72   : > { %533 = vst [vmem:[%s3380_s26 + $0x5f8] sm:$0xff] %v532_v63  ;;  %535 = vst [vmem:[%s3380_s26 + $0x600] sm:$0xff] %v534_v0  ;;  %v542_v4 = vld [vmem:[%s3372_s25 + $0xc20] sm:$0xff]  ;;  %v544_v5 = vld [vmem:[%s3372_s25 + $0xc28] sm:$0xff] }
  0x73   : > { %537 = vst [vmem:[%s3380_s26 + $0x608] sm:$0xff] %v536_v1  ;;  %539 = vst [vmem:[%s3380_s26 + $0x610] sm:$0xff] %v538_v2  ;;  %v546_v6 = vld [vmem:[%s3372_s25 + $0xc30] sm:$0xff]  ;;  %v548_v7 = vld [vmem:[%s3372_s25 + $0xc38] sm:$0xff] }
  0x74   : > { %541 = vst [vmem:[%s3380_s26 + $0x618] sm:$0xff] %v540_v3  ;;  %543 = vst [vmem:[%s3380_s26 + $0x620] sm:$0xff] %v542_v4  ;;  %v550_v8 = vld [vmem:[%s3372_s25 + $0xc40] sm:$0xff]  ;;  %v552_v9 = vld [vmem:[%s3372_s25 + $0xc48] sm:$0xff] }
  0x75   : > { %545 = vst [vmem:[%s3380_s26 + $0x628] sm:$0xff] %v544_v5  ;;  %547 = vst [vmem:[%s3380_s26 + $0x630] sm:$0xff] %v546_v6  ;;  %v554_v10 = vld [vmem:[%s3372_s25 + $0xc50] sm:$0xff]  ;;  %v556_v11 = vld [vmem:[%s3372_s25 + $0xc58] sm:$0xff] }
  0x76   : > { %549 = vst [vmem:[%s3380_s26 + $0x638] sm:$0xff] %v548_v7  ;;  %551 = vst [vmem:[%s3380_s26 + $0x640] sm:$0xff] %v550_v8  ;;  %v558_v12 = vld [vmem:[%s3372_s25 + $0xc60] sm:$0xff]  ;;  %v560_v13 = vld [vmem:[%s3372_s25 + $0xc68] sm:$0xff] }
  0x77   : > { %553 = vst [vmem:[%s3380_s26 + $0x648] sm:$0xff] %v552_v9  ;;  %555 = vst [vmem:[%s3380_s26 + $0x650] sm:$0xff] %v554_v10  ;;  %v562_v14 = vld [vmem:[%s3372_s25 + $0xc70] sm:$0xff]  ;;  %v564_v15 = vld [vmem:[%s3372_s25 + $0xc78] sm:$0xff] }
  0x78   : > { %557 = vst [vmem:[%s3380_s26 + $0x658] sm:$0xff] %v556_v11  ;;  %559 = vst [vmem:[%s3380_s26 + $0x660] sm:$0xff] %v558_v12  ;;  %v566_v16 = vld [vmem:[%s3372_s25 + $0xd00] sm:$0xff]  ;;  %v568_v17 = vld [vmem:[%s3372_s25 + $0xd08] sm:$0xff] }
  0x79   : > { %561 = vst [vmem:[%s3380_s26 + $0x668] sm:$0xff] %v560_v13  ;;  %563 = vst [vmem:[%s3380_s26 + $0x670] sm:$0xff] %v562_v14  ;;  %v570_v18 = vld [vmem:[%s3372_s25 + $0xd10] sm:$0xff]  ;;  %v572_v19 = vld [vmem:[%s3372_s25 + $0xd18] sm:$0xff] }
  0x7a   : > { %565 = vst [vmem:[%s3380_s26 + $0x678] sm:$0xff] %v564_v15  ;;  %567 = vst [vmem:[%s3380_s26 + $0x680] sm:$0xff] %v566_v16  ;;  %v574_v20 = vld [vmem:[%s3372_s25 + $0xd20] sm:$0xff]  ;;  %v576_v21 = vld [vmem:[%s3372_s25 + $0xd28] sm:$0xff] }
  0x7b   : > { %569 = vst [vmem:[%s3380_s26 + $0x688] sm:$0xff] %v568_v17  ;;  %571 = vst [vmem:[%s3380_s26 + $0x690] sm:$0xff] %v570_v18  ;;  %v578_v22 = vld [vmem:[%s3372_s25 + $0xd30] sm:$0xff]  ;;  %v580_v23 = vld [vmem:[%s3372_s25 + $0xd38] sm:$0xff] }
  0x7c   : > { %573 = vst [vmem:[%s3380_s26 + $0x698] sm:$0xff] %v572_v19  ;;  %575 = vst [vmem:[%s3380_s26 + $0x6a0] sm:$0xff] %v574_v20  ;;  %v582_v24 = vld [vmem:[%s3372_s25 + $0xd40] sm:$0xff]  ;;  %v584_v25 = vld [vmem:[%s3372_s25 + $0xd48] sm:$0xff] }
  0x7d   : > { %577 = vst [vmem:[%s3380_s26 + $0x6a8] sm:$0xff] %v576_v21  ;;  %579 = vst [vmem:[%s3380_s26 + $0x6b0] sm:$0xff] %v578_v22  ;;  %v586_v26 = vld [vmem:[%s3372_s25 + $0xd50] sm:$0xff]  ;;  %v588_v27 = vld [vmem:[%s3372_s25 + $0xd58] sm:$0xff] }
  0x7e   : > { %581 = vst [vmem:[%s3380_s26 + $0x6b8] sm:$0xff] %v580_v23  ;;  %583 = vst [vmem:[%s3380_s26 + $0x6c0] sm:$0xff] %v582_v24  ;;  %v590_v28 = vld [vmem:[%s3372_s25 + $0xd60] sm:$0xff]  ;;  %v592_v29 = vld [vmem:[%s3372_s25 + $0xd68] sm:$0xff] }
  0x7f   : > { %585 = vst [vmem:[%s3380_s26 + $0x6c8] sm:$0xff] %v584_v25  ;;  %587 = vst [vmem:[%s3380_s26 + $0x6d0] sm:$0xff] %v586_v26  ;;  %v594_v30 = vld [vmem:[%s3372_s25 + $0xd70] sm:$0xff]  ;;  %v596_v31 = vld [vmem:[%s3372_s25 + $0xd78] sm:$0xff] }
  0x80   : > { %589 = vst [vmem:[%s3380_s26 + $0x6d8] sm:$0xff] %v588_v27  ;;  %591 = vst [vmem:[%s3380_s26 + $0x6e0] sm:$0xff] %v590_v28 }
  0x81   : > { %593 = vst [vmem:[%s3380_s26 + $0x6e8] sm:$0xff] %v592_v29  ;;  %595 = vst [vmem:[%s3380_s26 + $0x6f0] sm:$0xff] %v594_v30 }
  0x82   : > { %597 = vst [vmem:[%s3380_s26 + $0x6f8] sm:$0xff] %v596_v31 }
  0x83 PF: > { %p3000_p5 = scmp.ge.s32.totalorder %s3314_s14, 1  ;;  %p602_p6 = scmp.lt.s32.totalorder %s3314_s14, 3 }
  0x85   : > { %p603_p7 = pnand %p3000_p5, %p602_p6 }
  0x86   : > { %s609_s27 = sand.u32 (!%p603_p7), 1, %s3306_s12   ;;  %v3316_v32 = vmov (!%p603_p7), 0   ;;  %v865_v33 = vld [vmem:[%s4226_s2] sm:$0x3] (!%p603_p7)  ;;  %vm1963_vm0 = vcmask (!%p603_p7), 1045504   ;;  %vm1959_vm1 = vcmask (!%p603_p7), 883712  }
  0x87   : > { %606 = sbr.rel (%p603_p7) target bundleno = 591 (0x24f), region = 51  ;;  %2092 = vmatprep.mubr.bf16.mxu0 (!%p603_p7), %v3316_v32  ;;  %2133 = vmatprep.mubr.bf16.mxu1 (!%p603_p7), %v3316_v32  ;;  %s3001_s9 = sshll.u32 (!%p603_p7), %s2994_s15, 5 }
  0x88   : > { %s3263_s28 = smul.u32 (!%p603_p7), 1792, %s609_s27  ;;  %3290 = vset.pattern.permute.xlu0 (!%p603_p7), %v3316_v32  ;;  %p634_p8 = scmp.lt.s32.totalorder (!%p603_p7), %s3001_s9, 63 }
  0x89   : > { %868 = vperm.xlu0 (!%p603_p7), %3290, %v865_v33  }
  0x8a   : > { %s3833_s4 = scalar_lea.vmem (!%p603_p7), [#allocation2], %s3263_s28 }
  0x8b   : > { %v641_v34 = vld [vmem:[%s3833_s4] sm:$0xff] (!%p603_p7)  ;;  %v642_v36 = vld [vmem:[%s3833_s4 + $0x8] sm:$0xff] (!%p603_p7)  ;;  %v643_v26 = vld [vmem:[%s3833_s4 + $0x10] sm:$0xff] (!%p603_p7) }
  0x8c   : > { %v657_v35 = vld [vmem:[%s3833_s4 + $0x80] sm:$0xff] (!%p603_p7)  ;;  %v658_v38 = vld [vmem:[%s3833_s4 + $0x88] sm:$0xff] (!%p603_p7)  ;;  %v659_v27 = vld [vmem:[%s3833_s4 + $0x90] sm:$0xff] (!%p603_p7) }
  0x8d   : > { %v3004_v37 = vcombine.high (!%p603_p7), %v641_v34, %v657_v35  ;;  %v3003_v39 = vcombine.low (!%p603_p7), %v641_v34, %v657_v35  ;;  %v673_v40 = vld [vmem:[%s3833_s4 + $0x100] sm:$0xff] (!%p603_p7)  ;;  %v3006_v42 = vcombine.high (!%p603_p7), %v642_v36, %v658_v38  ;;  %v3005_v43 = vcombine.low (!%p603_p7), %v642_v36, %v658_v38  ;;  %v674_v45 = vld [vmem:[%s3833_s4 + $0x108] sm:$0xff] (!%p603_p7)  ;;  %v644_v28 = vld [vmem:[%s3833_s4 + $0x18] sm:$0xff] (!%p603_p7) }
  0x8e   : > { %v689_v41 = vld [vmem:[%s3833_s4 + $0x180] sm:$0xff]  ;;  %v690_v46 = vld [vmem:[%s3833_s4 + $0x188] sm:$0xff]  ;;  %v660_v29 = vld [vmem:[%s3833_s4 + $0x98] sm:$0xff]  ;;  %v3008_v31 = vcombine.high %v643_v26, %v659_v27  ;;  %s4232_s9 = smov (!%p634_p8, %s3001_s9), 63 }
  0x8f   : > { %v3036_v44 = vcombine.high %v673_v40, %v689_v41  ;;  %v705_v47 = vld [vmem:[%s3833_s4 + $0x200] sm:$0xff]  ;;  %2060 = vmatprep.subr.bf16.mxu0 %v3004_v37  ;;  %v3038_v48 = vcombine.high %v674_v45, %v690_v46  ;;  %v706_v50 = vld [vmem:[%s3833_s4 + $0x208] sm:$0xff]  ;;  %2101 = vmatprep.subr.bf16.mxu1 %v3006_v42  ;;  %v3035_v52 = vcombine.low %v673_v40, %v689_v41  ;;  %v675_v35 = vld [vmem:[%s3833_s4 + $0x110] sm:$0xff]  ;;  %s3002_s10 = sshll.u32 %s4232_s9, 1 }
  0x90   : > { %v721_v49 = vld [vmem:[%s3833_s4 + $0x280] sm:$0xff]  ;;  %v722_v51 = vld [vmem:[%s3833_s4 + $0x288] sm:$0xff]  ;;  %2061 = vmatpush1.bf16.msra.mxu0 %v3003_v39  ;;  %2102 = vmatpush1.bf16.msra.mxu1 %v3005_v43  ;;  %v3037_v53 = vcombine.low %v674_v45, %v690_v46  ;;  %v3010_v34 = vcombine.high %v644_v28, %v660_v29  ;;  %v691_v36 = vld [vmem:[%s3833_s4 + $0x190] sm:$0xff]  ;;  %v3007_v40 = vcombine.low %v643_v26, %v659_v27  ;;  %s4162_s14 = scalar_lea.vmem %s4227_s3, %s3002_s10 }
  0x91   : > { %2062 = vmatprep.subr.bf16.mxu0 %v3036_v44  ;;  %v3068_v54 = vcombine.high %v705_v47, %v721_v49  ;;  %2103 = vmatprep.subr.bf16.mxu1 %v3038_v48  ;;  %v3070_v55 = vcombine.high %v706_v50, %v722_v51  ;;  %v737_v56 = vld [vmem:[%s3833_s4 + $0x300] sm:$0xff]  ;;  %v738_v58 = vld [vmem:[%s3833_s4 + $0x308] sm:$0xff]  ;;  %v3067_v60 = vcombine.low %v705_v47, %v721_v49  ;;  %v676_v37 = vld [vmem:[%s3833_s4 + $0x118] sm:$0xff] }
  0x92   : > { %v753_v57 = vld [vmem:[%s3833_s4 + $0x380] sm:$0xff]  ;;  %v754_v59 = vld [vmem:[%s3833_s4 + $0x388] sm:$0xff]  ;;  %v3069_v61 = vcombine.low %v706_v50, %v722_v51  ;;  %v692_v38 = vld [vmem:[%s3833_s4 + $0x198] sm:$0xff]  ;;  %v3009_v41 = vcombine.low %v644_v28, %v660_v29  ;;  %v3040_v42 = vcombine.high %v675_v35, %v691_v36  ;;  %v3039_v48 = vcombine.low %v675_v35, %v691_v36 }
  0x93   : > { %v3100_v62 = vcombine.high %v737_v56, %v753_v57  ;;  %v3102_v63 = vcombine.high %v738_v58, %v754_v59  ;;  %v769_v0 = vld [vmem:[%s3833_s4 + $0x400] sm:$0xff]  ;;  %v770_v2 = vld [vmem:[%s3833_s4 + $0x408] sm:$0xff]  ;;  %v3099_v4 = vcombine.low %v737_v56, %v753_v57  ;;  %v3101_v5 = vcombine.low %v738_v58, %v754_v59  ;;  %v707_v44 = vld [vmem:[%s3833_s4 + $0x210] sm:$0xff] }
  0x94   : > { %2063 = vmatpush1.bf16.msra.mxu0 %v3035_v52  ;;  %2104 = vmatpush1.bf16.msra.mxu1 %v3037_v53  ;;  %v785_v1 = vld [vmem:[%s3833_s4 + $0x480] sm:$0xff]  ;;  %v786_v3 = vld [vmem:[%s3833_s4 + $0x488] sm:$0xff]  ;;  %v3042_v43 = vcombine.high %v676_v37, %v692_v38  ;;  %v723_v45 = vld [vmem:[%s3833_s4 + $0x290] sm:$0xff]  ;;  %v3041_v49 = vcombine.low %v676_v37, %v692_v38 }
  0x95   : > { %2064 = vmatprep.subr.bf16.mxu0 %v3068_v54  ;;  %2105 = vmatprep.subr.bf16.mxu1 %v3070_v55  ;;  %v3132_v6 = vcombine.high %v769_v0, %v785_v1  ;;  %v3134_v7 = vcombine.high %v770_v2, %v786_v3  ;;  %v801_v8 = vld [vmem:[%s3833_s4 + $0x500] sm:$0xff]  ;;  %v802_v10 = vld [vmem:[%s3833_s4 + $0x508] sm:$0xff]  ;;  %v3131_v12 = vcombine.low %v769_v0, %v785_v1  ;;  %v708_v46 = vld [vmem:[%s3833_s4 + $0x218] sm:$0xff] }
  0x96   : > { %v817_v9 = vld [vmem:[%s3833_s4 + $0x580] sm:$0xff]  ;;  %v818_v11 = vld [vmem:[%s3833_s4 + $0x588] sm:$0xff]  ;;  %v3133_v13 = vcombine.low %v770_v2, %v786_v3  ;;  %v724_v47 = vld [vmem:[%s3833_s4 + $0x298] sm:$0xff]  ;;  %v3072_v50 = vcombine.high %v707_v44, %v723_v45  ;;  %v3071_v56 = vcombine.low %v707_v44, %v723_v45 }
  0x97   : > { %v3164_v14 = vcombine.high %v801_v8, %v817_v9  ;;  %v3166_v15 = vcombine.high %v802_v10, %v818_v11  ;;  %v833_v16 = vld [vmem:[%s3833_s4 + $0x600] sm:$0xff]  ;;  %v834_v18 = vld [vmem:[%s3833_s4 + $0x608] sm:$0xff]  ;;  %v3163_v20 = vcombine.low %v801_v8, %v817_v9  ;;  %v3165_v21 = vcombine.low %v802_v10, %v818_v11  ;;  %v739_v52 = vld [vmem:[%s3833_s4 + $0x310] sm:$0xff] }
  0x98   : > { %2065 = vmatpush1.bf16.msra.mxu0 %v3067_v60  ;;  %2106 = vmatpush1.bf16.msra.mxu1 %v3069_v61  ;;  %v849_v17 = vld [vmem:[%s3833_s4 + $0x680] sm:$0x33]  ;;  %v850_v19 = vld [vmem:[%s3833_s4 + $0x688] sm:$0x33]  ;;  %v3074_v51 = vcombine.high %v708_v46, %v724_v47  ;;  %v755_v53 = vld [vmem:[%s3833_s4 + $0x390] sm:$0xff]  ;;  %v3073_v57 = vcombine.low %v708_v46, %v724_v47 }
  0x99   : > { %2066 = vmatprep.subr.bf16.mxu0 %v3100_v62  ;;  %2107 = vmatprep.subr.bf16.mxu1 %v3102_v63  ;;  %v3196_v22 = vcombine.high %v833_v16, %v849_v17  ;;  %v3195_v23 = vcombine.low %v833_v16, %v849_v17  ;;  %v3198_v24 = vcombine.high %v834_v18, %v850_v19  ;;  %v3878_v39 = vld [vmem:[%s4224_s0] sm:$0x1]  ;;  %v740_v54 = vld [vmem:[%s3833_s4 + $0x318] sm:$0xff]  ;;  %v771_v60 = vld [vmem:[%s3833_s4 + $0x410] sm:$0xff] }
  0x9a   : > { %v3197_v25 = vcombine.low %v834_v18, %v850_v19  ;;  %v756_v55 = vld [vmem:[%s3833_s4 + $0x398] sm:$0xff]  ;;  %v3104_v58 = vcombine.high %v739_v52, %v755_v53  ;;  %v787_v61 = vld [vmem:[%s3833_s4 + $0x490] sm:$0xff]  ;;  %v3103_v0 = vcombine.low %v739_v52, %v755_v53 }
  0x9b   : > { %v1965_v30 = vsel %vm1963_vm0, %v3195_v23, 0  ;;  %v3106_v59 = vcombine.high %v740_v54, %v756_v55  ;;  %v772_v62 = vld [vmem:[%s3833_s4 + $0x418] sm:$0xff]  ;;  %v3105_v1 = vcombine.low %v740_v54, %v756_v55  ;;  %v3136_v2 = vcombine.high %v771_v60, %v787_v61  ;;  %v661_v23 = vld [vmem:[%s3833_s4 + $0xa0] sm:$0xff] }
  0x9c   : > { %2067 = vmatpush1.bf16.msra.mxu0 %v3099_v4  ;;  %2108 = vmatpush1.bf16.msra.mxu1 %v3101_v5  ;;  %v1971_v33 = vsel %vm1963_vm0, %v3197_v25, 0  ;;  %v788_v63 = vld [vmem:[%s3833_s4 + $0x498] sm:$0xff]  ;;  %v803_v4 = vld [vmem:[%s3833_s4 + $0x510] sm:$0xff]  ;;  %v3135_v8 = vcombine.low %v771_v60, %v787_v61  ;;  %v662_v25 = vld [vmem:[%s3833_s4 + $0xa8] sm:$0xff] }
  0x9d   : > { %2068 = vmatprep.subr.bf16.mxu0 %v3132_v6  ;;  %2109 = vmatprep.subr.bf16.mxu1 %v3134_v7  ;;  %v3138_v3 = vcombine.high %v772_v62, %v788_v63  ;;  %v819_v5 = vld [vmem:[%s3833_s4 + $0x590] sm:$0xff]  ;;  %v804_v6 = vld [vmem:[%s3833_s4 + $0x518] sm:$0xff]  ;;  %v3137_v9 = vcombine.low %v772_v62, %v788_v63 }
  0x9e   : > { %v820_v7 = vld [vmem:[%s3833_s4 + $0x598] sm:$0xff]  ;;  %v3168_v10 = vcombine.high %v803_v4, %v819_v5  ;;  %v3167_v16 = vcombine.low %v803_v4, %v819_v5 }
  0x9f   : > { %v3170_v11 = vcombine.high %v804_v6, %v820_v7  ;;  %v3169_v17 = vcombine.low %v804_v6, %v820_v7 }
  0xa0   : > { %2069 = vmatpush1.bf16.msra.mxu0 %v3131_v12  ;;  %2110 = vmatpush1.bf16.msra.mxu1 %v3133_v13  ;;  %v835_v12 = vld [vmem:[%s3833_s4 + $0x610] sm:$0xff] }
  0xa1   : > { %2070 = vmatprep.subr.bf16.mxu0 %v3164_v14  ;;  %2111 = vmatprep.subr.bf16.mxu1 %v3166_v15  ;;  %v851_v13 = vld [vmem:[%s3833_s4 + $0x690] sm:$0x33]  ;;  %v836_v14 = vld [vmem:[%s3833_s4 + $0x618] sm:$0xff] }
  0xa2   : > { %v852_v15 = vld [vmem:[%s3833_s4 + $0x698] sm:$0x33]  ;;  %v3200_v18 = vcombine.high %v835_v12, %v851_v13  ;;  %v3199_v19 = vcombine.low %v835_v12, %v851_v13 }
  0xa4   : > { %2071 = vmatpush1.bf16.msra.mxu0 %v3163_v20  ;;  %2112 = vmatpush1.bf16.msra.mxu1 %v3165_v21  ;;  %v3202_v20 = vcombine.high %v836_v14, %v852_v15  ;;  %v3201_v21 = vcombine.low %v836_v14, %v852_v15  ;;  %v1977_v26 = vsel %vm1963_vm0, %v3199_v19, 0  ;;  %v663_v19 = vld [vmem:[%s3833_s4 + $0xb0] sm:$0xff] }
  0xa5   : > { %3227 = vmatprep.subr.msk.bf16.mxu0 %vm1963_vm0, %v3196_v22  ;;  %3229 = vmatprep.subr.msk.bf16.mxu1 %vm1963_vm0, %v3198_v24  ;;  %v645_v22 = vld [vmem:[%s3833_s4 + $0x20] sm:$0xff]  ;;  %v646_v24 = vld [vmem:[%s3833_s4 + $0x28] sm:$0xff] }
  0xa6   : > { %v3012_v27 = vcombine.high %v645_v22, %v661_v23  ;;  %v1983_v28 = vsel %vm1963_vm0, %v3201_v21, 0  ;;  %v3014_v29 = vcombine.high %v646_v24, %v662_v25  ;;  %v3011_v35 = vcombine.low %v645_v22, %v661_v23  ;;  %v664_v21 = vld [vmem:[%s3833_s4 + $0xb8] sm:$0xff] }
  0xa7   : > { %v3013_v36 = vcombine.low %v646_v24, %v662_v25 }
  0xa8   : > { %2073 = vmatpush1.bf16.msra.mxu0 %v1965_v30  ;;  %2114 = vmatpush1.bf16.msra.mxu1 %v1971_v33  ;;  %v677_v30 = vld [vmem:[%s3833_s4 + $0x120] sm:$0xff]  ;;  %v678_v33 = vld [vmem:[%s3833_s4 + $0x128] sm:$0xff] }
  0xa9   : > { %2142 = vmatprep.subr.bf16.mxu0 %v3008_v31  ;;  %2183 = vmatprep.subr.bf16.mxu1 %v3010_v34  ;;  %v693_v31 = vld [vmem:[%s3833_s4 + $0x1a0] sm:$0xff]  ;;  %v694_v34 = vld [vmem:[%s3833_s4 + $0x1a8] sm:$0xff] }
  0xaa   : > { %v3044_v37 = vcombine.high %v677_v30, %v693_v31  ;;  %v3046_v38 = vcombine.high %v678_v33, %v694_v34  ;;  %v3043_v44 = vcombine.low %v677_v30, %v693_v31  ;;  %v3045_v45 = vcombine.low %v678_v33, %v694_v34 }
  0xab   : > { %3228 = vmatmul.mubr.msk.bf16.vlgmr.msra.gmra.mrb[0].mxu0 %vm1959_vm1, %v3878_v39  ;;  %3230 = vmatmul.mubr.msk.bf16.vlgmr.msra.gmra.mrb[0].mxu1 %vm1959_vm1, %v3878_v39 }
  0xac   : > { %2143 = vmatpush1.bf16.msra.mxu0 %v3007_v40  ;;  %2184 = vmatpush1.bf16.msra.mxu1 %v3009_v41  ;;  %v709_v40 = vld [vmem:[%s3833_s4 + $0x220] sm:$0xff] }
  0xad   : > { %2144 = vmatprep.subr.bf16.mxu0 %v3040_v42  ;;  %2185 = vmatprep.subr.bf16.mxu1 %v3042_v43  ;;  %v725_v41 = vld [vmem:[%s3833_s4 + $0x2a0] sm:$0xff]  ;;  %v710_v42 = vld [vmem:[%s3833_s4 + $0x228] sm:$0xff] }
  0xae   : > { %2174 = vmatprep.mubr.bf16.mxu0 %v3316_v32  ;;  %2215 = vmatprep.mubr.bf16.mxu1 %v3316_v32  ;;  %v726_v43 = vld [vmem:[%s3833_s4 + $0x2a8] sm:$0xff]  ;;  %v3076_v46 = vcombine.high %v709_v40, %v725_v41  ;;  %v3075_v52 = vcombine.low %v709_v40, %v725_v41 }
  0xaf   : > { %v3078_v47 = vcombine.high %v710_v42, %v726_v43  ;;  %v3077_v53 = vcombine.low %v710_v42, %v726_v43 }
  0xb0   : > { %2145 = vmatpush1.bf16.msra.mxu0 %v3039_v48  ;;  %2186 = vmatpush1.bf16.msra.mxu1 %v3041_v49  ;;  %v741_v48 = vld [vmem:[%s3833_s4 + $0x320] sm:$0xff] }
  0xb1   : > { %2146 = vmatprep.subr.bf16.mxu0 %v3072_v50  ;;  %2187 = vmatprep.subr.bf16.mxu1 %v3074_v51  ;;  %v757_v49 = vld [vmem:[%s3833_s4 + $0x3a0] sm:$0xff]  ;;  %v742_v50 = vld [vmem:[%s3833_s4 + $0x328] sm:$0xff] }
  0xb2   : > { %v758_v51 = vld [vmem:[%s3833_s4 + $0x3a8] sm:$0xff]  ;;  %v3108_v54 = vcombine.high %v741_v48, %v757_v49  ;;  %v3107_v60 = vcombine.low %v741_v48, %v757_v49 }
  0xb3   : > { %v3110_v55 = vcombine.high %v742_v50, %v758_v51  ;;  %v3109_v61 = vcombine.low %v742_v50, %v758_v51 }
  0xb4   : > { %2147 = vmatpush1.bf16.msra.mxu0 %v3071_v56  ;;  %2188 = vmatpush1.bf16.msra.mxu1 %v3073_v57  ;;  %v773_v56 = vld [vmem:[%s3833_s4 + $0x420] sm:$0xff] }
  0xb5   : > { %2148 = vmatprep.subr.bf16.mxu0 %v3104_v58  ;;  %2189 = vmatprep.subr.bf16.mxu1 %v3106_v59  ;;  %v789_v57 = vld [vmem:[%s3833_s4 + $0x4a0] sm:$0xff]  ;;  %v774_v58 = vld [vmem:[%s3833_s4 + $0x428] sm:$0xff] }
  0xb6   : > { %v790_v59 = vld [vmem:[%s3833_s4 + $0x4a8] sm:$0xff]  ;;  %v3140_v62 = vcombine.high %v773_v56, %v789_v57  ;;  %v3139_v4 = vcombine.low %v773_v56, %v789_v57 }
  0xb7   : > { %v3142_v63 = vcombine.high %v774_v58, %v790_v59  ;;  %v3141_v5 = vcombine.low %v774_v58, %v790_v59 }
  0xb8   : > { %2149 = vmatpush1.bf16.msra.mxu0 %v3103_v0  ;;  %2190 = vmatpush1.bf16.msra.mxu1 %v3105_v1  ;;  %v805_v0 = vld [vmem:[%s3833_s4 + $0x520] sm:$0xff] }
  0xb9   : > { %2150 = vmatprep.subr.bf16.mxu0 %v3136_v2  ;;  %2191 = vmatprep.subr.bf16.mxu1 %v3138_v3  ;;  %v821_v1 = vld [vmem:[%s3833_s4 + $0x5a0] sm:$0xff]  ;;  %v806_v2 = vld [vmem:[%s3833_s4 + $0x528] sm:$0xff] }
  0xba   : > { %v822_v3 = vld [vmem:[%s3833_s4 + $0x5a8] sm:$0xff]  ;;  %v3172_v6 = vcombine.high %v805_v0, %v821_v1  ;;  %v3171_v12 = vcombine.low %v805_v0, %v821_v1 }
  0xbb   : > { %v3174_v7 = vcombine.high %v806_v2, %v822_v3  ;;  %v3173_v13 = vcombine.low %v806_v2, %v822_v3 }
  0xbc   : > { %2151 = vmatpush1.bf16.msra.mxu0 %v3135_v8  ;;  %2192 = vmatpush1.bf16.msra.mxu1 %v3137_v9  ;;  %v837_v8 = vld [vmem:[%s3833_s4 + $0x620] sm:$0xff] }
  0xbd   : > { %2152 = vmatprep.subr.bf16.mxu0 %v3168_v10  ;;  %2193 = vmatprep.subr.bf16.mxu1 %v3170_v11  ;;  %v853_v9 = vld [vmem:[%s3833_s4 + $0x6a0] sm:$0x33]  ;;  %v838_v10 = vld [vmem:[%s3833_s4 + $0x628] sm:$0xff] }
  0xbe   : > { %v854_v11 = vld [vmem:[%s3833_s4 + $0x6a8] sm:$0x33]  ;;  %v3204_v14 = vcombine.high %v837_v8, %v853_v9  ;;  %v3203_v15 = vcombine.low %v837_v8, %v853_v9 }
  0xc0   : > { %2153 = vmatpush1.bf16.msra.mxu0 %v3167_v16  ;;  %2194 = vmatpush1.bf16.msra.mxu1 %v3169_v17  ;;  %v3206_v16 = vcombine.high %v838_v10, %v854_v11  ;;  %v3205_v17 = vcombine.low %v838_v10, %v854_v11  ;;  %v1989_v22 = vsel %vm1963_vm0, %v3203_v15, 0  ;;  %v665_v15 = vld [vmem:[%s3833_s4 + $0xc0] sm:$0xff] }
  0xc1   : > { %3231 = vmatprep.subr.msk.bf16.mxu0 %vm1963_vm0, %v3200_v18  ;;  %3233 = vmatprep.subr.msk.bf16.mxu1 %vm1963_vm0, %v3202_v20  ;;  %v647_v18 = vld [vmem:[%s3833_s4 + $0x30] sm:$0xff]  ;;  %v648_v20 = vld [vmem:[%s3833_s4 + $0x38] sm:$0xff] }
  0xc2   : > { %v3016_v23 = vcombine.high %v647_v18, %v663_v19  ;;  %v1995_v24 = vsel %vm1963_vm0, %v3205_v17, 0  ;;  %v3018_v25 = vcombine.high %v648_v20, %v664_v21  ;;  %v3015_v30 = vcombine.low %v647_v18, %v663_v19  ;;  %v666_v17 = vld [vmem:[%s3833_s4 + $0xc8] sm:$0xff] }
  0xc3   : > { %v3017_v31 = vcombine.low %v648_v20, %v664_v21 }
  0xc4   : > { %2155 = vmatpush1.bf16.msra.mxu0 %v1977_v26  ;;  %2196 = vmatpush1.bf16.msra.mxu1 %v1983_v28  ;;  %v679_v26 = vld [vmem:[%s3833_s4 + $0x130] sm:$0xff]  ;;  %v680_v28 = vld [vmem:[%s3833_s4 + $0x138] sm:$0xff] }
  0xc5   : > { %2224 = vmatprep.subr.bf16.mxu0 %v3012_v27  ;;  %2265 = vmatprep.subr.bf16.mxu1 %v3014_v29  ;;  %v695_v27 = vld [vmem:[%s3833_s4 + $0x1b0] sm:$0xff]  ;;  %v696_v29 = vld [vmem:[%s3833_s4 + $0x1b8] sm:$0xff] }
  0xc6   : > { %v3048_v33 = vcombine.high %v679_v26, %v695_v27  ;;  %v3050_v34 = vcombine.high %v680_v28, %v696_v29  ;;  %v3047_v40 = vcombine.low %v679_v26, %v695_v27  ;;  %v3049_v41 = vcombine.low %v680_v28, %v696_v29 }
  0xc7   : > { %3232 = vmatmul.mubr.msk.bf16.vlgmr.msra.gmra.mrb[4].mxu0 %vm1959_vm1, %v3878_v39  ;;  %3234 = vmatmul.mubr.msk.bf16.vlgmr.msra.gmra.mrb[4].mxu1 %vm1959_vm1, %v3878_v39 }
  0xc8   : > { %2225 = vmatpush1.bf16.msra.mxu0 %v3011_v35  ;;  %2266 = vmatpush1.bf16.msra.mxu1 %v3013_v36  ;;  %v711_v35 = vld [vmem:[%s3833_s4 + $0x230] sm:$0xff] }
  0xc9   : > { %2226 = vmatprep.subr.bf16.mxu0 %v3044_v37  ;;  %2267 = vmatprep.subr.bf16.mxu1 %v3046_v38  ;;  %v727_v36 = vld [vmem:[%s3833_s4 + $0x2b0] sm:$0xff]  ;;  %v712_v37 = vld [vmem:[%s3833_s4 + $0x238] sm:$0xff] }
  0xca   : > { %2256 = vmatprep.mubr.bf16.mxu0 %v3316_v32  ;;  %2297 = vmatprep.mubr.bf16.mxu1 %v3316_v32  ;;  %v728_v38 = vld [vmem:[%s3833_s4 + $0x2b8] sm:$0xff]  ;;  %v3080_v42 = vcombine.high %v711_v35, %v727_v36  ;;  %v3079_v48 = vcombine.low %v711_v35, %v727_v36 }
  0xcb   : > { %v3082_v43 = vcombine.high %v712_v37, %v728_v38  ;;  %v3081_v49 = vcombine.low %v712_v37, %v728_v38 }
  0xcc   : > { %2227 = vmatpush1.bf16.msra.mxu0 %v3043_v44  ;;  %2268 = vmatpush1.bf16.msra.mxu1 %v3045_v45  ;;  %v743_v44 = vld [vmem:[%s3833_s4 + $0x330] sm:$0xff] }
  0xcd   : > { %2228 = vmatprep.subr.bf16.mxu0 %v3076_v46  ;;  %2269 = vmatprep.subr.bf16.mxu1 %v3078_v47  ;;  %v759_v45 = vld [vmem:[%s3833_s4 + $0x3b0] sm:$0xff]  ;;  %v744_v46 = vld [vmem:[%s3833_s4 + $0x338] sm:$0xff] }
  0xce   : > { %v760_v47 = vld [vmem:[%s3833_s4 + $0x3b8] sm:$0xff]  ;;  %v3112_v50 = vcombine.high %v743_v44, %v759_v45  ;;  %v3111_v56 = vcombine.low %v743_v44, %v759_v45 }
  0xcf   : > { %v3114_v51 = vcombine.high %v744_v46, %v760_v47  ;;  %v3113_v57 = vcombine.low %v744_v46, %v760_v47 }
  0xd0   : > { %2229 = vmatpush1.bf16.msra.mxu0 %v3075_v52  ;;  %2270 = vmatpush1.bf16.msra.mxu1 %v3077_v53  ;;  %v775_v52 = vld [vmem:[%s3833_s4 + $0x430] sm:$0xff] }
  0xd1   : > { %2230 = vmatprep.subr.bf16.mxu0 %v3108_v54  ;;  %2271 = vmatprep.subr.bf16.mxu1 %v3110_v55  ;;  %v791_v53 = vld [vmem:[%s3833_s4 + $0x4b0] sm:$0xff]  ;;  %v776_v54 = vld [vmem:[%s3833_s4 + $0x438] sm:$0xff] }
  0xd2   : > { %v792_v55 = vld [vmem:[%s3833_s4 + $0x4b8] sm:$0xff]  ;;  %v3144_v58 = vcombine.high %v775_v52, %v791_v53  ;;  %v3143_v0 = vcombine.low %v775_v52, %v791_v53 }
  0xd3   : > { %v3146_v59 = vcombine.high %v776_v54, %v792_v55  ;;  %v3145_v1 = vcombine.low %v776_v54, %v792_v55 }
  0xd4   : > { %2231 = vmatpush1.bf16.msra.mxu0 %v3107_v60  ;;  %2272 = vmatpush1.bf16.msra.mxu1 %v3109_v61  ;;  %v807_v60 = vld [vmem:[%s3833_s4 + $0x530] sm:$0xff] }
  0xd5   : > { %2232 = vmatprep.subr.bf16.mxu0 %v3140_v62  ;;  %2273 = vmatprep.subr.bf16.mxu1 %v3142_v63  ;;  %v823_v61 = vld [vmem:[%s3833_s4 + $0x5b0] sm:$0xff]  ;;  %v808_v62 = vld [vmem:[%s3833_s4 + $0x538] sm:$0xff] }
  0xd6   : > { %v824_v63 = vld [vmem:[%s3833_s4 + $0x5b8] sm:$0xff]  ;;  %v3176_v2 = vcombine.high %v807_v60, %v823_v61  ;;  %v3175_v8 = vcombine.low %v807_v60, %v823_v61 }
  0xd7   : > { %v3178_v3 = vcombine.high %v808_v62, %v824_v63  ;;  %v3177_v9 = vcombine.low %v808_v62, %v824_v63 }
  0xd8   : > { %2233 = vmatpush1.bf16.msra.mxu0 %v3139_v4  ;;  %2274 = vmatpush1.bf16.msra.mxu1 %v3141_v5  ;;  %v839_v4 = vld [vmem:[%s3833_s4 + $0x630] sm:$0xff] }
  0xd9   : > { %2234 = vmatprep.subr.bf16.mxu0 %v3172_v6  ;;  %2275 = vmatprep.subr.bf16.mxu1 %v3174_v7  ;;  %v855_v5 = vld [vmem:[%s3833_s4 + $0x6b0] sm:$0x33]  ;;  %v840_v6 = vld [vmem:[%s3833_s4 + $0x638] sm:$0xff] }
  0xda   : > { %v856_v7 = vld [vmem:[%s3833_s4 + $0x6b8] sm:$0x33]  ;;  %v3208_v10 = vcombine.high %v839_v4, %v855_v5  ;;  %v3207_v11 = vcombine.low %v839_v4, %v855_v5 }
  0xdc   : > { %2235 = vmatpush1.bf16.msra.mxu0 %v3171_v12  ;;  %2276 = vmatpush1.bf16.msra.mxu1 %v3173_v13  ;;  %v3210_v12 = vcombine.high %v840_v6, %v856_v7  ;;  %v3209_v13 = vcombine.low %v840_v6, %v856_v7  ;;  %v2001_v18 = vsel %vm1963_vm0, %v3207_v11, 0  ;;  %v667_v11 = vld [vmem:[%s3833_s4 + $0xd0] sm:$0xff] }
  0xdd   : > { %3235 = vmatprep.subr.msk.bf16.mxu0 %vm1963_vm0, %v3204_v14  ;;  %3237 = vmatprep.subr.msk.bf16.mxu1 %vm1963_vm0, %v3206_v16  ;;  %v649_v14 = vld [vmem:[%s3833_s4 + $0x40] sm:$0xff]  ;;  %v650_v16 = vld [vmem:[%s3833_s4 + $0x48] sm:$0xff] }
  0xde   : > { %v3020_v19 = vcombine.high %v649_v14, %v665_v15  ;;  %v2007_v20 = vsel %vm1963_vm0, %v3209_v13, 0  ;;  %v3022_v21 = vcombine.high %v650_v16, %v666_v17  ;;  %v3019_v26 = vcombine.low %v649_v14, %v665_v15  ;;  %v668_v13 = vld [vmem:[%s3833_s4 + $0xd8] sm:$0xff] }
  0xdf   : > { %v3021_v27 = vcombine.low %v650_v16, %v666_v17 }
  0xe0   : > { %2237 = vmatpush1.bf16.msra.mxu0 %v1989_v22  ;;  %2278 = vmatpush1.bf16.msra.mxu1 %v1995_v24  ;;  %v681_v22 = vld [vmem:[%s3833_s4 + $0x140] sm:$0xff]  ;;  %v682_v24 = vld [vmem:[%s3833_s4 + $0x148] sm:$0xff] }
  0xe1   : > { %2306 = vmatprep.subr.bf16.mxu0 %v3016_v23  ;;  %2347 = vmatprep.subr.bf16.mxu1 %v3018_v25  ;;  %v697_v23 = vld [vmem:[%s3833_s4 + $0x1c0] sm:$0xff]  ;;  %v698_v25 = vld [vmem:[%s3833_s4 + $0x1c8] sm:$0xff] }
  0xe2   : > { %v3052_v28 = vcombine.high %v681_v22, %v697_v23  ;;  %v3054_v29 = vcombine.high %v682_v24, %v698_v25  ;;  %v3051_v35 = vcombine.low %v681_v22, %v697_v23  ;;  %v3053_v36 = vcombine.low %v682_v24, %v698_v25 }
  0xe3   : > { %3236 = vmatmul.mubr.msk.bf16.vlgmr.msra.gmra.mrb[8].mxu0 %vm1959_vm1, %v3878_v39  ;;  %3238 = vmatmul.mubr.msk.bf16.vlgmr.msra.gmra.mrb[8].mxu1 %vm1959_vm1, %v3878_v39 }
  0xe4   : > { %2307 = vmatpush1.bf16.msra.mxu0 %v3015_v30  ;;  %2348 = vmatpush1.bf16.msra.mxu1 %v3017_v31  ;;  %v713_v30 = vld [vmem:[%s3833_s4 + $0x240] sm:$0xff] }
  0xe5   : > { %2308 = vmatprep.subr.bf16.mxu0 %v3048_v33  ;;  %2349 = vmatprep.subr.bf16.mxu1 %v3050_v34  ;;  %v729_v31 = vld [vmem:[%s3833_s4 + $0x2c0] sm:$0xff]  ;;  %v714_v33 = vld [vmem:[%s3833_s4 + $0x248] sm:$0xff] }
  0xe6   : > { %2338 = vmatprep.mubr.bf16.mxu0 %v3316_v32  ;;  %2379 = vmatprep.mubr.bf16.mxu1 %v3316_v32  ;;  %v730_v34 = vld [vmem:[%s3833_s4 + $0x2c8] sm:$0xff]  ;;  %v3084_v37 = vcombine.high %v713_v30, %v729_v31  ;;  %v3083_v44 = vcombine.low %v713_v30, %v729_v31 }
  0xe7   : > { %v3086_v38 = vcombine.high %v714_v33, %v730_v34  ;;  %v3085_v45 = vcombine.low %v714_v33, %v730_v34 }
  0xe8   : > { %2309 = vmatpush1.bf16.msra.mxu0 %v3047_v40  ;;  %2350 = vmatpush1.bf16.msra.mxu1 %v3049_v41  ;;  %v745_v40 = vld [vmem:[%s3833_s4 + $0x340] sm:$0xff] }
  0xe9   : > { %2310 = vmatprep.subr.bf16.mxu0 %v3080_v42  ;;  %2351 = vmatprep.subr.bf16.mxu1 %v3082_v43  ;;  %v761_v41 = vld [vmem:[%s3833_s4 + $0x3c0] sm:$0xff]  ;;  %v746_v42 = vld [vmem:[%s3833_s4 + $0x348] sm:$0xff] }
  0xea   : > { %v762_v43 = vld [vmem:[%s3833_s4 + $0x3c8] sm:$0xff]  ;;  %v3116_v46 = vcombine.high %v745_v40, %v761_v41  ;;  %v3115_v52 = vcombine.low %v745_v40, %v761_v41 }
  0xeb   : > { %v3118_v47 = vcombine.high %v746_v42, %v762_v43  ;;  %v3117_v53 = vcombine.low %v746_v42, %v762_v43 }
  0xec   : > { %2311 = vmatpush1.bf16.msra.mxu0 %v3079_v48  ;;  %2352 = vmatpush1.bf16.msra.mxu1 %v3081_v49  ;;  %v777_v48 = vld [vmem:[%s3833_s4 + $0x440] sm:$0xff] }
  0xed   : > { %2312 = vmatprep.subr.bf16.mxu0 %v3112_v50  ;;  %2353 = vmatprep.subr.bf16.mxu1 %v3114_v51  ;;  %v793_v49 = vld [vmem:[%s3833_s4 + $0x4c0] sm:$0xff]  ;;  %v778_v50 = vld [vmem:[%s3833_s4 + $0x448] sm:$0xff] }
  0xee   : > { %v794_v51 = vld [vmem:[%s3833_s4 + $0x4c8] sm:$0xff]  ;;  %v3148_v54 = vcombine.high %v777_v48, %v793_v49  ;;  %v3147_v60 = vcombine.low %v777_v48, %v793_v49 }
  0xef   : > { %v3150_v55 = vcombine.high %v778_v50, %v794_v51  ;;  %v3149_v61 = vcombine.low %v778_v50, %v794_v51 }
  0xf0   : > { %2313 = vmatpush1.bf16.msra.mxu0 %v3111_v56  ;;  %2354 = vmatpush1.bf16.msra.mxu1 %v3113_v57  ;;  %v809_v56 = vld [vmem:[%s3833_s4 + $0x540] sm:$0xff] }
  0xf1   : > { %2314 = vmatprep.subr.bf16.mxu0 %v3144_v58  ;;  %2355 = vmatprep.subr.bf16.mxu1 %v3146_v59  ;;  %v825_v57 = vld [vmem:[%s3833_s4 + $0x5c0] sm:$0xff]  ;;  %v810_v58 = vld [vmem:[%s3833_s4 + $0x548] sm:$0xff] }
  0xf2   : > { %v826_v59 = vld [vmem:[%s3833_s4 + $0x5c8] sm:$0xff]  ;;  %v3180_v62 = vcombine.high %v809_v56, %v825_v57  ;;  %v3179_v4 = vcombine.low %v809_v56, %v825_v57 }
  0xf3   : > { %v3182_v63 = vcombine.high %v810_v58, %v826_v59  ;;  %v3181_v5 = vcombine.low %v810_v58, %v826_v59 }
  0xf4   : > { %2315 = vmatpush1.bf16.msra.mxu0 %v3143_v0  ;;  %2356 = vmatpush1.bf16.msra.mxu1 %v3145_v1  ;;  %v841_v0 = vld [vmem:[%s3833_s4 + $0x640] sm:$0xff] }
  0xf5   : > { %2316 = vmatprep.subr.bf16.mxu0 %v3176_v2  ;;  %2357 = vmatprep.subr.bf16.mxu1 %v3178_v3  ;;  %v857_v1 = vld [vmem:[%s3833_s4 + $0x6c0] sm:$0x33]  ;;  %v842_v2 = vld [vmem:[%s3833_s4 + $0x648] sm:$0xff] }
  0xf6   : > { %v858_v3 = vld [vmem:[%s3833_s4 + $0x6c8] sm:$0x33]  ;;  %v3212_v6 = vcombine.high %v841_v0, %v857_v1  ;;  %v3211_v7 = vcombine.low %v841_v0, %v857_v1 }
  0xf8   : > { %2317 = vmatpush1.bf16.msra.mxu0 %v3175_v8  ;;  %2358 = vmatpush1.bf16.msra.mxu1 %v3177_v9  ;;  %v3214_v8 = vcombine.high %v842_v2, %v858_v3  ;;  %v3213_v9 = vcombine.low %v842_v2, %v858_v3  ;;  %v2013_v14 = vsel %vm1963_vm0, %v3211_v7, 0  ;;  %v669_v7 = vld [vmem:[%s3833_s4 + $0xe0] sm:$0xff] }
  0xf9   : > { %3239 = vmatprep.subr.msk.bf16.mxu0 %vm1963_vm0, %v3208_v10  ;;  %3241 = vmatprep.subr.msk.bf16.mxu1 %vm1963_vm0, %v3210_v12  ;;  %v651_v10 = vld [vmem:[%s3833_s4 + $0x50] sm:$0xff]  ;;  %v652_v12 = vld [vmem:[%s3833_s4 + $0x58] sm:$0xff] }
  0xfa   : > { %v3024_v15 = vcombine.high %v651_v10, %v667_v11  ;;  %v2019_v16 = vsel %vm1963_vm0, %v3213_v9, 0  ;;  %v3026_v17 = vcombine.high %v652_v12, %v668_v13  ;;  %v3023_v22 = vcombine.low %v651_v10, %v667_v11  ;;  %v670_v9 = vld [vmem:[%s3833_s4 + $0xe8] sm:$0xff] }
  0xfb   : > { %v3025_v23 = vcombine.low %v652_v12, %v668_v13 }
  0xfc   : > { %2319 = vmatpush1.bf16.msra.mxu0 %v2001_v18  ;;  %2360 = vmatpush1.bf16.msra.mxu1 %v2007_v20  ;;  %v683_v18 = vld [vmem:[%s3833_s4 + $0x150] sm:$0xff]  ;;  %v684_v20 = vld [vmem:[%s3833_s4 + $0x158] sm:$0xff] }
  0xfd   : > { %2388 = vmatprep.subr.bf16.mxu0 %v3020_v19  ;;  %2429 = vmatprep.subr.bf16.mxu1 %v3022_v21  ;;  %v699_v19 = vld [vmem:[%s3833_s4 + $0x1d0] sm:$0xff]  ;;  %v700_v21 = vld [vmem:[%s3833_s4 + $0x1d8] sm:$0xff] }
  0xfe   : > { %v3056_v24 = vcombine.high %v683_v18, %v699_v19  ;;  %v3058_v25 = vcombine.high %v684_v20, %v700_v21  ;;  %v3055_v30 = vcombine.low %v683_v18, %v699_v19  ;;  %v3057_v31 = vcombine.low %v684_v20, %v700_v21 }
  0xff   : > { %3240 = vmatmul.mubr.msk.bf16.vlgmr.msra.gmra.mrb[12].mxu0 %vm1959_vm1, %v3878_v39  ;;  %3242 = vmatmul.mubr.msk.bf16.vlgmr.msra.gmra.mrb[12].mxu1 %vm1959_vm1, %v3878_v39 }
 0x100   : > { %2389 = vmatpush1.bf16.msra.mxu0 %v3019_v26  ;;  %2430 = vmatpush1.bf16.msra.mxu1 %v3021_v27  ;;  %v715_v26 = vld [vmem:[%s3833_s4 + $0x250] sm:$0xff] }
 0x101   : > { %2390 = vmatprep.subr.bf16.mxu0 %v3052_v28  ;;  %2431 = vmatprep.subr.bf16.mxu1 %v3054_v29  ;;  %v731_v27 = vld [vmem:[%s3833_s4 + $0x2d0] sm:$0xff]  ;;  %v716_v28 = vld [vmem:[%s3833_s4 + $0x258] sm:$0xff] }
 0x102   : > { %2420 = vmatprep.mubr.bf16.mxu0 %v3316_v32  ;;  %2461 = vmatprep.mubr.bf16.mxu1 %v3316_v32  ;;  %v732_v29 = vld [vmem:[%s3833_s4 + $0x2d8] sm:$0xff]  ;;  %v3088_v33 = vcombine.high %v715_v26, %v731_v27  ;;  %v3087_v40 = vcombine.low %v715_v26, %v731_v27 }
 0x103   : > { %v3090_v34 = vcombine.high %v716_v28, %v732_v29  ;;  %v3089_v41 = vcombine.low %v716_v28, %v732_v29 }
 0x104   : > { %2391 = vmatpush1.bf16.msra.mxu0 %v3051_v35  ;;  %2432 = vmatpush1.bf16.msra.mxu1 %v3053_v36  ;;  %v747_v35 = vld [vmem:[%s3833_s4 + $0x350] sm:$0xff] }
 0x105   : > { %2392 = vmatprep.subr.bf16.mxu0 %v3084_v37  ;;  %2433 = vmatprep.subr.bf16.mxu1 %v3086_v38  ;;  %v763_v36 = vld [vmem:[%s3833_s4 + $0x3d0] sm:$0xff]  ;;  %v748_v37 = vld [vmem:[%s3833_s4 + $0x358] sm:$0xff] }
 0x106   : > { %v764_v38 = vld [vmem:[%s3833_s4 + $0x3d8] sm:$0xff]  ;;  %v3120_v42 = vcombine.high %v747_v35, %v763_v36  ;;  %v3119_v48 = vcombine.low %v747_v35, %v763_v36 }
 0x107   : > { %v3122_v43 = vcombine.high %v748_v37, %v764_v38  ;;  %v3121_v49 = vcombine.low %v748_v37, %v764_v38  ;;  %v781_v38 = vld [vmem:[%s3833_s4 + $0x460] sm:$0xff] }
 0x108   : > { %2393 = vmatpush1.bf16.msra.mxu0 %v3083_v44  ;;  %2434 = vmatpush1.bf16.msra.mxu1 %v3085_v45  ;;  %v779_v44 = vld [vmem:[%s3833_s4 + $0x450] sm:$0xff] }
 0x109   : > { %2394 = vmatprep.subr.bf16.mxu0 %v3116_v46  ;;  %2435 = vmatprep.subr.bf16.mxu1 %v3118_v47  ;;  %v795_v45 = vld [vmem:[%s3833_s4 + $0x4d0] sm:$0xff]  ;;  %v780_v46 = vld [vmem:[%s3833_s4 + $0x458] sm:$0xff] }
 0x10a   : > { %v796_v47 = vld [vmem:[%s3833_s4 + $0x4d8] sm:$0xff]  ;;  %v3152_v50 = vcombine.high %v779_v44, %v795_v45  ;;  %v3151_v56 = vcombine.low %v779_v44, %v795_v45 }
 0x10b   : > { %v3154_v51 = vcombine.high %v780_v46, %v796_v47  ;;  %v3153_v57 = vcombine.low %v780_v46, %v796_v47  ;;  %v813_v47 = vld [vmem:[%s3833_s4 + $0x560] sm:$0xff] }
 0x10c   : > { %2395 = vmatpush1.bf16.msra.mxu0 %v3115_v52  ;;  %2436 = vmatpush1.bf16.msra.mxu1 %v3117_v53  ;;  %v811_v52 = vld [vmem:[%s3833_s4 + $0x550] sm:$0xff] }
 0x10d   : > { %2396 = vmatprep.subr.bf16.mxu0 %v3148_v54  ;;  %2437 = vmatprep.subr.bf16.mxu1 %v3150_v55  ;;  %v827_v53 = vld [vmem:[%s3833_s4 + $0x5d0] sm:$0xff]  ;;  %v812_v54 = vld [vmem:[%s3833_s4 + $0x558] sm:$0xff] }
 0x10e   : > { %v828_v55 = vld [vmem:[%s3833_s4 + $0x5d8] sm:$0xff]  ;;  %v3184_v58 = vcombine.high %v811_v52, %v827_v53  ;;  %v3183_v0 = vcombine.low %v811_v52, %v827_v53 }
 0x10f   : > { %v3186_v59 = vcombine.high %v812_v54, %v828_v55  ;;  %v3185_v1 = vcombine.low %v812_v54, %v828_v55  ;;  %v845_v55 = vld [vmem:[%s3833_s4 + $0x660] sm:$0xff] }
 0x110   : > { %2397 = vmatpush1.bf16.msra.mxu0 %v3147_v60  ;;  %2438 = vmatpush1.bf16.msra.mxu1 %v3149_v61  ;;  %v843_v60 = vld [vmem:[%s3833_s4 + $0x650] sm:$0xff] }
 0x111   : > { %2398 = vmatprep.subr.bf16.mxu0 %v3180_v62  ;;  %2439 = vmatprep.subr.bf16.mxu1 %v3182_v63  ;;  %v859_v61 = vld [vmem:[%s3833_s4 + $0x6d0] sm:$0x33]  ;;  %v844_v62 = vld [vmem:[%s3833_s4 + $0x658] sm:$0xff] }
 0x112   : > { %v860_v63 = vld [vmem:[%s3833_s4 + $0x6d8] sm:$0x33]  ;;  %v3216_v2 = vcombine.high %v843_v60, %v859_v61  ;;  %v3215_v3 = vcombine.low %v843_v60, %v859_v61 }
 0x114   : > { %2399 = vmatpush1.bf16.msra.mxu0 %v3179_v4  ;;  %2440 = vmatpush1.bf16.msra.mxu1 %v3181_v5  ;;  %v3218_v4 = vcombine.high %v844_v62, %v860_v63  ;;  %v3217_v5 = vcombine.low %v844_v62, %v860_v63  ;;  %v2025_v10 = vsel %vm1963_vm0, %v3215_v3, 0  ;;  %v656_v3 = vld [vmem:[%s3833_s4 + $0x78] sm:$0xff] }
 0x115   : > { %3243 = vmatprep.subr.msk.bf16.mxu0 %vm1963_vm0, %v3212_v6  ;;  %3245 = vmatprep.subr.msk.bf16.mxu1 %vm1963_vm0, %v3214_v8  ;;  %v653_v6 = vld [vmem:[%s3833_s4 + $0x60] sm:$0xff]  ;;  %v654_v8 = vld [vmem:[%s3833_s4 + $0x68] sm:$0xff] }
 0x116   : > { %v3028_v11 = vcombine.high %v653_v6, %v669_v7  ;;  %v2031_v12 = vsel %vm1963_vm0, %v3217_v5, 0  ;;  %v3030_v13 = vcombine.high %v654_v8, %v670_v9  ;;  %v3027_v18 = vcombine.low %v653_v6, %v669_v7 }
 0x117   : > { %v3029_v19 = vcombine.low %v654_v8, %v670_v9  ;;  %v687_v9 = vld [vmem:[%s3833_s4 + $0x170] sm:$0xff] }
 0x118   : > { %2401 = vmatpush1.bf16.msra.mxu0 %v2013_v14  ;;  %2442 = vmatpush1.bf16.msra.mxu1 %v2019_v16  ;;  %v685_v14 = vld [vmem:[%s3833_s4 + $0x160] sm:$0xff]  ;;  %v686_v16 = vld [vmem:[%s3833_s4 + $0x168] sm:$0xff] }
 0x119   : > { %2470 = vmatprep.subr.bf16.mxu0 %v3024_v15  ;;  %2511 = vmatprep.subr.bf16.mxu1 %v3026_v17  ;;  %v701_v15 = vld [vmem:[%s3833_s4 + $0x1e0] sm:$0xff]  ;;  %v702_v17 = vld [vmem:[%s3833_s4 + $0x1e8] sm:$0xff] }
 0x11a   : > { %v3060_v20 = vcombine.high %v685_v14, %v701_v15  ;;  %v3062_v21 = vcombine.high %v686_v16, %v702_v17  ;;  %v3059_v26 = vcombine.low %v685_v14, %v701_v15  ;;  %v3061_v27 = vcombine.low %v686_v16, %v702_v17  ;;  %v719_v17 = vld [vmem:[%s3833_s4 + $0x270] sm:$0xff] }
 0x11b   : > { %3244 = vmatmul.mubr.msk.bf16.vlgmr.msra.gmra.mrb[16].mxu0 %vm1959_vm1, %v3878_v39  ;;  %3246 = vmatmul.mubr.msk.bf16.vlgmr.msra.gmra.mrb[16].mxu1 %vm1959_vm1, %v3878_v39 }
 0x11c   : > { %2471 = vmatpush1.bf16.msra.mxu0 %v3023_v22  ;;  %2512 = vmatpush1.bf16.msra.mxu1 %v3025_v23  ;;  %v717_v22 = vld [vmem:[%s3833_s4 + $0x260] sm:$0xff] }
 0x11d   : > { %2472 = vmatprep.subr.bf16.mxu0 %v3056_v24  ;;  %2513 = vmatprep.subr.bf16.mxu1 %v3058_v25  ;;  %v733_v23 = vld [vmem:[%s3833_s4 + $0x2e0] sm:$0xff]  ;;  %v718_v24 = vld [vmem:[%s3833_s4 + $0x268] sm:$0xff] }
 0x11e   : > { %2502 = vmatprep.mubr.bf16.mxu0 %v3316_v32  ;;  %2543 = vmatprep.mubr.bf16.mxu1 %v3316_v32  ;;  %v734_v25 = vld [vmem:[%s3833_s4 + $0x2e8] sm:$0xff]  ;;  %v3092_v28 = vcombine.high %v717_v22, %v733_v23 }
 0x11f   : > { %v3094_v29 = vcombine.high %v718_v24, %v734_v25  ;;  %v3093_v35 = vcombine.low %v718_v24, %v734_v25 }
 0x120   : > { %2473 = vmatpush1.bf16.msra.mxu0 %v3055_v30  ;;  %2514 = vmatpush1.bf16.msra.mxu1 %v3057_v31  ;;  %v749_v30 = vld [vmem:[%s3833_s4 + $0x360] sm:$0xff] }
 0x121   : > { %2474 = vmatprep.subr.bf16.mxu0 %v3088_v33  ;;  %2515 = vmatprep.subr.bf16.mxu1 %v3090_v34  ;;  %v765_v31 = vld [vmem:[%s3833_s4 + $0x3e0] sm:$0xff]  ;;  %v750_v33 = vld [vmem:[%s3833_s4 + $0x368] sm:$0xff] }
 0x122   : > { %v766_v34 = vld [vmem:[%s3833_s4 + $0x3e8] sm:$0xff]  ;;  %v3124_v36 = vcombine.high %v749_v30, %v765_v31 }
 0x123   : > { %v3126_v37 = vcombine.high %v750_v33, %v766_v34  ;;  %v3125_v44 = vcombine.low %v750_v33, %v766_v34 }
 0x124   : > { %2475 = vmatpush1.bf16.msra.mxu0 %v3087_v40  ;;  %2516 = vmatpush1.bf16.msra.mxu1 %v3089_v41  ;;  %v797_v40 = vld [vmem:[%s3833_s4 + $0x4e0] sm:$0xff]  ;;  %v782_v41 = vld [vmem:[%s3833_s4 + $0x468] sm:$0xff] }
 0x125   : > { %2476 = vmatprep.subr.bf16.mxu0 %v3120_v42  ;;  %2517 = vmatprep.subr.bf16.mxu1 %v3122_v43  ;;  %v798_v42 = vld [vmem:[%s3833_s4 + $0x4e8] sm:$0xff]  ;;  %v3123_v43 = vcombine.low %v749_v30, %v765_v31  ;;  %v3156_v45 = vcombine.high %v781_v38, %v797_v40 }
 0x126   : > { %v3158_v46 = vcombine.high %v782_v41, %v798_v42  ;;  %v3157_v52 = vcombine.low %v782_v41, %v798_v42  ;;  %v815_v42 = vld [vmem:[%s3833_s4 + $0x570] sm:$0xff] }
 0x128   : > { %2477 = vmatpush1.bf16.msra.mxu0 %v3119_v48  ;;  %2518 = vmatpush1.bf16.msra.mxu1 %v3121_v49  ;;  %v829_v48 = vld [vmem:[%s3833_s4 + $0x5e0] sm:$0xff]  ;;  %v814_v49 = vld [vmem:[%s3833_s4 + $0x568] sm:$0xff] }
 0x129   : > { %2478 = vmatprep.subr.bf16.mxu0 %v3152_v50  ;;  %2519 = vmatprep.subr.bf16.mxu1 %v3154_v51  ;;  %v830_v50 = vld [vmem:[%s3833_s4 + $0x5e8] sm:$0xff]  ;;  %v3155_v51 = vcombine.low %v781_v38, %v797_v40  ;;  %v3188_v53 = vcombine.high %v813_v47, %v829_v48 }
 0x12a   : > { %v3190_v54 = vcombine.high %v814_v49, %v830_v50  ;;  %v3189_v60 = vcombine.low %v814_v49, %v830_v50  ;;  %v847_v50 = vld [vmem:[%s3833_s4 + $0x670] sm:$0xff] }
 0x12c   : > { %2479 = vmatpush1.bf16.msra.mxu0 %v3151_v56  ;;  %2520 = vmatpush1.bf16.msra.mxu1 %v3153_v57  ;;  %v861_v56 = vld [vmem:[%s3833_s4 + $0x6e0] sm:$0x33]  ;;  %v846_v57 = vld [vmem:[%s3833_s4 + $0x668] sm:$0xff] }
 0x12d   : > { %2480 = vmatprep.subr.bf16.mxu0 %v3184_v58  ;;  %2521 = vmatprep.subr.bf16.mxu1 %v3186_v59  ;;  %v862_v58 = vld [vmem:[%s3833_s4 + $0x6e8] sm:$0x33]  ;;  %v3187_v59 = vcombine.low %v813_v47, %v829_v48  ;;  %v3220_v61 = vcombine.high %v845_v55, %v861_v56  ;;  %v3219_v62 = vcombine.low %v845_v55, %v861_v56 }
 0x12e   : > { %v3222_v63 = vcombine.high %v846_v57, %v862_v58 }
 0x12f   : > { %v2037_v5 = vsel %vm1963_vm0, %v3219_v62, 0  ;;  %v3317_v62 = vmov 1983009808  }
 0x130   : > { %2481 = vmatpush1.bf16.msra.mxu0 %v3183_v0  ;;  %2522 = vmatpush1.bf16.msra.mxu1 %v3185_v1  ;;  %v3221_v0 = vcombine.low %v846_v57, %v862_v58  ;;  %v655_v1 = vld [vmem:[%s3833_s4 + $0x70] sm:$0xff] }
 0x131   : > { %3247 = vmatprep.subr.msk.bf16.mxu0 %vm1963_vm0, %v3216_v2  ;;  %3249 = vmatprep.subr.msk.bf16.mxu1 %vm1963_vm0, %v3218_v4  ;;  %v671_v2 = vld [vmem:[%s3833_s4 + $0xf0] sm:$0xff]  ;;  %v672_v4 = vld [vmem:[%s3833_s4 + $0xf8] sm:$0xff] }
 0x132   : > { %v3032_v6 = vcombine.high %v655_v1, %v671_v2  ;;  %v2043_v7 = vsel %vm1963_vm0, %v3221_v0, 0  ;;  %v3034_v8 = vcombine.high %v656_v3, %v672_v4  ;;  %v3033_v14 = vcombine.low %v656_v3, %v672_v4 }
 0x133   : > { %v2785_v0 = vlaneseq }
 0x134   : > { %2483 = vmatpush1.bf16.msra.mxu0 %v2025_v10  ;;  %2524 = vmatpush1.bf16.msra.mxu1 %v2031_v12  ;;  %v703_v10 = vld [vmem:[%s3833_s4 + $0x1f0] sm:$0xff]  ;;  %v704_v12 = vld [vmem:[%s3833_s4 + $0x1f8] sm:$0xff] }
 0x135   : > { %2552 = vmatprep.subr.bf16.mxu0 %v3028_v11  ;;  %2593 = vmatprep.subr.bf16.mxu1 %v3030_v13  ;;  %v688_v11 = vld [vmem:[%s3833_s4 + $0x178] sm:$0xff]  ;;  %v3031_v13 = vcombine.low %v655_v1, %v671_v2  ;;  %v3064_v15 = vcombine.high %v687_v9, %v703_v10  ;;  %v4149_v1 = vpop.permute.xlu0 %868  ;;  %v2786_v4 = vshrl.u32 %v2785_v0, 7 }
 0x136   : > { %v3066_v16 = vcombine.high %v688_v11, %v704_v12 }
 0x137   : > { %3248 = vmatmul.mubr.msk.bf16.vlgmr.msra.gmra.mrb[20].mxu0 %vm1959_vm1, %v3878_v39  ;;  %3250 = vmatmul.mubr.msk.bf16.vlgmr.msra.gmra.mrb[20].mxu1 %vm1959_vm1, %v3878_v39  ;;  %v3091_v39 = vcombine.low %v717_v22, %v733_v23  ;;  %v3063_v22 = vcombine.low %v687_v9, %v703_v10  ;;  %v3065_v23 = vcombine.low %v688_v11, %v704_v12 }
 0x138   : > { %2553 = vmatpush1.bf16.msra.mxu0 %v3027_v18  ;;  %2594 = vmatpush1.bf16.msra.mxu1 %v3029_v19  ;;  %v735_v18 = vld [vmem:[%s3833_s4 + $0x2f0] sm:$0xff]  ;;  %v4113_v19 = vld [vmem:[%s4224_s0] sm:$0x1] }
 0x139   : > { %2554 = vmatprep.subr.bf16.mxu0 %v3060_v20  ;;  %2595 = vmatprep.subr.bf16.mxu1 %v3062_v21  ;;  %v720_v20 = vld [vmem:[%s3833_s4 + $0x278] sm:$0xff]  ;;  %v3096_v24 = vcombine.high %v719_v17, %v735_v18  ;;  %v3095_v30 = vcombine.low %v719_v17, %v735_v18 }
 0x13a   : > { %2584 = vmatprep.mubr.bf16.mxu0 %v3316_v32  ;;  %2625 = vmatprep.mubr.bf16.mxu1 %v3316_v32  ;;  %v736_v21 = vld [vmem:[%s3833_s4 + $0x2f8] sm:$0xff] }
 0x13b   : > { %v3098_v25 = vcombine.high %v720_v20, %v736_v21  ;;  %v3097_v31 = vcombine.low %v720_v20, %v736_v21 }
 0x13c   : > { %2555 = vmatpush1.bf16.msra.mxu0 %v3059_v26  ;;  %2596 = vmatpush1.bf16.msra.mxu1 %v3061_v27  ;;  %v751_v26 = vld [vmem:[%s3833_s4 + $0x370] sm:$0xff] }
 0x13d   : > { %2556 = vmatprep.subr.bf16.mxu0 %v3092_v28  ;;  %2597 = vmatprep.subr.bf16.mxu1 %v3094_v29  ;;  %v767_v27 = vld [vmem:[%s3833_s4 + $0x3f0] sm:$0xff]  ;;  %v752_v28 = vld [vmem:[%s3833_s4 + $0x378] sm:$0xff] }
 0x13e   : > { %v768_v29 = vld [vmem:[%s3833_s4 + $0x3f8] sm:$0xff]  ;;  %v3128_v33 = vcombine.high %v751_v26, %v767_v27  ;;  %v3127_v38 = vcombine.low %v751_v26, %v767_v27 }
 0x13f   : > { %v3130_v34 = vcombine.high %v752_v28, %v768_v29 }
 0x140   : > { %2557 = vmatpush1.bf16.msra.mxu0 %v3091_v39  ;;  %2598 = vmatpush1.bf16.msra.mxu1 %v3093_v35  ;;  %v783_v39 = vld [vmem:[%s3833_s4 + $0x470] sm:$0xff] }
 0x141   : > { %2558 = vmatprep.subr.bf16.mxu0 %v3124_v36  ;;  %2599 = vmatprep.subr.bf16.mxu1 %v3126_v37  ;;  %v799_v35 = vld [vmem:[%s3833_s4 + $0x4f0] sm:$0xff]  ;;  %v784_v36 = vld [vmem:[%s3833_s4 + $0x478] sm:$0xff] }
 0x142   : > { %v800_v37 = vld [vmem:[%s3833_s4 + $0x4f8] sm:$0xff]  ;;  %v3160_v40 = vcombine.high %v783_v39, %v799_v35 }
 0x143   : > { %v3162_v41 = vcombine.high %v784_v36, %v800_v37  ;;  %v3161_v47 = vcombine.low %v784_v36, %v800_v37 }
 0x144   : > { %2559 = vmatpush1.bf16.msra.mxu0 %v3123_v43  ;;  %2600 = vmatpush1.bf16.msra.mxu1 %v3125_v44  ;;  %v831_v43 = vld [vmem:[%s3833_s4 + $0x5f0] sm:$0xff]  ;;  %v816_v44 = vld [vmem:[%s3833_s4 + $0x578] sm:$0xff] }
 0x145   : > { %2560 = vmatprep.subr.bf16.mxu0 %v3156_v45  ;;  %2601 = vmatprep.subr.bf16.mxu1 %v3158_v46  ;;  %v832_v45 = vld [vmem:[%s3833_s4 + $0x5f8] sm:$0xff]  ;;  %v3159_v46 = vcombine.low %v783_v39, %v799_v35  ;;  %v3192_v48 = vcombine.high %v815_v42, %v831_v43 }
 0x146   : > { %v3194_v49 = vcombine.high %v816_v44, %v832_v45  ;;  %v3193_v55 = vcombine.low %v816_v44, %v832_v45 }
 0x148   : > { %2561 = vmatpush1.bf16.msra.mxu0 %v3155_v51  ;;  %2602 = vmatpush1.bf16.msra.mxu1 %v3157_v52  ;;  %v863_v51 = vld [vmem:[%s3833_s4 + $0x6f0] sm:$0x33]  ;;  %v848_v52 = vld [vmem:[%s3833_s4 + $0x678] sm:$0xff] }
 0x149   : > { %2562 = vmatprep.subr.bf16.mxu0 %v3188_v53  ;;  %2603 = vmatprep.subr.bf16.mxu1 %v3190_v54  ;;  %v864_v53 = vld [vmem:[%s3833_s4 + $0x6f8] sm:$0x33]  ;;  %v3191_v54 = vcombine.low %v815_v42, %v831_v43  ;;  %v3224_v56 = vcombine.high %v847_v50, %v863_v51  ;;  %v3223_v57 = vcombine.low %v847_v50, %v863_v51 }
 0x14a   : > { %v3226_v58 = vcombine.high %v848_v52, %v864_v53 }
 0x14c   : > { %2563 = vmatpush1.bf16.msra.mxu0 %v3187_v59  ;;  %2604 = vmatpush1.bf16.msra.mxu1 %v3189_v60  ;;  %v3225_v59 = vcombine.low %v848_v52, %v864_v53  ;;  %v2049_v60 = vsel %vm1963_vm0, %v3223_v57, 0 }
 0x14d   : > { %3251 = vmatprep.subr.msk.bf16.mxu0 %vm1963_vm0, %v3220_v61  ;;  %3253 = vmatprep.subr.msk.bf16.mxu1 %vm1963_vm0, %v3222_v63  ;;  %v2783_v63 = vunpack.c.l.s4 %v3317_v62 }
 0x14e   : > { %v2055_v61 = vsel %vm1963_vm0, %v3225_v59, 0 }
 0x14f   : > { %v2784_v3 = vunpack.c.0.s8 %v2783_v63 }
 0x150   : > { %2565 = vmatpush1.bf16.msra.mxu0 %v2037_v5  ;;  %2606 = vmatpush1.bf16.msra.mxu1 %v2043_v7 }
 0x151   : > { %2634 = vmatprep.subr.bf16.mxu0 %v3032_v6  ;;  %2675 = vmatprep.subr.bf16.mxu1 %v3034_v8  ;;  %v4155_v17 = vsub.s32 %v2784_v3, %v2786_v4 }
 0x153   : > { %3252 = vmatmul.mubr.msk.bf16.vlgmr.msra.gmra.mrb[24].mxu0 %vm1959_vm1, %v4113_v19  ;;  %3254 = vmatmul.mubr.msk.bf16.vlgmr.msra.gmra.mrb[24].mxu1 %vm1959_vm1, %v4113_v19 }
 0x154   : > { %2635 = vmatpush1.bf16.msra.mxu0 %v3031_v13  ;;  %2676 = vmatpush1.bf16.msra.mxu1 %v3033_v14 }
 0x155   : > { %2636 = vmatprep.subr.bf16.mxu0 %v3064_v15  ;;  %2677 = vmatprep.subr.bf16.mxu1 %v3066_v16 }
 0x156   : > { %2666 = vmatprep.mubr.bf16.mxu0 %v3316_v32  ;;  %2707 = vmatprep.mubr.bf16.mxu1 %v3316_v32  ;;  %v3129_v32 = vcombine.low %v752_v28, %v768_v29 }
 0x158   : > { %2637 = vmatpush1.bf16.msra.mxu0 %v3063_v22  ;;  %2678 = vmatpush1.bf16.msra.mxu1 %v3065_v23 }
 0x159   : > { %2638 = vmatprep.subr.bf16.mxu0 %v3096_v24  ;;  %2679 = vmatprep.subr.bf16.mxu1 %v3098_v25 }
 0x15c   : > { %2639 = vmatpush1.bf16.msra.mxu0 %v3095_v30  ;;  %2680 = vmatpush1.bf16.msra.mxu1 %v3097_v31 }
 0x15d   : > { %2640 = vmatprep.subr.bf16.mxu0 %v3128_v33  ;;  %2681 = vmatprep.subr.bf16.mxu1 %v3130_v34 }
 0x160   : > { %2641 = vmatpush1.bf16.msra.mxu0 %v3127_v38  ;;  %2682 = vmatpush1.bf16.msra.mxu1 %v3129_v32 }
 0x161   : > { %2642 = vmatprep.subr.bf16.mxu0 %v3160_v40  ;;  %2683 = vmatprep.subr.bf16.mxu1 %v3162_v41 }
 0x164   : > { %2643 = vmatpush1.bf16.msra.mxu0 %v3159_v46  ;;  %2684 = vmatpush1.bf16.msra.mxu1 %v3161_v47 }
 0x165   : > { %2644 = vmatprep.subr.bf16.mxu0 %v3192_v48  ;;  %2685 = vmatprep.subr.bf16.mxu1 %v3194_v49 }
 0x168   : > { %2645 = vmatpush1.bf16.msra.mxu0 %v3191_v54  ;;  %2686 = vmatpush1.bf16.msra.mxu1 %v3193_v55 }
 0x169   : > { %3255 = vmatprep.subr.msk.bf16.mxu0 %vm1963_vm0, %v3224_v56  ;;  %3257 = vmatprep.subr.msk.bf16.mxu1 %vm1963_vm0, %v3226_v58 }
 0x16c   : > { %2647 = vmatpush1.bf16.msra.mxu0 %v2049_v60  ;;  %2688 = vmatpush1.bf16.msra.mxu1 %v2055_v61 }
 0x16f   : > { %3256 = vmatmul.mubr.msk.bf16.vlgmr.msra.gmra.mrb[28].mxu0 %vm1959_vm1, %v4113_v19  ;;  %3258 = vmatmul.mubr.msk.bf16.vlgmr.msra.gmra.mrb[28].mxu1 %vm1959_vm1, %v4113_v19 }
 0x17e   : > { %v2094_v2 = vpop.f32.mrb[0].mxu0  ;;  %v2135_v5 = vpop.f32.mrb[0].mxu1 }
 0x17f   : > { %v2095_v6 = vadd.f32 %v2094_v2, %v4149_v1  ;;  %v2096_v7 = vpop.f32.mrb[1].mxu0  ;;  %v2136_v9 = vadd.f32 %v2135_v5, %v4149_v1  ;;  %v2137_v10 = vpop.f32.mrb[1].mxu1 }
 0x180   : > { %v2097_v8 = vadd.f32 %v2096_v7, %v4149_v1  ;;  %v2098_v11 = vpop.f32.mrb[2].mxu0  ;;  %v2138_v13 = vadd.f32 %v2137_v10, %v4149_v1  ;;  %v2139_v14 = vpop.f32.mrb[2].mxu1 }
 0x181   : > { %v2716_v12 = vmax.f32 %v2095_v6, 0.0  ;;  %v2099_v15 = vpop.f32.mrb[3].mxu0  ;;  %v2718_v18 = vmax.f32 %v2136_v9, 0.0  ;;  %v2140_v19 = vpop.f32.mrb[3].mxu1 }
 0x182   : > { %v2717_v16 = vmax.f32 %v2097_v8, 0.0  ;;  %v2719_v20 = vmax.f32 %v2138_v13, 0.0 }
 0x184   : > { %v2780_v21 = vcombine.low %v2716_v12, %v2717_v16  ;;  %v2781_v22 = vcombine.low %v2718_v18, %v2719_v20 }
 0x186   : > { %v2788_v23 = vrot.slane %v2780_v21, %v4155_v17  ;;  %v2795_v24 = vrot.slane %v2781_v22, %v4155_v17 }
 0x188   : > { %v2796_v25 = vcombine.low %v2788_v23, %v2795_v24 }
 0x18a   : > { %2924 = vst [vmem:[%s4162_s14] sm:$0xff] %v2796_v25 }
 0x19a   : > { %v2176_v26 = vpop.f32.mrb[4].mxu0  ;;  %v2217_v28 = vpop.f32.mrb[4].mxu1 }
 0x19b   : > { %v2177_v27 = vadd.f32 %v2176_v26, %v4149_v1  ;;  %v2178_v29 = vpop.f32.mrb[5].mxu0  ;;  %v2218_v30 = vadd.f32 %v2217_v28, %v4149_v1  ;;  %v2219_v33 = vpop.f32.mrb[5].mxu1 }
 0x19c   : > { %v2179_v31 = vadd.f32 %v2178_v29, %v4149_v1  ;;  %v2180_v34 = vpop.f32.mrb[6].mxu0  ;;  %v2220_v35 = vadd.f32 %v2219_v33, %v4149_v1  ;;  %v2221_v36 = vpop.f32.mrb[6].mxu1 }
 0x19d   : > { %v2720_v39 = vmax.f32 %v2177_v27, 0.0  ;;  %v2181_v37 = vpop.f32.mrb[7].mxu0  ;;  %v2722_v38 = vmax.f32 %v2218_v30, 0.0  ;;  %v2222_v40 = vpop.f32.mrb[7].mxu1 }
 0x19e   : > { %v2721_v32 = vmax.f32 %v2179_v31, 0.0  ;;  %v2723_v41 = vmax.f32 %v2220_v35, 0.0 }
 0x1a0   : > { %v2797_v42 = vcombine.low %v2720_v39, %v2721_v32  ;;  %v2798_v43 = vcombine.low %v2722_v38, %v2723_v41 }
 0x1a2   : > { %v2805_v44 = vrot.slane %v2797_v42, %v4155_v17  ;;  %v2812_v45 = vrot.slane %v2798_v43, %v4155_v17 }
 0x1a4   : > { %v2813_v46 = vcombine.low %v2805_v44, %v2812_v45 }
 0x1a6   : > { %2925 = vst [vmem:[%s4162_s14 + $0x8] sm:$0xff] %v2813_v46 }
 0x1b6   : > { %v2258_v47 = vpop.f32.mrb[8].mxu0  ;;  %v2299_v49 = vpop.f32.mrb[8].mxu1 }
 0x1b7   : > { %v2259_v48 = vadd.f32 %v2258_v47, %v4149_v1  ;;  %v2260_v50 = vpop.f32.mrb[9].mxu0  ;;  %v2300_v51 = vadd.f32 %v2299_v49, %v4149_v1  ;;  %v2301_v53 = vpop.f32.mrb[9].mxu1 }
 0x1b8   : > { %v2261_v52 = vadd.f32 %v2260_v50, %v4149_v1  ;;  %v2262_v54 = vpop.f32.mrb[10].mxu0  ;;  %v2302_v56 = vadd.f32 %v2301_v53, %v4149_v1  ;;  %v2303_v57 = vpop.f32.mrb[10].mxu1 }
 0x1b9   : > { %v2724_v55 = vmax.f32 %v2259_v48, 0.0  ;;  %v2263_v58 = vpop.f32.mrb[11].mxu0  ;;  %v2726_v59 = vmax.f32 %v2300_v51, 0.0  ;;  %v2304_v61 = vpop.f32.mrb[11].mxu1 }
 0x1ba   : > { %v2725_v60 = vmax.f32 %v2261_v52, 0.0  ;;  %v2727_v62 = vmax.f32 %v2302_v56, 0.0 }
 0x1bc   : > { %v2814_v63 = vcombine.low %v2724_v55, %v2725_v60  ;;  %v2815_v0 = vcombine.low %v2726_v59, %v2727_v62 }
 0x1be   : > { %v2822_v2 = vrot.slane %v2814_v63, %v4155_v17  ;;  %v2829_v3 = vrot.slane %v2815_v0, %v4155_v17 }
 0x1c0   : > { %v2830_v4 = vcombine.low %v2822_v2, %v2829_v3 }
 0x1c2   : > { %2926 = vst [vmem:[%s4162_s14 + $0x10] sm:$0xff] %v2830_v4 }
 0x1d2   : > { %v2340_v5 = vpop.f32.mrb[12].mxu0  ;;  %v2381_v7 = vpop.f32.mrb[12].mxu1 }
 0x1d3   : > { %v2341_v6 = vadd.f32 %v2340_v5, %v4149_v1  ;;  %v2342_v8 = vpop.f32.mrb[13].mxu0  ;;  %v2382_v9 = vadd.f32 %v2381_v7, %v4149_v1  ;;  %v2383_v11 = vpop.f32.mrb[13].mxu1 }
 0x1d4   : > { %v2343_v10 = vadd.f32 %v2342_v8, %v4149_v1  ;;  %v2344_v12 = vpop.f32.mrb[14].mxu0  ;;  %v2384_v14 = vadd.f32 %v2383_v11, %v4149_v1  ;;  %v2385_v15 = vpop.f32.mrb[14].mxu1 }
 0x1d5   : > { %v2728_v13 = vmax.f32 %v2341_v6, 0.0  ;;  %v2345_v16 = vpop.f32.mrb[15].mxu0  ;;  %v2730_v18 = vmax.f32 %v2382_v9, 0.0  ;;  %v2386_v20 = vpop.f32.mrb[15].mxu1 }
 0x1d6   : > { %v2729_v19 = vmax.f32 %v2343_v10, 0.0  ;;  %v2731_v21 = vmax.f32 %v2384_v14, 0.0 }
 0x1d8   : > { %v2831_v22 = vcombine.low %v2728_v13, %v2729_v19  ;;  %v2832_v23 = vcombine.low %v2730_v18, %v2731_v21 }
 0x1da   : > { %v2839_v24 = vrot.slane %v2831_v22, %v4155_v17  ;;  %v2846_v25 = vrot.slane %v2832_v23, %v4155_v17 }
 0x1dc   : > { %v2847_v26 = vcombine.low %v2839_v24, %v2846_v25 }
 0x1de   : > { %2927 = vst [vmem:[%s4162_s14 + $0x18] sm:$0xff] %v2847_v26 }
 0x1ee   : > { %v2422_v27 = vpop.f32.mrb[16].mxu0  ;;  %v2463_v29 = vpop.f32.mrb[16].mxu1 }
 0x1ef   : > { %v2423_v28 = vadd.f32 %v2422_v27, %v4149_v1  ;;  %v2424_v30 = vpop.f32.mrb[17].mxu0  ;;  %v2464_v31 = vadd.f32 %v2463_v29, %v4149_v1  ;;  %v2465_v34 = vpop.f32.mrb[17].mxu1 }
 0x1f0   : > { %v2425_v33 = vadd.f32 %v2424_v30, %v4149_v1  ;;  %v2426_v39 = vpop.f32.mrb[18].mxu0  ;;  %v2466_v36 = vadd.f32 %v2465_v34, %v4149_v1  ;;  %v2467_v37 = vpop.f32.mrb[18].mxu1 }
 0x1f1   : > { %v2732_v35 = vmax.f32 %v2423_v28, 0.0  ;;  %v2427_v38 = vpop.f32.mrb[19].mxu0  ;;  %v2734_v32 = vmax.f32 %v2464_v31, 0.0  ;;  %v2468_v41 = vpop.f32.mrb[19].mxu1 }
 0x1f2   : > { %v2733_v40 = vmax.f32 %v2425_v33, 0.0  ;;  %v2735_v42 = vmax.f32 %v2466_v36, 0.0 }
 0x1f4   : > { %v2848_v43 = vcombine.low %v2732_v35, %v2733_v40  ;;  %v2849_v44 = vcombine.low %v2734_v32, %v2735_v42 }
 0x1f6   : > { %v2856_v45 = vrot.slane %v2848_v43, %v4155_v17  ;;  %v2863_v46 = vrot.slane %v2849_v44, %v4155_v17 }
 0x1f8   : > { %v2864_v47 = vcombine.low %v2856_v45, %v2863_v46 }
 0x1fa   : > { %2928 = vst [vmem:[%s4162_s14 + $0x20] sm:$0xff] %v2864_v47 }
 0x20a   : > { %v2504_v48 = vpop.f32.mrb[20].mxu0  ;;  %v2545_v50 = vpop.f32.mrb[20].mxu1 }
 0x20b   : > { %v2505_v49 = vadd.f32 %v2504_v48, %v4149_v1  ;;  %v2506_v51 = vpop.f32.mrb[21].mxu0  ;;  %v2546_v52 = vadd.f32 %v2545_v50, %v4149_v1  ;;  %v2547_v54 = vpop.f32.mrb[21].mxu1 }
 0x20c   : > { %v2507_v53 = vadd.f32 %v2506_v51, %v4149_v1  ;;  %v2508_v55 = vpop.f32.mrb[22].mxu0  ;;  %v2548_v57 = vadd.f32 %v2547_v54, %v4149_v1  ;;  %v2549_v58 = vpop.f32.mrb[22].mxu1 }
 0x20d   : > { %v2736_v56 = vmax.f32 %v2505_v49, 0.0  ;;  %v2509_v59 = vpop.f32.mrb[23].mxu0  ;;  %v2738_v60 = vmax.f32 %v2546_v52, 0.0  ;;  %v2550_v62 = vpop.f32.mrb[23].mxu1 }
 0x20e   : > { %v2737_v61 = vmax.f32 %v2507_v53, 0.0  ;;  %v2739_v63 = vmax.f32 %v2548_v57, 0.0 }
 0x210   : > { %v2865_v0 = vcombine.low %v2736_v56, %v2737_v61  ;;  %v2866_v2 = vcombine.low %v2738_v60, %v2739_v63 }
 0x212   : > { %v2873_v3 = vrot.slane %v2865_v0, %v4155_v17  ;;  %v2880_v4 = vrot.slane %v2866_v2, %v4155_v17 }
 0x214   : > { %v2881_v5 = vcombine.low %v2873_v3, %v2880_v4 }
 0x216   : > { %2929 = vst [vmem:[%s4162_s14 + $0x28] sm:$0xff] %v2881_v5 }
 0x226   : > { %v2586_v6 = vpop.f32.mrb[24].mxu0  ;;  %v2627_v8 = vpop.f32.mrb[24].mxu1 }
 0x227   : > { %v2587_v7 = vadd.f32 %v2586_v6, %v4149_v1  ;;  %v2588_v9 = vpop.f32.mrb[25].mxu0  ;;  %v2628_v10 = vadd.f32 %v2627_v8, %v4149_v1  ;;  %v2629_v12 = vpop.f32.mrb[25].mxu1 }
 0x228   : > { %v2589_v11 = vadd.f32 %v2588_v9, %v4149_v1  ;;  %v2590_v13 = vpop.f32.mrb[26].mxu0  ;;  %v2630_v15 = vadd.f32 %v2629_v12, %v4149_v1  ;;  %v2631_v16 = vpop.f32.mrb[26].mxu1 }
 0x229   : > { %v2740_v14 = vmax.f32 %v2587_v7, 0.0  ;;  %v2591_v18 = vpop.f32.mrb[27].mxu0  ;;  %v2742_v19 = vmax.f32 %v2628_v10, 0.0  ;;  %v2632_v21 = vpop.f32.mrb[27].mxu1 }
 0x22a   : > { %v2741_v20 = vmax.f32 %v2589_v11, 0.0  ;;  %v2743_v22 = vmax.f32 %v2630_v15, 0.0 }
 0x22c   : > { %v2882_v23 = vcombine.low %v2740_v14, %v2741_v20  ;;  %v2883_v24 = vcombine.low %v2742_v19, %v2743_v22 }
 0x22e   : > { %v2890_v25 = vrot.slane %v2882_v23, %v4155_v17  ;;  %v2897_v26 = vrot.slane %v2883_v24, %v4155_v17 }
 0x230   : > { %v2898_v27 = vcombine.low %v2890_v25, %v2897_v26 }
 0x232   : > { %2930 = vst [vmem:[%s4162_s14 + $0x30] sm:$0xff] %v2898_v27 }
 0x242   : > { %v2668_v28 = vpop.f32.mrb[28].mxu0  ;;  %v2709_v30 = vpop.f32.mrb[28].mxu1 }
 0x243   : > { %v2669_v29 = vadd.f32 %v2668_v28, %v4149_v1  ;;  %v2670_v31 = vpop.f32.mrb[29].mxu0  ;;  %v2710_v33 = vadd.f32 %v2709_v30, %v4149_v1  ;;  %v2711_v39 = vpop.f32.mrb[29].mxu1 }
 0x244   : > { %v2671_v34 = vadd.f32 %v2670_v31, %v4149_v1  ;;  %v2672_v35 = vpop.f32.mrb[30].mxu0  ;;  %v2712_v37 = vadd.f32 %v2711_v39, %v4149_v1  ;;  %v2713_v38 = vpop.f32.mrb[30].mxu1 }
 0x245   : > { %v2744_v36 = vmax.f32 %v2669_v29, 0.0  ;;  %v2673_v32 = vpop.f32.mrb[31].mxu0  ;;  %v2746_v40 = vmax.f32 %v2710_v33, 0.0  ;;  %v2714_v42 = vpop.f32.mrb[31].mxu1 }
 0x246   : > { %v2745_v41 = vmax.f32 %v2671_v34, 0.0  ;;  %v2747_v43 = vmax.f32 %v2712_v37, 0.0 }
 0x248   : > { %v2899_v44 = vcombine.low %v2744_v36, %v2745_v41  ;;  %v2900_v45 = vcombine.low %v2746_v40, %v2747_v43 }
 0x24a   : > { %v2907_v46 = vrot.slane %v2899_v44, %v4155_v17  ;;  %v2914_v47 = vrot.slane %v2900_v45, %v4155_v17 }
 0x24c   : > { %v2915_v48 = vcombine.low %v2907_v46, %v2914_v47 }
 0x24e   : > { %2931 = vst [vmem:[%s4162_s14 + $0x38] sm:$0xff] %v2915_v48 }
 0x24f PF: > { %p10_p9 = scmp.ge.s32.totalorder %s3355_s16, 4   ;;  %s4228_s12 = smov %s3310_s13 }
 0x250   : > { %s4229_s13 = smov %s3364_s19  ;;  %s4230_s14 = smov %s3355_s16 }
 0x251   :  { %12 = sbr.rel (!%p10_p9) target bundleno = 2 (0x2), region = 90 }

// kernel: unet_forward.10
= control target key start
LH: loop header
LB: loop body
LE: loop exit
PB: predicated region body
PF: predicated region fallthrough
CT: control target
= control target key end

     0   :  { %s2303_s12 = smov 0   ;;  %s2305_s13 = smov 0   ;;  %s2838_s0 = inlined_call_operand.vmem [shape: bf16[4,54], index: 0, kind: input, shape index: {}]   ;;  %s2839_s1 = inlined_call_operand.vmem [shape: bf16[54,8192], index: 1, kind: input, shape index: {}]   ;;  %s2840_s2 = inlined_call_operand.vmem [shape: f32[4,1], index: 2, kind: input, shape index: {}]   ;;  %s2841_s3 = inlined_call_operand.vmem [shape: f32[4,8192], index: 3, kind: output, shape index: {}]  }
   0x1   :  { %s2307_s14 = smov 0  }
   0x2 LB: > { %s2026_s15 = sadd.s32 4294967295, %s2280_s14   ;;  %s2320_s16 = sadd.s32 1, %s2280_s14   ;;  %s2280_s14 = sphi %s2307_s14, %s2844_s14   ;;  %s2276_s13 = sphi %s2305_s13, %s2843_s13   ;;  %s2272_s12 = sphi %s2303_s12, %s2842_s12  }
   0x3   : > { %s38_s17 = ssub.s32 %s2280_s14, %s2320_s16  ;;  %s41_s18 = sadd.s32 1, %s2276_s13 }
   0x4   : > { %p39_p0 = scmp.eq.s32.totalorder %s38_s17, 0  ;;  %p48_p1 = scmp.ne.s32.totalorder %s2276_s13, %s2272_s12 }
   0x5   : > { %p49_p2 = scmp.eq.s32.totalorder %s2280_s14, 0  ;;  %p2029_p4 = scmp.ge.s32.totalorder %s2280_s14, 2 }
   0x6   : > { %s2329_s19 = scalar_select %p39_p0, %s2276_s13, %s41_s18  }
   0x7   : > { %p50_p3 = por %p49_p2, %p48_p1  ;;  %127 = sbr.rel (%p2029_p4) target bundleno = 75 (0x4b), region = 24 }
   0xe   : > { %130 = sbr.rel (!%p50_p3) target bundleno = 75 (0x4b), region = 28  ;;  %s132_s20 = sand.u32 (%p50_p3), 1, %s2276_s13  }
   0xf   : > { %s2197_s21 = sshll.u32 (%p50_p3), %s2280_s14, 7  ;;  %s2198_s22 = smul.u32 (%p50_p3), 896, %s132_s20 }
  0x10   : > { %s2337_s25 = scalar_lea.vmem (%p50_p3), %s2839_s1, %s2197_s21 }
  0x11   : > { %v150_v0 = vld [vmem:[%s2337_s25] sm:$0xff] (%p50_p3)  ;;  %v152_v1 = vld [vmem:[%s2337_s25 + $0x8] sm:$0xff] (%p50_p3)  ;;  %v154_v2 = vld [vmem:[%s2337_s25 + $0x10] sm:$0xff] (%p50_p3)  ;;  %s2345_s26 = scalar_lea.vmem (%p50_p3), [#allocation2], %s2198_s22 }
  0x12   : > { %v156_v3 = vld [vmem:[%s2337_s25 + $0x18] sm:$0xff] (%p50_p3)  ;;  %v158_v4 = vld [vmem:[%s2337_s25 + $0x20] sm:$0xff] (%p50_p3)  ;;  %v160_v5 = vld [vmem:[%s2337_s25 + $0x28] sm:$0xff] (%p50_p3)  ;;  %151 = vst [vmem:[%s2345_s26] sm:$0xff] (%p50_p3), %v150_v0 }
  0x13   : > { %153 = vst [vmem:[%s2345_s26 + $0x8] sm:$0xff] (%p50_p3), %v152_v1  ;;  %155 = vst [vmem:[%s2345_s26 + $0x10] sm:$0xff] (%p50_p3), %v154_v2  ;;  %v162_v6 = vld [vmem:[%s2337_s25 + $0x30] sm:$0xff] (%p50_p3)  ;;  %v164_v7 = vld [vmem:[%s2337_s25 + $0x38] sm:$0xff] (%p50_p3) }
  0x14   : > { %157 = vst [vmem:[%s2345_s26 + $0x18] sm:$0xff] (%p50_p3), %v156_v3  ;;  %159 = vst [vmem:[%s2345_s26 + $0x20] sm:$0xff] (%p50_p3), %v158_v4  ;;  %v166_v8 = vld [vmem:[%s2337_s25 + $0x40] sm:$0xff] (%p50_p3)  ;;  %v168_v9 = vld [vmem:[%s2337_s25 + $0x48] sm:$0xff] (%p50_p3) }
  0x15   : > { %161 = vst [vmem:[%s2345_s26 + $0x28] sm:$0xff] %v160_v5  ;;  %163 = vst [vmem:[%s2345_s26 + $0x30] sm:$0xff] %v162_v6  ;;  %v170_v10 = vld [vmem:[%s2337_s25 + $0x50] sm:$0xff]  ;;  %v172_v11 = vld [vmem:[%s2337_s25 + $0x58] sm:$0xff] }
  0x16   : > { %165 = vst [vmem:[%s2345_s26 + $0x38] sm:$0xff] %v164_v7  ;;  %167 = vst [vmem:[%s2345_s26 + $0x40] sm:$0xff] %v166_v8  ;;  %v174_v12 = vld [vmem:[%s2337_s25 + $0x60] sm:$0xff]  ;;  %v176_v13 = vld [vmem:[%s2337_s25 + $0x68] sm:$0xff] }
  0x17   : > { %169 = vst [vmem:[%s2345_s26 + $0x48] sm:$0xff] %v168_v9  ;;  %171 = vst [vmem:[%s2345_s26 + $0x50] sm:$0xff] %v170_v10  ;;  %v178_v14 = vld [vmem:[%s2337_s25 + $0x70] sm:$0xff]  ;;  %v180_v15 = vld [vmem:[%s2337_s25 + $0x78] sm:$0xff] }
  0x18   : > { %173 = vst [vmem:[%s2345_s26 + $0x58] sm:$0xff] %v172_v11  ;;  %175 = vst [vmem:[%s2345_s26 + $0x60] sm:$0xff] %v174_v12  ;;  %v182_v16 = vld [vmem:[%s2337_s25 + $0x100] sm:$0xff]  ;;  %v184_v17 = vld [vmem:[%s2337_s25 + $0x108] sm:$0xff] }
  0x19   : > { %177 = vst [vmem:[%s2345_s26 + $0x68] sm:$0xff] %v176_v13  ;;  %179 = vst [vmem:[%s2345_s26 + $0x70] sm:$0xff] %v178_v14  ;;  %v186_v18 = vld [vmem:[%s2337_s25 + $0x110] sm:$0xff]  ;;  %v188_v19 = vld [vmem:[%s2337_s25 + $0x118] sm:$0xff] }
  0x1a   : > { %181 = vst [vmem:[%s2345_s26 + $0x78] sm:$0xff] %v180_v15  ;;  %183 = vst [vmem:[%s2345_s26 + $0x80] sm:$0xff] %v182_v16  ;;  %v190_v20 = vld [vmem:[%s2337_s25 + $0x120] sm:$0xff]  ;;  %v192_v21 = vld [vmem:[%s2337_s25 + $0x128] sm:$0xff] }
  0x1b   : > { %185 = vst [vmem:[%s2345_s26 + $0x88] sm:$0xff] %v184_v17  ;;  %187 = vst [vmem:[%s2345_s26 + $0x90] sm:$0xff] %v186_v18  ;;  %v194_v22 = vld [vmem:[%s2337_s25 + $0x130] sm:$0xff]  ;;  %v196_v23 = vld [vmem:[%s2337_s25 + $0x138] sm:$0xff] }
  0x1c   : > { %189 = vst [vmem:[%s2345_s26 + $0x98] sm:$0xff] %v188_v19  ;;  %191 = vst [vmem:[%s2345_s26 + $0xa0] sm:$0xff] %v190_v20  ;;  %v198_v24 = vld [vmem:[%s2337_s25 + $0x140] sm:$0xff]  ;;  %v200_v25 = vld [vmem:[%s2337_s25 + $0x148] sm:$0xff] }
  0x1d   : > { %193 = vst [vmem:[%s2345_s26 + $0xa8] sm:$0xff] %v192_v21  ;;  %195 = vst [vmem:[%s2345_s26 + $0xb0] sm:$0xff] %v194_v22  ;;  %v202_v26 = vld [vmem:[%s2337_s25 + $0x150] sm:$0xff]  ;;  %v204_v27 = vld [vmem:[%s2337_s25 + $0x158] sm:$0xff] }
  0x1e   : > { %197 = vst [vmem:[%s2345_s26 + $0xb8] sm:$0xff] %v196_v23  ;;  %199 = vst [vmem:[%s2345_s26 + $0xc0] sm:$0xff] %v198_v24  ;;  %v206_v28 = vld [vmem:[%s2337_s25 + $0x160] sm:$0xff]  ;;  %v208_v29 = vld [vmem:[%s2337_s25 + $0x168] sm:$0xff] }
  0x1f   : > { %201 = vst [vmem:[%s2345_s26 + $0xc8] sm:$0xff] %v200_v25  ;;  %203 = vst [vmem:[%s2345_s26 + $0xd0] sm:$0xff] %v202_v26  ;;  %v210_v30 = vld [vmem:[%s2337_s25 + $0x170] sm:$0xff]  ;;  %v212_v31 = vld [vmem:[%s2337_s25 + $0x178] sm:$0xff] }
  0x20   : > { %205 = vst [vmem:[%s2345_s26 + $0xd8] sm:$0xff] %v204_v27  ;;  %207 = vst [vmem:[%s2345_s26 + $0xe0] sm:$0xff] %v206_v28  ;;  %v214_v32 = vld [vmem:[%s2337_s25 + $0x200] sm:$0xff]  ;;  %v216_v33 = vld [vmem:[%s2337_s25 + $0x208] sm:$0xff] }
  0x21   : > { %209 = vst [vmem:[%s2345_s26 + $0xe8] sm:$0xff] %v208_v29  ;;  %211 = vst [vmem:[%s2345_s26 + $0xf0] sm:$0xff] %v210_v30  ;;  %v218_v34 = vld [vmem:[%s2337_s25 + $0x210] sm:$0xff]  ;;  %v220_v35 = vld [vmem:[%s2337_s25 + $0x218] sm:$0xff] }
  0x22   : > { %213 = vst [vmem:[%s2345_s26 + $0xf8] sm:$0xff] %v212_v31  ;;  %215 = vst [vmem:[%s2345_s26 + $0x100] sm:$0xff] %v214_v32  ;;  %v222_v36 = vld [vmem:[%s2337_s25 + $0x220] sm:$0xff]  ;;  %v224_v37 = vld [vmem:[%s2337_s25 + $0x228] sm:$0xff] }
  0x23   : > { %217 = vst [vmem:[%s2345_s26 + $0x108] sm:$0xff] %v216_v33  ;;  %219 = vst [vmem:[%s2345_s26 + $0x110] sm:$0xff] %v218_v34  ;;  %v226_v38 = vld [vmem:[%s2337_s25 + $0x230] sm:$0xff]  ;;  %v228_v39 = vld [vmem:[%s2337_s25 + $0x238] sm:$0xff] }
  0x24   : > { %221 = vst [vmem:[%s2345_s26 + $0x118] sm:$0xff] %v220_v35  ;;  %223 = vst [vmem:[%s2345_s26 + $0x120] sm:$0xff] %v222_v36  ;;  %v230_v40 = vld [vmem:[%s2337_s25 + $0x240] sm:$0xff]  ;;  %v232_v41 = vld [vmem:[%s2337_s25 + $0x248] sm:$0xff] }
  0x25   : > { %225 = vst [vmem:[%s2345_s26 + $0x128] sm:$0xff] %v224_v37  ;;  %227 = vst [vmem:[%s2345_s26 + $0x130] sm:$0xff] %v226_v38  ;;  %v234_v42 = vld [vmem:[%s2337_s25 + $0x250] sm:$0xff]  ;;  %v236_v43 = vld [vmem:[%s2337_s25 + $0x258] sm:$0xff] }
  0x26   : > { %229 = vst [vmem:[%s2345_s26 + $0x138] sm:$0xff] %v228_v39  ;;  %231 = vst [vmem:[%s2345_s26 + $0x140] sm:$0xff] %v230_v40  ;;  %v238_v44 = vld [vmem:[%s2337_s25 + $0x260] sm:$0xff]  ;;  %v240_v45 = vld [vmem:[%s2337_s25 + $0x268] sm:$0xff] }
  0x27   : > { %233 = vst [vmem:[%s2345_s26 + $0x148] sm:$0xff] %v232_v41  ;;  %235 = vst [vmem:[%s2345_s26 + $0x150] sm:$0xff] %v234_v42  ;;  %v242_v46 = vld [vmem:[%s2337_s25 + $0x270] sm:$0xff]  ;;  %v244_v47 = vld [vmem:[%s2337_s25 + $0x278] sm:$0xff] }
  0x28   : > { %237 = vst [vmem:[%s2345_s26 + $0x158] sm:$0xff] %v236_v43  ;;  %239 = vst [vmem:[%s2345_s26 + $0x160] sm:$0xff] %v238_v44  ;;  %v246_v48 = vld [vmem:[%s2337_s25 + $0x300] sm:$0xff]  ;;  %v248_v49 = vld [vmem:[%s2337_s25 + $0x308] sm:$0xff] }
  0x29   : > { %241 = vst [vmem:[%s2345_s26 + $0x168] sm:$0xff] %v240_v45  ;;  %243 = vst [vmem:[%s2345_s26 + $0x170] sm:$0xff] %v242_v46  ;;  %v250_v50 = vld [vmem:[%s2337_s25 + $0x310] sm:$0xff]  ;;  %v252_v51 = vld [vmem:[%s2337_s25 + $0x318] sm:$0xff] }
  0x2a   : > { %245 = vst [vmem:[%s2345_s26 + $0x178] sm:$0xff] %v244_v47  ;;  %247 = vst [vmem:[%s2345_s26 + $0x180] sm:$0xff] %v246_v48  ;;  %v254_v52 = vld [vmem:[%s2337_s25 + $0x320] sm:$0xff]  ;;  %v256_v53 = vld [vmem:[%s2337_s25 + $0x328] sm:$0xff] }
  0x2b   : > { %249 = vst [vmem:[%s2345_s26 + $0x188] sm:$0xff] %v248_v49  ;;  %251 = vst [vmem:[%s2345_s26 + $0x190] sm:$0xff] %v250_v50  ;;  %v258_v54 = vld [vmem:[%s2337_s25 + $0x330] sm:$0xff]  ;;  %v260_v55 = vld [vmem:[%s2337_s25 + $0x338] sm:$0xff] }
  0x2c   : > { %253 = vst [vmem:[%s2345_s26 + $0x198] sm:$0xff] %v252_v51  ;;  %255 = vst [vmem:[%s2345_s26 + $0x1a0] sm:$0xff] %v254_v52  ;;  %v262_v56 = vld [vmem:[%s2337_s25 + $0x340] sm:$0xff]  ;;  %v264_v57 = vld [vmem:[%s2337_s25 + $0x348] sm:$0xff] }
  0x2d   : > { %257 = vst [vmem:[%s2345_s26 + $0x1a8] sm:$0xff] %v256_v53  ;;  %259 = vst [vmem:[%s2345_s26 + $0x1b0] sm:$0xff] %v258_v54  ;;  %v266_v58 = vld [vmem:[%s2337_s25 + $0x350] sm:$0xff]  ;;  %v268_v59 = vld [vmem:[%s2337_s25 + $0x358] sm:$0xff] }
  0x2e   : > { %261 = vst [vmem:[%s2345_s26 + $0x1b8] sm:$0xff] %v260_v55  ;;  %263 = vst [vmem:[%s2345_s26 + $0x1c0] sm:$0xff] %v262_v56  ;;  %v270_v60 = vld [vmem:[%s2337_s25 + $0x360] sm:$0xff]  ;;  %v272_v61 = vld [vmem:[%s2337_s25 + $0x368] sm:$0xff] }
  0x2f   : > { %265 = vst [vmem:[%s2345_s26 + $0x1c8] sm:$0xff] %v264_v57  ;;  %267 = vst [vmem:[%s2345_s26 + $0x1d0] sm:$0xff] %v266_v58  ;;  %v274_v62 = vld [vmem:[%s2337_s25 + $0x370] sm:$0xff]  ;;  %v276_v63 = vld [vmem:[%s2337_s25 + $0x378] sm:$0xff] }
  0x30   : > { %269 = vst [vmem:[%s2345_s26 + $0x1d8] sm:$0xff] %v268_v59  ;;  %271 = vst [vmem:[%s2345_s26 + $0x1e0] sm:$0xff] %v270_v60  ;;  %v278_v0 = vld [vmem:[%s2337_s25 + $0x400] sm:$0xff]  ;;  %v280_v1 = vld [vmem:[%s2337_s25 + $0x408] sm:$0xff] }
  0x31   : > { %273 = vst [vmem:[%s2345_s26 + $0x1e8] sm:$0xff] %v272_v61  ;;  %275 = vst [vmem:[%s2345_s26 + $0x1f0] sm:$0xff] %v274_v62  ;;  %v282_v2 = vld [vmem:[%s2337_s25 + $0x410] sm:$0xff]  ;;  %v284_v3 = vld [vmem:[%s2337_s25 + $0x418] sm:$0xff] }
  0x32   : > { %277 = vst [vmem:[%s2345_s26 + $0x1f8] sm:$0xff] %v276_v63  ;;  %279 = vst [vmem:[%s2345_s26 + $0x200] sm:$0xff] %v278_v0  ;;  %v286_v4 = vld [vmem:[%s2337_s25 + $0x420] sm:$0xff]  ;;  %v288_v5 = vld [vmem:[%s2337_s25 + $0x428] sm:$0xff] }
  0x33   : > { %281 = vst [vmem:[%s2345_s26 + $0x208] sm:$0xff] %v280_v1  ;;  %283 = vst [vmem:[%s2345_s26 + $0x210] sm:$0xff] %v282_v2  ;;  %v290_v6 = vld [vmem:[%s2337_s25 + $0x430] sm:$0xff]  ;;  %v292_v7 = vld [vmem:[%s2337_s25 + $0x438] sm:$0xff] }
  0x34   : > { %285 = vst [vmem:[%s2345_s26 + $0x218] sm:$0xff] %v284_v3  ;;  %287 = vst [vmem:[%s2345_s26 + $0x220] sm:$0xff] %v286_v4  ;;  %v294_v8 = vld [vmem:[%s2337_s25 + $0x440] sm:$0xff]  ;;  %v296_v9 = vld [vmem:[%s2337_s25 + $0x448] sm:$0xff] }
  0x35   : > { %289 = vst [vmem:[%s2345_s26 + $0x228] sm:$0xff] %v288_v5  ;;  %291 = vst [vmem:[%s2345_s26 + $0x230] sm:$0xff] %v290_v6  ;;  %v298_v10 = vld [vmem:[%s2337_s25 + $0x450] sm:$0xff]  ;;  %v300_v11 = vld [vmem:[%s2337_s25 + $0x458] sm:$0xff] }
  0x36   : > { %293 = vst [vmem:[%s2345_s26 + $0x238] sm:$0xff] %v292_v7  ;;  %295 = vst [vmem:[%s2345_s26 + $0x240] sm:$0xff] %v294_v8  ;;  %v302_v12 = vld [vmem:[%s2337_s25 + $0x460] sm:$0xff]  ;;  %v304_v13 = vld [vmem:[%s2337_s25 + $0x468] sm:$0xff] }
  0x37   : > { %297 = vst [vmem:[%s2345_s26 + $0x248] sm:$0xff] %v296_v9  ;;  %299 = vst [vmem:[%s2345_s26 + $0x250] sm:$0xff] %v298_v10  ;;  %v306_v14 = vld [vmem:[%s2337_s25 + $0x470] sm:$0xff]  ;;  %v308_v15 = vld [vmem:[%s2337_s25 + $0x478] sm:$0xff] }
  0x38   : > { %301 = vst [vmem:[%s2345_s26 + $0x258] sm:$0xff] %v300_v11  ;;  %303 = vst [vmem:[%s2345_s26 + $0x260] sm:$0xff] %v302_v12  ;;  %v310_v16 = vld [vmem:[%s2337_s25 + $0x500] sm:$0xff]  ;;  %v312_v17 = vld [vmem:[%s2337_s25 + $0x508] sm:$0xff] }
  0x39   : > { %305 = vst [vmem:[%s2345_s26 + $0x268] sm:$0xff] %v304_v13  ;;  %307 = vst [vmem:[%s2345_s26 + $0x270] sm:$0xff] %v306_v14  ;;  %v314_v18 = vld [vmem:[%s2337_s25 + $0x510] sm:$0xff]  ;;  %v316_v19 = vld [vmem:[%s2337_s25 + $0x518] sm:$0xff] }
  0x3a   : > { %309 = vst [vmem:[%s2345_s26 + $0x278] sm:$0xff] %v308_v15  ;;  %311 = vst [vmem:[%s2345_s26 + $0x280] sm:$0xff] %v310_v16  ;;  %v318_v20 = vld [vmem:[%s2337_s25 + $0x520] sm:$0xff]  ;;  %v320_v21 = vld [vmem:[%s2337_s25 + $0x528] sm:$0xff] }
  0x3b   : > { %313 = vst [vmem:[%s2345_s26 + $0x288] sm:$0xff] %v312_v17  ;;  %315 = vst [vmem:[%s2345_s26 + $0x290] sm:$0xff] %v314_v18  ;;  %v322_v22 = vld [vmem:[%s2337_s25 + $0x530] sm:$0xff]  ;;  %v324_v23 = vld [vmem:[%s2337_s25 + $0x538] sm:$0xff] }
  0x3c   : > { %317 = vst [vmem:[%s2345_s26 + $0x298] sm:$0xff] %v316_v19  ;;  %319 = vst [vmem:[%s2345_s26 + $0x2a0] sm:$0xff] %v318_v20  ;;  %v326_v24 = vld [vmem:[%s2337_s25 + $0x540] sm:$0xff]  ;;  %v328_v25 = vld [vmem:[%s2337_s25 + $0x548] sm:$0xff] }
  0x3d   : > { %321 = vst [vmem:[%s2345_s26 + $0x2a8] sm:$0xff] %v320_v21  ;;  %323 = vst [vmem:[%s2345_s26 + $0x2b0] sm:$0xff] %v322_v22  ;;  %v330_v26 = vld [vmem:[%s2337_s25 + $0x550] sm:$0xff]  ;;  %v332_v27 = vld [vmem:[%s2337_s25 + $0x558] sm:$0xff] }
  0x3e   : > { %325 = vst [vmem:[%s2345_s26 + $0x2b8] sm:$0xff] %v324_v23  ;;  %327 = vst [vmem:[%s2345_s26 + $0x2c0] sm:$0xff] %v326_v24  ;;  %v334_v28 = vld [vmem:[%s2337_s25 + $0x560] sm:$0xff]  ;;  %v336_v29 = vld [vmem:[%s2337_s25 + $0x568] sm:$0xff] }
  0x3f   : > { %329 = vst [vmem:[%s2345_s26 + $0x2c8] sm:$0xff] %v328_v25  ;;  %331 = vst [vmem:[%s2345_s26 + $0x2d0] sm:$0xff] %v330_v26  ;;  %v338_v30 = vld [vmem:[%s2337_s25 + $0x570] sm:$0xff]  ;;  %v340_v31 = vld [vmem:[%s2337_s25 + $0x578] sm:$0xff] }
  0x40   : > { %333 = vst [vmem:[%s2345_s26 + $0x2d8] sm:$0xff] %v332_v27  ;;  %335 = vst [vmem:[%s2345_s26 + $0x2e0] sm:$0xff] %v334_v28  ;;  %v342_v32 = vld [vmem:[%s2337_s25 + $0x600] sm:$0xff]  ;;  %v344_v33 = vld [vmem:[%s2337_s25 + $0x608] sm:$0xff] }
  0x41   : > { %337 = vst [vmem:[%s2345_s26 + $0x2e8] sm:$0xff] %v336_v29  ;;  %339 = vst [vmem:[%s2345_s26 + $0x2f0] sm:$0xff] %v338_v30  ;;  %v346_v34 = vld [vmem:[%s2337_s25 + $0x610] sm:$0xff]  ;;  %v348_v35 = vld [vmem:[%s2337_s25 + $0x618] sm:$0xff] }
  0x42   : > { %341 = vst [vmem:[%s2345_s26 + $0x2f8] sm:$0xff] %v340_v31  ;;  %343 = vst [vmem:[%s2345_s26 + $0x300] sm:$0xff] %v342_v32  ;;  %v350_v36 = vld [vmem:[%s2337_s25 + $0x620] sm:$0xff]  ;;  %v352_v37 = vld [vmem:[%s2337_s25 + $0x628] sm:$0xff] }
  0x43   : > { %345 = vst [vmem:[%s2345_s26 + $0x308] sm:$0xff] %v344_v33  ;;  %347 = vst [vmem:[%s2345_s26 + $0x310] sm:$0xff] %v346_v34  ;;  %v354_v38 = vld [vmem:[%s2337_s25 + $0x630] sm:$0xff]  ;;  %v356_v39 = vld [vmem:[%s2337_s25 + $0x638] sm:$0xff] }
  0x44   : > { %349 = vst [vmem:[%s2345_s26 + $0x318] sm:$0xff] %v348_v35  ;;  %351 = vst [vmem:[%s2345_s26 + $0x320] sm:$0xff] %v350_v36  ;;  %v358_v40 = vld [vmem:[%s2337_s25 + $0x640] sm:$0xff]  ;;  %v360_v41 = vld [vmem:[%s2337_s25 + $0x648] sm:$0xff] }
  0x45   : > { %353 = vst [vmem:[%s2345_s26 + $0x328] sm:$0xff] %v352_v37  ;;  %355 = vst [vmem:[%s2345_s26 + $0x330] sm:$0xff] %v354_v38  ;;  %v362_v42 = vld [vmem:[%s2337_s25 + $0x650] sm:$0xff]  ;;  %v364_v43 = vld [vmem:[%s2337_s25 + $0x658] sm:$0xff] }
  0x46   : > { %357 = vst [vmem:[%s2345_s26 + $0x338] sm:$0xff] %v356_v39  ;;  %359 = vst [vmem:[%s2345_s26 + $0x340] sm:$0xff] %v358_v40  ;;  %v366_v44 = vld [vmem:[%s2337_s25 + $0x660] sm:$0xff]  ;;  %v368_v45 = vld [vmem:[%s2337_s25 + $0x668] sm:$0xff] }
  0x47   : > { %361 = vst [vmem:[%s2345_s26 + $0x348] sm:$0xff] %v360_v41  ;;  %363 = vst [vmem:[%s2345_s26 + $0x350] sm:$0xff] %v362_v42  ;;  %v370_v46 = vld [vmem:[%s2337_s25 + $0x670] sm:$0xff]  ;;  %v372_v47 = vld [vmem:[%s2337_s25 + $0x678] sm:$0xff] }
  0x48   : > { %365 = vst [vmem:[%s2345_s26 + $0x358] sm:$0xff] %v364_v43  ;;  %367 = vst [vmem:[%s2345_s26 + $0x360] sm:$0xff] %v366_v44 }
  0x49   : > { %369 = vst [vmem:[%s2345_s26 + $0x368] sm:$0xff] %v368_v45  ;;  %371 = vst [vmem:[%s2345_s26 + $0x370] sm:$0xff] %v370_v46 }
  0x4a   : > { %373 = vst [vmem:[%s2345_s26 + $0x378] sm:$0xff] %v372_v47 }
  0x4b PF: > { %p2032_p5 = scmp.ge.s32.totalorder %s2280_s14, 1  ;;  %p378_p6 = scmp.lt.s32.totalorder %s2280_s14, 3 }
  0x4d   : > { %p379_p7 = pnand %p2032_p5, %p378_p6 }
  0x4e   : > { %s385_s27 = sand.u32 (!%p379_p7), 1, %s2272_s12   ;;  %v2282_v48 = vmov (!%p379_p7), 0   ;;  %v529_v49 = vld [vmem:[%s2840_s2] sm:$0xf] (!%p379_p7)  ;;  %vm1099_vm0 = vcmask (!%p379_p7), 1042432   ;;  %vm1095_vm1 = vcmask (!%p379_p7), 441344  }
  0x4f   : > { %382 = sbr.rel (%p379_p7) target bundleno = 435 (0x1b3), region = 51  ;;  %1228 = vmatprep.mubr.bf16.mxu0 (!%p379_p7), %v2282_v48  ;;  %1269 = vmatprep.mubr.bf16.mxu1 (!%p379_p7), %v2282_v48  ;;  %v2605_v28 = vld [vmem:[%s2838_s0] sm:$0x3] (!%p379_p7)  ;;  %s2033_s7 = sshll.u32 (!%p379_p7), %s2026_s15, 5 }
  0x50   : > { %s2199_s28 = smul.u32 (!%p379_p7), 896, %s385_s27  ;;  %2225 = vset.pattern.permute.xlu0 (!%p379_p7), %v2282_v48  ;;  %p410_p8 = scmp.lt.s32.totalorder (!%p379_p7), %s2033_s7, 63 }
  0x51   : > { %532 = vperm.xlu0 (!%p379_p7), %2225, %v529_v49  }
  0x52   : > { %s2574_s4 = scalar_lea.vmem (!%p379_p7), [#allocation2], %s2199_s28 }
  0x53   : > { %v417_v50 = vld [vmem:[%s2574_s4] sm:$0xff] (!%p379_p7)  ;;  %v418_v52 = vld [vmem:[%s2574_s4 + $0x8] sm:$0xff] (!%p379_p7)  ;;  %v419_v16 = vld [vmem:[%s2574_s4 + $0x10] sm:$0xff] (!%p379_p7) }
  0x54   : > { %v433_v51 = vld [vmem:[%s2574_s4 + $0x80] sm:$0xff] (!%p379_p7)  ;;  %v434_v54 = vld [vmem:[%s2574_s4 + $0x88] sm:$0xff] (!%p379_p7)  ;;  %v435_v17 = vld [vmem:[%s2574_s4 + $0x90] sm:$0xff] (!%p379_p7) }
  0x55   : > { %v2036_v53 = vcombine.high (!%p379_p7), %v417_v50, %v433_v51  ;;  %v2035_v55 = vcombine.low (!%p379_p7), %v417_v50, %v433_v51  ;;  %v449_v56 = vld [vmem:[%s2574_s4 + $0x100] sm:$0xff] (!%p379_p7)  ;;  %v2038_v58 = vcombine.high (!%p379_p7), %v418_v52, %v434_v54  ;;  %v2037_v59 = vcombine.low (!%p379_p7), %v418_v52, %v434_v54  ;;  %v450_v61 = vld [vmem:[%s2574_s4 + $0x108] sm:$0xff] (!%p379_p7)  ;;  %v420_v18 = vld [vmem:[%s2574_s4 + $0x18] sm:$0xff] (!%p379_p7) }
  0x56   : > { %v465_v57 = vld [vmem:[%s2574_s4 + $0x180] sm:$0xff]  ;;  %v466_v62 = vld [vmem:[%s2574_s4 + $0x188] sm:$0xff]  ;;  %v436_v19 = vld [vmem:[%s2574_s4 + $0x98] sm:$0xff]  ;;  %v2040_v21 = vcombine.high %v419_v16, %v435_v17  ;;  %v2039_v29 = vcombine.low %v419_v16, %v435_v17  ;;  %s2846_s7 = smov (!%p410_p8, %s2033_s7), 63 }
  0x57   : > { %v2068_v60 = vcombine.high %v449_v56, %v465_v57  ;;  %v481_v63 = vld [vmem:[%s2574_s4 + $0x200] sm:$0xff]  ;;  %1196 = vmatprep.subr.bf16.mxu0 %v2036_v53  ;;  %v2070_v0 = vcombine.high %v450_v61, %v466_v62  ;;  %v482_v2 = vld [vmem:[%s2574_s4 + $0x208] sm:$0xff]  ;;  %1237 = vmatprep.subr.bf16.mxu1 %v2038_v58  ;;  %v2067_v4 = vcombine.low %v449_v56, %v465_v57  ;;  %v451_v24 = vld [vmem:[%s2574_s4 + $0x110] sm:$0xff]  ;;  %s2034_s8 = sshll.u32 %s2846_s7, 2 }
  0x58   : > { %v497_v1 = vld [vmem:[%s2574_s4 + $0x280] sm:$0xff]  ;;  %v498_v3 = vld [vmem:[%s2574_s4 + $0x288] sm:$0xff]  ;;  %1197 = vmatpush1.bf16.msra.mxu0 %v2035_v55  ;;  %1238 = vmatpush1.bf16.msra.mxu1 %v2037_v59  ;;  %v2069_v5 = vcombine.low %v450_v61, %v466_v62  ;;  %v2042_v23 = vcombine.high %v420_v18, %v436_v19  ;;  %v467_v25 = vld [vmem:[%s2574_s4 + $0x190] sm:$0xff]  ;;  %v2041_v30 = vcombine.low %v420_v18, %v436_v19  ;;  %s2782_s11 = scalar_lea.vmem %s2841_s3, %s2034_s8 }
  0x59   : > { %1198 = vmatprep.subr.bf16.mxu0 %v2068_v60  ;;  %v2100_v6 = vcombine.high %v481_v63, %v497_v1  ;;  %1239 = vmatprep.subr.bf16.mxu1 %v2070_v0  ;;  %v2102_v7 = vcombine.high %v482_v2, %v498_v3  ;;  %v513_v8 = vld [vmem:[%s2574_s4 + $0x300] sm:$0x77]  ;;  %v514_v9 = vld [vmem:[%s2574_s4 + $0x308] sm:$0x77]  ;;  %v2099_v10 = vcombine.low %v481_v63, %v497_v1  ;;  %v452_v26 = vld [vmem:[%s2574_s4 + $0x118] sm:$0xff] }
  0x5a   : > { %v2101_v11 = vcombine.low %v482_v2, %v498_v3  ;;  %v2132_v12 = vcombine.high %v513_v8, %v513_v8  ;;  %v2131_v13 = vcombine.low %v513_v8, %v513_v8  ;;  %v2134_v14 = vcombine.high %v514_v9, %v514_v9  ;;  %v468_v27 = vld [vmem:[%s2574_s4 + $0x198] sm:$0xff]  ;;  %v483_v33 = vld [vmem:[%s2574_s4 + $0x210] sm:$0xff]  ;;  %v421_v50 = vld [vmem:[%s2574_s4 + $0x20] sm:$0xff] }
  0x5b   : > { %v2133_v15 = vcombine.low %v514_v9, %v514_v9  ;;  %v2072_v31 = vcombine.high %v451_v24, %v467_v25  ;;  %v2074_v32 = vcombine.high %v452_v26, %v468_v27  ;;  %v499_v34 = vld [vmem:[%s2574_s4 + $0x290] sm:$0xff]  ;;  %v484_v35 = vld [vmem:[%s2574_s4 + $0x218] sm:$0xff]  ;;  %v2071_v37 = vcombine.low %v451_v24, %v467_v25  ;;  %v437_v51 = vld [vmem:[%s2574_s4 + $0xa0] sm:$0xff] }
  0x5c   : > { %1199 = vmatpush1.bf16.msra.mxu0 %v2067_v4  ;;  %1240 = vmatpush1.bf16.msra.mxu1 %v2069_v5  ;;  %v1101_v20 = vsel %vm1099_vm0, %v2131_v13, 0  ;;  %v500_v36 = vld [vmem:[%s2574_s4 + $0x298] sm:$0xff]  ;;  %v2073_v38 = vcombine.low %v452_v26, %v468_v27  ;;  %v2104_v39 = vcombine.high %v483_v33, %v499_v34  ;;  %v515_v41 = vld [vmem:[%s2574_s4 + $0x310] sm:$0x77]  ;;  %v2103_v43 = vcombine.low %v483_v33, %v499_v34  ;;  %v422_v52 = vld [vmem:[%s2574_s4 + $0x28] sm:$0xff] }
  0x5d   : > { %1200 = vmatprep.subr.bf16.mxu0 %v2100_v6  ;;  %1241 = vmatprep.subr.bf16.mxu1 %v2102_v7  ;;  %v1107_v22 = vsel %vm1099_vm0, %v2133_v15, 0  ;;  %v2106_v40 = vcombine.high %v484_v35, %v500_v36  ;;  %v516_v42 = vld [vmem:[%s2574_s4 + $0x318] sm:$0x77]  ;;  %v2105_v44 = vcombine.low %v484_v35, %v500_v36  ;;  %v2136_v45 = vcombine.high %v515_v41, %v515_v41  ;;  %v438_v53 = vld [vmem:[%s2574_s4 + $0xa8] sm:$0xff]  ;;  %v453_v58 = vld [vmem:[%s2574_s4 + $0x120] sm:$0xff] }
  0x5e   : > { %v2135_v46 = vcombine.low %v515_v41, %v515_v41  ;;  %v2138_v47 = vcombine.high %v516_v42, %v516_v42  ;;  %v2137_v49 = vcombine.low %v516_v42, %v516_v42  ;;  %v2044_v55 = vcombine.high %v421_v50, %v437_v51  ;;  %v469_v59 = vld [vmem:[%s2574_s4 + $0x1a0] sm:$0xff]  ;;  %v454_v60 = vld [vmem:[%s2574_s4 + $0x128] sm:$0xff]  ;;  %v423_v18 = vld [vmem:[%s2574_s4 + $0x30] sm:$0xff] }
  0x5f   : > { %v2046_v57 = vcombine.high %v422_v52, %v438_v53  ;;  %v470_v61 = vld [vmem:[%s2574_s4 + $0x1a8] sm:$0xff]  ;;  %v2043_v62 = vcombine.low %v421_v50, %v437_v51  ;;  %v2045_v63 = vcombine.low %v422_v52, %v438_v53  ;;  %v2076_v0 = vcombine.high %v453_v58, %v469_v59  ;;  %v485_v2 = vld [vmem:[%s2574_s4 + $0x220] sm:$0xff]  ;;  %v439_v19 = vld [vmem:[%s2574_s4 + $0xb0] sm:$0xff] }
  0x60   : > { %1201 = vmatpush1.bf16.msra.mxu0 %v2099_v10  ;;  %1242 = vmatpush1.bf16.msra.mxu1 %v2101_v11  ;;  %v1113_v54 = vsel %vm1099_vm0, %v2135_v46, 0  ;;  %v1119_v56 = vsel %vm1099_vm0, %v2137_v49, 0  ;;  %v2078_v1 = vcombine.high %v454_v60, %v470_v61  ;;  %v501_v3 = vld [vmem:[%s2574_s4 + $0x2a0] sm:$0xff]  ;;  %v486_v4 = vld [vmem:[%s2574_s4 + $0x228] sm:$0xff]  ;;  %v2075_v6 = vcombine.low %v453_v58, %v469_v59  ;;  %v455_v26 = vld [vmem:[%s2574_s4 + $0x130] sm:$0xff] }
  0x61   : > { %2163 = vmatprep.subr.msk.bf16.mxu0 %vm1099_vm0, %v2132_v12  ;;  %2165 = vmatprep.subr.msk.bf16.mxu1 %vm1099_vm0, %v2134_v14  ;;  %v502_v5 = vld [vmem:[%s2574_s4 + $0x2a8] sm:$0xff]  ;;  %v2077_v7 = vcombine.low %v454_v60, %v470_v61  ;;  %v2108_v8 = vcombine.high %v485_v2, %v501_v3  ;;  %v517_v10 = vld [vmem:[%s2574_s4 + $0x320] sm:$0x77]  ;;  %v2107_v12 = vcombine.low %v485_v2, %v501_v3  ;;  %v471_v27 = vld [vmem:[%s2574_s4 + $0x1b0] sm:$0xff] }
  0x62   : > { %v2110_v9 = vcombine.high %v486_v4, %v502_v5  ;;  %v518_v11 = vld [vmem:[%s2574_s4 + $0x328] sm:$0x77]  ;;  %v2109_v13 = vcombine.low %v486_v4, %v502_v5  ;;  %v2140_v14 = vcombine.high %v517_v10, %v517_v10  ;;  %v2139_v15 = vcombine.low %v517_v10, %v517_v10  ;;  %v487_v35 = vld [vmem:[%s2574_s4 + $0x230] sm:$0xff]  ;;  %v425_v52 = vld [vmem:[%s2574_s4 + $0x40] sm:$0xff] }
  0x63   : > { %v2142_v16 = vcombine.high %v518_v11, %v518_v11  ;;  %v2141_v17 = vcombine.low %v518_v11, %v518_v11  ;;  %v2080_v33 = vcombine.high %v455_v26, %v471_v27  ;;  %v503_v36 = vld [vmem:[%s2574_s4 + $0x2b0] sm:$0xff]  ;;  %v441_v53 = vld [vmem:[%s2574_s4 + $0xc0] sm:$0xff] }
  0x64   : > { %1203 = vmatpush1.bf16.msra.mxu0 %v1101_v20  ;;  %1244 = vmatpush1.bf16.msra.mxu1 %v1107_v22  ;;  %v424_v20 = vld [vmem:[%s2574_s4 + $0x38] sm:$0xff]  ;;  %v1125_v22 = vsel %vm1099_vm0, %v2139_v15, 0  ;;  %v2112_v41 = vcombine.high %v487_v35, %v503_v36  ;;  %v457_v60 = vld [vmem:[%s2574_s4 + $0x140] sm:$0xff] }
  0x65   : > { %1278 = vmatprep.subr.bf16.mxu0 %v2040_v21  ;;  %1319 = vmatprep.subr.bf16.mxu1 %v2042_v23  ;;  %v440_v21 = vld [vmem:[%s2574_s4 + $0xb8] sm:$0xff]  ;;  %v2048_v23 = vcombine.high %v423_v18, %v439_v19  ;;  %v1131_v24 = vsel %vm1099_vm0, %v2141_v17, 0  ;;  %v473_v61 = vld [vmem:[%s2574_s4 + $0x1c0] sm:$0xff] }
  0x66   : > { %v2050_v25 = vcombine.high %v424_v20, %v440_v21  ;;  %v2084_v2 = vcombine.high %v457_v60, %v473_v61  ;;  %v489_v4 = vld [vmem:[%s2574_s4 + $0x240] sm:$0xff] }
  0x67   : > { %2164 = vmatmul.mubr.msk.bf16.vlgmr.msra.gmra.mrb[0].mxu0 %vm1095_vm1, %v2605_v28  ;;  %2166 = vmatmul.mubr.msk.bf16.vlgmr.msra.gmra.mrb[0].mxu1 %vm1095_vm1, %v2605_v28  ;;  %v505_v5 = vld [vmem:[%s2574_s4 + $0x2c0] sm:$0xff] }
  0x68   : > { %1279 = vmatpush1.bf16.msra.mxu0 %v2039_v29  ;;  %1320 = vmatpush1.bf16.msra.mxu1 %v2041_v30  ;;  %v456_v29 = vld [vmem:[%s2574_s4 + $0x138] sm:$0xff]  ;;  %v2116_v10 = vcombine.high %v489_v4, %v505_v5 }
  0x69   : > { %1280 = vmatprep.subr.bf16.mxu0 %v2072_v31  ;;  %1321 = vmatprep.subr.bf16.mxu1 %v2074_v32  ;;  %v472_v30 = vld [vmem:[%s2574_s4 + $0x1b8] sm:$0xff]  ;;  %v2047_v31 = vcombine.low %v423_v18, %v439_v19  ;;  %v2049_v32 = vcombine.low %v424_v20, %v440_v21  ;;  %v427_v20 = vld [vmem:[%s2574_s4 + $0x50] sm:$0xff] }
  0x6a   : > { %1310 = vmatprep.mubr.bf16.mxu0 %v2282_v48  ;;  %1351 = vmatprep.mubr.bf16.mxu1 %v2282_v48  ;;  %v2082_v34 = vcombine.high %v456_v29, %v472_v30  ;;  %v443_v21 = vld [vmem:[%s2574_s4 + $0xd0] sm:$0xff] }
  0x6c   : > { %1281 = vmatpush1.bf16.msra.mxu0 %v2071_v37  ;;  %1322 = vmatpush1.bf16.msra.mxu1 %v2073_v38  ;;  %v488_v37 = vld [vmem:[%s2574_s4 + $0x238] sm:$0xff] }
  0x6d   : > { %1282 = vmatprep.subr.bf16.mxu0 %v2104_v39  ;;  %1323 = vmatprep.subr.bf16.mxu1 %v2106_v40  ;;  %v504_v38 = vld [vmem:[%s2574_s4 + $0x2b8] sm:$0xff]  ;;  %v2079_v39 = vcombine.low %v455_v26, %v471_v27  ;;  %v2081_v40 = vcombine.low %v456_v29, %v472_v30  ;;  %v459_v29 = vld [vmem:[%s2574_s4 + $0x150] sm:$0xff] }
  0x6e   : > { %v2114_v42 = vcombine.high %v488_v37, %v504_v38  ;;  %v2113_v46 = vcombine.low %v488_v37, %v504_v38  ;;  %v475_v30 = vld [vmem:[%s2574_s4 + $0x1d0] sm:$0xff] }
  0x6f   : > { %v491_v37 = vld [vmem:[%s2574_s4 + $0x250] sm:$0xff] }
  0x70   : > { %1283 = vmatpush1.bf16.msra.mxu0 %v2103_v43  ;;  %1324 = vmatpush1.bf16.msra.mxu1 %v2105_v44  ;;  %v519_v43 = vld [vmem:[%s2574_s4 + $0x330] sm:$0x77]  ;;  %v520_v44 = vld [vmem:[%s2574_s4 + $0x338] sm:$0x77] }
  0x71   : > { %2167 = vmatprep.subr.msk.bf16.mxu0 %vm1099_vm0, %v2136_v45  ;;  %2169 = vmatprep.subr.msk.bf16.mxu1 %vm1099_vm0, %v2138_v47  ;;  %v2111_v45 = vcombine.low %v487_v35, %v503_v36  ;;  %v2144_v47 = vcombine.high %v519_v43, %v519_v43  ;;  %v2143_v49 = vcombine.low %v519_v43, %v519_v43  ;;  %v507_v38 = vld [vmem:[%s2574_s4 + $0x2d0] sm:$0xff] }
  0x72   : > { %v2146_v50 = vcombine.high %v520_v44, %v520_v44  ;;  %v2145_v51 = vcombine.low %v520_v44, %v520_v44  ;;  %v2088_v35 = vcombine.high %v459_v29, %v475_v30  ;;  %v2120_v43 = vcombine.high %v491_v37, %v507_v38 }
  0x74   : > { %1285 = vmatpush1.bf16.msra.mxu0 %v1113_v54  ;;  %1326 = vmatpush1.bf16.msra.mxu1 %v1119_v56  ;;  %v426_v54 = vld [vmem:[%s2574_s4 + $0x48] sm:$0xff]  ;;  %v1137_v56 = vsel %vm1099_vm0, %v2143_v49, 0  ;;  %v1143_v58 = vsel %vm1099_vm0, %v2145_v51, 0 }
  0x75   : > { %1360 = vmatprep.subr.bf16.mxu0 %v2044_v55  ;;  %1401 = vmatprep.subr.bf16.mxu1 %v2046_v57  ;;  %v442_v55 = vld [vmem:[%s2574_s4 + $0xc8] sm:$0xff]  ;;  %v2052_v57 = vcombine.high %v425_v52, %v441_v53 }
  0x76   : > { %v2054_v59 = vcombine.high %v426_v54, %v442_v55 }
  0x77   : > { %2168 = vmatmul.mubr.msk.bf16.vlgmr.msra.gmra.mrb[4].mxu0 %vm1095_vm1, %v2605_v28  ;;  %2170 = vmatmul.mubr.msk.bf16.vlgmr.msra.gmra.mrb[4].mxu1 %vm1095_vm1, %v2605_v28 }
  0x78   : > { %1361 = vmatpush1.bf16.msra.mxu0 %v2043_v62  ;;  %1402 = vmatpush1.bf16.msra.mxu1 %v2045_v63  ;;  %v458_v62 = vld [vmem:[%s2574_s4 + $0x148] sm:$0xff] }
  0x79   : > { %1362 = vmatprep.subr.bf16.mxu0 %v2076_v0  ;;  %1403 = vmatprep.subr.bf16.mxu1 %v2078_v1  ;;  %v474_v63 = vld [vmem:[%s2574_s4 + $0x1c8] sm:$0xff]  ;;  %v2051_v0 = vcombine.low %v425_v52, %v441_v53  ;;  %v2053_v1 = vcombine.low %v426_v54, %v442_v55  ;;  %v429_v54 = vld [vmem:[%s2574_s4 + $0x60] sm:$0xff] }
  0x7a   : > { %1392 = vmatprep.mubr.bf16.mxu0 %v2282_v48  ;;  %1433 = vmatprep.mubr.bf16.mxu1 %v2282_v48  ;;  %v2086_v3 = vcombine.high %v458_v62, %v474_v63  ;;  %v445_v55 = vld [vmem:[%s2574_s4 + $0xe0] sm:$0xff] }
  0x7c   : > { %1363 = vmatpush1.bf16.msra.mxu0 %v2075_v6  ;;  %1404 = vmatpush1.bf16.msra.mxu1 %v2077_v7  ;;  %v490_v6 = vld [vmem:[%s2574_s4 + $0x248] sm:$0xff] }
  0x7d   : > { %1364 = vmatprep.subr.bf16.mxu0 %v2108_v8  ;;  %1405 = vmatprep.subr.bf16.mxu1 %v2110_v9  ;;  %v506_v7 = vld [vmem:[%s2574_s4 + $0x2c8] sm:$0xff]  ;;  %v2083_v8 = vcombine.low %v457_v60, %v473_v61  ;;  %v2085_v9 = vcombine.low %v458_v62, %v474_v63  ;;  %v461_v62 = vld [vmem:[%s2574_s4 + $0x160] sm:$0xff] }
  0x7e   : > { %v2118_v11 = vcombine.high %v490_v6, %v506_v7  ;;  %v2117_v15 = vcombine.low %v490_v6, %v506_v7  ;;  %v477_v63 = vld [vmem:[%s2574_s4 + $0x1e0] sm:$0xff] }
  0x7f   : > { %v493_v6 = vld [vmem:[%s2574_s4 + $0x260] sm:$0xff] }
  0x80   : > { %1365 = vmatpush1.bf16.msra.mxu0 %v2107_v12  ;;  %1406 = vmatpush1.bf16.msra.mxu1 %v2109_v13  ;;  %v521_v12 = vld [vmem:[%s2574_s4 + $0x340] sm:$0x77]  ;;  %v522_v13 = vld [vmem:[%s2574_s4 + $0x348] sm:$0x77] }
  0x81   : > { %2171 = vmatprep.subr.msk.bf16.mxu0 %vm1099_vm0, %v2140_v14  ;;  %2173 = vmatprep.subr.msk.bf16.mxu1 %vm1099_vm0, %v2142_v16  ;;  %v2115_v14 = vcombine.low %v489_v4, %v505_v5  ;;  %v2148_v16 = vcombine.high %v521_v12, %v521_v12  ;;  %v2147_v17 = vcombine.low %v521_v12, %v521_v12  ;;  %v509_v7 = vld [vmem:[%s2574_s4 + $0x2e0] sm:$0xff] }
  0x82   : > { %v2150_v18 = vcombine.high %v522_v13, %v522_v13  ;;  %v2149_v19 = vcombine.low %v522_v13, %v522_v13  ;;  %v2092_v4 = vcombine.high %v461_v62, %v477_v63  ;;  %v2124_v12 = vcombine.high %v493_v6, %v509_v7 }
  0x84   : > { %1367 = vmatpush1.bf16.msra.mxu0 %v1125_v22  ;;  %1408 = vmatpush1.bf16.msra.mxu1 %v1131_v24  ;;  %v428_v22 = vld [vmem:[%s2574_s4 + $0x58] sm:$0xff]  ;;  %v1149_v24 = vsel %vm1099_vm0, %v2147_v17, 0  ;;  %v1155_v26 = vsel %vm1099_vm0, %v2149_v19, 0 }
  0x85   : > { %1442 = vmatprep.subr.bf16.mxu0 %v2048_v23  ;;  %1483 = vmatprep.subr.bf16.mxu1 %v2050_v25  ;;  %v444_v23 = vld [vmem:[%s2574_s4 + $0xd8] sm:$0xff]  ;;  %v2056_v25 = vcombine.high %v427_v20, %v443_v21 }
  0x86   : > { %v2058_v27 = vcombine.high %v428_v22, %v444_v23 }
  0x87   : > { %2172 = vmatmul.mubr.msk.bf16.vlgmr.msra.gmra.mrb[8].mxu0 %vm1095_vm1, %v2605_v28  ;;  %2174 = vmatmul.mubr.msk.bf16.vlgmr.msra.gmra.mrb[8].mxu1 %vm1095_vm1, %v2605_v28 }
  0x88   : > { %1443 = vmatpush1.bf16.msra.mxu0 %v2047_v31  ;;  %1484 = vmatpush1.bf16.msra.mxu1 %v2049_v32  ;;  %v460_v31 = vld [vmem:[%s2574_s4 + $0x158] sm:$0xff] }
  0x89   : > { %1444 = vmatprep.subr.bf16.mxu0 %v2080_v33  ;;  %1485 = vmatprep.subr.bf16.mxu1 %v2082_v34  ;;  %v476_v32 = vld [vmem:[%s2574_s4 + $0x1d8] sm:$0xff]  ;;  %v2055_v33 = vcombine.low %v427_v20, %v443_v21  ;;  %v2057_v34 = vcombine.low %v428_v22, %v444_v23  ;;  %v431_v22 = vld [vmem:[%s2574_s4 + $0x70] sm:$0xff] }
  0x8a   : > { %1474 = vmatprep.mubr.bf16.mxu0 %v2282_v48  ;;  %1515 = vmatprep.mubr.bf16.mxu1 %v2282_v48  ;;  %v2090_v36 = vcombine.high %v460_v31, %v476_v32  ;;  %v447_v23 = vld [vmem:[%s2574_s4 + $0xf0] sm:$0xff] }
  0x8c   : > { %1445 = vmatpush1.bf16.msra.mxu0 %v2079_v39  ;;  %1486 = vmatpush1.bf16.msra.mxu1 %v2081_v40  ;;  %v492_v39 = vld [vmem:[%s2574_s4 + $0x258] sm:$0xff] }
  0x8d   : > { %1446 = vmatprep.subr.bf16.mxu0 %v2112_v41  ;;  %1487 = vmatprep.subr.bf16.mxu1 %v2114_v42  ;;  %v508_v40 = vld [vmem:[%s2574_s4 + $0x2d8] sm:$0xff]  ;;  %v2087_v41 = vcombine.low %v459_v29, %v475_v30  ;;  %v2089_v42 = vcombine.low %v460_v31, %v476_v32  ;;  %v463_v31 = vld [vmem:[%s2574_s4 + $0x170] sm:$0xff] }
  0x8e   : > { %v2122_v44 = vcombine.high %v492_v39, %v508_v40  ;;  %v2121_v49 = vcombine.low %v492_v39, %v508_v40  ;;  %v479_v32 = vld [vmem:[%s2574_s4 + $0x1f0] sm:$0xff] }
  0x8f   : > { %v495_v39 = vld [vmem:[%s2574_s4 + $0x270] sm:$0xff] }
  0x90   : > { %1447 = vmatpush1.bf16.msra.mxu0 %v2111_v45  ;;  %1488 = vmatpush1.bf16.msra.mxu1 %v2113_v46  ;;  %v523_v45 = vld [vmem:[%s2574_s4 + $0x350] sm:$0x77]  ;;  %v524_v46 = vld [vmem:[%s2574_s4 + $0x358] sm:$0x77] }
  0x91   : > { %2175 = vmatprep.subr.msk.bf16.mxu0 %vm1099_vm0, %v2144_v47  ;;  %2177 = vmatprep.subr.msk.bf16.mxu1 %vm1099_vm0, %v2146_v50  ;;  %v2119_v47 = vcombine.low %v491_v37, %v507_v38  ;;  %v2152_v50 = vcombine.high %v523_v45, %v523_v45  ;;  %v2151_v51 = vcombine.low %v523_v45, %v523_v45  ;;  %v511_v40 = vld [vmem:[%s2574_s4 + $0x2f0] sm:$0xff] }
  0x92   : > { %v2154_v52 = vcombine.high %v524_v46, %v524_v46  ;;  %v2153_v53 = vcombine.low %v524_v46, %v524_v46  ;;  %v2096_v37 = vcombine.high %v463_v31, %v479_v32  ;;  %v2128_v45 = vcombine.high %v495_v39, %v511_v40 }
  0x94   : > { %1449 = vmatpush1.bf16.msra.mxu0 %v1137_v56  ;;  %1490 = vmatpush1.bf16.msra.mxu1 %v1143_v58  ;;  %v430_v56 = vld [vmem:[%s2574_s4 + $0x68] sm:$0xff]  ;;  %v1161_v58 = vsel %vm1099_vm0, %v2151_v51, 0  ;;  %v1167_v60 = vsel %vm1099_vm0, %v2153_v53, 0 }
  0x95   : > { %1524 = vmatprep.subr.bf16.mxu0 %v2052_v57  ;;  %1565 = vmatprep.subr.bf16.mxu1 %v2054_v59  ;;  %v446_v57 = vld [vmem:[%s2574_s4 + $0xe8] sm:$0xff]  ;;  %v2060_v59 = vcombine.high %v429_v54, %v445_v55 }
  0x96   : > { %v2062_v61 = vcombine.high %v430_v56, %v446_v57 }
  0x97   : > { %2176 = vmatmul.mubr.msk.bf16.vlgmr.msra.gmra.mrb[12].mxu0 %vm1095_vm1, %v2605_v28  ;;  %2178 = vmatmul.mubr.msk.bf16.vlgmr.msra.gmra.mrb[12].mxu1 %vm1095_vm1, %v2605_v28 }
  0x98   : > { %1525 = vmatpush1.bf16.msra.mxu0 %v2051_v0  ;;  %1566 = vmatpush1.bf16.msra.mxu1 %v2053_v1  ;;  %v462_v0 = vld [vmem:[%s2574_s4 + $0x168] sm:$0xff] }
  0x99   : > { %1526 = vmatprep.subr.bf16.mxu0 %v2084_v2  ;;  %1567 = vmatprep.subr.bf16.mxu1 %v2086_v3  ;;  %v478_v1 = vld [vmem:[%s2574_s4 + $0x1e8] sm:$0xff]  ;;  %v2059_v2 = vcombine.low %v429_v54, %v445_v55  ;;  %v2061_v3 = vcombine.low %v430_v56, %v446_v57 }
  0x9a   : > { %1556 = vmatprep.mubr.bf16.mxu0 %v2282_v48  ;;  %1597 = vmatprep.mubr.bf16.mxu1 %v2282_v48  ;;  %v2094_v5 = vcombine.high %v462_v0, %v478_v1 }
  0x9c   : > { %1527 = vmatpush1.bf16.msra.mxu0 %v2083_v8  ;;  %1568 = vmatpush1.bf16.msra.mxu1 %v2085_v9  ;;  %v494_v8 = vld [vmem:[%s2574_s4 + $0x268] sm:$0xff] }
  0x9d   : > { %1528 = vmatprep.subr.bf16.mxu0 %v2116_v10  ;;  %1569 = vmatprep.subr.bf16.mxu1 %v2118_v11  ;;  %v510_v9 = vld [vmem:[%s2574_s4 + $0x2e8] sm:$0xff]  ;;  %v2091_v10 = vcombine.low %v461_v62, %v477_v63  ;;  %v2093_v11 = vcombine.low %v462_v0, %v478_v1 }
  0x9e   : > { %v2126_v13 = vcombine.high %v494_v8, %v510_v9  ;;  %v2125_v17 = vcombine.low %v494_v8, %v510_v9 }
  0xa0   : > { %1529 = vmatpush1.bf16.msra.mxu0 %v2115_v14  ;;  %1570 = vmatpush1.bf16.msra.mxu1 %v2117_v15  ;;  %v525_v14 = vld [vmem:[%s2574_s4 + $0x360] sm:$0x77]  ;;  %v526_v15 = vld [vmem:[%s2574_s4 + $0x368] sm:$0x77] }
  0xa1   : > { %2179 = vmatprep.subr.msk.bf16.mxu0 %vm1099_vm0, %v2148_v16  ;;  %2181 = vmatprep.subr.msk.bf16.mxu1 %vm1099_vm0, %v2150_v18  ;;  %v2123_v16 = vcombine.low %v493_v6, %v509_v7  ;;  %v2156_v18 = vcombine.high %v525_v14, %v525_v14  ;;  %v2155_v19 = vcombine.low %v525_v14, %v525_v14 }
  0xa2   : > { %v2158_v20 = vcombine.high %v526_v15, %v526_v15  ;;  %v2157_v21 = vcombine.low %v526_v15, %v526_v15 }
  0xa4   : > { %1531 = vmatpush1.bf16.msra.mxu0 %v1149_v24  ;;  %1572 = vmatpush1.bf16.msra.mxu1 %v1155_v26  ;;  %v432_v24 = vld [vmem:[%s2574_s4 + $0x78] sm:$0xff]  ;;  %v1173_v26 = vsel %vm1099_vm0, %v2155_v19, 0  ;;  %v1179_v29 = vsel %vm1099_vm0, %v2157_v21, 0 }
  0xa5   : > { %1606 = vmatprep.subr.bf16.mxu0 %v2056_v25  ;;  %1647 = vmatprep.subr.bf16.mxu1 %v2058_v27  ;;  %v448_v25 = vld [vmem:[%s2574_s4 + $0xf8] sm:$0xff]  ;;  %v2064_v27 = vcombine.high %v431_v22, %v447_v23 }
  0xa6   : > { %v2066_v30 = vcombine.high %v432_v24, %v448_v25 }
  0xa7   : > { %2180 = vmatmul.mubr.msk.bf16.vlgmr.msra.gmra.mrb[16].mxu0 %vm1095_vm1, %v2605_v28  ;;  %2182 = vmatmul.mubr.msk.bf16.vlgmr.msra.gmra.mrb[16].mxu1 %vm1095_vm1, %v2605_v28 }
  0xa8   : > { %1607 = vmatpush1.bf16.msra.mxu0 %v2055_v33  ;;  %1648 = vmatpush1.bf16.msra.mxu1 %v2057_v34  ;;  %v464_v33 = vld [vmem:[%s2574_s4 + $0x178] sm:$0xff] }
  0xa9   : > { %1608 = vmatprep.subr.bf16.mxu0 %v2088_v35  ;;  %1649 = vmatprep.subr.bf16.mxu1 %v2090_v36  ;;  %v480_v34 = vld [vmem:[%s2574_s4 + $0x1f8] sm:$0xff]  ;;  %v2063_v35 = vcombine.low %v431_v22, %v447_v23  ;;  %v2065_v36 = vcombine.low %v432_v24, %v448_v25 }
  0xaa   : > { %1638 = vmatprep.mubr.bf16.mxu0 %v2282_v48  ;;  %1679 = vmatprep.mubr.bf16.mxu1 %v2282_v48  ;;  %v2098_v38 = vcombine.high %v464_v33, %v480_v34 }
  0xac   : > { %1609 = vmatpush1.bf16.msra.mxu0 %v2087_v41  ;;  %1650 = vmatpush1.bf16.msra.mxu1 %v2089_v42  ;;  %v496_v41 = vld [vmem:[%s2574_s4 + $0x278] sm:$0xff] }
  0xad   : > { %1610 = vmatprep.subr.bf16.mxu0 %v2120_v43  ;;  %1651 = vmatprep.subr.bf16.mxu1 %v2122_v44  ;;  %v512_v42 = vld [vmem:[%s2574_s4 + $0x2f8] sm:$0xff]  ;;  %v2095_v43 = vcombine.low %v463_v31, %v479_v32  ;;  %v2097_v44 = vcombine.low %v464_v33, %v480_v34 }
  0xae   : > { %v2130_v46 = vcombine.high %v496_v41, %v512_v42  ;;  %v2129_v51 = vcombine.low %v496_v41, %v512_v42 }
  0xb0   : > { %1611 = vmatpush1.bf16.msra.mxu0 %v2119_v47  ;;  %1652 = vmatpush1.bf16.msra.mxu1 %v2121_v49  ;;  %v527_v47 = vld [vmem:[%s2574_s4 + $0x370] sm:$0x77]  ;;  %v528_v49 = vld [vmem:[%s2574_s4 + $0x378] sm:$0x77] }
  0xb1   : > { %2183 = vmatprep.subr.msk.bf16.mxu0 %vm1099_vm0, %v2152_v50  ;;  %2185 = vmatprep.subr.msk.bf16.mxu1 %vm1099_vm0, %v2154_v52  ;;  %v2127_v50 = vcombine.low %v495_v39, %v511_v40  ;;  %v2160_v52 = vcombine.high %v527_v47, %v527_v47  ;;  %v2159_v53 = vcombine.low %v527_v47, %v527_v47 }
  0xb2   : > { %v2162_v54 = vcombine.high %v528_v49, %v528_v49  ;;  %v2161_v55 = vcombine.low %v528_v49, %v528_v49 }
  0xb3   : > { %v1185_v56 = vsel %vm1099_vm0, %v2159_v53, 0 }
  0xb4   : > { %1613 = vmatpush1.bf16.msra.mxu0 %v1161_v58  ;;  %1654 = vmatpush1.bf16.msra.mxu1 %v1167_v60 }
  0xb5   : > { %1688 = vmatprep.subr.bf16.mxu0 %v2060_v59  ;;  %1729 = vmatprep.subr.bf16.mxu1 %v2062_v61 }
  0xb7   : > { %2184 = vmatmul.mubr.msk.bf16.vlgmr.msra.gmra.mrb[20].mxu0 %vm1095_vm1, %v2605_v28  ;;  %2186 = vmatmul.mubr.msk.bf16.vlgmr.msra.gmra.mrb[20].mxu1 %vm1095_vm1, %v2605_v28 }
  0xb8   : > { %1689 = vmatpush1.bf16.msra.mxu0 %v2059_v2  ;;  %1730 = vmatpush1.bf16.msra.mxu1 %v2061_v3 }
  0xb9   : > { %1690 = vmatprep.subr.bf16.mxu0 %v2092_v4  ;;  %1731 = vmatprep.subr.bf16.mxu1 %v2094_v5 }
  0xba   : > { %1720 = vmatprep.mubr.bf16.mxu0 %v2282_v48  ;;  %1761 = vmatprep.mubr.bf16.mxu1 %v2282_v48 }
  0xbc   : > { %1691 = vmatpush1.bf16.msra.mxu0 %v2091_v10  ;;  %1732 = vmatpush1.bf16.msra.mxu1 %v2093_v11 }
  0xbd   : > { %1692 = vmatprep.subr.bf16.mxu0 %v2124_v12  ;;  %1733 = vmatprep.subr.bf16.mxu1 %v2126_v13 }
  0xc0   : > { %1693 = vmatpush1.bf16.msra.mxu0 %v2123_v16  ;;  %1734 = vmatpush1.bf16.msra.mxu1 %v2125_v17 }
  0xc1   : > { %2187 = vmatprep.subr.msk.bf16.mxu0 %vm1099_vm0, %v2156_v18  ;;  %2189 = vmatprep.subr.msk.bf16.mxu1 %vm1099_vm0, %v2158_v20 }
  0xc4   : > { %1695 = vmatpush1.bf16.msra.mxu0 %v1173_v26  ;;  %1736 = vmatpush1.bf16.msra.mxu1 %v1179_v29 }
  0xc5   : > { %1770 = vmatprep.subr.bf16.mxu0 %v2064_v27  ;;  %1811 = vmatprep.subr.bf16.mxu1 %v2066_v30 }
  0xc7   : > { %2188 = vmatmul.mubr.msk.bf16.vlgmr.msra.gmra.mrb[24].mxu0 %vm1095_vm1, %v2605_v28  ;;  %2190 = vmatmul.mubr.msk.bf16.vlgmr.msra.gmra.mrb[24].mxu1 %vm1095_vm1, %v2605_v28 }
  0xc8   : > { %1771 = vmatpush1.bf16.msra.mxu0 %v2063_v35  ;;  %1812 = vmatpush1.bf16.msra.mxu1 %v2065_v36 }
  0xc9   : > { %1772 = vmatprep.subr.bf16.mxu0 %v2096_v37  ;;  %1813 = vmatprep.subr.bf16.mxu1 %v2098_v38 }
  0xca   : > { %1802 = vmatprep.mubr.bf16.mxu0 %v2282_v48  ;;  %1843 = vmatprep.mubr.bf16.mxu1 %v2282_v48  ;;  %v1191_v48 = vsel %vm1099_vm0, %v2161_v55, 0 }
  0xcc   : > { %1773 = vmatpush1.bf16.msra.mxu0 %v2095_v43  ;;  %1814 = vmatpush1.bf16.msra.mxu1 %v2097_v44 }
  0xcd   : > { %1774 = vmatprep.subr.bf16.mxu0 %v2128_v45  ;;  %1815 = vmatprep.subr.bf16.mxu1 %v2130_v46 }
  0xd0   : > { %1775 = vmatpush1.bf16.msra.mxu0 %v2127_v50  ;;  %1816 = vmatpush1.bf16.msra.mxu1 %v2129_v51  ;;  %v2773_v57 = vpop.permute.xlu0 %532 }
  0xd1   : > { %2191 = vmatprep.subr.msk.bf16.mxu0 %vm1099_vm0, %v2160_v52  ;;  %2193 = vmatprep.subr.msk.bf16.mxu1 %vm1099_vm0, %v2162_v54 }
  0xd4   : > { %1777 = vmatpush1.bf16.msra.mxu0 %v1185_v56  ;;  %1818 = vmatpush1.bf16.msra.mxu1 %v1191_v48 }
  0xd7   : > { %2192 = vmatmul.mubr.msk.bf16.vlgmr.msra.gmra.mrb[28].mxu0 %vm1095_vm1, %v2605_v28  ;;  %2194 = vmatmul.mubr.msk.bf16.vlgmr.msra.gmra.mrb[28].mxu1 %vm1095_vm1, %v2605_v28 }
 0x13a   : > { %v1230_v58 = vpop.f32.mrb[0].mxu0  ;;  %v1271_v59 = vpop.f32.mrb[0].mxu1 }
 0x13b   : > { %v1231_v60 = vadd.f32 %v1230_v58, %v2773_v57  ;;  %v1232_v61 = vpop.f32.mrb[1].mxu0  ;;  %v1272_v63 = vadd.f32 %v1271_v59, %v2773_v57  ;;  %v1273_v0 = vpop.f32.mrb[1].mxu1 }
 0x13c   : > { %v1233_v62 = vadd.f32 %v1232_v61, %v2773_v57  ;;  %v1234_v1 = vpop.f32.mrb[2].mxu0  ;;  %v1274_v28 = vadd.f32 %v1273_v0, %v2773_v57  ;;  %v1275_v3 = vpop.f32.mrb[2].mxu1 }
 0x13d   : > { %v1852_v2 = vmax.f32 %v1231_v60, 0.0  ;;  %v1235_v4 = vpop.f32.mrb[3].mxu0  ;;  %v1854_v6 = vmax.f32 %v1272_v63, 0.0  ;;  %v1276_v7 = vpop.f32.mrb[3].mxu1 }
 0x13e   : > { %v1853_v5 = vmax.f32 %v1233_v62, 0.0  ;;  %v1855_v8 = vmax.f32 %v1274_v28, 0.0 }
 0x140   : > { %v1916_v9 = vcombine.low %v1852_v2, %v1853_v5  ;;  %v1917_v10 = vcombine.low %v1854_v6, %v1855_v8 }
 0x142   : > { %1948 = vst [vmem:[%s2782_s11] sm:$0xff] %v1916_v9  ;;  %1949 = vst [vmem:[%s2782_s11 + $0x8] sm:$0xff] %v1917_v10 }
 0x14a   : > { %v1312_v11 = vpop.f32.mrb[4].mxu0  ;;  %v1353_v13 = vpop.f32.mrb[4].mxu1 }
 0x14b   : > { %v1313_v12 = vadd.f32 %v1312_v11, %v2773_v57  ;;  %v1314_v14 = vpop.f32.mrb[5].mxu0  ;;  %v1354_v15 = vadd.f32 %v1353_v13, %v2773_v57  ;;  %v1355_v17 = vpop.f32.mrb[5].mxu1 }
 0x14c   : > { %v1315_v16 = vadd.f32 %v1314_v14, %v2773_v57  ;;  %v1316_v18 = vpop.f32.mrb[6].mxu0  ;;  %v1356_v20 = vadd.f32 %v1355_v17, %v2773_v57  ;;  %v1357_v21 = vpop.f32.mrb[6].mxu1 }
 0x14d   : > { %v1856_v19 = vmax.f32 %v1313_v12, 0.0  ;;  %v1317_v22 = vpop.f32.mrb[7].mxu0  ;;  %v1858_v23 = vmax.f32 %v1354_v15, 0.0  ;;  %v1358_v25 = vpop.f32.mrb[7].mxu1 }
 0x14e   : > { %v1857_v24 = vmax.f32 %v1315_v16, 0.0  ;;  %v1859_v26 = vmax.f32 %v1356_v20, 0.0 }
 0x150   : > { %v1918_v27 = vcombine.low %v1856_v19, %v1857_v24  ;;  %v1919_v29 = vcombine.low %v1858_v23, %v1859_v26 }
 0x152   : > { %1950 = vst [vmem:[%s2782_s11 + $0x10] sm:$0xff] %v1918_v27  ;;  %1951 = vst [vmem:[%s2782_s11 + $0x18] sm:$0xff] %v1919_v29 }
 0x15a   : > { %v1394_v30 = vpop.f32.mrb[8].mxu0  ;;  %v1435_v32 = vpop.f32.mrb[8].mxu1 }
 0x15b   : > { %v1395_v31 = vadd.f32 %v1394_v30, %v2773_v57  ;;  %v1396_v33 = vpop.f32.mrb[9].mxu0  ;;  %v1436_v34 = vadd.f32 %v1435_v32, %v2773_v57  ;;  %v1437_v36 = vpop.f32.mrb[9].mxu1 }
 0x15c   : > { %v1397_v35 = vadd.f32 %v1396_v33, %v2773_v57  ;;  %v1398_v37 = vpop.f32.mrb[10].mxu0  ;;  %v1438_v39 = vadd.f32 %v1437_v36, %v2773_v57  ;;  %v1439_v40 = vpop.f32.mrb[10].mxu1 }
 0x15d   : > { %v1860_v38 = vmax.f32 %v1395_v31, 0.0  ;;  %v1399_v41 = vpop.f32.mrb[11].mxu0  ;;  %v1862_v42 = vmax.f32 %v1436_v34, 0.0  ;;  %v1440_v44 = vpop.f32.mrb[11].mxu1 }
 0x15e   : > { %v1861_v43 = vmax.f32 %v1397_v35, 0.0  ;;  %v1863_v45 = vmax.f32 %v1438_v39, 0.0 }
 0x160   : > { %v1920_v46 = vcombine.low %v1860_v38, %v1861_v43  ;;  %v1921_v47 = vcombine.low %v1862_v42, %v1863_v45 }
 0x162   : > { %1952 = vst [vmem:[%s2782_s11 + $0x20] sm:$0xff] %v1920_v46  ;;  %1953 = vst [vmem:[%s2782_s11 + $0x28] sm:$0xff] %v1921_v47 }
 0x16a   : > { %v1476_v49 = vpop.f32.mrb[12].mxu0  ;;  %v1517_v51 = vpop.f32.mrb[12].mxu1 }
 0x16b   : > { %v1477_v50 = vadd.f32 %v1476_v49, %v2773_v57  ;;  %v1478_v52 = vpop.f32.mrb[13].mxu0  ;;  %v1518_v53 = vadd.f32 %v1517_v51, %v2773_v57  ;;  %v1519_v55 = vpop.f32.mrb[13].mxu1 }
 0x16c   : > { %v1479_v54 = vadd.f32 %v1478_v52, %v2773_v57  ;;  %v1480_v56 = vpop.f32.mrb[14].mxu0  ;;  %v1520_v58 = vadd.f32 %v1519_v55, %v2773_v57  ;;  %v1521_v59 = vpop.f32.mrb[14].mxu1 }
 0x16d   : > { %v1864_v48 = vmax.f32 %v1477_v50, 0.0  ;;  %v1481_v60 = vpop.f32.mrb[15].mxu0  ;;  %v1866_v61 = vmax.f32 %v1518_v53, 0.0  ;;  %v1522_v63 = vpop.f32.mrb[15].mxu1 }
 0x16e   : > { %v1865_v62 = vmax.f32 %v1479_v54, 0.0  ;;  %v1867_v0 = vmax.f32 %v1520_v58, 0.0 }
 0x170   : > { %v1922_v1 = vcombine.low %v1864_v48, %v1865_v62  ;;  %v1923_v2 = vcombine.low %v1866_v61, %v1867_v0 }
 0x172   : > { %1954 = vst [vmem:[%s2782_s11 + $0x30] sm:$0xff] %v1922_v1  ;;  %1955 = vst [vmem:[%s2782_s11 + $0x38] sm:$0xff] %v1923_v2 }
 0x17a   : > { %v1558_v28 = vpop.f32.mrb[16].mxu0  ;;  %v1599_v4 = vpop.f32.mrb[16].mxu1 }
 0x17b   : > { %v1559_v3 = vadd.f32 %v1558_v28, %v2773_v57  ;;  %v1560_v5 = vpop.f32.mrb[17].mxu0  ;;  %v1600_v6 = vadd.f32 %v1599_v4, %v2773_v57  ;;  %v1601_v8 = vpop.f32.mrb[17].mxu1 }
 0x17c   : > { %v1561_v7 = vadd.f32 %v1560_v5, %v2773_v57  ;;  %v1562_v9 = vpop.f32.mrb[18].mxu0  ;;  %v1602_v11 = vadd.f32 %v1601_v8, %v2773_v57  ;;  %v1603_v12 = vpop.f32.mrb[18].mxu1 }
 0x17d   : > { %v1868_v10 = vmax.f32 %v1559_v3, 0.0  ;;  %v1563_v13 = vpop.f32.mrb[19].mxu0  ;;  %v1870_v14 = vmax.f32 %v1600_v6, 0.0  ;;  %v1604_v16 = vpop.f32.mrb[19].mxu1 }
 0x17e   : > { %v1869_v15 = vmax.f32 %v1561_v7, 0.0  ;;  %v1871_v17 = vmax.f32 %v1602_v11, 0.0 }
 0x180   : > { %v1924_v18 = vcombine.low %v1868_v10, %v1869_v15  ;;  %v1925_v19 = vcombine.low %v1870_v14, %v1871_v17 }
 0x182   : > { %1956 = vst [vmem:[%s2782_s11 + $0x40] sm:$0xff] %v1924_v18  ;;  %1957 = vst [vmem:[%s2782_s11 + $0x48] sm:$0xff] %v1925_v19 }
 0x18a   : > { %v1640_v20 = vpop.f32.mrb[20].mxu0  ;;  %v1681_v22 = vpop.f32.mrb[20].mxu1 }
 0x18b   : > { %v1641_v21 = vadd.f32 %v1640_v20, %v2773_v57  ;;  %v1642_v23 = vpop.f32.mrb[21].mxu0  ;;  %v1682_v24 = vadd.f32 %v1681_v22, %v2773_v57  ;;  %v1683_v26 = vpop.f32.mrb[21].mxu1 }
 0x18c   : > { %v1643_v25 = vadd.f32 %v1642_v23, %v2773_v57  ;;  %v1644_v27 = vpop.f32.mrb[22].mxu0  ;;  %v1684_v30 = vadd.f32 %v1683_v26, %v2773_v57  ;;  %v1685_v31 = vpop.f32.mrb[22].mxu1 }
 0x18d   : > { %v1872_v29 = vmax.f32 %v1641_v21, 0.0  ;;  %v1645_v32 = vpop.f32.mrb[23].mxu0  ;;  %v1874_v33 = vmax.f32 %v1682_v24, 0.0  ;;  %v1686_v35 = vpop.f32.mrb[23].mxu1 }
 0x18e   : > { %v1873_v34 = vmax.f32 %v1643_v25, 0.0  ;;  %v1875_v36 = vmax.f32 %v1684_v30, 0.0 }
 0x190   : > { %v1926_v37 = vcombine.low %v1872_v29, %v1873_v34  ;;  %v1927_v38 = vcombine.low %v1874_v33, %v1875_v36 }
 0x192   : > { %1958 = vst [vmem:[%s2782_s11 + $0x50] sm:$0xff] %v1926_v37  ;;  %1959 = vst [vmem:[%s2782_s11 + $0x58] sm:$0xff] %v1927_v38 }
 0x19a   : > { %v1722_v39 = vpop.f32.mrb[24].mxu0  ;;  %v1763_v41 = vpop.f32.mrb[24].mxu1 }
 0x19b   : > { %v1723_v40 = vadd.f32 %v1722_v39, %v2773_v57  ;;  %v1724_v42 = vpop.f32.mrb[25].mxu0  ;;  %v1764_v43 = vadd.f32 %v1763_v41, %v2773_v57  ;;  %v1765_v45 = vpop.f32.mrb[25].mxu1 }
 0x19c   : > { %v1725_v44 = vadd.f32 %v1724_v42, %v2773_v57  ;;  %v1726_v46 = vpop.f32.mrb[26].mxu0  ;;  %v1766_v49 = vadd.f32 %v1765_v45, %v2773_v57  ;;  %v1767_v50 = vpop.f32.mrb[26].mxu1 }
 0x19d   : > { %v1876_v47 = vmax.f32 %v1723_v40, 0.0  ;;  %v1727_v51 = vpop.f32.mrb[27].mxu0  ;;  %v1878_v52 = vmax.f32 %v1764_v43, 0.0  ;;  %v1768_v54 = vpop.f32.mrb[27].mxu1 }
 0x19e   : > { %v1877_v53 = vmax.f32 %v1725_v44, 0.0  ;;  %v1879_v55 = vmax.f32 %v1766_v49, 0.0 }
 0x1a0   : > { %v1928_v56 = vcombine.low %v1876_v47, %v1877_v53  ;;  %v1929_v48 = vcombine.low %v1878_v52, %v1879_v55 }
 0x1a2   : > { %1960 = vst [vmem:[%s2782_s11 + $0x60] sm:$0xff] %v1928_v56  ;;  %1961 = vst [vmem:[%s2782_s11 + $0x68] sm:$0xff] %v1929_v48 }
 0x1aa   : > { %v1804_v58 = vpop.f32.mrb[28].mxu0  ;;  %v1845_v60 = vpop.f32.mrb[28].mxu1 }
 0x1ab   : > { %v1805_v59 = vadd.f32 %v1804_v58, %v2773_v57  ;;  %v1806_v61 = vpop.f32.mrb[29].mxu0  ;;  %v1846_v62 = vadd.f32 %v1845_v60, %v2773_v57  ;;  %v1847_v0 = vpop.f32.mrb[29].mxu1 }
 0x1ac   : > { %v1807_v63 = vadd.f32 %v1806_v61, %v2773_v57  ;;  %v1808_v1 = vpop.f32.mrb[30].mxu0  ;;  %v1848_v28 = vadd.f32 %v1847_v0, %v2773_v57  ;;  %v1849_v3 = vpop.f32.mrb[30].mxu1 }
 0x1ad   : > { %v1880_v2 = vmax.f32 %v1805_v59, 0.0  ;;  %v1809_v4 = vpop.f32.mrb[31].mxu0  ;;  %v1882_v5 = vmax.f32 %v1846_v62, 0.0  ;;  %v1850_v7 = vpop.f32.mrb[31].mxu1 }
 0x1ae   : > { %v1881_v6 = vmax.f32 %v1807_v63, 0.0  ;;  %v1883_v8 = vmax.f32 %v1848_v28, 0.0 }
 0x1b0   : > { %v1930_v9 = vcombine.low %v1880_v2, %v1881_v6  ;;  %v1931_v10 = vcombine.low %v1882_v5, %v1883_v8 }
 0x1b2   : > { %1962 = vst [vmem:[%s2782_s11 + $0x70] sm:$0xff] %v1930_v9  ;;  %1963 = vst [vmem:[%s2782_s11 + $0x78] sm:$0xff] %v1931_v10 }
 0x1b3 PF: > { %p10_p9 = scmp.ge.s32.totalorder %s2320_s16, 4   ;;  %s2842_s12 = smov %s2276_s13 }
 0x1b4   : > { %s2843_s13 = smov %s2329_s19  ;;  %s2844_s14 = smov %s2320_s16 }
 0x1b5   :  { %12 = sbr.rel (!%p10_p9) target bundleno = 2 (0x2), region = 90 }

// kernel: unet_forward.11
= control target key start
LH: loop header
LB: loop body
LE: loop exit
PB: predicated region body
PF: predicated region fallthrough
CT: control target
= control target key end

     0   :  { %s753_s12 = smov 0   ;;  %s755_s13 = smov 0   ;;  %s901_s0 = inlined_call_operand.vmem [shape: bf16[4,108], index: 0, kind: input, shape index: {}]   ;;  %s902_s1 = inlined_call_operand.vmem [shape: bf16[108,1024], index: 1, kind: input, shape index: {}]   ;;  %s903_s2 = inlined_call_operand.vmem [shape: f32[4,1], index: 2, kind: input, shape index: {}]   ;;  %s904_s3 = inlined_call_operand.vmem [shape: f32[4,1024], index: 3, kind: output, shape index: {}]  }
   0x1   :  { %s757_s14 = smov 0  }
   0x2 LB: > { %s594_s15 = sadd.s32 4294967295, %s730_s14   ;;  %s770_s16 = sadd.s32 1, %s730_s14   ;;  %s730_s14 = sphi %s757_s14, %s907_s14   ;;  %s726_s13 = sphi %s755_s13, %s906_s13   ;;  %s722_s12 = sphi %s753_s12, %s905_s12  }
   0x3   : > { %s38_s17 = ssub.s32 %s730_s14, %s770_s16  ;;  %s41_s18 = sadd.s32 1, %s726_s13 }
   0x4   : > { %p39_p0 = scmp.eq.s32.totalorder %s38_s17, 0  ;;  %p48_p1 = scmp.ne.s32.totalorder %s726_s13, %s722_s12 }
   0x5   : > { %p49_p2 = scmp.eq.s32.totalorder %s730_s14, 0  ;;  %p597_p4 = scmp.ge.s32.totalorder %s730_s14, 2 }
   0x6   : > { %s779_s19 = scalar_select %p39_p0, %s726_s13, %s41_s18  }
   0x7   : > { %p50_p3 = por %p49_p2, %p48_p1  ;;  %127 = sbr.rel (%p597_p4) target bundleno = 32 (0x20), region = 24 }
   0xe   : > { %130 = sbr.rel (!%p50_p3) target bundleno = 32 (0x20), region = 28  ;;  %s132_s20 = sand.u32 (%p50_p3), 1, %s726_s13  }
   0xf   : > { %s637_s21 = sshll.u32 (%p50_p3), %s730_s14, 4  ;;  %s638_s22 = smul.u32 (%p50_p3), 224, %s132_s20 }
  0x10   : > { %s787_s25 = scalar_lea.vmem (%p50_p3), %s902_s1, %s637_s21 }
  0x11   : > { %v150_v0 = vld [vmem:[%s787_s25] sm:$0xff] (%p50_p3)  ;;  %v152_v1 = vld [vmem:[%s787_s25 + $0x8] sm:$0xff] (%p50_p3)  ;;  %s795_s26 = scalar_lea.vmem (%p50_p3), [#allocation2], %s638_s22 }
  0x12   : > { %v154_v2 = vld [vmem:[%s787_s25 + $0x20] sm:$0xff] (%p50_p3)  ;;  %v156_v3 = vld [vmem:[%s787_s25 + $0x28] sm:$0xff] (%p50_p3)  ;;  %151 = vst [vmem:[%s795_s26] sm:$0xff] (%p50_p3), %v150_v0  ;;  %153 = vst [vmem:[%s795_s26 + $0x8] sm:$0xff] (%p50_p3), %v152_v1 }
  0x13   : > { %v158_v4 = vld [vmem:[%s787_s25 + $0x40] sm:$0xff] (%p50_p3)  ;;  %v160_v5 = vld [vmem:[%s787_s25 + $0x48] sm:$0xff] (%p50_p3)  ;;  %155 = vst [vmem:[%s795_s26 + $0x10] sm:$0xff] (%p50_p3), %v154_v2  ;;  %157 = vst [vmem:[%s795_s26 + $0x18] sm:$0xff] (%p50_p3), %v156_v3 }
  0x14   : > { %159 = vst [vmem:[%s795_s26 + $0x20] sm:$0xff] (%p50_p3), %v158_v4  ;;  %161 = vst [vmem:[%s795_s26 + $0x28] sm:$0xff] (%p50_p3), %v160_v5  ;;  %v162_v6 = vld [vmem:[%s787_s25 + $0x60] sm:$0xff] (%p50_p3)  ;;  %v164_v7 = vld [vmem:[%s787_s25 + $0x68] sm:$0xff] (%p50_p3) }
  0x15   : > { %v166_v8 = vld [vmem:[%s787_s25 + $0x80] sm:$0xff]  ;;  %163 = vst [vmem:[%s795_s26 + $0x30] sm:$0xff] %v162_v6  ;;  %165 = vst [vmem:[%s795_s26 + $0x38] sm:$0xff] %v164_v7  ;;  %v168_v9 = vld [vmem:[%s787_s25 + $0x88] sm:$0xff] }
  0x16   : > { %167 = vst [vmem:[%s795_s26 + $0x40] sm:$0xff] %v166_v8  ;;  %v170_v10 = vld [vmem:[%s787_s25 + $0xa0] sm:$0xff]  ;;  %v172_v11 = vld [vmem:[%s787_s25 + $0xa8] sm:$0xff]  ;;  %169 = vst [vmem:[%s795_s26 + $0x48] sm:$0xff] %v168_v9 }
  0x17   : > { %171 = vst [vmem:[%s795_s26 + $0x50] sm:$0xff] %v170_v10  ;;  %173 = vst [vmem:[%s795_s26 + $0x58] sm:$0xff] %v172_v11  ;;  %v174_v12 = vld [vmem:[%s787_s25 + $0xc0] sm:$0xff]  ;;  %v176_v13 = vld [vmem:[%s787_s25 + $0xc8] sm:$0xff] }
  0x18   : > { %v178_v14 = vld [vmem:[%s787_s25 + $0xe0] sm:$0xff]  ;;  %175 = vst [vmem:[%s795_s26 + $0x60] sm:$0xff] %v174_v12  ;;  %177 = vst [vmem:[%s795_s26 + $0x68] sm:$0xff] %v176_v13  ;;  %v180_v15 = vld [vmem:[%s787_s25 + $0xe8] sm:$0xff] }
  0x19   : > { %179 = vst [vmem:[%s795_s26 + $0x70] sm:$0xff] %v178_v14  ;;  %v182_v16 = vld [vmem:[%s787_s25 + $0x100] sm:$0xff]  ;;  %v184_v17 = vld [vmem:[%s787_s25 + $0x108] sm:$0xff]  ;;  %181 = vst [vmem:[%s795_s26 + $0x78] sm:$0xff] %v180_v15 }
  0x1a   : > { %183 = vst [vmem:[%s795_s26 + $0x80] sm:$0xff] %v182_v16  ;;  %185 = vst [vmem:[%s795_s26 + $0x88] sm:$0xff] %v184_v17  ;;  %v186_v18 = vld [vmem:[%s787_s25 + $0x120] sm:$0xff]  ;;  %v188_v19 = vld [vmem:[%s787_s25 + $0x128] sm:$0xff] }
  0x1b   : > { %v190_v20 = vld [vmem:[%s787_s25 + $0x140] sm:$0xff]  ;;  %187 = vst [vmem:[%s795_s26 + $0x90] sm:$0xff] %v186_v18  ;;  %189 = vst [vmem:[%s795_s26 + $0x98] sm:$0xff] %v188_v19  ;;  %v192_v21 = vld [vmem:[%s787_s25 + $0x148] sm:$0xff] }
  0x1c   : > { %191 = vst [vmem:[%s795_s26 + $0xa0] sm:$0xff] %v190_v20  ;;  %v194_v22 = vld [vmem:[%s787_s25 + $0x160] sm:$0xff]  ;;  %v196_v23 = vld [vmem:[%s787_s25 + $0x168] sm:$0xff]  ;;  %193 = vst [vmem:[%s795_s26 + $0xa8] sm:$0xff] %v192_v21 }
  0x1d   : > { %195 = vst [vmem:[%s795_s26 + $0xb0] sm:$0xff] %v194_v22  ;;  %197 = vst [vmem:[%s795_s26 + $0xb8] sm:$0xff] %v196_v23  ;;  %v198_v24 = vld [vmem:[%s787_s25 + $0x180] sm:$0xff]  ;;  %v200_v25 = vld [vmem:[%s787_s25 + $0x188] sm:$0xff] }
  0x1e   : > { %v202_v26 = vld [vmem:[%s787_s25 + $0x1a0] sm:$0xff]  ;;  %199 = vst [vmem:[%s795_s26 + $0xc0] sm:$0xff] %v198_v24  ;;  %201 = vst [vmem:[%s795_s26 + $0xc8] sm:$0xff] %v200_v25  ;;  %v204_v27 = vld [vmem:[%s787_s25 + $0x1a8] sm:$0xff] }
  0x1f   : > { %203 = vst [vmem:[%s795_s26 + $0xd0] sm:$0xff] %v202_v26  ;;  %205 = vst [vmem:[%s795_s26 + $0xd8] sm:$0xff] %v204_v27 }
  0x20 PF: > { %p600_p5 = scmp.ge.s32.totalorder %s730_s14, 1  ;;  %p210_p6 = scmp.lt.s32.totalorder %s730_s14, 3 }
  0x22   : > { %p211_p7 = pnand %p600_p5, %p210_p6 }
  0x23   : > { %s217_s27 = sand.u32 (!%p211_p7), 1, %s722_s12   ;;  %v732_v28 = vmov (!%p211_p7), 0   ;;  %v277_v29 = vld [vmem:[%s903_s2] sm:$0xf] (!%p211_p7)  ;;  %vm423_vm0 = vcmask (!%p211_p7), 1045504   ;;  %vm419_vm1 = vcmask (!%p211_p7), 883712  }
  0x24   : > { %214 = sbr.rel (%p211_p7) target bundleno = 289 (0x121), region = 51  ;;  %468 = vmatprep.mubr.bf16.mxu0 (!%p211_p7), %v732_v28  ;;  %509 = vmatprep.mubr.bf16.mxu1 (!%p211_p7), %v732_v28  ;;  %v248_v60 = vld [vmem:[%s901_s0] sm:$0x3] (!%p211_p7)  ;;  %s601_s7 = sshll.u32 (!%p211_p7), %s594_s15, 2 }
  0x25   : > { %s639_s28 = smul.u32 (!%p211_p7), 224, %s217_s27  ;;  %665 = vset.pattern.permute.xlu0 (!%p211_p7), %v732_v28  ;;  %p242_p8 = scmp.lt.s32.totalorder (!%p211_p7), %s601_s7, 7 }
  0x26   : > { %280 = vperm.xlu0 (!%p211_p7), %665, %v277_v29  }
  0x27   : > { %s853_s4 = scalar_lea.vmem (!%p211_p7), [#allocation2], %s639_s28 }
  0x28   : > { %v666_v30 = vld [vmem:[%s853_s4 + $0x4] ss:$16 sps:$4 sm:$0xff] (!%p211_p7)   ;;  %v668_v31 = vld [vmem:[%s853_s4 + $0xc] ss:$16 sps:$4 sm:$0xff] (!%p211_p7)   ;;  %v670_v32 = vld [vmem:[%s853_s4] ss:$16 sps:$4 sm:$0xff] (!%p211_p7)  }
  0x29   : > { %436 = vmatprep.subr.bf16.mxu0 (!%p211_p7), %v666_v30  ;;  %v671_v33 = vld [vmem:[%s853_s4 + $0x8] ss:$16 sps:$4 sm:$0xff] (!%p211_p7)   ;;  %477 = vmatprep.subr.bf16.mxu1 (!%p211_p7), %v668_v31  ;;  %v672_v34 = vld [vmem:[%s853_s4 + $0x24] ss:$16 sps:$4 sm:$0xff] (!%p211_p7)   ;;  %v674_v35 = vld [vmem:[%s853_s4 + $0x2c] ss:$16 sps:$4 sm:$0xff] (!%p211_p7)  }
  0x2a   : > { %437 = vmatpush1.bf16.msra.mxu0 (!%p211_p7), %v670_v32  ;;  %478 = vmatpush1.bf16.msra.mxu1 (!%p211_p7), %v671_v33  ;;  %v676_v36 = vld [vmem:[%s853_s4 + $0x20] ss:$16 sps:$4 sm:$0xff] (!%p211_p7)   ;;  %v677_v37 = vld [vmem:[%s853_s4 + $0x28] ss:$16 sps:$4 sm:$0xff] (!%p211_p7)   ;;  %v678_v38 = vld [vmem:[%s853_s4 + $0x44] ss:$16 sps:$4 sm:$0xff] (!%p211_p7)  }
  0x2b   : > { %438 = vmatprep.subr.bf16.mxu0 %v672_v34  ;;  %479 = vmatprep.subr.bf16.mxu1 %v674_v35  ;;  %v680_v39 = vld [vmem:[%s853_s4 + $0x4c] ss:$16 sps:$4 sm:$0xff]   ;;  %v682_v40 = vld [vmem:[%s853_s4 + $0x40] ss:$16 sps:$4 sm:$0xff]   ;;  %v683_v41 = vld [vmem:[%s853_s4 + $0x48] ss:$16 sps:$4 sm:$0xff]  }
  0x2c   : > { %v684_v42 = vld [vmem:[%s853_s4 + $0x64] ss:$16 sps:$4 sm:$0xff]   ;;  %v686_v43 = vld [vmem:[%s853_s4 + $0x6c] ss:$16 sps:$4 sm:$0xff]   ;;  %v688_v44 = vld [vmem:[%s853_s4 + $0x60] ss:$16 sps:$4 sm:$0xff]  }
  0x2d   : > { %v689_v45 = vld [vmem:[%s853_s4 + $0x68] ss:$16 sps:$4 sm:$0xff]   ;;  %v690_v46 = vld [vmem:[%s853_s4 + $0x84] ss:$16 sps:$4 sm:$0xff]   ;;  %v692_v47 = vld [vmem:[%s853_s4 + $0x8c] ss:$16 sps:$4 sm:$0xff]  }
  0x2e   : > { %439 = vmatpush1.bf16.msra.mxu0 %v676_v36  ;;  %480 = vmatpush1.bf16.msra.mxu1 %v677_v37  ;;  %v694_v48 = vld [vmem:[%s853_s4 + $0x80] ss:$16 sps:$4 sm:$0xff]   ;;  %v695_v49 = vld [vmem:[%s853_s4 + $0x88] ss:$16 sps:$4 sm:$0xff]   ;;  %v696_v50 = vld [vmem:[%s853_s4 + $0xa4] ss:$16 sps:$4 sm:$0xff]  }
  0x2f   : > { %440 = vmatprep.subr.bf16.mxu0 %v678_v38  ;;  %481 = vmatprep.subr.bf16.mxu1 %v680_v39  ;;  %v698_v51 = vld [vmem:[%s853_s4 + $0xac] ss:$16 sps:$4 sm:$0xff]   ;;  %v700_v52 = vld [vmem:[%s853_s4 + $0xa0] ss:$16 sps:$4 sm:$0xff]   ;;  %v701_v53 = vld [vmem:[%s853_s4 + $0xa8] ss:$16 sps:$4 sm:$0xff]  }
  0x30   : > { %v702_v54 = vld [vmem:[%s853_s4 + $0xc4] ss:$16 sps:$4 sm:$0x3f]   ;;  %v704_v55 = vld [vmem:[%s853_s4 + $0xcc] ss:$16 sps:$4 sm:$0x3f]  }
  0x31   : > { %v706_v56 = vld [vmem:[%s853_s4 + $0xc0] ss:$16 sps:$4 sm:$0x3f]   ;;  %v707_v57 = vld [vmem:[%s853_s4 + $0xc8] ss:$16 sps:$4 sm:$0x3f]  }
  0x32   : > { %441 = vmatpush1.bf16.msra.mxu0 %v682_v40  ;;  %482 = vmatpush1.bf16.msra.mxu1 %v683_v41  ;;  %v425_v58 = vsel %vm423_vm0, %v706_v56, 0  ;;  %v431_v59 = vsel %vm423_vm0, %v707_v57, 0  ;;  %s909_s7 = smov (!%p242_p8, %s601_s7), 7 }
  0x33   : > { %442 = vmatprep.subr.bf16.mxu0 %v684_v42  ;;  %483 = vmatprep.subr.bf16.mxu1 %v686_v43  ;;  %s602_s8 = sshll.u32 %s909_s7, 2 }
  0x34   : > { %s245_s11 = scalar_lea.vmem %s904_s3, %s602_s8 }
  0x36   : > { %443 = vmatpush1.bf16.msra.mxu0 %v688_v44  ;;  %484 = vmatpush1.bf16.msra.mxu1 %v689_v45 }
  0x37   : > { %444 = vmatprep.subr.bf16.mxu0 %v690_v46  ;;  %485 = vmatprep.subr.bf16.mxu1 %v692_v47 }
  0x3a   : > { %445 = vmatpush1.bf16.msra.mxu0 %v694_v48  ;;  %486 = vmatpush1.bf16.msra.mxu1 %v695_v49 }
  0x3b   : > { %446 = vmatprep.subr.bf16.mxu0 %v696_v50  ;;  %487 = vmatprep.subr.bf16.mxu1 %v698_v51 }
  0x3e   : > { %447 = vmatpush1.bf16.msra.mxu0 %v700_v52  ;;  %488 = vmatpush1.bf16.msra.mxu1 %v701_v53 }
  0x3f   : > { %631 = vmatprep.subr.msk.bf16.mxu0 %vm423_vm0, %v702_v54  ;;  %633 = vmatprep.subr.msk.bf16.mxu1 %vm423_vm0, %v704_v55 }
  0x42   : > { %449 = vmatpush1.bf16.msra.mxu0 %v425_v58  ;;  %490 = vmatpush1.bf16.msra.mxu1 %v431_v59 }
  0x45   : > { %632 = vmatmul.mubr.msk.bf16.vlgmr.msra.gmra.mrb[0].mxu0 %vm419_vm1, %v248_v60  ;;  %634 = vmatmul.mubr.msk.bf16.vlgmr.msra.gmra.mrb[0].mxu1 %vm419_vm1, %v248_v60 }
  0xa5   : > { %v281_v61 = vpop.permute.xlu0 %280 }
 0x118   : > { %v470_v62 = vpop.f32.mrb[0].mxu0  ;;  %v511_v63 = vpop.f32.mrb[0].mxu1 }
 0x119   : > { %v471_v0 = vadd.f32 %v470_v62, %v281_v61  ;;  %v512_v1 = vadd.f32 %v511_v63, %v281_v61  ;;  %v472_v2 = vpop.f32.mrb[1].mxu0  ;;  %v513_v3 = vpop.f32.mrb[1].mxu1 }
 0x11a   : > { %v473_v4 = vadd.f32 %v472_v2, %v281_v61  ;;  %v514_v5 = vadd.f32 %v513_v3, %v281_v61  ;;  %v474_v6 = vpop.f32.mrb[2].mxu0  ;;  %v515_v7 = vpop.f32.mrb[2].mxu1 }
 0x11b   : > { %v518_v8 = vmax.f32 %v471_v0, 0.0  ;;  %v520_v9 = vmax.f32 %v512_v1, 0.0  ;;  %v475_v10 = vpop.f32.mrb[3].mxu0  ;;  %v516_v11 = vpop.f32.mrb[3].mxu1 }
 0x11c   : > { %v519_v12 = vmax.f32 %v473_v4, 0.0  ;;  %v521_v13 = vmax.f32 %v514_v5, 0.0 }
 0x11e   : > { %v526_v14 = vcombine.low %v518_v8, %v519_v12  ;;  %v527_v15 = vcombine.low %v520_v9, %v521_v13 }
 0x120   : > { %530 = vst [vmem:[%s245_s11] sm:$0xff] %v526_v14  ;;  %531 = vst [vmem:[%s245_s11 + $0x8] sm:$0xff] %v527_v15 }
 0x121 PF: > { %p10_p9 = scmp.ge.s32.totalorder %s770_s16, 4   ;;  %s905_s12 = smov %s726_s13 }
 0x122   : > { %s906_s13 = smov %s779_s19  ;;  %s907_s14 = smov %s770_s16 }
 0x123   :  { %12 = sbr.rel (!%p10_p9) target bundleno = 2 (0x2), region = 90 }

// kernel: unet_forward.12
= control target key start
LH: loop header
LB: loop body
LE: loop exit
PB: predicated region body
PF: predicated region fallthrough
CT: control target
= control target key end

     0   :  { %s747_s12 = smov 0   ;;  %s749_s13 = smov 0   ;;  %s895_s0 = inlined_call_operand.vmem [shape: bf16[8,108], index: 0, kind: input, shape index: {}]   ;;  %s896_s1 = inlined_call_operand.vmem [shape: bf16[108,1024], index: 1, kind: input, shape index: {}]   ;;  %s897_s2 = inlined_call_operand.vmem [shape: f32[8,1], index: 2, kind: input, shape index: {}]   ;;  %s898_s3 = inlined_call_operand.vmem [shape: f32[8,1024], index: 3, kind: output, shape index: {}]  }
   0x1   :  { %s751_s14 = smov 0  }
   0x2 LB: > { %s588_s15 = sadd.s32 4294967295, %s724_s14   ;;  %s764_s16 = sadd.s32 1, %s724_s14   ;;  %s724_s14 = sphi %s751_s14, %s901_s14   ;;  %s720_s13 = sphi %s749_s13, %s900_s13   ;;  %s716_s12 = sphi %s747_s12, %s899_s12  }
   0x3   : > { %s38_s17 = ssub.s32 %s724_s14, %s764_s16  ;;  %s41_s18 = sadd.s32 1, %s720_s13 }
   0x4   : > { %p39_p0 = scmp.eq.s32.totalorder %s38_s17, 0  ;;  %p48_p1 = scmp.ne.s32.totalorder %s720_s13, %s716_s12 }
   0x5   : > { %p49_p2 = scmp.eq.s32.totalorder %s724_s14, 0  ;;  %p591_p4 = scmp.ge.s32.totalorder %s724_s14, 2 }
   0x6   : > { %s773_s19 = scalar_select %p39_p0, %s720_s13, %s41_s18  }
   0x7   : > { %p50_p3 = por %p49_p2, %p48_p1  ;;  %127 = sbr.rel (%p591_p4) target bundleno = 32 (0x20), region = 24 }
   0xe   : > { %130 = sbr.rel (!%p50_p3) target bundleno = 32 (0x20), region = 28  ;;  %s132_s20 = sand.u32 (%p50_p3), 1, %s720_s13  }
   0xf   : > { %s631_s21 = sshll.u32 (%p50_p3), %s724_s14, 4  ;;  %s632_s22 = smul.u32 (%p50_p3), 224, %s132_s20 }
  0x10   : > { %s781_s25 = scalar_lea.vmem (%p50_p3), %s896_s1, %s631_s21 }
  0x11   : > { %v150_v0 = vld [vmem:[%s781_s25] sm:$0xff] (%p50_p3)  ;;  %v152_v1 = vld [vmem:[%s781_s25 + $0x8] sm:$0xff] (%p50_p3)  ;;  %s789_s26 = scalar_lea.vmem (%p50_p3), [#allocation2], %s632_s22 }
  0x12   : > { %v154_v2 = vld [vmem:[%s781_s25 + $0x20] sm:$0xff] (%p50_p3)  ;;  %v156_v3 = vld [vmem:[%s781_s25 + $0x28] sm:$0xff] (%p50_p3)  ;;  %151 = vst [vmem:[%s789_s26] sm:$0xff] (%p50_p3), %v150_v0  ;;  %153 = vst [vmem:[%s789_s26 + $0x8] sm:$0xff] (%p50_p3), %v152_v1 }
  0x13   : > { %v158_v4 = vld [vmem:[%s781_s25 + $0x40] sm:$0xff] (%p50_p3)  ;;  %v160_v5 = vld [vmem:[%s781_s25 + $0x48] sm:$0xff] (%p50_p3)  ;;  %155 = vst [vmem:[%s789_s26 + $0x10] sm:$0xff] (%p50_p3), %v154_v2  ;;  %157 = vst [vmem:[%s789_s26 + $0x18] sm:$0xff] (%p50_p3), %v156_v3 }
  0x14   : > { %159 = vst [vmem:[%s789_s26 + $0x20] sm:$0xff] (%p50_p3), %v158_v4  ;;  %161 = vst [vmem:[%s789_s26 + $0x28] sm:$0xff] (%p50_p3), %v160_v5  ;;  %v162_v6 = vld [vmem:[%s781_s25 + $0x60] sm:$0xff] (%p50_p3)  ;;  %v164_v7 = vld [vmem:[%s781_s25 + $0x68] sm:$0xff] (%p50_p3) }
  0x15   : > { %v166_v8 = vld [vmem:[%s781_s25 + $0x80] sm:$0xff]  ;;  %163 = vst [vmem:[%s789_s26 + $0x30] sm:$0xff] %v162_v6  ;;  %165 = vst [vmem:[%s789_s26 + $0x38] sm:$0xff] %v164_v7  ;;  %v168_v9 = vld [vmem:[%s781_s25 + $0x88] sm:$0xff] }
  0x16   : > { %167 = vst [vmem:[%s789_s26 + $0x40] sm:$0xff] %v166_v8  ;;  %v170_v10 = vld [vmem:[%s781_s25 + $0xa0] sm:$0xff]  ;;  %v172_v11 = vld [vmem:[%s781_s25 + $0xa8] sm:$0xff]  ;;  %169 = vst [vmem:[%s789_s26 + $0x48] sm:$0xff] %v168_v9 }
  0x17   : > { %171 = vst [vmem:[%s789_s26 + $0x50] sm:$0xff] %v170_v10  ;;  %173 = vst [vmem:[%s789_s26 + $0x58] sm:$0xff] %v172_v11  ;;  %v174_v12 = vld [vmem:[%s781_s25 + $0xc0] sm:$0xff]  ;;  %v176_v13 = vld [vmem:[%s781_s25 + $0xc8] sm:$0xff] }
  0x18   : > { %v178_v14 = vld [vmem:[%s781_s25 + $0xe0] sm:$0xff]  ;;  %175 = vst [vmem:[%s789_s26 + $0x60] sm:$0xff] %v174_v12  ;;  %177 = vst [vmem:[%s789_s26 + $0x68] sm:$0xff] %v176_v13  ;;  %v180_v15 = vld [vmem:[%s781_s25 + $0xe8] sm:$0xff] }
  0x19   : > { %179 = vst [vmem:[%s789_s26 + $0x70] sm:$0xff] %v178_v14  ;;  %v182_v16 = vld [vmem:[%s781_s25 + $0x100] sm:$0xff]  ;;  %v184_v17 = vld [vmem:[%s781_s25 + $0x108] sm:$0xff]  ;;  %181 = vst [vmem:[%s789_s26 + $0x78] sm:$0xff] %v180_v15 }
  0x1a   : > { %183 = vst [vmem:[%s789_s26 + $0x80] sm:$0xff] %v182_v16  ;;  %185 = vst [vmem:[%s789_s26 + $0x88] sm:$0xff] %v184_v17  ;;  %v186_v18 = vld [vmem:[%s781_s25 + $0x120] sm:$0xff]  ;;  %v188_v19 = vld [vmem:[%s781_s25 + $0x128] sm:$0xff] }
  0x1b   : > { %v190_v20 = vld [vmem:[%s781_s25 + $0x140] sm:$0xff]  ;;  %187 = vst [vmem:[%s789_s26 + $0x90] sm:$0xff] %v186_v18  ;;  %189 = vst [vmem:[%s789_s26 + $0x98] sm:$0xff] %v188_v19  ;;  %v192_v21 = vld [vmem:[%s781_s25 + $0x148] sm:$0xff] }
  0x1c   : > { %191 = vst [vmem:[%s789_s26 + $0xa0] sm:$0xff] %v190_v20  ;;  %v194_v22 = vld [vmem:[%s781_s25 + $0x160] sm:$0xff]  ;;  %v196_v23 = vld [vmem:[%s781_s25 + $0x168] sm:$0xff]  ;;  %193 = vst [vmem:[%s789_s26 + $0xa8] sm:$0xff] %v192_v21 }
  0x1d   : > { %195 = vst [vmem:[%s789_s26 + $0xb0] sm:$0xff] %v194_v22  ;;  %197 = vst [vmem:[%s789_s26 + $0xb8] sm:$0xff] %v196_v23  ;;  %v198_v24 = vld [vmem:[%s781_s25 + $0x180] sm:$0xff]  ;;  %v200_v25 = vld [vmem:[%s781_s25 + $0x188] sm:$0xff] }
  0x1e   : > { %v202_v26 = vld [vmem:[%s781_s25 + $0x1a0] sm:$0xff]  ;;  %199 = vst [vmem:[%s789_s26 + $0xc0] sm:$0xff] %v198_v24  ;;  %201 = vst [vmem:[%s789_s26 + $0xc8] sm:$0xff] %v200_v25  ;;  %v204_v27 = vld [vmem:[%s781_s25 + $0x1a8] sm:$0xff] }
  0x1f   : > { %203 = vst [vmem:[%s789_s26 + $0xd0] sm:$0xff] %v202_v26  ;;  %205 = vst [vmem:[%s789_s26 + $0xd8] sm:$0xff] %v204_v27 }
  0x20 PF: > { %p594_p5 = scmp.ge.s32.totalorder %s724_s14, 1  ;;  %p210_p6 = scmp.lt.s32.totalorder %s724_s14, 3 }
  0x22   : > { %p211_p7 = pnand %p594_p5, %p210_p6 }
  0x23   : > { %s217_s27 = sand.u32 (!%p211_p7), 1, %s716_s12   ;;  %v726_v28 = vmov (!%p211_p7), 0   ;;  %v277_v29 = vld [vmem:[%s897_s2] sm:$0xff] (!%p211_p7)  ;;  %vm423_vm0 = vcmask (!%p211_p7), 1045504   ;;  %vm419_vm1 = vcmask (!%p211_p7), 883712   ;;  %s595_s7 = sshll.u32 (!%p211_p7), %s588_s15, 2 }
  0x24   : > { %214 = sbr.rel (%p211_p7) target bundleno = 287 (0x11f), region = 51  ;;  %468 = vmatprep.mubr.bf16.mxu0 (!%p211_p7), %v726_v28  ;;  %509 = vmatprep.mubr.bf16.mxu1 (!%p211_p7), %v726_v28  ;;  %v248_v60 = vld [vmem:[%s895_s0] sm:$0xf] (!%p211_p7)  ;;  %p242_p8 = scmp.lt.s32.totalorder (!%p211_p7), %s595_s7, 7 }
  0x25   : > { %s633_s28 = smul.u32 (!%p211_p7), 224, %s217_s27  ;;  %659 = vset.pattern.permute.xlu0 (!%p211_p7), %v726_v28 }
  0x26   : > { %280 = vperm.xlu0 (!%p211_p7), %659, %v277_v29  }
  0x27   : > { %s847_s4 = scalar_lea.vmem (!%p211_p7), [#allocation2], %s633_s28 }
  0x28   : > { %v660_v30 = vld [vmem:[%s847_s4 + $0x4] ss:$16 sps:$4 sm:$0xff] (!%p211_p7)   ;;  %v662_v31 = vld [vmem:[%s847_s4 + $0xc] ss:$16 sps:$4 sm:$0xff] (!%p211_p7)   ;;  %v664_v32 = vld [vmem:[%s847_s4] ss:$16 sps:$4 sm:$0xff] (!%p211_p7)  }
  0x29   : > { %436 = vmatprep.subr.bf16.mxu0 (!%p211_p7), %v660_v30  ;;  %v665_v33 = vld [vmem:[%s847_s4 + $0x8] ss:$16 sps:$4 sm:$0xff] (!%p211_p7)   ;;  %477 = vmatprep.subr.bf16.mxu1 (!%p211_p7), %v662_v31  ;;  %v666_v34 = vld [vmem:[%s847_s4 + $0x24] ss:$16 sps:$4 sm:$0xff] (!%p211_p7)   ;;  %v668_v35 = vld [vmem:[%s847_s4 + $0x2c] ss:$16 sps:$4 sm:$0xff] (!%p211_p7)  }
  0x2a   : > { %437 = vmatpush1.bf16.msra.mxu0 (!%p211_p7), %v664_v32  ;;  %478 = vmatpush1.bf16.msra.mxu1 (!%p211_p7), %v665_v33  ;;  %v670_v36 = vld [vmem:[%s847_s4 + $0x20] ss:$16 sps:$4 sm:$0xff] (!%p211_p7)   ;;  %v671_v37 = vld [vmem:[%s847_s4 + $0x28] ss:$16 sps:$4 sm:$0xff] (!%p211_p7)   ;;  %v672_v38 = vld [vmem:[%s847_s4 + $0x44] ss:$16 sps:$4 sm:$0xff] (!%p211_p7)  }
  0x2b   : > { %438 = vmatprep.subr.bf16.mxu0 %v666_v34  ;;  %479 = vmatprep.subr.bf16.mxu1 %v668_v35  ;;  %v674_v39 = vld [vmem:[%s847_s4 + $0x4c] ss:$16 sps:$4 sm:$0xff]   ;;  %v676_v40 = vld [vmem:[%s847_s4 + $0x40] ss:$16 sps:$4 sm:$0xff]   ;;  %v677_v41 = vld [vmem:[%s847_s4 + $0x48] ss:$16 sps:$4 sm:$0xff]  }
  0x2c   : > { %v678_v42 = vld [vmem:[%s847_s4 + $0x64] ss:$16 sps:$4 sm:$0xff]   ;;  %v680_v43 = vld [vmem:[%s847_s4 + $0x6c] ss:$16 sps:$4 sm:$0xff]   ;;  %v682_v44 = vld [vmem:[%s847_s4 + $0x60] ss:$16 sps:$4 sm:$0xff]  }
  0x2d   : > { %v683_v45 = vld [vmem:[%s847_s4 + $0x68] ss:$16 sps:$4 sm:$0xff]   ;;  %v684_v46 = vld [vmem:[%s847_s4 + $0x84] ss:$16 sps:$4 sm:$0xff]   ;;  %v686_v47 = vld [vmem:[%s847_s4 + $0x8c] ss:$16 sps:$4 sm:$0xff]  }
  0x2e   : > { %439 = vmatpush1.bf16.msra.mxu0 %v670_v36  ;;  %480 = vmatpush1.bf16.msra.mxu1 %v671_v37  ;;  %v688_v48 = vld [vmem:[%s847_s4 + $0x80] ss:$16 sps:$4 sm:$0xff]   ;;  %v689_v49 = vld [vmem:[%s847_s4 + $0x88] ss:$16 sps:$4 sm:$0xff]   ;;  %v690_v50 = vld [vmem:[%s847_s4 + $0xa4] ss:$16 sps:$4 sm:$0xff]  }
  0x2f   : > { %440 = vmatprep.subr.bf16.mxu0 %v672_v38  ;;  %481 = vmatprep.subr.bf16.mxu1 %v674_v39  ;;  %v692_v51 = vld [vmem:[%s847_s4 + $0xac] ss:$16 sps:$4 sm:$0xff]   ;;  %v694_v52 = vld [vmem:[%s847_s4 + $0xa0] ss:$16 sps:$4 sm:$0xff]   ;;  %v695_v53 = vld [vmem:[%s847_s4 + $0xa8] ss:$16 sps:$4 sm:$0xff]  }
  0x30   : > { %v696_v54 = vld [vmem:[%s847_s4 + $0xc4] ss:$16 sps:$4 sm:$0x3f]   ;;  %v698_v55 = vld [vmem:[%s847_s4 + $0xcc] ss:$16 sps:$4 sm:$0x3f]  }
  0x31   : > { %v700_v56 = vld [vmem:[%s847_s4 + $0xc0] ss:$16 sps:$4 sm:$0x3f]   ;;  %v701_v57 = vld [vmem:[%s847_s4 + $0xc8] ss:$16 sps:$4 sm:$0x3f]  }
  0x32   : > { %441 = vmatpush1.bf16.msra.mxu0 %v676_v40  ;;  %482 = vmatpush1.bf16.msra.mxu1 %v677_v41  ;;  %v425_v58 = vsel %vm423_vm0, %v700_v56, 0  ;;  %v431_v59 = vsel %vm423_vm0, %v701_v57, 0  ;;  %s903_s7 = smov (!%p242_p8, %s595_s7), 7 }
  0x33   : > { %442 = vmatprep.subr.bf16.mxu0 %v678_v42  ;;  %483 = vmatprep.subr.bf16.mxu1 %v680_v43  ;;  %s596_s8 = sshll.u32 %s903_s7, 3 }
  0x34   : > { %s245_s11 = scalar_lea.vmem %s898_s3, %s596_s8 }
  0x36   : > { %443 = vmatpush1.bf16.msra.mxu0 %v682_v44  ;;  %484 = vmatpush1.bf16.msra.mxu1 %v683_v45 }
  0x37   : > { %444 = vmatprep.subr.bf16.mxu0 %v684_v46  ;;  %485 = vmatprep.subr.bf16.mxu1 %v686_v47 }
  0x3a   : > { %445 = vmatpush1.bf16.msra.mxu0 %v688_v48  ;;  %486 = vmatpush1.bf16.msra.mxu1 %v689_v49 }
  0x3b   : > { %446 = vmatprep.subr.bf16.mxu0 %v690_v50  ;;  %487 = vmatprep.subr.bf16.mxu1 %v692_v51 }
  0x3e   : > { %447 = vmatpush1.bf16.msra.mxu0 %v694_v52  ;;  %488 = vmatpush1.bf16.msra.mxu1 %v695_v53 }
  0x3f   : > { %625 = vmatprep.subr.msk.bf16.mxu0 %vm423_vm0, %v696_v54  ;;  %627 = vmatprep.subr.msk.bf16.mxu1 %vm423_vm0, %v698_v55 }
  0x42   : > { %449 = vmatpush1.bf16.msra.mxu0 %v425_v58  ;;  %490 = vmatpush1.bf16.msra.mxu1 %v431_v59 }
  0x45   : > { %626 = vmatmul.mubr.msk.bf16.vlgmr.msra.gmra.mrb[0].mxu0 %vm419_vm1, %v248_v60  ;;  %628 = vmatmul.mubr.msk.bf16.vlgmr.msra.gmra.mrb[0].mxu1 %vm419_vm1, %v248_v60 }
  0xa5   : > { %v281_v61 = vpop.permute.xlu0 %280 }
 0x118   : > { %v470_v62 = vpop.f32.mrb[0].mxu0  ;;  %v511_v63 = vpop.f32.mrb[0].mxu1 }
 0x119   : > { %v471_v0 = vadd.f32 %v470_v62, %v281_v61  ;;  %v512_v1 = vadd.f32 %v511_v63, %v281_v61  ;;  %v472_v2 = vpop.f32.mrb[1].mxu0  ;;  %v513_v3 = vpop.f32.mrb[1].mxu1 }
 0x11a   : > { %v473_v4 = vadd.f32 %v472_v2, %v281_v61  ;;  %v514_v5 = vadd.f32 %v513_v3, %v281_v61  ;;  %v474_v6 = vpop.f32.mrb[2].mxu0  ;;  %v515_v7 = vpop.f32.mrb[2].mxu1 }
 0x11b   : > { %v518_v8 = vmax.f32 %v471_v0, 0.0  ;;  %v475_v9 = vpop.f32.mrb[3].mxu0  ;;  %v516_v10 = vpop.f32.mrb[3].mxu1  ;;  %v520_v12 = vmax.f32 %v512_v1, 0.0 }
 0x11c   : > { %v519_v11 = vmax.f32 %v473_v4, 0.0  ;;  %v521_v13 = vmax.f32 %v514_v5, 0.0 }
 0x11d   : > { %522 = vst [vmem:[%s245_s11] sm:$0xff] %v518_v8  ;;  %524 = vst [vmem:[%s245_s11 + $0x10] sm:$0xff] %v520_v12 }
 0x11e   : > { %523 = vst [vmem:[%s245_s11 + $0x8] sm:$0xff] %v519_v11  ;;  %525 = vst [vmem:[%s245_s11 + $0x18] sm:$0xff] %v521_v13 }
 0x11f PF: > { %p10_p9 = scmp.ge.s32.totalorder %s764_s16, 4   ;;  %s899_s12 = smov %s720_s13 }
 0x120   : > { %s900_s13 = smov %s773_s19  ;;  %s901_s14 = smov %s764_s16 }
 0x121   :  { %12 = sbr.rel (!%p10_p9) target bundleno = 2 (0x2), region = 90 }

// kernel: unet_forward.13
= control target key start
LH: loop header
LB: loop body
LE: loop exit
PB: predicated region body
PF: predicated region fallthrough
CT: control target
= control target key end

     0   :  { %s1692_s12 = smov 0   ;;  %s1694_s13 = smov 0   ;;  %s2095_s0 = inlined_call_operand.vmem [shape: bf16[8,432], index: 0, kind: input, shape index: {}]   ;;  %s2096_s1 = inlined_call_operand.vmem [shape: bf16[432,1024], index: 1, kind: input, shape index: {}]   ;;  %s2097_s2 = inlined_call_operand.vmem [shape: f32[8,1], index: 2, kind: input, shape index: {}]   ;;  %s2098_s3 = inlined_call_operand.vmem [shape: f32[8,1024], index: 3, kind: output, shape index: {}]  }
   0x1   :  { %s1696_s14 = smov 0  }
   0x2 LB: > { %s1315_s15 = sadd.s32 4294967295, %s1669_s14   ;;  %s1709_s16 = sadd.s32 1, %s1669_s14   ;;  %s1669_s14 = sphi %s1696_s14, %s2101_s14   ;;  %s1665_s13 = sphi %s1694_s13, %s2100_s13   ;;  %s1661_s12 = sphi %s1692_s12, %s2099_s12  }
   0x3   : > { %s38_s17 = ssub.s32 %s1669_s14, %s1709_s16  ;;  %s41_s18 = sadd.s32 1, %s1665_s13 }
   0x4   : > { %p39_p0 = scmp.eq.s32.totalorder %s38_s17, 0  ;;  %p48_p1 = scmp.ne.s32.totalorder %s1665_s13, %s1661_s12 }
   0x5   : > { %p49_p2 = scmp.eq.s32.totalorder %s1669_s14, 0  ;;  %p1318_p4 = scmp.ge.s32.totalorder %s1669_s14, 2 }
   0x6   : > { %s1718_s19 = scalar_select %p39_p0, %s1665_s13, %s41_s18  }
   0x7   : > { %p50_p3 = por %p49_p2, %p48_p1  ;;  %127 = sbr.rel (%p1318_p4) target bundleno = 72 (0x48), region = 24 }
   0xe   : > { %130 = sbr.rel (!%p50_p3) target bundleno = 72 (0x48), region = 28  ;;  %s132_s20 = sand.u32 (%p50_p3), 1, %s1665_s13  }
   0xf   : > { %s1440_s21 = sshll.u32 (%p50_p3), %s1669_s14, 4  ;;  %s1453_s22 = smul.u32 (%p50_p3), 864, %s132_s20 }
  0x10   : > { %s1726_s25 = scalar_lea.vmem (%p50_p3), %s2096_s1, %s1440_s21 }
  0x11   : > { %v150_v0 = vld [vmem:[%s1726_s25] sm:$0xff] (%p50_p3)  ;;  %v152_v1 = vld [vmem:[%s1726_s25 + $0x8] sm:$0xff] (%p50_p3)  ;;  %s1734_s26 = scalar_lea.vmem (%p50_p3), [#allocation2], %s1453_s22 }
  0x12   : > { %v154_v2 = vld [vmem:[%s1726_s25 + $0x20] sm:$0xff] (%p50_p3)  ;;  %v156_v3 = vld [vmem:[%s1726_s25 + $0x28] sm:$0xff] (%p50_p3)  ;;  %151 = vst [vmem:[%s1734_s26] sm:$0xff] (%p50_p3), %v150_v0  ;;  %153 = vst [vmem:[%s1734_s26 + $0x8] sm:$0xff] (%p50_p3), %v152_v1 }
  0x13   : > { %v158_v4 = vld [vmem:[%s1726_s25 + $0x40] sm:$0xff] (%p50_p3)  ;;  %v160_v5 = vld [vmem:[%s1726_s25 + $0x48] sm:$0xff] (%p50_p3)  ;;  %155 = vst [vmem:[%s1734_s26 + $0x10] sm:$0xff] (%p50_p3), %v154_v2  ;;  %157 = vst [vmem:[%s1734_s26 + $0x18] sm:$0xff] (%p50_p3), %v156_v3 }
  0x14   : > { %159 = vst [vmem:[%s1734_s26 + $0x20] sm:$0xff] (%p50_p3), %v158_v4  ;;  %161 = vst [vmem:[%s1734_s26 + $0x28] sm:$0xff] (%p50_p3), %v160_v5  ;;  %v162_v6 = vld [vmem:[%s1726_s25 + $0x60] sm:$0xff] (%p50_p3)  ;;  %v164_v7 = vld [vmem:[%s1726_s25 + $0x68] sm:$0xff] (%p50_p3) }
  0x15   : > { %v166_v8 = vld [vmem:[%s1726_s25 + $0x80] sm:$0xff]  ;;  %163 = vst [vmem:[%s1734_s26 + $0x30] sm:$0xff] %v162_v6  ;;  %165 = vst [vmem:[%s1734_s26 + $0x38] sm:$0xff] %v164_v7  ;;  %v168_v9 = vld [vmem:[%s1726_s25 + $0x88] sm:$0xff] }
  0x16   : > { %167 = vst [vmem:[%s1734_s26 + $0x40] sm:$0xff] %v166_v8  ;;  %v170_v10 = vld [vmem:[%s1726_s25 + $0xa0] sm:$0xff]  ;;  %v172_v11 = vld [vmem:[%s1726_s25 + $0xa8] sm:$0xff]  ;;  %169 = vst [vmem:[%s1734_s26 + $0x48] sm:$0xff] %v168_v9 }
  0x17   : > { %171 = vst [vmem:[%s1734_s26 + $0x50] sm:$0xff] %v170_v10  ;;  %173 = vst [vmem:[%s1734_s26 + $0x58] sm:$0xff] %v172_v11  ;;  %v174_v12 = vld [vmem:[%s1726_s25 + $0xc0] sm:$0xff]  ;;  %v176_v13 = vld [vmem:[%s1726_s25 + $0xc8] sm:$0xff] }
  0x18   : > { %v178_v14 = vld [vmem:[%s1726_s25 + $0xe0] sm:$0xff]  ;;  %175 = vst [vmem:[%s1734_s26 + $0x60] sm:$0xff] %v174_v12  ;;  %177 = vst [vmem:[%s1734_s26 + $0x68] sm:$0xff] %v176_v13  ;;  %v180_v15 = vld [vmem:[%s1726_s25 + $0xe8] sm:$0xff] }
  0x19   : > { %179 = vst [vmem:[%s1734_s26 + $0x70] sm:$0xff] %v178_v14  ;;  %v182_v16 = vld [vmem:[%s1726_s25 + $0x100] sm:$0xff]  ;;  %v184_v17 = vld [vmem:[%s1726_s25 + $0x108] sm:$0xff]  ;;  %181 = vst [vmem:[%s1734_s26 + $0x78] sm:$0xff] %v180_v15 }
  0x1a   : > { %183 = vst [vmem:[%s1734_s26 + $0x80] sm:$0xff] %v182_v16  ;;  %185 = vst [vmem:[%s1734_s26 + $0x88] sm:$0xff] %v184_v17  ;;  %v186_v18 = vld [vmem:[%s1726_s25 + $0x120] sm:$0xff]  ;;  %v188_v19 = vld [vmem:[%s1726_s25 + $0x128] sm:$0xff] }
  0x1b   : > { %v190_v20 = vld [vmem:[%s1726_s25 + $0x140] sm:$0xff]  ;;  %187 = vst [vmem:[%s1734_s26 + $0x90] sm:$0xff] %v186_v18  ;;  %189 = vst [vmem:[%s1734_s26 + $0x98] sm:$0xff] %v188_v19  ;;  %v192_v21 = vld [vmem:[%s1726_s25 + $0x148] sm:$0xff] }
  0x1c   : > { %191 = vst [vmem:[%s1734_s26 + $0xa0] sm:$0xff] %v190_v20  ;;  %v194_v22 = vld [vmem:[%s1726_s25 + $0x160] sm:$0xff]  ;;  %v196_v23 = vld [vmem:[%s1726_s25 + $0x168] sm:$0xff]  ;;  %193 = vst [vmem:[%s1734_s26 + $0xa8] sm:$0xff] %v192_v21 }
  0x1d   : > { %195 = vst [vmem:[%s1734_s26 + $0xb0] sm:$0xff] %v194_v22  ;;  %197 = vst [vmem:[%s1734_s26 + $0xb8] sm:$0xff] %v196_v23  ;;  %v198_v24 = vld [vmem:[%s1726_s25 + $0x180] sm:$0xff]  ;;  %v200_v25 = vld [vmem:[%s1726_s25 + $0x188] sm:$0xff] }
  0x1e   : > { %v202_v26 = vld [vmem:[%s1726_s25 + $0x1a0] sm:$0xff]  ;;  %199 = vst [vmem:[%s1734_s26 + $0xc0] sm:$0xff] %v198_v24  ;;  %201 = vst [vmem:[%s1734_s26 + $0xc8] sm:$0xff] %v200_v25  ;;  %v204_v27 = vld [vmem:[%s1726_s25 + $0x1a8] sm:$0xff] }
  0x1f   : > { %203 = vst [vmem:[%s1734_s26 + $0xd0] sm:$0xff] %v202_v26  ;;  %v206_v28 = vld [vmem:[%s1726_s25 + $0x1c0] sm:$0xff]  ;;  %v208_v29 = vld [vmem:[%s1726_s25 + $0x1c8] sm:$0xff]  ;;  %205 = vst [vmem:[%s1734_s26 + $0xd8] sm:$0xff] %v204_v27 }
  0x20   : > { %207 = vst [vmem:[%s1734_s26 + $0xe0] sm:$0xff] %v206_v28  ;;  %209 = vst [vmem:[%s1734_s26 + $0xe8] sm:$0xff] %v208_v29  ;;  %v210_v30 = vld [vmem:[%s1726_s25 + $0x1e0] sm:$0xff]  ;;  %v212_v31 = vld [vmem:[%s1726_s25 + $0x1e8] sm:$0xff] }
  0x21   : > { %v214_v32 = vld [vmem:[%s1726_s25 + $0x200] sm:$0xff]  ;;  %211 = vst [vmem:[%s1734_s26 + $0xf0] sm:$0xff] %v210_v30  ;;  %213 = vst [vmem:[%s1734_s26 + $0xf8] sm:$0xff] %v212_v31  ;;  %v216_v33 = vld [vmem:[%s1726_s25 + $0x208] sm:$0xff] }
  0x22   : > { %215 = vst [vmem:[%s1734_s26 + $0x100] sm:$0xff] %v214_v32  ;;  %v218_v34 = vld [vmem:[%s1726_s25 + $0x220] sm:$0xff]  ;;  %v220_v35 = vld [vmem:[%s1726_s25 + $0x228] sm:$0xff]  ;;  %217 = vst [vmem:[%s1734_s26 + $0x108] sm:$0xff] %v216_v33 }
  0x23   : > { %219 = vst [vmem:[%s1734_s26 + $0x110] sm:$0xff] %v218_v34  ;;  %221 = vst [vmem:[%s1734_s26 + $0x118] sm:$0xff] %v220_v35  ;;  %v222_v36 = vld [vmem:[%s1726_s25 + $0x240] sm:$0xff]  ;;  %v224_v37 = vld [vmem:[%s1726_s25 + $0x248] sm:$0xff] }
  0x24   : > { %v226_v38 = vld [vmem:[%s1726_s25 + $0x260] sm:$0xff]  ;;  %223 = vst [vmem:[%s1734_s26 + $0x120] sm:$0xff] %v222_v36  ;;  %225 = vst [vmem:[%s1734_s26 + $0x128] sm:$0xff] %v224_v37  ;;  %v228_v39 = vld [vmem:[%s1726_s25 + $0x268] sm:$0xff] }
  0x25   : > { %227 = vst [vmem:[%s1734_s26 + $0x130] sm:$0xff] %v226_v38  ;;  %v230_v40 = vld [vmem:[%s1726_s25 + $0x280] sm:$0xff]  ;;  %v232_v41 = vld [vmem:[%s1726_s25 + $0x288] sm:$0xff]  ;;  %229 = vst [vmem:[%s1734_s26 + $0x138] sm:$0xff] %v228_v39 }
  0x26   : > { %231 = vst [vmem:[%s1734_s26 + $0x140] sm:$0xff] %v230_v40  ;;  %233 = vst [vmem:[%s1734_s26 + $0x148] sm:$0xff] %v232_v41  ;;  %v234_v42 = vld [vmem:[%s1726_s25 + $0x2a0] sm:$0xff]  ;;  %v236_v43 = vld [vmem:[%s1726_s25 + $0x2a8] sm:$0xff] }
  0x27   : > { %v238_v44 = vld [vmem:[%s1726_s25 + $0x2c0] sm:$0xff]  ;;  %235 = vst [vmem:[%s1734_s26 + $0x150] sm:$0xff] %v234_v42  ;;  %237 = vst [vmem:[%s1734_s26 + $0x158] sm:$0xff] %v236_v43  ;;  %v240_v45 = vld [vmem:[%s1726_s25 + $0x2c8] sm:$0xff] }
  0x28   : > { %239 = vst [vmem:[%s1734_s26 + $0x160] sm:$0xff] %v238_v44  ;;  %v242_v46 = vld [vmem:[%s1726_s25 + $0x2e0] sm:$0xff]  ;;  %v244_v47 = vld [vmem:[%s1726_s25 + $0x2e8] sm:$0xff]  ;;  %241 = vst [vmem:[%s1734_s26 + $0x168] sm:$0xff] %v240_v45 }
  0x29   : > { %243 = vst [vmem:[%s1734_s26 + $0x170] sm:$0xff] %v242_v46  ;;  %245 = vst [vmem:[%s1734_s26 + $0x178] sm:$0xff] %v244_v47  ;;  %v246_v48 = vld [vmem:[%s1726_s25 + $0x300] sm:$0xff]  ;;  %v248_v49 = vld [vmem:[%s1726_s25 + $0x308] sm:$0xff] }
  0x2a   : > { %v250_v50 = vld [vmem:[%s1726_s25 + $0x320] sm:$0xff]  ;;  %247 = vst [vmem:[%s1734_s26 + $0x180] sm:$0xff] %v246_v48  ;;  %249 = vst [vmem:[%s1734_s26 + $0x188] sm:$0xff] %v248_v49  ;;  %v252_v51 = vld [vmem:[%s1726_s25 + $0x328] sm:$0xff] }
  0x2b   : > { %251 = vst [vmem:[%s1734_s26 + $0x190] sm:$0xff] %v250_v50  ;;  %v254_v52 = vld [vmem:[%s1726_s25 + $0x340] sm:$0xff]  ;;  %v256_v53 = vld [vmem:[%s1726_s25 + $0x348] sm:$0xff]  ;;  %253 = vst [vmem:[%s1734_s26 + $0x198] sm:$0xff] %v252_v51 }
  0x2c   : > { %255 = vst [vmem:[%s1734_s26 + $0x1a0] sm:$0xff] %v254_v52  ;;  %257 = vst [vmem:[%s1734_s26 + $0x1a8] sm:$0xff] %v256_v53  ;;  %v258_v54 = vld [vmem:[%s1726_s25 + $0x360] sm:$0xff]  ;;  %v260_v55 = vld [vmem:[%s1726_s25 + $0x368] sm:$0xff] }
  0x2d   : > { %v262_v56 = vld [vmem:[%s1726_s25 + $0x380] sm:$0xff]  ;;  %259 = vst [vmem:[%s1734_s26 + $0x1b0] sm:$0xff] %v258_v54  ;;  %261 = vst [vmem:[%s1734_s26 + $0x1b8] sm:$0xff] %v260_v55  ;;  %v264_v57 = vld [vmem:[%s1726_s25 + $0x388] sm:$0xff] }
  0x2e   : > { %263 = vst [vmem:[%s1734_s26 + $0x1c0] sm:$0xff] %v262_v56  ;;  %v266_v58 = vld [vmem:[%s1726_s25 + $0x3a0] sm:$0xff]  ;;  %v268_v59 = vld [vmem:[%s1726_s25 + $0x3a8] sm:$0xff]  ;;  %265 = vst [vmem:[%s1734_s26 + $0x1c8] sm:$0xff] %v264_v57 }
  0x2f   : > { %267 = vst [vmem:[%s1734_s26 + $0x1d0] sm:$0xff] %v266_v58  ;;  %269 = vst [vmem:[%s1734_s26 + $0x1d8] sm:$0xff] %v268_v59  ;;  %v270_v60 = vld [vmem:[%s1726_s25 + $0x3c0] sm:$0xff]  ;;  %v272_v61 = vld [vmem:[%s1726_s25 + $0x3c8] sm:$0xff] }
  0x30   : > { %v274_v62 = vld [vmem:[%s1726_s25 + $0x3e0] sm:$0xff]  ;;  %271 = vst [vmem:[%s1734_s26 + $0x1e0] sm:$0xff] %v270_v60  ;;  %273 = vst [vmem:[%s1734_s26 + $0x1e8] sm:$0xff] %v272_v61  ;;  %v276_v63 = vld [vmem:[%s1726_s25 + $0x3e8] sm:$0xff] }
  0x31   : > { %275 = vst [vmem:[%s1734_s26 + $0x1f0] sm:$0xff] %v274_v62  ;;  %v278_v0 = vld [vmem:[%s1726_s25 + $0x400] sm:$0xff]  ;;  %v280_v1 = vld [vmem:[%s1726_s25 + $0x408] sm:$0xff]  ;;  %277 = vst [vmem:[%s1734_s26 + $0x1f8] sm:$0xff] %v276_v63 }
  0x32   : > { %279 = vst [vmem:[%s1734_s26 + $0x200] sm:$0xff] %v278_v0  ;;  %281 = vst [vmem:[%s1734_s26 + $0x208] sm:$0xff] %v280_v1  ;;  %v282_v2 = vld [vmem:[%s1726_s25 + $0x420] sm:$0xff]  ;;  %v284_v3 = vld [vmem:[%s1726_s25 + $0x428] sm:$0xff] }
  0x33   : > { %v286_v4 = vld [vmem:[%s1726_s25 + $0x440] sm:$0xff]  ;;  %283 = vst [vmem:[%s1734_s26 + $0x210] sm:$0xff] %v282_v2  ;;  %285 = vst [vmem:[%s1734_s26 + $0x218] sm:$0xff] %v284_v3  ;;  %v288_v5 = vld [vmem:[%s1726_s25 + $0x448] sm:$0xff] }
  0x34   : > { %287 = vst [vmem:[%s1734_s26 + $0x220] sm:$0xff] %v286_v4  ;;  %v290_v6 = vld [vmem:[%s1726_s25 + $0x460] sm:$0xff]  ;;  %v292_v7 = vld [vmem:[%s1726_s25 + $0x468] sm:$0xff]  ;;  %289 = vst [vmem:[%s1734_s26 + $0x228] sm:$0xff] %v288_v5 }
  0x35   : > { %291 = vst [vmem:[%s1734_s26 + $0x230] sm:$0xff] %v290_v6  ;;  %293 = vst [vmem:[%s1734_s26 + $0x238] sm:$0xff] %v292_v7  ;;  %v294_v8 = vld [vmem:[%s1726_s25 + $0x480] sm:$0xff]  ;;  %v296_v9 = vld [vmem:[%s1726_s25 + $0x488] sm:$0xff] }
  0x36   : > { %v298_v10 = vld [vmem:[%s1726_s25 + $0x4a0] sm:$0xff]  ;;  %295 = vst [vmem:[%s1734_s26 + $0x240] sm:$0xff] %v294_v8  ;;  %297 = vst [vmem:[%s1734_s26 + $0x248] sm:$0xff] %v296_v9  ;;  %v300_v11 = vld [vmem:[%s1726_s25 + $0x4a8] sm:$0xff] }
  0x37   : > { %299 = vst [vmem:[%s1734_s26 + $0x250] sm:$0xff] %v298_v10  ;;  %v302_v12 = vld [vmem:[%s1726_s25 + $0x4c0] sm:$0xff]  ;;  %v304_v13 = vld [vmem:[%s1726_s25 + $0x4c8] sm:$0xff]  ;;  %301 = vst [vmem:[%s1734_s26 + $0x258] sm:$0xff] %v300_v11 }
  0x38   : > { %303 = vst [vmem:[%s1734_s26 + $0x260] sm:$0xff] %v302_v12  ;;  %305 = vst [vmem:[%s1734_s26 + $0x268] sm:$0xff] %v304_v13  ;;  %v306_v14 = vld [vmem:[%s1726_s25 + $0x4e0] sm:$0xff]  ;;  %v308_v15 = vld [vmem:[%s1726_s25 + $0x4e8] sm:$0xff] }
  0x39   : > { %v310_v16 = vld [vmem:[%s1726_s25 + $0x500] sm:$0xff]  ;;  %307 = vst [vmem:[%s1734_s26 + $0x270] sm:$0xff] %v306_v14  ;;  %309 = vst [vmem:[%s1734_s26 + $0x278] sm:$0xff] %v308_v15  ;;  %v312_v17 = vld [vmem:[%s1726_s25 + $0x508] sm:$0xff] }
  0x3a   : > { %311 = vst [vmem:[%s1734_s26 + $0x280] sm:$0xff] %v310_v16  ;;  %v314_v18 = vld [vmem:[%s1726_s25 + $0x520] sm:$0xff]  ;;  %v316_v19 = vld [vmem:[%s1726_s25 + $0x528] sm:$0xff]  ;;  %313 = vst [vmem:[%s1734_s26 + $0x288] sm:$0xff] %v312_v17 }
  0x3b   : > { %315 = vst [vmem:[%s1734_s26 + $0x290] sm:$0xff] %v314_v18  ;;  %317 = vst [vmem:[%s1734_s26 + $0x298] sm:$0xff] %v316_v19  ;;  %v318_v20 = vld [vmem:[%s1726_s25 + $0x540] sm:$0xff]  ;;  %v320_v21 = vld [vmem:[%s1726_s25 + $0x548] sm:$0xff] }
  0x3c   : > { %v322_v22 = vld [vmem:[%s1726_s25 + $0x560] sm:$0xff]  ;;  %319 = vst [vmem:[%s1734_s26 + $0x2a0] sm:$0xff] %v318_v20  ;;  %321 = vst [vmem:[%s1734_s26 + $0x2a8] sm:$0xff] %v320_v21  ;;  %v324_v23 = vld [vmem:[%s1726_s25 + $0x568] sm:$0xff] }
  0x3d   : > { %323 = vst [vmem:[%s1734_s26 + $0x2b0] sm:$0xff] %v322_v22  ;;  %v326_v24 = vld [vmem:[%s1726_s25 + $0x580] sm:$0xff]  ;;  %v328_v25 = vld [vmem:[%s1726_s25 + $0x588] sm:$0xff]  ;;  %325 = vst [vmem:[%s1734_s26 + $0x2b8] sm:$0xff] %v324_v23 }
  0x3e   : > { %327 = vst [vmem:[%s1734_s26 + $0x2c0] sm:$0xff] %v326_v24  ;;  %329 = vst [vmem:[%s1734_s26 + $0x2c8] sm:$0xff] %v328_v25  ;;  %v330_v26 = vld [vmem:[%s1726_s25 + $0x5a0] sm:$0xff]  ;;  %v332_v27 = vld [vmem:[%s1726_s25 + $0x5a8] sm:$0xff] }
  0x3f   : > { %v334_v28 = vld [vmem:[%s1726_s25 + $0x5c0] sm:$0xff]  ;;  %331 = vst [vmem:[%s1734_s26 + $0x2d0] sm:$0xff] %v330_v26  ;;  %333 = vst [vmem:[%s1734_s26 + $0x2d8] sm:$0xff] %v332_v27  ;;  %v336_v29 = vld [vmem:[%s1726_s25 + $0x5c8] sm:$0xff] }
  0x40   : > { %335 = vst [vmem:[%s1734_s26 + $0x2e0] sm:$0xff] %v334_v28  ;;  %v338_v30 = vld [vmem:[%s1726_s25 + $0x5e0] sm:$0xff]  ;;  %v340_v31 = vld [vmem:[%s1726_s25 + $0x5e8] sm:$0xff]  ;;  %337 = vst [vmem:[%s1734_s26 + $0x2e8] sm:$0xff] %v336_v29 }
  0x41   : > { %339 = vst [vmem:[%s1734_s26 + $0x2f0] sm:$0xff] %v338_v30  ;;  %341 = vst [vmem:[%s1734_s26 + $0x2f8] sm:$0xff] %v340_v31  ;;  %v342_v32 = vld [vmem:[%s1726_s25 + $0x600] sm:$0xff]  ;;  %v344_v33 = vld [vmem:[%s1726_s25 + $0x608] sm:$0xff] }
  0x42   : > { %v346_v34 = vld [vmem:[%s1726_s25 + $0x620] sm:$0xff]  ;;  %343 = vst [vmem:[%s1734_s26 + $0x300] sm:$0xff] %v342_v32  ;;  %345 = vst [vmem:[%s1734_s26 + $0x308] sm:$0xff] %v344_v33  ;;  %v348_v35 = vld [vmem:[%s1726_s25 + $0x628] sm:$0xff] }
  0x43   : > { %347 = vst [vmem:[%s1734_s26 + $0x310] sm:$0xff] %v346_v34  ;;  %v350_v36 = vld [vmem:[%s1726_s25 + $0x640] sm:$0xff]  ;;  %v352_v37 = vld [vmem:[%s1726_s25 + $0x648] sm:$0xff]  ;;  %349 = vst [vmem:[%s1734_s26 + $0x318] sm:$0xff] %v348_v35 }
  0x44   : > { %351 = vst [vmem:[%s1734_s26 + $0x320] sm:$0xff] %v350_v36  ;;  %353 = vst [vmem:[%s1734_s26 + $0x328] sm:$0xff] %v352_v37  ;;  %v354_v38 = vld [vmem:[%s1726_s25 + $0x660] sm:$0xff]  ;;  %v356_v39 = vld [vmem:[%s1726_s25 + $0x668] sm:$0xff] }
  0x45   : > { %v358_v40 = vld [vmem:[%s1726_s25 + $0x680] sm:$0xff]  ;;  %355 = vst [vmem:[%s1734_s26 + $0x330] sm:$0xff] %v354_v38  ;;  %357 = vst [vmem:[%s1734_s26 + $0x338] sm:$0xff] %v356_v39  ;;  %v360_v41 = vld [vmem:[%s1726_s25 + $0x688] sm:$0xff] }
  0x46   : > { %359 = vst [vmem:[%s1734_s26 + $0x340] sm:$0xff] %v358_v40  ;;  %v362_v42 = vld [vmem:[%s1726_s25 + $0x6a0] sm:$0xff]  ;;  %v364_v43 = vld [vmem:[%s1726_s25 + $0x6a8] sm:$0xff]  ;;  %361 = vst [vmem:[%s1734_s26 + $0x348] sm:$0xff] %v360_v41 }
  0x47   : > { %363 = vst [vmem:[%s1734_s26 + $0x350] sm:$0xff] %v362_v42  ;;  %365 = vst [vmem:[%s1734_s26 + $0x358] sm:$0xff] %v364_v43 }
  0x48 PF: > { %p1321_p5 = scmp.ge.s32.totalorder %s1669_s14, 1  ;;  %p370_p6 = scmp.lt.s32.totalorder %s1669_s14, 3 }
  0x4a   : > { %p371_p7 = pnand %p1321_p5, %p370_p6 }
  0x4b   : > { %s377_s27 = sand.u32 (!%p371_p7), 1, %s1661_s12   ;;  %v1952_v44 = vld [vmem:[%s2095_s0] sm:$0xff] (!%p371_p7)  ;;  %v1671_v47 = vmov (!%p371_p7), 0   ;;  %vm1077_vm0 = vcmask (!%p371_p7), 392192   ;;  %s1322_s9 = sshll.u32 (!%p371_p7), %s1315_s15, 2 }
  0x4c   : > { %374 = sbr.rel (%p371_p7) target bundleno = 407 (0x197), region = 51  ;;  %v518_v45 = vld [vmem:[%s2097_s2] sm:$0xff] (!%p371_p7)  ;;  %v1325_v46 = vcombine.high (!%p371_p7), %v1952_v44, %v1952_v44  ;;  %1480 = vset.pattern.permute.xlu0 (!%p371_p7), %v1671_v47  ;;  %p402_p8 = scmp.lt.s32.totalorder (!%p371_p7), %s1322_s9, 7 }
  0x4d   : > { %s1454_s5 = smul.u32 (!%p371_p7), 864, %s377_s27  ;;  %521 = vperm.xlu0 (!%p371_p7), %1480, %v518_v45  }
  0x4e   : > { %1113 = vmatprep.mubr.bf16.mxu0 (!%p371_p7), %v1325_v46  ;;  %1195 = vmatprep.mubr.bf16.mxu1 (!%p371_p7), %v1325_v46 }
  0x4f   : > { %s1959_s6 = scalar_lea.vmem (!%p371_p7), [#allocation2], %s1454_s5 }
  0x50   : > { %v1481_v48 = vld [vmem:[%s1959_s6 + $0x4] ss:$16 sps:$4 sm:$0xff] (!%p371_p7)   ;;  %v1483_v49 = vld [vmem:[%s1959_s6 + $0xc] ss:$16 sps:$4 sm:$0xff] (!%p371_p7)   ;;  %v1485_v50 = vld [vmem:[%s1959_s6] ss:$16 sps:$4 sm:$0xff] (!%p371_p7)  }
  0x51   : > { %1081 = vmatprep.subr.bf16.mxu0 (!%p371_p7), %v1481_v48  ;;  %v1486_v51 = vld [vmem:[%s1959_s6 + $0x8] ss:$16 sps:$4 sm:$0xff] (!%p371_p7)   ;;  %1163 = vmatprep.subr.bf16.mxu1 (!%p371_p7), %v1483_v49  ;;  %v1487_v52 = vld [vmem:[%s1959_s6 + $0x24] ss:$16 sps:$4 sm:$0xff] (!%p371_p7)   ;;  %v1489_v53 = vld [vmem:[%s1959_s6 + $0x2c] ss:$16 sps:$4 sm:$0xff] (!%p371_p7)  }
  0x52   : > { %1082 = vmatpush1.bf16.msra.mxu0 (!%p371_p7), %v1485_v50  ;;  %1164 = vmatpush1.bf16.msra.mxu1 (!%p371_p7), %v1486_v51  ;;  %v1491_v54 = vld [vmem:[%s1959_s6 + $0x20] ss:$16 sps:$4 sm:$0xff] (!%p371_p7)   ;;  %v1492_v55 = vld [vmem:[%s1959_s6 + $0x28] ss:$16 sps:$4 sm:$0xff] (!%p371_p7)   ;;  %v1493_v56 = vld [vmem:[%s1959_s6 + $0x44] ss:$16 sps:$4 sm:$0xff] (!%p371_p7)  }
  0x53   : > { %1083 = vmatprep.subr.bf16.mxu0 %v1487_v52  ;;  %1165 = vmatprep.subr.bf16.mxu1 %v1489_v53  ;;  %v1495_v57 = vld [vmem:[%s1959_s6 + $0x4c] ss:$16 sps:$4 sm:$0xff]   ;;  %v1497_v58 = vld [vmem:[%s1959_s6 + $0x40] ss:$16 sps:$4 sm:$0xff]   ;;  %v1498_v59 = vld [vmem:[%s1959_s6 + $0x48] ss:$16 sps:$4 sm:$0xff]   ;;  %v1324_v52 = vcombine.low %v1952_v44, %v1952_v44 }
  0x54   : > { %v1499_v60 = vld [vmem:[%s1959_s6 + $0x64] ss:$16 sps:$4 sm:$0xff]   ;;  %v1501_v61 = vld [vmem:[%s1959_s6 + $0x6c] ss:$16 sps:$4 sm:$0xff]   ;;  %v1503_v62 = vld [vmem:[%s1959_s6 + $0x60] ss:$16 sps:$4 sm:$0xff]  }
  0x55   : > { %v1504_v63 = vld [vmem:[%s1959_s6 + $0x68] ss:$16 sps:$4 sm:$0xff]   ;;  %v1505_v0 = vld [vmem:[%s1959_s6 + $0x84] ss:$16 sps:$4 sm:$0xff]   ;;  %v1507_v1 = vld [vmem:[%s1959_s6 + $0x8c] ss:$16 sps:$4 sm:$0xff]  }
  0x56   : > { %1084 = vmatpush1.bf16.msra.mxu0 %v1491_v54  ;;  %1166 = vmatpush1.bf16.msra.mxu1 %v1492_v55  ;;  %v1509_v2 = vld [vmem:[%s1959_s6 + $0x80] ss:$16 sps:$4 sm:$0xff]   ;;  %v1510_v3 = vld [vmem:[%s1959_s6 + $0x88] ss:$16 sps:$4 sm:$0xff]   ;;  %v1511_v4 = vld [vmem:[%s1959_s6 + $0xa4] ss:$16 sps:$4 sm:$0xff]  }
  0x57   : > { %1085 = vmatprep.subr.bf16.mxu0 %v1493_v56  ;;  %1167 = vmatprep.subr.bf16.mxu1 %v1495_v57  ;;  %v1513_v5 = vld [vmem:[%s1959_s6 + $0xac] ss:$16 sps:$4 sm:$0xff]   ;;  %v1515_v6 = vld [vmem:[%s1959_s6 + $0xa0] ss:$16 sps:$4 sm:$0xff]   ;;  %v1516_v7 = vld [vmem:[%s1959_s6 + $0xa8] ss:$16 sps:$4 sm:$0xff]  }
  0x58   : > { %v1517_v8 = vld [vmem:[%s1959_s6 + $0xc4] ss:$16 sps:$4 sm:$0xff]   ;;  %v1519_v9 = vld [vmem:[%s1959_s6 + $0xcc] ss:$16 sps:$4 sm:$0xff]   ;;  %v1521_v10 = vld [vmem:[%s1959_s6 + $0xc0] ss:$16 sps:$4 sm:$0xff]  }
  0x59   : > { %v1522_v11 = vld [vmem:[%s1959_s6 + $0xc8] ss:$16 sps:$4 sm:$0xff]   ;;  %v1523_v12 = vld [vmem:[%s1959_s6 + $0xe4] ss:$16 sps:$4 sm:$0xff]   ;;  %v1525_v13 = vld [vmem:[%s1959_s6 + $0xec] ss:$16 sps:$4 sm:$0xff]  }
  0x5a   : > { %1086 = vmatpush1.bf16.msra.mxu0 %v1497_v58  ;;  %1168 = vmatpush1.bf16.msra.mxu1 %v1498_v59  ;;  %v1527_v14 = vld [vmem:[%s1959_s6 + $0xe0] ss:$16 sps:$4 sm:$0xff]   ;;  %v1528_v15 = vld [vmem:[%s1959_s6 + $0xe8] ss:$16 sps:$4 sm:$0xff]   ;;  %v1529_v16 = vld [vmem:[%s1959_s6 + $0x104] ss:$16 sps:$4 sm:$0xff]  }
  0x5b   : > { %1087 = vmatprep.subr.bf16.mxu0 %v1499_v60  ;;  %1169 = vmatprep.subr.bf16.mxu1 %v1501_v61  ;;  %v1531_v17 = vld [vmem:[%s1959_s6 + $0x10c] ss:$16 sps:$4 sm:$0xff]   ;;  %v1533_v18 = vld [vmem:[%s1959_s6 + $0x100] ss:$16 sps:$4 sm:$0xff]   ;;  %v1534_v19 = vld [vmem:[%s1959_s6 + $0x108] ss:$16 sps:$4 sm:$0xff]  }
  0x5c   : > { %v1535_v20 = vld [vmem:[%s1959_s6 + $0x124] ss:$16 sps:$4 sm:$0xff]   ;;  %v1537_v21 = vld [vmem:[%s1959_s6 + $0x12c] ss:$16 sps:$4 sm:$0xff]   ;;  %v1539_v22 = vld [vmem:[%s1959_s6 + $0x120] ss:$16 sps:$4 sm:$0xff]  }
  0x5d   : > { %v1540_v23 = vld [vmem:[%s1959_s6 + $0x128] ss:$16 sps:$4 sm:$0xff]   ;;  %v1541_v24 = vld [vmem:[%s1959_s6 + $0x144] ss:$16 sps:$4 sm:$0xff]   ;;  %v1543_v25 = vld [vmem:[%s1959_s6 + $0x14c] ss:$16 sps:$4 sm:$0xff]  }
  0x5e   : > { %1088 = vmatpush1.bf16.msra.mxu0 %v1503_v62  ;;  %1170 = vmatpush1.bf16.msra.mxu1 %v1504_v63  ;;  %v1545_v26 = vld [vmem:[%s1959_s6 + $0x140] ss:$16 sps:$4 sm:$0xff]   ;;  %v1546_v27 = vld [vmem:[%s1959_s6 + $0x148] ss:$16 sps:$4 sm:$0xff]   ;;  %v1547_v28 = vld [vmem:[%s1959_s6 + $0x164] ss:$16 sps:$4 sm:$0xff]  }
  0x5f   : > { %1089 = vmatprep.subr.bf16.mxu0 %v1505_v0  ;;  %1171 = vmatprep.subr.bf16.mxu1 %v1507_v1  ;;  %v1549_v29 = vld [vmem:[%s1959_s6 + $0x16c] ss:$16 sps:$4 sm:$0xff]   ;;  %v1551_v30 = vld [vmem:[%s1959_s6 + $0x160] ss:$16 sps:$4 sm:$0xff]   ;;  %v1552_v31 = vld [vmem:[%s1959_s6 + $0x168] ss:$16 sps:$4 sm:$0xff]  }
  0x60   : > { %v1553_v32 = vld [vmem:[%s1959_s6 + $0x184] ss:$16 sps:$4 sm:$0xff]   ;;  %v1555_v33 = vld [vmem:[%s1959_s6 + $0x18c] ss:$16 sps:$4 sm:$0xff]   ;;  %v1557_v34 = vld [vmem:[%s1959_s6 + $0x180] ss:$16 sps:$4 sm:$0xff]  }
  0x61   : > { %v1558_v35 = vld [vmem:[%s1959_s6 + $0x188] ss:$16 sps:$4 sm:$0xff]   ;;  %v1559_v36 = vld [vmem:[%s1959_s6 + $0x1a4] ss:$16 sps:$4 sm:$0xff]   ;;  %v1561_v37 = vld [vmem:[%s1959_s6 + $0x1ac] ss:$16 sps:$4 sm:$0xff]  }
  0x62   : > { %1090 = vmatpush1.bf16.msra.mxu0 %v1509_v2  ;;  %1172 = vmatpush1.bf16.msra.mxu1 %v1510_v3  ;;  %v1563_v38 = vld [vmem:[%s1959_s6 + $0x1a0] ss:$16 sps:$4 sm:$0xff]   ;;  %v1564_v39 = vld [vmem:[%s1959_s6 + $0x1a8] ss:$16 sps:$4 sm:$0xff]   ;;  %v1565_v40 = vld [vmem:[%s1959_s6 + $0x1c4] ss:$16 sps:$4 sm:$0xff]  }
  0x63   : > { %1091 = vmatprep.subr.bf16.mxu0 %v1511_v4  ;;  %1173 = vmatprep.subr.bf16.mxu1 %v1513_v5  ;;  %v1567_v41 = vld [vmem:[%s1959_s6 + $0x1cc] ss:$16 sps:$4 sm:$0xff]   ;;  %v1569_v42 = vld [vmem:[%s1959_s6 + $0x1c0] ss:$16 sps:$4 sm:$0xff]   ;;  %v1570_v43 = vld [vmem:[%s1959_s6 + $0x1c8] ss:$16 sps:$4 sm:$0xff]  }
  0x64   : > { %v1571_v45 = vld [vmem:[%s1959_s6 + $0x1e4] ss:$16 sps:$4 sm:$0xff]   ;;  %v1573_v46 = vld [vmem:[%s1959_s6 + $0x1ec] ss:$16 sps:$4 sm:$0xff]   ;;  %v1575_v47 = vld [vmem:[%s1959_s6 + $0x1e0] ss:$16 sps:$4 sm:$0xff]  }
  0x65   : > { %v1576_v48 = vld [vmem:[%s1959_s6 + $0x1e8] ss:$16 sps:$4 sm:$0xff]   ;;  %v1581_v49 = vld [vmem:[%s1959_s6 + $0x204] ss:$16 sps:$4 sm:$0xff]   ;;  %v1584_v50 = vld [vmem:[%s1959_s6 + $0x20c] ss:$16 sps:$4 sm:$0xff]  }
  0x66   : > { %1092 = vmatpush1.bf16.msra.mxu0 %v1515_v6  ;;  %1174 = vmatpush1.bf16.msra.mxu1 %v1516_v7  ;;  %v2030_v51 = vld [vmem:[%s2095_s0 + $0x8] sm:$0xff]  ;;  %v1579_v53 = vld [vmem:[%s1959_s6 + $0x200] ss:$16 sps:$4 sm:$0xff]   ;;  %v1587_v55 = vld [vmem:[%s1959_s6 + $0x224] ss:$16 sps:$4 sm:$0xff]   ;;  %s2103_s9 = smov (!%p402_p8, %s1322_s9), 7 }
  0x67   : > { %1093 = vmatprep.subr.bf16.mxu0 %v1517_v8  ;;  %1175 = vmatprep.subr.bf16.mxu1 %v1519_v9  ;;  %v1582_v54 = vld [vmem:[%s1959_s6 + $0x208] ss:$16 sps:$4 sm:$0xff]   ;;  %v1590_v56 = vld [vmem:[%s1959_s6 + $0x22c] ss:$16 sps:$4 sm:$0xff]   ;;  %v1327_v57 = vcombine.high %v2030_v51, %v2030_v51  ;;  %v1585_v58 = vld [vmem:[%s1959_s6 + $0x220] ss:$16 sps:$4 sm:$0xff]  }
  0x68   : > { %v1588_v59 = vld [vmem:[%s1959_s6 + $0x228] ss:$16 sps:$4 sm:$0xff]   ;;  %v1593_v44 = vld [vmem:[%s1959_s6 + $0x244] ss:$16 sps:$4 sm:$0xff]   ;;  %v1596_v60 = vld [vmem:[%s1959_s6 + $0x24c] ss:$16 sps:$4 sm:$0xff]  }
  0x69   : > { %v1591_v61 = vld [vmem:[%s1959_s6 + $0x240] ss:$16 sps:$4 sm:$0xff]   ;;  %v1594_v62 = vld [vmem:[%s1959_s6 + $0x248] ss:$16 sps:$4 sm:$0xff]   ;;  %v1599_v63 = vld [vmem:[%s1959_s6 + $0x264] ss:$16 sps:$4 sm:$0xff]  }
  0x6a   : > { %1094 = vmatpush1.bf16.msra.mxu0 %v1521_v10  ;;  %1176 = vmatpush1.bf16.msra.mxu1 %v1522_v11  ;;  %v1602_v0 = vld [vmem:[%s1959_s6 + $0x26c] ss:$16 sps:$4 sm:$0xff]   ;;  %v1597_v1 = vld [vmem:[%s1959_s6 + $0x260] ss:$16 sps:$4 sm:$0xff]   ;;  %v1600_v2 = vld [vmem:[%s1959_s6 + $0x268] ss:$16 sps:$4 sm:$0xff]  }
  0x6b   : > { %1095 = vmatprep.subr.bf16.mxu0 %v1523_v12  ;;  %1177 = vmatprep.subr.bf16.mxu1 %v1525_v13  ;;  %v1605_v3 = vld [vmem:[%s1959_s6 + $0x284] ss:$16 sps:$4 sm:$0xff]   ;;  %v1608_v4 = vld [vmem:[%s1959_s6 + $0x28c] ss:$16 sps:$4 sm:$0xff]   ;;  %v1603_v5 = vld [vmem:[%s1959_s6 + $0x280] ss:$16 sps:$4 sm:$0xff]  }
  0x6c   : > { %v1606_v6 = vld [vmem:[%s1959_s6 + $0x288] ss:$16 sps:$4 sm:$0xff]   ;;  %v1611_v7 = vld [vmem:[%s1959_s6 + $0x2a4] ss:$16 sps:$4 sm:$0xff]   ;;  %v1614_v8 = vld [vmem:[%s1959_s6 + $0x2ac] ss:$16 sps:$4 sm:$0xff]  }
  0x6d   : > { %v1609_v9 = vld [vmem:[%s1959_s6 + $0x2a0] ss:$16 sps:$4 sm:$0xff]   ;;  %v1612_v10 = vld [vmem:[%s1959_s6 + $0x2a8] ss:$16 sps:$4 sm:$0xff]   ;;  %v1617_v11 = vld [vmem:[%s1959_s6 + $0x2c4] ss:$16 sps:$4 sm:$0xff]  }
  0x6e   : > { %1096 = vmatpush1.bf16.msra.mxu0 %v1527_v14  ;;  %1178 = vmatpush1.bf16.msra.mxu1 %v1528_v15  ;;  %v1620_v12 = vld [vmem:[%s1959_s6 + $0x2cc] ss:$16 sps:$4 sm:$0xff]   ;;  %v1615_v13 = vld [vmem:[%s1959_s6 + $0x2c0] ss:$16 sps:$4 sm:$0xff]   ;;  %v1618_v14 = vld [vmem:[%s1959_s6 + $0x2c8] ss:$16 sps:$4 sm:$0xff]  }
  0x6f   : > { %1097 = vmatprep.subr.bf16.mxu0 %v1529_v16  ;;  %1179 = vmatprep.subr.bf16.mxu1 %v1531_v17  ;;  %v1623_v15 = vld [vmem:[%s1959_s6 + $0x2e4] ss:$16 sps:$4 sm:$0xff]   ;;  %v1626_v16 = vld [vmem:[%s1959_s6 + $0x2ec] ss:$16 sps:$4 sm:$0xff]   ;;  %v1621_v17 = vld [vmem:[%s1959_s6 + $0x2e0] ss:$16 sps:$4 sm:$0xff]  }
  0x70   : > { %s1323_s10 = sshll.u32 %s2103_s9, 3 }
  0x71   : > { %s405_s17 = scalar_lea.vmem %s2098_s3, %s1323_s10 }
  0x72   : > { %1098 = vmatpush1.bf16.msra.mxu0 %v1533_v18  ;;  %1180 = vmatpush1.bf16.msra.mxu1 %v1534_v19  ;;  %v1624_v18 = vld [vmem:[%s1959_s6 + $0x2e8] ss:$16 sps:$4 sm:$0xff]   ;;  %v1629_v19 = vld [vmem:[%s1959_s6 + $0x304] ss:$16 sps:$4 sm:$0xff]  }
  0x73   : > { %1099 = vmatprep.subr.bf16.mxu0 %v1535_v20  ;;  %1181 = vmatprep.subr.bf16.mxu1 %v1537_v21  ;;  %v1632_v20 = vld [vmem:[%s1959_s6 + $0x30c] ss:$16 sps:$4 sm:$0xff]   ;;  %v1627_v21 = vld [vmem:[%s1959_s6 + $0x300] ss:$16 sps:$4 sm:$0xff]  }
  0x76   : > { %1100 = vmatpush1.bf16.msra.mxu0 %v1539_v22  ;;  %1182 = vmatpush1.bf16.msra.mxu1 %v1540_v23  ;;  %v1630_v22 = vld [vmem:[%s1959_s6 + $0x308] ss:$16 sps:$4 sm:$0xff]   ;;  %v1635_v23 = vld [vmem:[%s1959_s6 + $0x324] ss:$16 sps:$4 sm:$0xff]  }
  0x77   : > { %1101 = vmatprep.subr.bf16.mxu0 %v1541_v24  ;;  %1183 = vmatprep.subr.bf16.mxu1 %v1543_v25  ;;  %v1638_v24 = vld [vmem:[%s1959_s6 + $0x32c] ss:$16 sps:$4 sm:$0xff]   ;;  %v1633_v25 = vld [vmem:[%s1959_s6 + $0x320] ss:$16 sps:$4 sm:$0xff]  }
  0x7a   : > { %1102 = vmatpush1.bf16.msra.mxu0 %v1545_v26  ;;  %1184 = vmatpush1.bf16.msra.mxu1 %v1546_v27  ;;  %v1636_v26 = vld [vmem:[%s1959_s6 + $0x328] ss:$16 sps:$4 sm:$0xff]   ;;  %v1641_v27 = vld [vmem:[%s1959_s6 + $0x344] ss:$16 sps:$4 sm:$0xff]  }
  0x7b   : > { %1103 = vmatprep.subr.bf16.mxu0 %v1547_v28  ;;  %1185 = vmatprep.subr.bf16.mxu1 %v1549_v29  ;;  %v1644_v28 = vld [vmem:[%s1959_s6 + $0x34c] ss:$16 sps:$4 sm:$0xff]   ;;  %v1639_v29 = vld [vmem:[%s1959_s6 + $0x340] ss:$16 sps:$4 sm:$0xff]  }
  0x7e   : > { %1104 = vmatpush1.bf16.msra.mxu0 %v1551_v30  ;;  %1186 = vmatpush1.bf16.msra.mxu1 %v1552_v31  ;;  %v1642_v30 = vld [vmem:[%s1959_s6 + $0x348] ss:$16 sps:$4 sm:$0xff]   ;;  %v1326_v31 = vcombine.low %v2030_v51, %v2030_v51 }
  0x7f   : > { %1105 = vmatprep.subr.bf16.mxu0 %v1553_v32  ;;  %1187 = vmatprep.subr.bf16.mxu1 %v1555_v33 }
  0x82   : > { %1106 = vmatpush1.bf16.msra.mxu0 %v1557_v34  ;;  %1188 = vmatpush1.bf16.msra.mxu1 %v1558_v35 }
  0x83   : > { %1107 = vmatprep.subr.bf16.mxu0 %v1559_v36  ;;  %1189 = vmatprep.subr.bf16.mxu1 %v1561_v37 }
  0x86   : > { %1108 = vmatpush1.bf16.msra.mxu0 %v1563_v38  ;;  %1190 = vmatpush1.bf16.msra.mxu1 %v1564_v39 }
  0x87   : > { %1109 = vmatprep.subr.bf16.mxu0 %v1565_v40  ;;  %1191 = vmatprep.subr.bf16.mxu1 %v1567_v41 }
  0x8a   : > { %1110 = vmatpush1.bf16.msra.mxu0 %v1569_v42  ;;  %1192 = vmatpush1.bf16.msra.mxu1 %v1570_v43 }
  0x8b   : > { %1111 = vmatprep.subr.bf16.mxu0 %v1571_v45  ;;  %1193 = vmatprep.subr.bf16.mxu1 %v1573_v46 }
  0x8e   : > { %1112 = vmatpush1.bf16.msra.mxu0 %v1575_v47  ;;  %1194 = vmatpush1.bf16.msra.mxu1 %v1576_v48 }
  0x8f   : > { %1122 = vmatprep.subr.bf16.mxu0 %v1581_v49  ;;  %1204 = vmatprep.subr.bf16.mxu1 %v1584_v50 }
  0x91   : > { %1114 = vmatmul.mubr.bf16.vlgmr.msra.gmra.mrb[0].mxu0 %v1324_v52  ;;  %1196 = vmatmul.mubr.bf16.vlgmr.msra.gmra.mrb[0].mxu1 %v1324_v52 }
  0x92   : > { %1123 = vmatpush1.bf16.msra.mxu0 %v1579_v53  ;;  %1205 = vmatpush1.bf16.msra.mxu1 %v1582_v54 }
  0x93   : > { %1124 = vmatprep.subr.bf16.mxu0 %v1587_v55  ;;  %1206 = vmatprep.subr.bf16.mxu1 %v1590_v56 }
  0x94   : > { %1436 = vmatprep.mubr.msk.bf16.mxu0 %vm1077_vm0, %v1327_v57  ;;  %1437 = vmatprep.mubr.msk.bf16.mxu1 %vm1077_vm0, %v1327_v57 }
  0x96   : > { %1125 = vmatpush1.bf16.msra.mxu0 %v1585_v58  ;;  %1207 = vmatpush1.bf16.msra.mxu1 %v1588_v59 }
  0x97   : > { %1126 = vmatprep.subr.bf16.mxu0 %v1593_v44  ;;  %1208 = vmatprep.subr.bf16.mxu1 %v1596_v60 }
  0x9a   : > { %1127 = vmatpush1.bf16.msra.mxu0 %v1591_v61  ;;  %1209 = vmatpush1.bf16.msra.mxu1 %v1594_v62 }
  0x9b   : > { %1128 = vmatprep.subr.bf16.mxu0 %v1599_v63  ;;  %1210 = vmatprep.subr.bf16.mxu1 %v1602_v0 }
  0x9e   : > { %1129 = vmatpush1.bf16.msra.mxu0 %v1597_v1  ;;  %1211 = vmatpush1.bf16.msra.mxu1 %v1600_v2 }
  0x9f   : > { %1130 = vmatprep.subr.bf16.mxu0 %v1605_v3  ;;  %1212 = vmatprep.subr.bf16.mxu1 %v1608_v4 }
  0xa2   : > { %1131 = vmatpush1.bf16.msra.mxu0 %v1603_v5  ;;  %1213 = vmatpush1.bf16.msra.mxu1 %v1606_v6 }
  0xa3   : > { %1132 = vmatprep.subr.bf16.mxu0 %v1611_v7  ;;  %1214 = vmatprep.subr.bf16.mxu1 %v1614_v8 }
  0xa6   : > { %1133 = vmatpush1.bf16.msra.mxu0 %v1609_v9  ;;  %1215 = vmatpush1.bf16.msra.mxu1 %v1612_v10 }
  0xa7   : > { %1134 = vmatprep.subr.bf16.mxu0 %v1617_v11  ;;  %1216 = vmatprep.subr.bf16.mxu1 %v1620_v12 }
  0xaa   : > { %1135 = vmatpush1.bf16.msra.mxu0 %v1615_v13  ;;  %1217 = vmatpush1.bf16.msra.mxu1 %v1618_v14 }
  0xab   : > { %1136 = vmatprep.subr.bf16.mxu0 %v1623_v15  ;;  %1218 = vmatprep.subr.bf16.mxu1 %v1626_v16 }
  0xae   : > { %1137 = vmatpush1.bf16.msra.mxu0 %v1621_v17  ;;  %1219 = vmatpush1.bf16.msra.mxu1 %v1624_v18 }
  0xaf   : > { %1138 = vmatprep.subr.bf16.mxu0 %v1629_v19  ;;  %1220 = vmatprep.subr.bf16.mxu1 %v1632_v20 }
  0xb2   : > { %1139 = vmatpush1.bf16.msra.mxu0 %v1627_v21  ;;  %1221 = vmatpush1.bf16.msra.mxu1 %v1630_v22 }
  0xb3   : > { %1140 = vmatprep.subr.bf16.mxu0 %v1635_v23  ;;  %1222 = vmatprep.subr.bf16.mxu1 %v1638_v24 }
  0xb6   : > { %1141 = vmatpush1.bf16.msra.mxu0 %v1633_v25  ;;  %1223 = vmatpush1.bf16.msra.mxu1 %v1636_v26 }
  0xb7   : > { %1142 = vmatprep.subr.bf16.mxu0 %v1641_v27  ;;  %1224 = vmatprep.subr.bf16.mxu1 %v1644_v28 }
  0xba   : > { %1143 = vmatpush1.bf16.msra.mxu0 %v1639_v29  ;;  %1225 = vmatpush1.bf16.msra.mxu1 %v1642_v30 }
  0xbd   : > { %1155 = vmatmul.mubr.bf16.vlgmr.msra.gmra.mrb[0].mxu0 %v1326_v31  ;;  %1237 = vmatmul.mubr.bf16.vlgmr.msra.gmra.mrb[0].mxu1 %v1326_v31 }
  0xcc   : > { %v522_v32 = vpop.permute.xlu0 %521 }
 0x190   : > { %v1156_v33 = vpop.f32.mrb[0].mxu0  ;;  %v1238_v34 = vpop.f32.mrb[0].mxu1 }
 0x191   : > { %v1441_v35 = vadd.f32 %v1156_v33, %v522_v32  ;;  %v1443_v36 = vadd.f32 %v1238_v34, %v522_v32  ;;  %v1158_v37 = vpop.f32.mrb[1].mxu0  ;;  %v1240_v38 = vpop.f32.mrb[1].mxu1 }
 0x192   : > { %v1442_v39 = vadd.f32 %v1158_v37, %v522_v32  ;;  %v1444_v40 = vadd.f32 %v1240_v38, %v522_v32  ;;  %v1160_v41 = vpop.f32.mrb[2].mxu0  ;;  %v1242_v42 = vpop.f32.mrb[2].mxu1 }
 0x193   : > { %v1245_v43 = vmax.f32 %v1441_v35, 0.0  ;;  %v1161_v45 = vpop.f32.mrb[3].mxu0  ;;  %v1243_v46 = vpop.f32.mrb[3].mxu1  ;;  %v1247_v48 = vmax.f32 %v1443_v36, 0.0 }
 0x194   : > { %v1246_v47 = vmax.f32 %v1442_v39, 0.0  ;;  %v1248_v49 = vmax.f32 %v1444_v40, 0.0 }
 0x195   : > { %1249 = vst [vmem:[%s405_s17] sm:$0xff] %v1245_v43  ;;  %1251 = vst [vmem:[%s405_s17 + $0x10] sm:$0xff] %v1247_v48 }
 0x196   : > { %1250 = vst [vmem:[%s405_s17 + $0x8] sm:$0xff] %v1246_v47  ;;  %1252 = vst [vmem:[%s405_s17 + $0x18] sm:$0xff] %v1248_v49 }
 0x197 PF: > { %p10_p9 = scmp.ge.s32.totalorder %s1709_s16, 4   ;;  %s2099_s12 = smov %s1665_s13 }
 0x198   : > { %s2100_s13 = smov %s1718_s19  ;;  %s2101_s14 = smov %s1709_s16 }
 0x199   :  { %12 = sbr.rel (!%p10_p9) target bundleno = 2 (0x2), region = 90 }

// kernel: unet_forward.14
= control target key start
LH: loop header
LB: loop body
LE: loop exit
PB: predicated region body
PF: predicated region fallthrough
CT: control target
= control target key end

     0   :  { %s1044_s12 = smov 0   ;;  %s1046_s13 = smov 0   ;;  %s1276_s0 = inlined_call_operand.vmem [shape: bf16[4,216], index: 0, kind: input, shape index: {}]   ;;  %s1277_s1 = inlined_call_operand.vmem [shape: bf16[216,1024], index: 1, kind: input, shape index: {}]   ;;  %s1278_s2 = inlined_call_operand.vmem [shape: f32[4,1], index: 2, kind: input, shape index: {}]   ;;  %s1279_s3 = inlined_call_operand.vmem [shape: f32[4,1024], index: 3, kind: output, shape index: {}]  }
   0x1   :  { %s1048_s14 = smov 0  }
   0x2 LB: > { %s816_s15 = sadd.s32 4294967295, %s1021_s14   ;;  %s1061_s16 = sadd.s32 1, %s1021_s14   ;;  %s1021_s14 = sphi %s1048_s14, %s1282_s14   ;;  %s1017_s13 = sphi %s1046_s13, %s1281_s13   ;;  %s1013_s12 = sphi %s1044_s12, %s1280_s12  }
   0x3   : > { %s38_s17 = ssub.s32 %s1021_s14, %s1061_s16  ;;  %s41_s18 = sadd.s32 1, %s1017_s13 }
   0x4   : > { %p39_p0 = scmp.eq.s32.totalorder %s38_s17, 0  ;;  %p48_p1 = scmp.ne.s32.totalorder %s1017_s13, %s1013_s12 }
   0x5   : > { %p49_p2 = scmp.eq.s32.totalorder %s1021_s14, 0  ;;  %p819_p4 = scmp.ge.s32.totalorder %s1021_s14, 2 }
   0x6   : > { %s1070_s19 = scalar_select %p39_p0, %s1017_s13, %s41_s18  }
   0x7   : > { %p50_p3 = por %p49_p2, %p48_p1  ;;  %127 = sbr.rel (%p819_p4) target bundleno = 45 (0x2d), region = 24 }
   0xe   : > { %130 = sbr.rel (!%p50_p3) target bundleno = 45 (0x2d), region = 28  ;;  %s132_s20 = sand.u32 (%p50_p3), 1, %s1017_s13  }
   0xf   : > { %s888_s21 = sshll.u32 (%p50_p3), %s1021_s14, 4  ;;  %s889_s22 = smul.u32 (%p50_p3), 432, %s132_s20 }
  0x10   : > { %s1078_s25 = scalar_lea.vmem (%p50_p3), %s1277_s1, %s888_s21 }
  0x11   : > { %v150_v0 = vld [vmem:[%s1078_s25] sm:$0xff] (%p50_p3)  ;;  %v152_v1 = vld [vmem:[%s1078_s25 + $0x8] sm:$0xff] (%p50_p3)  ;;  %s1086_s26 = scalar_lea.vmem (%p50_p3), [#allocation2], %s889_s22 }
  0x12   : > { %v154_v2 = vld [vmem:[%s1078_s25 + $0x20] sm:$0xff] (%p50_p3)  ;;  %v156_v3 = vld [vmem:[%s1078_s25 + $0x28] sm:$0xff] (%p50_p3)  ;;  %151 = vst [vmem:[%s1086_s26] sm:$0xff] (%p50_p3), %v150_v0  ;;  %153 = vst [vmem:[%s1086_s26 + $0x8] sm:$0xff] (%p50_p3), %v152_v1 }
  0x13   : > { %v158_v4 = vld [vmem:[%s1078_s25 + $0x40] sm:$0xff] (%p50_p3)  ;;  %v160_v5 = vld [vmem:[%s1078_s25 + $0x48] sm:$0xff] (%p50_p3)  ;;  %155 = vst [vmem:[%s1086_s26 + $0x10] sm:$0xff] (%p50_p3), %v154_v2  ;;  %157 = vst [vmem:[%s1086_s26 + $0x18] sm:$0xff] (%p50_p3), %v156_v3 }
  0x14   : > { %159 = vst [vmem:[%s1086_s26 + $0x20] sm:$0xff] (%p50_p3), %v158_v4  ;;  %161 = vst [vmem:[%s1086_s26 + $0x28] sm:$0xff] (%p50_p3), %v160_v5  ;;  %v162_v6 = vld [vmem:[%s1078_s25 + $0x60] sm:$0xff] (%p50_p3)  ;;  %v164_v7 = vld [vmem:[%s1078_s25 + $0x68] sm:$0xff] (%p50_p3) }
  0x15   : > { %v166_v8 = vld [vmem:[%s1078_s25 + $0x80] sm:$0xff]  ;;  %163 = vst [vmem:[%s1086_s26 + $0x30] sm:$0xff] %v162_v6  ;;  %165 = vst [vmem:[%s1086_s26 + $0x38] sm:$0xff] %v164_v7  ;;  %v168_v9 = vld [vmem:[%s1078_s25 + $0x88] sm:$0xff] }
  0x16   : > { %167 = vst [vmem:[%s1086_s26 + $0x40] sm:$0xff] %v166_v8  ;;  %v170_v10 = vld [vmem:[%s1078_s25 + $0xa0] sm:$0xff]  ;;  %v172_v11 = vld [vmem:[%s1078_s25 + $0xa8] sm:$0xff]  ;;  %169 = vst [vmem:[%s1086_s26 + $0x48] sm:$0xff] %v168_v9 }
  0x17   : > { %171 = vst [vmem:[%s1086_s26 + $0x50] sm:$0xff] %v170_v10  ;;  %173 = vst [vmem:[%s1086_s26 + $0x58] sm:$0xff] %v172_v11  ;;  %v174_v12 = vld [vmem:[%s1078_s25 + $0xc0] sm:$0xff]  ;;  %v176_v13 = vld [vmem:[%s1078_s25 + $0xc8] sm:$0xff] }
  0x18   : > { %v178_v14 = vld [vmem:[%s1078_s25 + $0xe0] sm:$0xff]  ;;  %175 = vst [vmem:[%s1086_s26 + $0x60] sm:$0xff] %v174_v12  ;;  %177 = vst [vmem:[%s1086_s26 + $0x68] sm:$0xff] %v176_v13  ;;  %v180_v15 = vld [vmem:[%s1078_s25 + $0xe8] sm:$0xff] }
  0x19   : > { %179 = vst [vmem:[%s1086_s26 + $0x70] sm:$0xff] %v178_v14  ;;  %v182_v16 = vld [vmem:[%s1078_s25 + $0x100] sm:$0xff]  ;;  %v184_v17 = vld [vmem:[%s1078_s25 + $0x108] sm:$0xff]  ;;  %181 = vst [vmem:[%s1086_s26 + $0x78] sm:$0xff] %v180_v15 }
  0x1a   : > { %183 = vst [vmem:[%s1086_s26 + $0x80] sm:$0xff] %v182_v16  ;;  %185 = vst [vmem:[%s1086_s26 + $0x88] sm:$0xff] %v184_v17  ;;  %v186_v18 = vld [vmem:[%s1078_s25 + $0x120] sm:$0xff]  ;;  %v188_v19 = vld [vmem:[%s1078_s25 + $0x128] sm:$0xff] }
  0x1b   : > { %v190_v20 = vld [vmem:[%s1078_s25 + $0x140] sm:$0xff]  ;;  %187 = vst [vmem:[%s1086_s26 + $0x90] sm:$0xff] %v186_v18  ;;  %189 = vst [vmem:[%s1086_s26 + $0x98] sm:$0xff] %v188_v19  ;;  %v192_v21 = vld [vmem:[%s1078_s25 + $0x148] sm:$0xff] }
  0x1c   : > { %191 = vst [vmem:[%s1086_s26 + $0xa0] sm:$0xff] %v190_v20  ;;  %v194_v22 = vld [vmem:[%s1078_s25 + $0x160] sm:$0xff]  ;;  %v196_v23 = vld [vmem:[%s1078_s25 + $0x168] sm:$0xff]  ;;  %193 = vst [vmem:[%s1086_s26 + $0xa8] sm:$0xff] %v192_v21 }
  0x1d   : > { %195 = vst [vmem:[%s1086_s26 + $0xb0] sm:$0xff] %v194_v22  ;;  %197 = vst [vmem:[%s1086_s26 + $0xb8] sm:$0xff] %v196_v23  ;;  %v198_v24 = vld [vmem:[%s1078_s25 + $0x180] sm:$0xff]  ;;  %v200_v25 = vld [vmem:[%s1078_s25 + $0x188] sm:$0xff] }
  0x1e   : > { %v202_v26 = vld [vmem:[%s1078_s25 + $0x1a0] sm:$0xff]  ;;  %199 = vst [vmem:[%s1086_s26 + $0xc0] sm:$0xff] %v198_v24  ;;  %201 = vst [vmem:[%s1086_s26 + $0xc8] sm:$0xff] %v200_v25  ;;  %v204_v27 = vld [vmem:[%s1078_s25 + $0x1a8] sm:$0xff] }
  0x1f   : > { %203 = vst [vmem:[%s1086_s26 + $0xd0] sm:$0xff] %v202_v26  ;;  %v206_v28 = vld [vmem:[%s1078_s25 + $0x1c0] sm:$0xff]  ;;  %v208_v29 = vld [vmem:[%s1078_s25 + $0x1c8] sm:$0xff]  ;;  %205 = vst [vmem:[%s1086_s26 + $0xd8] sm:$0xff] %v204_v27 }
  0x20   : > { %207 = vst [vmem:[%s1086_s26 + $0xe0] sm:$0xff] %v206_v28  ;;  %209 = vst [vmem:[%s1086_s26 + $0xe8] sm:$0xff] %v208_v29  ;;  %v210_v30 = vld [vmem:[%s1078_s25 + $0x1e0] sm:$0xff]  ;;  %v212_v31 = vld [vmem:[%s1078_s25 + $0x1e8] sm:$0xff] }
  0x21   : > { %v214_v32 = vld [vmem:[%s1078_s25 + $0x200] sm:$0xff]  ;;  %211 = vst [vmem:[%s1086_s26 + $0xf0] sm:$0xff] %v210_v30  ;;  %213 = vst [vmem:[%s1086_s26 + $0xf8] sm:$0xff] %v212_v31  ;;  %v216_v33 = vld [vmem:[%s1078_s25 + $0x208] sm:$0xff] }
  0x22   : > { %215 = vst [vmem:[%s1086_s26 + $0x100] sm:$0xff] %v214_v32  ;;  %v218_v34 = vld [vmem:[%s1078_s25 + $0x220] sm:$0xff]  ;;  %v220_v35 = vld [vmem:[%s1078_s25 + $0x228] sm:$0xff]  ;;  %217 = vst [vmem:[%s1086_s26 + $0x108] sm:$0xff] %v216_v33 }
  0x23   : > { %219 = vst [vmem:[%s1086_s26 + $0x110] sm:$0xff] %v218_v34  ;;  %221 = vst [vmem:[%s1086_s26 + $0x118] sm:$0xff] %v220_v35  ;;  %v222_v36 = vld [vmem:[%s1078_s25 + $0x240] sm:$0xff]  ;;  %v224_v37 = vld [vmem:[%s1078_s25 + $0x248] sm:$0xff] }
  0x24   : > { %v226_v38 = vld [vmem:[%s1078_s25 + $0x260] sm:$0xff]  ;;  %223 = vst [vmem:[%s1086_s26 + $0x120] sm:$0xff] %v222_v36  ;;  %225 = vst [vmem:[%s1086_s26 + $0x128] sm:$0xff] %v224_v37  ;;  %v228_v39 = vld [vmem:[%s1078_s25 + $0x268] sm:$0xff] }
  0x25   : > { %227 = vst [vmem:[%s1086_s26 + $0x130] sm:$0xff] %v226_v38  ;;  %v230_v40 = vld [vmem:[%s1078_s25 + $0x280] sm:$0xff]  ;;  %v232_v41 = vld [vmem:[%s1078_s25 + $0x288] sm:$0xff]  ;;  %229 = vst [vmem:[%s1086_s26 + $0x138] sm:$0xff] %v228_v39 }
  0x26   : > { %231 = vst [vmem:[%s1086_s26 + $0x140] sm:$0xff] %v230_v40  ;;  %233 = vst [vmem:[%s1086_s26 + $0x148] sm:$0xff] %v232_v41  ;;  %v234_v42 = vld [vmem:[%s1078_s25 + $0x2a0] sm:$0xff]  ;;  %v236_v43 = vld [vmem:[%s1078_s25 + $0x2a8] sm:$0xff] }
  0x27   : > { %v238_v44 = vld [vmem:[%s1078_s25 + $0x2c0] sm:$0xff]  ;;  %235 = vst [vmem:[%s1086_s26 + $0x150] sm:$0xff] %v234_v42  ;;  %237 = vst [vmem:[%s1086_s26 + $0x158] sm:$0xff] %v236_v43  ;;  %v240_v45 = vld [vmem:[%s1078_s25 + $0x2c8] sm:$0xff] }
  0x28   : > { %239 = vst [vmem:[%s1086_s26 + $0x160] sm:$0xff] %v238_v44  ;;  %v242_v46 = vld [vmem:[%s1078_s25 + $0x2e0] sm:$0xff]  ;;  %v244_v47 = vld [vmem:[%s1078_s25 + $0x2e8] sm:$0xff]  ;;  %241 = vst [vmem:[%s1086_s26 + $0x168] sm:$0xff] %v240_v45 }
  0x29   : > { %243 = vst [vmem:[%s1086_s26 + $0x170] sm:$0xff] %v242_v46  ;;  %245 = vst [vmem:[%s1086_s26 + $0x178] sm:$0xff] %v244_v47  ;;  %v246_v48 = vld [vmem:[%s1078_s25 + $0x300] sm:$0xff]  ;;  %v248_v49 = vld [vmem:[%s1078_s25 + $0x308] sm:$0xff] }
  0x2a   : > { %v250_v50 = vld [vmem:[%s1078_s25 + $0x320] sm:$0xff]  ;;  %247 = vst [vmem:[%s1086_s26 + $0x180] sm:$0xff] %v246_v48  ;;  %249 = vst [vmem:[%s1086_s26 + $0x188] sm:$0xff] %v248_v49  ;;  %v252_v51 = vld [vmem:[%s1078_s25 + $0x328] sm:$0xff] }
  0x2b   : > { %251 = vst [vmem:[%s1086_s26 + $0x190] sm:$0xff] %v250_v50  ;;  %v254_v52 = vld [vmem:[%s1078_s25 + $0x340] sm:$0xff]  ;;  %v256_v53 = vld [vmem:[%s1078_s25 + $0x348] sm:$0xff]  ;;  %253 = vst [vmem:[%s1086_s26 + $0x198] sm:$0xff] %v252_v51 }
  0x2c   : > { %255 = vst [vmem:[%s1086_s26 + $0x1a0] sm:$0xff] %v254_v52  ;;  %257 = vst [vmem:[%s1086_s26 + $0x1a8] sm:$0xff] %v256_v53 }
  0x2d PF: > { %p822_p5 = scmp.ge.s32.totalorder %s1021_s14, 1  ;;  %p262_p6 = scmp.lt.s32.totalorder %s1021_s14, 3 }
  0x2f   : > { %p263_p7 = pnand %p822_p5, %p262_p6 }
  0x30   : > { %s269_s27 = sand.u32 (!%p263_p7), 1, %s1013_s12   ;;  %v1196_v54 = vld.sshfl [vmem:[%s1276_s0] sm:$0x33 pattern:$0x76325410] (!%p263_p7)  ;;  %vm641_vm0 = vcmask (!%p263_p7), 719872  }
  0x31   : > { %266 = sbr.rel (%p263_p7) target bundleno = 330 (0x14a), region = 51  ;;  %v369_v55 = vcombine.high (!%p263_p7), %v1196_v54, %v1196_v54  ;;  %v355_v56 = vld [vmem:[%s1278_s2] sm:$0xf] (!%p263_p7)  ;;  %v1023_v57 = vmov (!%p263_p7), 0   ;;  %vm645_vm1 = vcmask (!%p263_p7), 1043456   ;;  %s823_s7 = sshll.u32 (!%p263_p7), %s816_s15, 2 }
  0x32   : > { %s890_s30 = smul.u32 (!%p263_p7), 432, %s269_s27  ;;  %916 = vset.pattern.permute.xlu0 (!%p263_p7), %v1023_v57  ;;  %p294_p8 = scmp.lt.s32.totalorder (!%p263_p7), %s823_s7, 7 }
  0x33   : > { %883 = vmatprep.mubr.msk.bf16.mxu0 (!%p263_p7), %vm641_vm0, %v369_v55  ;;  %885 = vmatprep.mubr.msk.bf16.mxu1 (!%p263_p7), %vm641_vm0, %v369_v55 }
  0x34   : > { %s1203_s6 = scalar_lea.vmem (!%p263_p7), [#allocation2], %s890_s30  ;;  %358 = vperm.xlu0 (!%p263_p7), %916, %v355_v56  }
  0x35   : > { %v917_v58 = vld [vmem:[%s1203_s6 + $0x4] ss:$16 sps:$4 sm:$0xff] (!%p263_p7)   ;;  %v919_v59 = vld [vmem:[%s1203_s6 + $0xc] ss:$16 sps:$4 sm:$0xff] (!%p263_p7)   ;;  %v921_v60 = vld [vmem:[%s1203_s6] ss:$16 sps:$4 sm:$0xff] (!%p263_p7)  }
  0x36   : > { %658 = vmatprep.subr.bf16.mxu0 (!%p263_p7), %v917_v58  ;;  %v922_v61 = vld [vmem:[%s1203_s6 + $0x8] ss:$16 sps:$4 sm:$0xff] (!%p263_p7)   ;;  %699 = vmatprep.subr.bf16.mxu1 (!%p263_p7), %v919_v59  ;;  %v923_v62 = vld [vmem:[%s1203_s6 + $0x24] ss:$16 sps:$4 sm:$0xff] (!%p263_p7)   ;;  %v925_v63 = vld [vmem:[%s1203_s6 + $0x2c] ss:$16 sps:$4 sm:$0xff] (!%p263_p7)  }
  0x37   : > { %659 = vmatpush1.bf16.msra.mxu0 (!%p263_p7), %v921_v60  ;;  %700 = vmatpush1.bf16.msra.mxu1 (!%p263_p7), %v922_v61  ;;  %v927_v0 = vld [vmem:[%s1203_s6 + $0x20] ss:$16 sps:$4 sm:$0xff] (!%p263_p7)   ;;  %v928_v1 = vld [vmem:[%s1203_s6 + $0x28] ss:$16 sps:$4 sm:$0xff] (!%p263_p7)   ;;  %v929_v2 = vld [vmem:[%s1203_s6 + $0x44] ss:$16 sps:$4 sm:$0xff] (!%p263_p7)  }
  0x38   : > { %660 = vmatprep.subr.bf16.mxu0 %v923_v62  ;;  %701 = vmatprep.subr.bf16.mxu1 %v925_v63  ;;  %v931_v3 = vld [vmem:[%s1203_s6 + $0x4c] ss:$16 sps:$4 sm:$0xff]   ;;  %v933_v4 = vld [vmem:[%s1203_s6 + $0x40] ss:$16 sps:$4 sm:$0xff]   ;;  %v934_v5 = vld [vmem:[%s1203_s6 + $0x48] ss:$16 sps:$4 sm:$0xff]  }
  0x39   : > { %v935_v6 = vld [vmem:[%s1203_s6 + $0x64] ss:$16 sps:$4 sm:$0xff]   ;;  %v937_v7 = vld [vmem:[%s1203_s6 + $0x6c] ss:$16 sps:$4 sm:$0xff]   ;;  %v939_v8 = vld [vmem:[%s1203_s6 + $0x60] ss:$16 sps:$4 sm:$0xff]  }
  0x3a   : > { %v940_v9 = vld [vmem:[%s1203_s6 + $0x68] ss:$16 sps:$4 sm:$0xff]   ;;  %v941_v10 = vld [vmem:[%s1203_s6 + $0x84] ss:$16 sps:$4 sm:$0xff]   ;;  %v943_v11 = vld [vmem:[%s1203_s6 + $0x8c] ss:$16 sps:$4 sm:$0xff]  }
  0x3b   : > { %661 = vmatpush1.bf16.msra.mxu0 %v927_v0  ;;  %702 = vmatpush1.bf16.msra.mxu1 %v928_v1  ;;  %v945_v12 = vld [vmem:[%s1203_s6 + $0x80] ss:$16 sps:$4 sm:$0xff]   ;;  %v946_v13 = vld [vmem:[%s1203_s6 + $0x88] ss:$16 sps:$4 sm:$0xff]   ;;  %v947_v14 = vld [vmem:[%s1203_s6 + $0xa4] ss:$16 sps:$4 sm:$0xff]  }
  0x3c   : > { %662 = vmatprep.subr.bf16.mxu0 %v929_v2  ;;  %703 = vmatprep.subr.bf16.mxu1 %v931_v3  ;;  %v949_v15 = vld [vmem:[%s1203_s6 + $0xac] ss:$16 sps:$4 sm:$0xff]   ;;  %v951_v16 = vld [vmem:[%s1203_s6 + $0xa0] ss:$16 sps:$4 sm:$0xff]   ;;  %v952_v17 = vld [vmem:[%s1203_s6 + $0xa8] ss:$16 sps:$4 sm:$0xff]  }
  0x3d   : > { %v953_v18 = vld [vmem:[%s1203_s6 + $0xc4] ss:$16 sps:$4 sm:$0xff]   ;;  %v955_v19 = vld [vmem:[%s1203_s6 + $0xcc] ss:$16 sps:$4 sm:$0xff]   ;;  %v957_v20 = vld [vmem:[%s1203_s6 + $0xc0] ss:$16 sps:$4 sm:$0xff]  }
  0x3e   : > { %v958_v21 = vld [vmem:[%s1203_s6 + $0xc8] ss:$16 sps:$4 sm:$0xff]   ;;  %v959_v22 = vld [vmem:[%s1203_s6 + $0xe4] ss:$16 sps:$4 sm:$0xff]   ;;  %v961_v23 = vld [vmem:[%s1203_s6 + $0xec] ss:$16 sps:$4 sm:$0xff]  }
  0x3f   : > { %663 = vmatpush1.bf16.msra.mxu0 %v933_v4  ;;  %704 = vmatpush1.bf16.msra.mxu1 %v934_v5  ;;  %v963_v24 = vld [vmem:[%s1203_s6 + $0xe0] ss:$16 sps:$4 sm:$0xff]   ;;  %v964_v25 = vld [vmem:[%s1203_s6 + $0xe8] ss:$16 sps:$4 sm:$0xff]   ;;  %v965_v26 = vld [vmem:[%s1203_s6 + $0x104] ss:$16 sps:$4 sm:$0xff]  }
  0x40   : > { %664 = vmatprep.subr.bf16.mxu0 %v935_v6  ;;  %705 = vmatprep.subr.bf16.mxu1 %v937_v7  ;;  %v967_v27 = vld [vmem:[%s1203_s6 + $0x10c] ss:$16 sps:$4 sm:$0xff]   ;;  %v969_v28 = vld [vmem:[%s1203_s6 + $0x100] ss:$16 sps:$4 sm:$0xff]   ;;  %v970_v29 = vld [vmem:[%s1203_s6 + $0x108] ss:$16 sps:$4 sm:$0xff]  }
  0x41   : > { %v971_v30 = vld [vmem:[%s1203_s6 + $0x124] ss:$16 sps:$4 sm:$0xff]   ;;  %v973_v31 = vld [vmem:[%s1203_s6 + $0x12c] ss:$16 sps:$4 sm:$0xff]   ;;  %v975_v32 = vld [vmem:[%s1203_s6 + $0x120] ss:$16 sps:$4 sm:$0xff]  }
  0x42   : > { %v976_v33 = vld [vmem:[%s1203_s6 + $0x128] ss:$16 sps:$4 sm:$0xff]   ;;  %v977_v34 = vld [vmem:[%s1203_s6 + $0x144] ss:$16 sps:$4 sm:$0xff]   ;;  %v979_v35 = vld [vmem:[%s1203_s6 + $0x14c] ss:$16 sps:$4 sm:$0xff]  }
  0x43   : > { %665 = vmatpush1.bf16.msra.mxu0 %v939_v8  ;;  %706 = vmatpush1.bf16.msra.mxu1 %v940_v9  ;;  %v981_v36 = vld [vmem:[%s1203_s6 + $0x140] ss:$16 sps:$4 sm:$0xff]   ;;  %v982_v37 = vld [vmem:[%s1203_s6 + $0x148] ss:$16 sps:$4 sm:$0xff]   ;;  %v983_v38 = vld [vmem:[%s1203_s6 + $0x164] ss:$16 sps:$4 sm:$0xff]  }
  0x44   : > { %666 = vmatprep.subr.bf16.mxu0 %v941_v10  ;;  %707 = vmatprep.subr.bf16.mxu1 %v943_v11  ;;  %v985_v39 = vld [vmem:[%s1203_s6 + $0x16c] ss:$16 sps:$4 sm:$0xff]   ;;  %v987_v40 = vld [vmem:[%s1203_s6 + $0x160] ss:$16 sps:$4 sm:$0xff]   ;;  %v988_v41 = vld [vmem:[%s1203_s6 + $0x168] ss:$16 sps:$4 sm:$0xff]  }
  0x45   : > { %v989_v42 = vld [vmem:[%s1203_s6 + $0x184] ss:$16 sps:$4 sm:$0xff]   ;;  %v991_v43 = vld [vmem:[%s1203_s6 + $0x18c] ss:$16 sps:$4 sm:$0xff]   ;;  %v993_v46 = vld [vmem:[%s1203_s6 + $0x180] ss:$16 sps:$4 sm:$0xff]  }
  0x46   : > { %v353_v44 = vld [vmem:[%s1203_s6 + $0x1a0] sm:$0xff]  ;;  %v354_v45 = vld [vmem:[%s1203_s6 + $0x1a8] sm:$0xff]  ;;  %s1284_s7 = smov (!%p294_p8, %s823_s7), 7 }
  0x47   : > { %667 = vmatpush1.bf16.msra.mxu0 %v945_v12  ;;  %708 = vmatpush1.bf16.msra.mxu1 %v946_v13  ;;  %v994_v47 = vld [vmem:[%s1203_s6 + $0x188] ss:$16 sps:$4 sm:$0xff]   ;;  %v879_v48 = vcombine.high %v353_v44, %v353_v44  ;;  %v881_v49 = vcombine.high %v354_v45, %v354_v45  ;;  %v878_v50 = vcombine.low %v353_v44, %v353_v44  ;;  %s824_s8 = sshll.u32 %s1284_s7, 2 }
  0x48   : > { %668 = vmatprep.subr.bf16.mxu0 %v947_v14  ;;  %709 = vmatprep.subr.bf16.mxu1 %v949_v15  ;;  %v880_v51 = vcombine.low %v354_v45, %v354_v45  ;;  %s297_s11 = scalar_lea.vmem %s1279_s3, %s824_s8 }
  0x49   : > { %v647_v52 = vsel %vm645_vm1, %v878_v50, 0 }
  0x4a   : > { %v653_v53 = vsel %vm645_vm1, %v880_v51, 0 }
  0x4b   : > { %669 = vmatpush1.bf16.msra.mxu0 %v951_v16  ;;  %710 = vmatpush1.bf16.msra.mxu1 %v952_v17 }
  0x4c   : > { %670 = vmatprep.subr.bf16.mxu0 %v953_v18  ;;  %711 = vmatprep.subr.bf16.mxu1 %v955_v19 }
  0x4f   : > { %671 = vmatpush1.bf16.msra.mxu0 %v957_v20  ;;  %712 = vmatpush1.bf16.msra.mxu1 %v958_v21 }
  0x50   : > { %672 = vmatprep.subr.bf16.mxu0 %v959_v22  ;;  %713 = vmatprep.subr.bf16.mxu1 %v961_v23 }
  0x53   : > { %673 = vmatpush1.bf16.msra.mxu0 %v963_v24  ;;  %714 = vmatpush1.bf16.msra.mxu1 %v964_v25 }
  0x54   : > { %674 = vmatprep.subr.bf16.mxu0 %v965_v26  ;;  %715 = vmatprep.subr.bf16.mxu1 %v967_v27 }
  0x57   : > { %675 = vmatpush1.bf16.msra.mxu0 %v969_v28  ;;  %716 = vmatpush1.bf16.msra.mxu1 %v970_v29 }
  0x58   : > { %676 = vmatprep.subr.bf16.mxu0 %v971_v30  ;;  %717 = vmatprep.subr.bf16.mxu1 %v973_v31 }
  0x5b   : > { %677 = vmatpush1.bf16.msra.mxu0 %v975_v32  ;;  %718 = vmatpush1.bf16.msra.mxu1 %v976_v33 }
  0x5c   : > { %678 = vmatprep.subr.bf16.mxu0 %v977_v34  ;;  %719 = vmatprep.subr.bf16.mxu1 %v979_v35 }
  0x5f   : > { %679 = vmatpush1.bf16.msra.mxu0 %v981_v36  ;;  %720 = vmatpush1.bf16.msra.mxu1 %v982_v37 }
  0x60   : > { %680 = vmatprep.subr.bf16.mxu0 %v983_v38  ;;  %721 = vmatprep.subr.bf16.mxu1 %v985_v39 }
  0x63   : > { %681 = vmatpush1.bf16.msra.mxu0 %v987_v40  ;;  %722 = vmatpush1.bf16.msra.mxu1 %v988_v41 }
  0x64   : > { %682 = vmatprep.subr.bf16.mxu0 %v989_v42  ;;  %723 = vmatprep.subr.bf16.mxu1 %v991_v43 }
  0x67   : > { %683 = vmatpush1.bf16.msra.mxu0 %v993_v46  ;;  %724 = vmatpush1.bf16.msra.mxu1 %v994_v47 }
  0x68   : > { %882 = vmatprep.subr.msk.bf16.mxu0 %vm645_vm1, %v879_v48  ;;  %884 = vmatprep.subr.msk.bf16.mxu1 %vm645_vm1, %v881_v49 }
  0x6b   : > { %685 = vmatpush1.bf16.msra.mxu0 %v647_v52  ;;  %726 = vmatpush1.bf16.msra.mxu1 %v653_v53 }
  0x6e   : > { %691 = vmatmul.mubr.bf16.vlgmr.msra.gmra.mrb[0].mxu0 %v1196_v54  ;;  %732 = vmatmul.mubr.bf16.vlgmr.msra.gmra.mrb[0].mxu1 %v1196_v54 }
  0xb3   : > { %v359_v55 = vpop.permute.xlu0 %358 }
 0x141   : > { %v692_v56 = vpop.f32.mrb[0].mxu0  ;;  %v733_v57 = vpop.f32.mrb[0].mxu1 }
 0x142   : > { %v693_v58 = vadd.f32 %v692_v56, %v359_v55  ;;  %v734_v59 = vadd.f32 %v733_v57, %v359_v55  ;;  %v694_v60 = vpop.f32.mrb[1].mxu0  ;;  %v735_v61 = vpop.f32.mrb[1].mxu1 }
 0x143   : > { %v695_v62 = vadd.f32 %v694_v60, %v359_v55  ;;  %v736_v63 = vadd.f32 %v735_v61, %v359_v55  ;;  %v696_v0 = vpop.f32.mrb[2].mxu0  ;;  %v737_v1 = vpop.f32.mrb[2].mxu1 }
 0x144   : > { %v740_v2 = vmax.f32 %v693_v58, 0.0  ;;  %v742_v3 = vmax.f32 %v734_v59, 0.0  ;;  %v697_v4 = vpop.f32.mrb[3].mxu0  ;;  %v738_v54 = vpop.f32.mrb[3].mxu1 }
 0x145   : > { %v741_v5 = vmax.f32 %v695_v62, 0.0  ;;  %v743_v6 = vmax.f32 %v736_v63, 0.0 }
 0x147   : > { %v748_v7 = vcombine.low %v740_v2, %v741_v5  ;;  %v749_v8 = vcombine.low %v742_v3, %v743_v6 }
 0x149   : > { %752 = vst [vmem:[%s297_s11] sm:$0xff] %v748_v7  ;;  %753 = vst [vmem:[%s297_s11 + $0x8] sm:$0xff] %v749_v8 }
 0x14a PF: > { %p10_p9 = scmp.ge.s32.totalorder %s1061_s16, 4   ;;  %s1280_s12 = smov %s1017_s13 }
 0x14b   : > { %s1281_s13 = smov %s1070_s19  ;;  %s1282_s14 = smov %s1061_s16 }
 0x14c   :  { %12 = sbr.rel (!%p10_p9) target bundleno = 2 (0x2), region = 90 }

// kernel: unet_forward.15
= control target key start
LH: loop header
LB: loop body
LE: loop exit
PB: predicated region body
PF: predicated region fallthrough
CT: control target
= control target key end

     0   :  { %s5196_s12 = smov 0   ;;  %s5198_s13 = smov 0   ;;  %s6707_s0 = inlined_call_operand.vmem [shape: bf16[4,216], index: 0, kind: input, shape index: {}]   ;;  %s6708_s1 = inlined_call_operand.vmem [shape: bf16[216,8192], index: 1, kind: input, shape index: {}]   ;;  %s6709_s2 = inlined_call_operand.vmem [shape: f32[4,1], index: 2, kind: input, shape index: {}]   ;;  %s6710_s3 = inlined_call_operand.vmem [shape: f32[4,8192], index: 3, kind: output, shape index: {}]  }
   0x1   :  { %s5200_s14 = smov 0  }
   0x2 LB: > { %s4596_s15 = sadd.s32 4294967295, %s5173_s14   ;;  %s5213_s16 = sadd.s32 1, %s5173_s14   ;;  %s5173_s14 = sphi %s5200_s14, %s6713_s14   ;;  %s5169_s13 = sphi %s5198_s13, %s6712_s13   ;;  %s5165_s12 = sphi %s5196_s12, %s6711_s12  }
   0x3   : > { %s38_s17 = ssub.s32 %s5173_s14, %s5213_s16  ;;  %s41_s18 = sadd.s32 1, %s5169_s13 }
   0x4   : > { %p39_p0 = scmp.eq.s32.totalorder %s38_s17, 0  ;;  %p48_p1 = scmp.ne.s32.totalorder %s5169_s13, %s5165_s12 }
   0x5   : > { %p49_p2 = scmp.eq.s32.totalorder %s5173_s14, 0  ;;  %p4599_p4 = scmp.ge.s32.totalorder %s5173_s14, 2 }
   0x6   : > { %s5222_s19 = scalar_select %p39_p0, %s5169_s13, %s41_s18  }
   0x7   : > { %p50_p3 = por %p49_p2, %p48_p1  ;;  %127 = sbr.rel (%p4599_p4) target bundleno = 235 (0xeb), region = 24 }
   0xe   : > { %130 = sbr.rel (!%p50_p3) target bundleno = 235 (0xeb), region = 28  ;;  %s132_s20 = sand.u32 (%p50_p3), 1, %s5169_s13  }
   0xf   : > { %s5088_s21 = sshll.u32 (%p50_p3), %s5173_s14, 7  ;;  %s5089_s22 = smul.u32 (%p50_p3), 3456, %s132_s20 }
  0x10   : > { %s5230_s25 = scalar_lea.vmem (%p50_p3), %s6708_s1, %s5088_s21 }
  0x11   : > { %v150_v0 = vld [vmem:[%s5230_s25] sm:$0xff] (%p50_p3)  ;;  %v152_v1 = vld [vmem:[%s5230_s25 + $0x8] sm:$0xff] (%p50_p3)  ;;  %v154_v2 = vld [vmem:[%s5230_s25 + $0x10] sm:$0xff] (%p50_p3)  ;;  %s5238_s26 = scalar_lea.vmem (%p50_p3), [#allocation2], %s5089_s22 }
  0x12   : > { %v156_v3 = vld [vmem:[%s5230_s25 + $0x18] sm:$0xff] (%p50_p3)  ;;  %v158_v4 = vld [vmem:[%s5230_s25 + $0x20] sm:$0xff] (%p50_p3)  ;;  %v160_v5 = vld [vmem:[%s5230_s25 + $0x28] sm:$0xff] (%p50_p3)  ;;  %151 = vst [vmem:[%s5238_s26] sm:$0xff] (%p50_p3), %v150_v0 }
  0x13   : > { %153 = vst [vmem:[%s5238_s26 + $0x8] sm:$0xff] (%p50_p3), %v152_v1  ;;  %155 = vst [vmem:[%s5238_s26 + $0x10] sm:$0xff] (%p50_p3), %v154_v2  ;;  %v162_v6 = vld [vmem:[%s5230_s25 + $0x30] sm:$0xff] (%p50_p3)  ;;  %v164_v7 = vld [vmem:[%s5230_s25 + $0x38] sm:$0xff] (%p50_p3) }
  0x14   : > { %157 = vst [vmem:[%s5238_s26 + $0x18] sm:$0xff] (%p50_p3), %v156_v3  ;;  %159 = vst [vmem:[%s5238_s26 + $0x20] sm:$0xff] (%p50_p3), %v158_v4  ;;  %v166_v8 = vld [vmem:[%s5230_s25 + $0x40] sm:$0xff] (%p50_p3)  ;;  %v168_v9 = vld [vmem:[%s5230_s25 + $0x48] sm:$0xff] (%p50_p3) }
  0x15   : > { %161 = vst [vmem:[%s5238_s26 + $0x28] sm:$0xff] %v160_v5  ;;  %163 = vst [vmem:[%s5238_s26 + $0x30] sm:$0xff] %v162_v6  ;;  %v170_v10 = vld [vmem:[%s5230_s25 + $0x50] sm:$0xff]  ;;  %v172_v11 = vld [vmem:[%s5230_s25 + $0x58] sm:$0xff] }
  0x16   : > { %165 = vst [vmem:[%s5238_s26 + $0x38] sm:$0xff] %v164_v7  ;;  %167 = vst [vmem:[%s5238_s26 + $0x40] sm:$0xff] %v166_v8  ;;  %v174_v12 = vld [vmem:[%s5230_s25 + $0x60] sm:$0xff]  ;;  %v176_v13 = vld [vmem:[%s5230_s25 + $0x68] sm:$0xff] }
  0x17   : > { %169 = vst [vmem:[%s5238_s26 + $0x48] sm:$0xff] %v168_v9  ;;  %171 = vst [vmem:[%s5238_s26 + $0x50] sm:$0xff] %v170_v10  ;;  %v178_v14 = vld [vmem:[%s5230_s25 + $0x70] sm:$0xff]  ;;  %v180_v15 = vld [vmem:[%s5230_s25 + $0x78] sm:$0xff] }
  0x18   : > { %173 = vst [vmem:[%s5238_s26 + $0x58] sm:$0xff] %v172_v11  ;;  %175 = vst [vmem:[%s5238_s26 + $0x60] sm:$0xff] %v174_v12  ;;  %v182_v16 = vld [vmem:[%s5230_s25 + $0x100] sm:$0xff]  ;;  %v184_v17 = vld [vmem:[%s5230_s25 + $0x108] sm:$0xff] }
  0x19   : > { %177 = vst [vmem:[%s5238_s26 + $0x68] sm:$0xff] %v176_v13  ;;  %179 = vst [vmem:[%s5238_s26 + $0x70] sm:$0xff] %v178_v14  ;;  %v186_v18 = vld [vmem:[%s5230_s25 + $0x110] sm:$0xff]  ;;  %v188_v19 = vld [vmem:[%s5230_s25 + $0x118] sm:$0xff] }
  0x1a   : > { %181 = vst [vmem:[%s5238_s26 + $0x78] sm:$0xff] %v180_v15  ;;  %183 = vst [vmem:[%s5238_s26 + $0x80] sm:$0xff] %v182_v16  ;;  %v190_v20 = vld [vmem:[%s5230_s25 + $0x120] sm:$0xff]  ;;  %v192_v21 = vld [vmem:[%s5230_s25 + $0x128] sm:$0xff] }
  0x1b   : > { %185 = vst [vmem:[%s5238_s26 + $0x88] sm:$0xff] %v184_v17  ;;  %187 = vst [vmem:[%s5238_s26 + $0x90] sm:$0xff] %v186_v18  ;;  %v194_v22 = vld [vmem:[%s5230_s25 + $0x130] sm:$0xff]  ;;  %v196_v23 = vld [vmem:[%s5230_s25 + $0x138] sm:$0xff] }
  0x1c   : > { %189 = vst [vmem:[%s5238_s26 + $0x98] sm:$0xff] %v188_v19  ;;  %191 = vst [vmem:[%s5238_s26 + $0xa0] sm:$0xff] %v190_v20  ;;  %v198_v24 = vld [vmem:[%s5230_s25 + $0x140] sm:$0xff]  ;;  %v200_v25 = vld [vmem:[%s5230_s25 + $0x148] sm:$0xff] }
  0x1d   : > { %193 = vst [vmem:[%s5238_s26 + $0xa8] sm:$0xff] %v192_v21  ;;  %195 = vst [vmem:[%s5238_s26 + $0xb0] sm:$0xff] %v194_v22  ;;  %v202_v26 = vld [vmem:[%s5230_s25 + $0x150] sm:$0xff]  ;;  %v204_v27 = vld [vmem:[%s5230_s25 + $0x158] sm:$0xff] }
  0x1e   : > { %197 = vst [vmem:[%s5238_s26 + $0xb8] sm:$0xff] %v196_v23  ;;  %199 = vst [vmem:[%s5238_s26 + $0xc0] sm:$0xff] %v198_v24  ;;  %v206_v28 = vld [vmem:[%s5230_s25 + $0x160] sm:$0xff]  ;;  %v208_v29 = vld [vmem:[%s5230_s25 + $0x168] sm:$0xff] }
  0x1f   : > { %201 = vst [vmem:[%s5238_s26 + $0xc8] sm:$0xff] %v200_v25  ;;  %203 = vst [vmem:[%s5238_s26 + $0xd0] sm:$0xff] %v202_v26  ;;  %v210_v30 = vld [vmem:[%s5230_s25 + $0x170] sm:$0xff]  ;;  %v212_v31 = vld [vmem:[%s5230_s25 + $0x178] sm:$0xff] }
  0x20   : > { %205 = vst [vmem:[%s5238_s26 + $0xd8] sm:$0xff] %v204_v27  ;;  %207 = vst [vmem:[%s5238_s26 + $0xe0] sm:$0xff] %v206_v28  ;;  %v214_v32 = vld [vmem:[%s5230_s25 + $0x200] sm:$0xff]  ;;  %v216_v33 = vld [vmem:[%s5230_s25 + $0x208] sm:$0xff] }
  0x21   : > { %209 = vst [vmem:[%s5238_s26 + $0xe8] sm:$0xff] %v208_v29  ;;  %211 = vst [vmem:[%s5238_s26 + $0xf0] sm:$0xff] %v210_v30  ;;  %v218_v34 = vld [vmem:[%s5230_s25 + $0x210] sm:$0xff]  ;;  %v220_v35 = vld [vmem:[%s5230_s25 + $0x218] sm:$0xff] }
  0x22   : > { %213 = vst [vmem:[%s5238_s26 + $0xf8] sm:$0xff] %v212_v31  ;;  %215 = vst [vmem:[%s5238_s26 + $0x100] sm:$0xff] %v214_v32  ;;  %v222_v36 = vld [vmem:[%s5230_s25 + $0x220] sm:$0xff]  ;;  %v224_v37 = vld [vmem:[%s5230_s25 + $0x228] sm:$0xff] }
  0x23   : > { %217 = vst [vmem:[%s5238_s26 + $0x108] sm:$0xff] %v216_v33  ;;  %219 = vst [vmem:[%s5238_s26 + $0x110] sm:$0xff] %v218_v34  ;;  %v226_v38 = vld [vmem:[%s5230_s25 + $0x230] sm:$0xff]  ;;  %v228_v39 = vld [vmem:[%s5230_s25 + $0x238] sm:$0xff] }
  0x24   : > { %221 = vst [vmem:[%s5238_s26 + $0x118] sm:$0xff] %v220_v35  ;;  %223 = vst [vmem:[%s5238_s26 + $0x120] sm:$0xff] %v222_v36  ;;  %v230_v40 = vld [vmem:[%s5230_s25 + $0x240] sm:$0xff]  ;;  %v232_v41 = vld [vmem:[%s5230_s25 + $0x248] sm:$0xff] }
  0x25   : > { %225 = vst [vmem:[%s5238_s26 + $0x128] sm:$0xff] %v224_v37  ;;  %227 = vst [vmem:[%s5238_s26 + $0x130] sm:$0xff] %v226_v38  ;;  %v234_v42 = vld [vmem:[%s5230_s25 + $0x250] sm:$0xff]  ;;  %v236_v43 = vld [vmem:[%s5230_s25 + $0x258] sm:$0xff] }
  0x26   : > { %229 = vst [vmem:[%s5238_s26 + $0x138] sm:$0xff] %v228_v39  ;;  %231 = vst [vmem:[%s5238_s26 + $0x140] sm:$0xff] %v230_v40  ;;  %v238_v44 = vld [vmem:[%s5230_s25 + $0x260] sm:$0xff]  ;;  %v240_v45 = vld [vmem:[%s5230_s25 + $0x268] sm:$0xff] }
  0x27   : > { %233 = vst [vmem:[%s5238_s26 + $0x148] sm:$0xff] %v232_v41  ;;  %235 = vst [vmem:[%s5238_s26 + $0x150] sm:$0xff] %v234_v42  ;;  %v242_v46 = vld [vmem:[%s5230_s25 + $0x270] sm:$0xff]  ;;  %v244_v47 = vld [vmem:[%s5230_s25 + $0x278] sm:$0xff] }
  0x28   : > { %237 = vst [vmem:[%s5238_s26 + $0x158] sm:$0xff] %v236_v43  ;;  %239 = vst [vmem:[%s5238_s26 + $0x160] sm:$0xff] %v238_v44  ;;  %v246_v48 = vld [vmem:[%s5230_s25 + $0x300] sm:$0xff]  ;;  %v248_v49 = vld [vmem:[%s5230_s25 + $0x308] sm:$0xff] }
  0x29   : > { %241 = vst [vmem:[%s5238_s26 + $0x168] sm:$0xff] %v240_v45  ;;  %243 = vst [vmem:[%s5238_s26 + $0x170] sm:$0xff] %v242_v46  ;;  %v250_v50 = vld [vmem:[%s5230_s25 + $0x310] sm:$0xff]  ;;  %v252_v51 = vld [vmem:[%s5230_s25 + $0x318] sm:$0xff] }
  0x2a   : > { %245 = vst [vmem:[%s5238_s26 + $0x178] sm:$0xff] %v244_v47  ;;  %247 = vst [vmem:[%s5238_s26 + $0x180] sm:$0xff] %v246_v48  ;;  %v254_v52 = vld [vmem:[%s5230_s25 + $0x320] sm:$0xff]  ;;  %v256_v53 = vld [vmem:[%s5230_s25 + $0x328] sm:$0xff] }
  0x2b   : > { %249 = vst [vmem:[%s5238_s26 + $0x188] sm:$0xff] %v248_v49  ;;  %251 = vst [vmem:[%s5238_s26 + $0x190] sm:$0xff] %v250_v50  ;;  %v258_v54 = vld [vmem:[%s5230_s25 + $0x330] sm:$0xff]  ;;  %v260_v55 = vld [vmem:[%s5230_s25 + $0x338] sm:$0xff] }
  0x2c   : > { %253 = vst [vmem:[%s5238_s26 + $0x198] sm:$0xff] %v252_v51  ;;  %255 = vst [vmem:[%s5238_s26 + $0x1a0] sm:$0xff] %v254_v52  ;;  %v262_v56 = vld [vmem:[%s5230_s25 + $0x340] sm:$0xff]  ;;  %v264_v57 = vld [vmem:[%s5230_s25 + $0x348] sm:$0xff] }
  0x2d   : > { %257 = vst [vmem:[%s5238_s26 + $0x1a8] sm:$0xff] %v256_v53  ;;  %259 = vst [vmem:[%s5238_s26 + $0x1b0] sm:$0xff] %v258_v54  ;;  %v266_v58 = vld [vmem:[%s5230_s25 + $0x350] sm:$0xff]  ;;  %v268_v59 = vld [vmem:[%s5230_s25 + $0x358] sm:$0xff] }
  0x2e   : > { %261 = vst [vmem:[%s5238_s26 + $0x1b8] sm:$0xff] %v260_v55  ;;  %263 = vst [vmem:[%s5238_s26 + $0x1c0] sm:$0xff] %v262_v56  ;;  %v270_v60 = vld [vmem:[%s5230_s25 + $0x360] sm:$0xff]  ;;  %v272_v61 = vld [vmem:[%s5230_s25 + $0x368] sm:$0xff] }
  0x2f   : > { %265 = vst [vmem:[%s5238_s26 + $0x1c8] sm:$0xff] %v264_v57  ;;  %267 = vst [vmem:[%s5238_s26 + $0x1d0] sm:$0xff] %v266_v58  ;;  %v274_v62 = vld [vmem:[%s5230_s25 + $0x370] sm:$0xff]  ;;  %v276_v63 = vld [vmem:[%s5230_s25 + $0x378] sm:$0xff] }
  0x30   : > { %269 = vst [vmem:[%s5238_s26 + $0x1d8] sm:$0xff] %v268_v59  ;;  %271 = vst [vmem:[%s5238_s26 + $0x1e0] sm:$0xff] %v270_v60  ;;  %v278_v0 = vld [vmem:[%s5230_s25 + $0x400] sm:$0xff]  ;;  %v280_v1 = vld [vmem:[%s5230_s25 + $0x408] sm:$0xff] }
  0x31   : > { %273 = vst [vmem:[%s5238_s26 + $0x1e8] sm:$0xff] %v272_v61  ;;  %275 = vst [vmem:[%s5238_s26 + $0x1f0] sm:$0xff] %v274_v62  ;;  %v282_v2 = vld [vmem:[%s5230_s25 + $0x410] sm:$0xff]  ;;  %v284_v3 = vld [vmem:[%s5230_s25 + $0x418] sm:$0xff] }
  0x32   : > { %277 = vst [vmem:[%s5238_s26 + $0x1f8] sm:$0xff] %v276_v63  ;;  %279 = vst [vmem:[%s5238_s26 + $0x200] sm:$0xff] %v278_v0  ;;  %v286_v4 = vld [vmem:[%s5230_s25 + $0x420] sm:$0xff]  ;;  %v288_v5 = vld [vmem:[%s5230_s25 + $0x428] sm:$0xff] }
  0x33   : > { %281 = vst [vmem:[%s5238_s26 + $0x208] sm:$0xff] %v280_v1  ;;  %283 = vst [vmem:[%s5238_s26 + $0x210] sm:$0xff] %v282_v2  ;;  %v290_v6 = vld [vmem:[%s5230_s25 + $0x430] sm:$0xff]  ;;  %v292_v7 = vld [vmem:[%s5230_s25 + $0x438] sm:$0xff] }
  0x34   : > { %285 = vst [vmem:[%s5238_s26 + $0x218] sm:$0xff] %v284_v3  ;;  %287 = vst [vmem:[%s5238_s26 + $0x220] sm:$0xff] %v286_v4  ;;  %v294_v8 = vld [vmem:[%s5230_s25 + $0x440] sm:$0xff]  ;;  %v296_v9 = vld [vmem:[%s5230_s25 + $0x448] sm:$0xff] }
  0x35   : > { %289 = vst [vmem:[%s5238_s26 + $0x228] sm:$0xff] %v288_v5  ;;  %291 = vst [vmem:[%s5238_s26 + $0x230] sm:$0xff] %v290_v6  ;;  %v298_v10 = vld [vmem:[%s5230_s25 + $0x450] sm:$0xff]  ;;  %v300_v11 = vld [vmem:[%s5230_s25 + $0x458] sm:$0xff] }
  0x36   : > { %293 = vst [vmem:[%s5238_s26 + $0x238] sm:$0xff] %v292_v7  ;;  %295 = vst [vmem:[%s5238_s26 + $0x240] sm:$0xff] %v294_v8  ;;  %v302_v12 = vld [vmem:[%s5230_s25 + $0x460] sm:$0xff]  ;;  %v304_v13 = vld [vmem:[%s5230_s25 + $0x468] sm:$0xff] }
  0x37   : > { %297 = vst [vmem:[%s5238_s26 + $0x248] sm:$0xff] %v296_v9  ;;  %299 = vst [vmem:[%s5238_s26 + $0x250] sm:$0xff] %v298_v10  ;;  %v306_v14 = vld [vmem:[%s5230_s25 + $0x470] sm:$0xff]  ;;  %v308_v15 = vld [vmem:[%s5230_s25 + $0x478] sm:$0xff] }
  0x38   : > { %301 = vst [vmem:[%s5238_s26 + $0x258] sm:$0xff] %v300_v11  ;;  %303 = vst [vmem:[%s5238_s26 + $0x260] sm:$0xff] %v302_v12  ;;  %v310_v16 = vld [vmem:[%s5230_s25 + $0x500] sm:$0xff]  ;;  %v312_v17 = vld [vmem:[%s5230_s25 + $0x508] sm:$0xff] }
  0x39   : > { %305 = vst [vmem:[%s5238_s26 + $0x268] sm:$0xff] %v304_v13  ;;  %307 = vst [vmem:[%s5238_s26 + $0x270] sm:$0xff] %v306_v14  ;;  %v314_v18 = vld [vmem:[%s5230_s25 + $0x510] sm:$0xff]  ;;  %v316_v19 = vld [vmem:[%s5230_s25 + $0x518] sm:$0xff] }
  0x3a   : > { %309 = vst [vmem:[%s5238_s26 + $0x278] sm:$0xff] %v308_v15  ;;  %311 = vst [vmem:[%s5238_s26 + $0x280] sm:$0xff] %v310_v16  ;;  %v318_v20 = vld [vmem:[%s5230_s25 + $0x520] sm:$0xff]  ;;  %v320_v21 = vld [vmem:[%s5230_s25 + $0x528] sm:$0xff] }
  0x3b   : > { %313 = vst [vmem:[%s5238_s26 + $0x288] sm:$0xff] %v312_v17  ;;  %315 = vst [vmem:[%s5238_s26 + $0x290] sm:$0xff] %v314_v18  ;;  %v322_v22 = vld [vmem:[%s5230_s25 + $0x530] sm:$0xff]  ;;  %v324_v23 = vld [vmem:[%s5230_s25 + $0x538] sm:$0xff] }
  0x3c   : > { %317 = vst [vmem:[%s5238_s26 + $0x298] sm:$0xff] %v316_v19  ;;  %319 = vst [vmem:[%s5238_s26 + $0x2a0] sm:$0xff] %v318_v20  ;;  %v326_v24 = vld [vmem:[%s5230_s25 + $0x540] sm:$0xff]  ;;  %v328_v25 = vld [vmem:[%s5230_s25 + $0x548] sm:$0xff] }
  0x3d   : > { %321 = vst [vmem:[%s5238_s26 + $0x2a8] sm:$0xff] %v320_v21  ;;  %323 = vst [vmem:[%s5238_s26 + $0x2b0] sm:$0xff] %v322_v22  ;;  %v330_v26 = vld [vmem:[%s5230_s25 + $0x550] sm:$0xff]  ;;  %v332_v27 = vld [vmem:[%s5230_s25 + $0x558] sm:$0xff] }
  0x3e   : > { %325 = vst [vmem:[%s5238_s26 + $0x2b8] sm:$0xff] %v324_v23  ;;  %327 = vst [vmem:[%s5238_s26 + $0x2c0] sm:$0xff] %v326_v24  ;;  %v334_v28 = vld [vmem:[%s5230_s25 + $0x560] sm:$0xff]  ;;  %v336_v29 = vld [vmem:[%s5230_s25 + $0x568] sm:$0xff] }
  0x3f   : > { %329 = vst [vmem:[%s5238_s26 + $0x2c8] sm:$0xff] %v328_v25  ;;  %331 = vst [vmem:[%s5238_s26 + $0x2d0] sm:$0xff] %v330_v26  ;;  %v338_v30 = vld [vmem:[%s5230_s25 + $0x570] sm:$0xff]  ;;  %v340_v31 = vld [vmem:[%s5230_s25 + $0x578] sm:$0xff] }
  0x40   : > { %333 = vst [vmem:[%s5238_s26 + $0x2d8] sm:$0xff] %v332_v27  ;;  %335 = vst [vmem:[%s5238_s26 + $0x2e0] sm:$0xff] %v334_v28  ;;  %v342_v32 = vld [vmem:[%s5230_s25 + $0x600] sm:$0xff]  ;;  %v344_v33 = vld [vmem:[%s5230_s25 + $0x608] sm:$0xff] }
  0x41   : > { %337 = vst [vmem:[%s5238_s26 + $0x2e8] sm:$0xff] %v336_v29  ;;  %339 = vst [vmem:[%s5238_s26 + $0x2f0] sm:$0xff] %v338_v30  ;;  %v346_v34 = vld [vmem:[%s5230_s25 + $0x610] sm:$0xff]  ;;  %v348_v35 = vld [vmem:[%s5230_s25 + $0x618] sm:$0xff] }
  0x42   : > { %341 = vst [vmem:[%s5238_s26 + $0x2f8] sm:$0xff] %v340_v31  ;;  %343 = vst [vmem:[%s5238_s26 + $0x300] sm:$0xff] %v342_v32  ;;  %v350_v36 = vld [vmem:[%s5230_s25 + $0x620] sm:$0xff]  ;;  %v352_v37 = vld [vmem:[%s5230_s25 + $0x628] sm:$0xff] }
  0x43   : > { %345 = vst [vmem:[%s5238_s26 + $0x308] sm:$0xff] %v344_v33  ;;  %347 = vst [vmem:[%s5238_s26 + $0x310] sm:$0xff] %v346_v34  ;;  %v354_v38 = vld [vmem:[%s5230_s25 + $0x630] sm:$0xff]  ;;  %v356_v39 = vld [vmem:[%s5230_s25 + $0x638] sm:$0xff] }
  0x44   : > { %349 = vst [vmem:[%s5238_s26 + $0x318] sm:$0xff] %v348_v35  ;;  %351 = vst [vmem:[%s5238_s26 + $0x320] sm:$0xff] %v350_v36  ;;  %v358_v40 = vld [vmem:[%s5230_s25 + $0x640] sm:$0xff]  ;;  %v360_v41 = vld [vmem:[%s5230_s25 + $0x648] sm:$0xff] }
  0x45   : > { %353 = vst [vmem:[%s5238_s26 + $0x328] sm:$0xff] %v352_v37  ;;  %355 = vst [vmem:[%s5238_s26 + $0x330] sm:$0xff] %v354_v38  ;;  %v362_v42 = vld [vmem:[%s5230_s25 + $0x650] sm:$0xff]  ;;  %v364_v43 = vld [vmem:[%s5230_s25 + $0x658] sm:$0xff] }
  0x46   : > { %357 = vst [vmem:[%s5238_s26 + $0x338] sm:$0xff] %v356_v39  ;;  %359 = vst [vmem:[%s5238_s26 + $0x340] sm:$0xff] %v358_v40  ;;  %v366_v44 = vld [vmem:[%s5230_s25 + $0x660] sm:$0xff]  ;;  %v368_v45 = vld [vmem:[%s5230_s25 + $0x668] sm:$0xff] }
  0x47   : > { %361 = vst [vmem:[%s5238_s26 + $0x348] sm:$0xff] %v360_v41  ;;  %363 = vst [vmem:[%s5238_s26 + $0x350] sm:$0xff] %v362_v42  ;;  %v370_v46 = vld [vmem:[%s5230_s25 + $0x670] sm:$0xff]  ;;  %v372_v47 = vld [vmem:[%s5230_s25 + $0x678] sm:$0xff] }
  0x48   : > { %365 = vst [vmem:[%s5238_s26 + $0x358] sm:$0xff] %v364_v43  ;;  %367 = vst [vmem:[%s5238_s26 + $0x360] sm:$0xff] %v366_v44  ;;  %v374_v48 = vld [vmem:[%s5230_s25 + $0x700] sm:$0xff]  ;;  %v376_v49 = vld [vmem:[%s5230_s25 + $0x708] sm:$0xff] }
  0x49   : > { %369 = vst [vmem:[%s5238_s26 + $0x368] sm:$0xff] %v368_v45  ;;  %371 = vst [vmem:[%s5238_s26 + $0x370] sm:$0xff] %v370_v46  ;;  %v378_v50 = vld [vmem:[%s5230_s25 + $0x710] sm:$0xff]  ;;  %v380_v51 = vld [vmem:[%s5230_s25 + $0x718] sm:$0xff] }
  0x4a   : > { %373 = vst [vmem:[%s5238_s26 + $0x378] sm:$0xff] %v372_v47  ;;  %375 = vst [vmem:[%s5238_s26 + $0x380] sm:$0xff] %v374_v48  ;;  %v382_v52 = vld [vmem:[%s5230_s25 + $0x720] sm:$0xff]  ;;  %v384_v53 = vld [vmem:[%s5230_s25 + $0x728] sm:$0xff] }
  0x4b   : > { %377 = vst [vmem:[%s5238_s26 + $0x388] sm:$0xff] %v376_v49  ;;  %379 = vst [vmem:[%s5238_s26 + $0x390] sm:$0xff] %v378_v50  ;;  %v386_v54 = vld [vmem:[%s5230_s25 + $0x730] sm:$0xff]  ;;  %v388_v55 = vld [vmem:[%s5230_s25 + $0x738] sm:$0xff] }
  0x4c   : > { %381 = vst [vmem:[%s5238_s26 + $0x398] sm:$0xff] %v380_v51  ;;  %383 = vst [vmem:[%s5238_s26 + $0x3a0] sm:$0xff] %v382_v52  ;;  %v390_v56 = vld [vmem:[%s5230_s25 + $0x740] sm:$0xff]  ;;  %v392_v57 = vld [vmem:[%s5230_s25 + $0x748] sm:$0xff] }
  0x4d   : > { %385 = vst [vmem:[%s5238_s26 + $0x3a8] sm:$0xff] %v384_v53  ;;  %387 = vst [vmem:[%s5238_s26 + $0x3b0] sm:$0xff] %v386_v54  ;;  %v394_v58 = vld [vmem:[%s5230_s25 + $0x750] sm:$0xff]  ;;  %v396_v59 = vld [vmem:[%s5230_s25 + $0x758] sm:$0xff] }
  0x4e   : > { %389 = vst [vmem:[%s5238_s26 + $0x3b8] sm:$0xff] %v388_v55  ;;  %391 = vst [vmem:[%s5238_s26 + $0x3c0] sm:$0xff] %v390_v56  ;;  %v398_v60 = vld [vmem:[%s5230_s25 + $0x760] sm:$0xff]  ;;  %v400_v61 = vld [vmem:[%s5230_s25 + $0x768] sm:$0xff] }
  0x4f   : > { %393 = vst [vmem:[%s5238_s26 + $0x3c8] sm:$0xff] %v392_v57  ;;  %395 = vst [vmem:[%s5238_s26 + $0x3d0] sm:$0xff] %v394_v58  ;;  %v402_v62 = vld [vmem:[%s5230_s25 + $0x770] sm:$0xff]  ;;  %v404_v63 = vld [vmem:[%s5230_s25 + $0x778] sm:$0xff] }
  0x50   : > { %397 = vst [vmem:[%s5238_s26 + $0x3d8] sm:$0xff] %v396_v59  ;;  %399 = vst [vmem:[%s5238_s26 + $0x3e0] sm:$0xff] %v398_v60  ;;  %v406_v0 = vld [vmem:[%s5230_s25 + $0x800] sm:$0xff]  ;;  %v408_v1 = vld [vmem:[%s5230_s25 + $0x808] sm:$0xff] }
  0x51   : > { %401 = vst [vmem:[%s5238_s26 + $0x3e8] sm:$0xff] %v400_v61  ;;  %403 = vst [vmem:[%s5238_s26 + $0x3f0] sm:$0xff] %v402_v62  ;;  %v410_v2 = vld [vmem:[%s5230_s25 + $0x810] sm:$0xff]  ;;  %v412_v3 = vld [vmem:[%s5230_s25 + $0x818] sm:$0xff] }
  0x52   : > { %405 = vst [vmem:[%s5238_s26 + $0x3f8] sm:$0xff] %v404_v63  ;;  %407 = vst [vmem:[%s5238_s26 + $0x400] sm:$0xff] %v406_v0  ;;  %v414_v4 = vld [vmem:[%s5230_s25 + $0x820] sm:$0xff]  ;;  %v416_v5 = vld [vmem:[%s5230_s25 + $0x828] sm:$0xff] }
  0x53   : > { %409 = vst [vmem:[%s5238_s26 + $0x408] sm:$0xff] %v408_v1  ;;  %411 = vst [vmem:[%s5238_s26 + $0x410] sm:$0xff] %v410_v2  ;;  %v418_v6 = vld [vmem:[%s5230_s25 + $0x830] sm:$0xff]  ;;  %v420_v7 = vld [vmem:[%s5230_s25 + $0x838] sm:$0xff] }
  0x54   : > { %413 = vst [vmem:[%s5238_s26 + $0x418] sm:$0xff] %v412_v3  ;;  %415 = vst [vmem:[%s5238_s26 + $0x420] sm:$0xff] %v414_v4  ;;  %v422_v8 = vld [vmem:[%s5230_s25 + $0x840] sm:$0xff]  ;;  %v424_v9 = vld [vmem:[%s5230_s25 + $0x848] sm:$0xff] }
  0x55   : > { %417 = vst [vmem:[%s5238_s26 + $0x428] sm:$0xff] %v416_v5  ;;  %419 = vst [vmem:[%s5238_s26 + $0x430] sm:$0xff] %v418_v6  ;;  %v426_v10 = vld [vmem:[%s5230_s25 + $0x850] sm:$0xff]  ;;  %v428_v11 = vld [vmem:[%s5230_s25 + $0x858] sm:$0xff] }
  0x56   : > { %421 = vst [vmem:[%s5238_s26 + $0x438] sm:$0xff] %v420_v7  ;;  %423 = vst [vmem:[%s5238_s26 + $0x440] sm:$0xff] %v422_v8  ;;  %v430_v12 = vld [vmem:[%s5230_s25 + $0x860] sm:$0xff]  ;;  %v432_v13 = vld [vmem:[%s5230_s25 + $0x868] sm:$0xff] }
  0x57   : > { %425 = vst [vmem:[%s5238_s26 + $0x448] sm:$0xff] %v424_v9  ;;  %427 = vst [vmem:[%s5238_s26 + $0x450] sm:$0xff] %v426_v10  ;;  %v434_v14 = vld [vmem:[%s5230_s25 + $0x870] sm:$0xff]  ;;  %v436_v15 = vld [vmem:[%s5230_s25 + $0x878] sm:$0xff] }
  0x58   : > { %429 = vst [vmem:[%s5238_s26 + $0x458] sm:$0xff] %v428_v11  ;;  %431 = vst [vmem:[%s5238_s26 + $0x460] sm:$0xff] %v430_v12  ;;  %v438_v16 = vld [vmem:[%s5230_s25 + $0x900] sm:$0xff]  ;;  %v440_v17 = vld [vmem:[%s5230_s25 + $0x908] sm:$0xff] }
  0x59   : > { %433 = vst [vmem:[%s5238_s26 + $0x468] sm:$0xff] %v432_v13  ;;  %435 = vst [vmem:[%s5238_s26 + $0x470] sm:$0xff] %v434_v14  ;;  %v442_v18 = vld [vmem:[%s5230_s25 + $0x910] sm:$0xff]  ;;  %v444_v19 = vld [vmem:[%s5230_s25 + $0x918] sm:$0xff] }
  0x5a   : > { %437 = vst [vmem:[%s5238_s26 + $0x478] sm:$0xff] %v436_v15  ;;  %439 = vst [vmem:[%s5238_s26 + $0x480] sm:$0xff] %v438_v16  ;;  %v446_v20 = vld [vmem:[%s5230_s25 + $0x920] sm:$0xff]  ;;  %v448_v21 = vld [vmem:[%s5230_s25 + $0x928] sm:$0xff] }
  0x5b   : > { %441 = vst [vmem:[%s5238_s26 + $0x488] sm:$0xff] %v440_v17  ;;  %443 = vst [vmem:[%s5238_s26 + $0x490] sm:$0xff] %v442_v18  ;;  %v450_v22 = vld [vmem:[%s5230_s25 + $0x930] sm:$0xff]  ;;  %v452_v23 = vld [vmem:[%s5230_s25 + $0x938] sm:$0xff] }
  0x5c   : > { %445 = vst [vmem:[%s5238_s26 + $0x498] sm:$0xff] %v444_v19  ;;  %447 = vst [vmem:[%s5238_s26 + $0x4a0] sm:$0xff] %v446_v20  ;;  %v454_v24 = vld [vmem:[%s5230_s25 + $0x940] sm:$0xff]  ;;  %v456_v25 = vld [vmem:[%s5230_s25 + $0x948] sm:$0xff] }
  0x5d   : > { %449 = vst [vmem:[%s5238_s26 + $0x4a8] sm:$0xff] %v448_v21  ;;  %451 = vst [vmem:[%s5238_s26 + $0x4b0] sm:$0xff] %v450_v22  ;;  %v458_v26 = vld [vmem:[%s5230_s25 + $0x950] sm:$0xff]  ;;  %v460_v27 = vld [vmem:[%s5230_s25 + $0x958] sm:$0xff] }
  0x5e   : > { %453 = vst [vmem:[%s5238_s26 + $0x4b8] sm:$0xff] %v452_v23  ;;  %455 = vst [vmem:[%s5238_s26 + $0x4c0] sm:$0xff] %v454_v24  ;;  %v462_v28 = vld [vmem:[%s5230_s25 + $0x960] sm:$0xff]  ;;  %v464_v29 = vld [vmem:[%s5230_s25 + $0x968] sm:$0xff] }
  0x5f   : > { %457 = vst [vmem:[%s5238_s26 + $0x4c8] sm:$0xff] %v456_v25  ;;  %459 = vst [vmem:[%s5238_s26 + $0x4d0] sm:$0xff] %v458_v26  ;;  %v466_v30 = vld [vmem:[%s5230_s25 + $0x970] sm:$0xff]  ;;  %v468_v31 = vld [vmem:[%s5230_s25 + $0x978] sm:$0xff] }
  0x60   : > { %461 = vst [vmem:[%s5238_s26 + $0x4d8] sm:$0xff] %v460_v27  ;;  %463 = vst [vmem:[%s5238_s26 + $0x4e0] sm:$0xff] %v462_v28  ;;  %v470_v32 = vld [vmem:[%s5230_s25 + $0xa00] sm:$0xff]  ;;  %v472_v33 = vld [vmem:[%s5230_s25 + $0xa08] sm:$0xff] }
  0x61   : > { %465 = vst [vmem:[%s5238_s26 + $0x4e8] sm:$0xff] %v464_v29  ;;  %467 = vst [vmem:[%s5238_s26 + $0x4f0] sm:$0xff] %v466_v30  ;;  %v474_v34 = vld [vmem:[%s5230_s25 + $0xa10] sm:$0xff]  ;;  %v476_v35 = vld [vmem:[%s5230_s25 + $0xa18] sm:$0xff] }
  0x62   : > { %469 = vst [vmem:[%s5238_s26 + $0x4f8] sm:$0xff] %v468_v31  ;;  %471 = vst [vmem:[%s5238_s26 + $0x500] sm:$0xff] %v470_v32  ;;  %v478_v36 = vld [vmem:[%s5230_s25 + $0xa20] sm:$0xff]  ;;  %v480_v37 = vld [vmem:[%s5230_s25 + $0xa28] sm:$0xff] }
  0x63   : > { %473 = vst [vmem:[%s5238_s26 + $0x508] sm:$0xff] %v472_v33  ;;  %475 = vst [vmem:[%s5238_s26 + $0x510] sm:$0xff] %v474_v34  ;;  %v482_v38 = vld [vmem:[%s5230_s25 + $0xa30] sm:$0xff]  ;;  %v484_v39 = vld [vmem:[%s5230_s25 + $0xa38] sm:$0xff] }
  0x64   : > { %477 = vst [vmem:[%s5238_s26 + $0x518] sm:$0xff] %v476_v35  ;;  %479 = vst [vmem:[%s5238_s26 + $0x520] sm:$0xff] %v478_v36  ;;  %v486_v40 = vld [vmem:[%s5230_s25 + $0xa40] sm:$0xff]  ;;  %v488_v41 = vld [vmem:[%s5230_s25 + $0xa48] sm:$0xff] }
  0x65   : > { %481 = vst [vmem:[%s5238_s26 + $0x528] sm:$0xff] %v480_v37  ;;  %483 = vst [vmem:[%s5238_s26 + $0x530] sm:$0xff] %v482_v38  ;;  %v490_v42 = vld [vmem:[%s5230_s25 + $0xa50] sm:$0xff]  ;;  %v492_v43 = vld [vmem:[%s5230_s25 + $0xa58] sm:$0xff] }
  0x66   : > { %485 = vst [vmem:[%s5238_s26 + $0x538] sm:$0xff] %v484_v39  ;;  %487 = vst [vmem:[%s5238_s26 + $0x540] sm:$0xff] %v486_v40  ;;  %v494_v44 = vld [vmem:[%s5230_s25 + $0xa60] sm:$0xff]  ;;  %v496_v45 = vld [vmem:[%s5230_s25 + $0xa68] sm:$0xff] }
  0x67   : > { %489 = vst [vmem:[%s5238_s26 + $0x548] sm:$0xff] %v488_v41  ;;  %491 = vst [vmem:[%s5238_s26 + $0x550] sm:$0xff] %v490_v42  ;;  %v498_v46 = vld [vmem:[%s5230_s25 + $0xa70] sm:$0xff]  ;;  %v500_v47 = vld [vmem:[%s5230_s25 + $0xa78] sm:$0xff] }
  0x68   : > { %493 = vst [vmem:[%s5238_s26 + $0x558] sm:$0xff] %v492_v43  ;;  %495 = vst [vmem:[%s5238_s26 + $0x560] sm:$0xff] %v494_v44  ;;  %v502_v48 = vld [vmem:[%s5230_s25 + $0xb00] sm:$0xff]  ;;  %v504_v49 = vld [vmem:[%s5230_s25 + $0xb08] sm:$0xff] }
  0x69   : > { %497 = vst [vmem:[%s5238_s26 + $0x568] sm:$0xff] %v496_v45  ;;  %499 = vst [vmem:[%s5238_s26 + $0x570] sm:$0xff] %v498_v46  ;;  %v506_v50 = vld [vmem:[%s5230_s25 + $0xb10] sm:$0xff]  ;;  %v508_v51 = vld [vmem:[%s5230_s25 + $0xb18] sm:$0xff] }
  0x6a   : > { %501 = vst [vmem:[%s5238_s26 + $0x578] sm:$0xff] %v500_v47  ;;  %503 = vst [vmem:[%s5238_s26 + $0x580] sm:$0xff] %v502_v48  ;;  %v510_v52 = vld [vmem:[%s5230_s25 + $0xb20] sm:$0xff]  ;;  %v512_v53 = vld [vmem:[%s5230_s25 + $0xb28] sm:$0xff] }
  0x6b   : > { %505 = vst [vmem:[%s5238_s26 + $0x588] sm:$0xff] %v504_v49  ;;  %507 = vst [vmem:[%s5238_s26 + $0x590] sm:$0xff] %v506_v50  ;;  %v514_v54 = vld [vmem:[%s5230_s25 + $0xb30] sm:$0xff]  ;;  %v516_v55 = vld [vmem:[%s5230_s25 + $0xb38] sm:$0xff] }
  0x6c   : > { %509 = vst [vmem:[%s5238_s26 + $0x598] sm:$0xff] %v508_v51  ;;  %511 = vst [vmem:[%s5238_s26 + $0x5a0] sm:$0xff] %v510_v52  ;;  %v518_v56 = vld [vmem:[%s5230_s25 + $0xb40] sm:$0xff]  ;;  %v520_v57 = vld [vmem:[%s5230_s25 + $0xb48] sm:$0xff] }
  0x6d   : > { %513 = vst [vmem:[%s5238_s26 + $0x5a8] sm:$0xff] %v512_v53  ;;  %515 = vst [vmem:[%s5238_s26 + $0x5b0] sm:$0xff] %v514_v54  ;;  %v522_v58 = vld [vmem:[%s5230_s25 + $0xb50] sm:$0xff]  ;;  %v524_v59 = vld [vmem:[%s5230_s25 + $0xb58] sm:$0xff] }
  0x6e   : > { %517 = vst [vmem:[%s5238_s26 + $0x5b8] sm:$0xff] %v516_v55  ;;  %519 = vst [vmem:[%s5238_s26 + $0x5c0] sm:$0xff] %v518_v56  ;;  %v526_v60 = vld [vmem:[%s5230_s25 + $0xb60] sm:$0xff]  ;;  %v528_v61 = vld [vmem:[%s5230_s25 + $0xb68] sm:$0xff] }
  0x6f   : > { %521 = vst [vmem:[%s5238_s26 + $0x5c8] sm:$0xff] %v520_v57  ;;  %523 = vst [vmem:[%s5238_s26 + $0x5d0] sm:$0xff] %v522_v58  ;;  %v530_v62 = vld [vmem:[%s5230_s25 + $0xb70] sm:$0xff]  ;;  %v532_v63 = vld [vmem:[%s5230_s25 + $0xb78] sm:$0xff] }
  0x70   : > { %525 = vst [vmem:[%s5238_s26 + $0x5d8] sm:$0xff] %v524_v59  ;;  %527 = vst [vmem:[%s5238_s26 + $0x5e0] sm:$0xff] %v526_v60  ;;  %v534_v0 = vld [vmem:[%s5230_s25 + $0xc00] sm:$0xff]  ;;  %v536_v1 = vld [vmem:[%s5230_s25 + $0xc08] sm:$0xff] }
  0x71   : > { %529 = vst [vmem:[%s5238_s26 + $0x5e8] sm:$0xff] %v528_v61  ;;  %531 = vst [vmem:[%s5238_s26 + $0x5f0] sm:$0xff] %v530_v62  ;;  %v538_v2 = vld [vmem:[%s5230_s25 + $0xc10] sm:$0xff]  ;;  %v540_v3 = vld [vmem:[%s5230_s25 + $0xc18] sm:$0xff] }
  0x72   : > { %533 = vst [vmem:[%s5238_s26 + $0x5f8] sm:$0xff] %v532_v63  ;;  %535 = vst [vmem:[%s5238_s26 + $0x600] sm:$0xff] %v534_v0  ;;  %v542_v4 = vld [vmem:[%s5230_s25 + $0xc20] sm:$0xff]  ;;  %v544_v5 = vld [vmem:[%s5230_s25 + $0xc28] sm:$0xff] }
  0x73   : > { %537 = vst [vmem:[%s5238_s26 + $0x608] sm:$0xff] %v536_v1  ;;  %539 = vst [vmem:[%s5238_s26 + $0x610] sm:$0xff] %v538_v2  ;;  %v546_v6 = vld [vmem:[%s5230_s25 + $0xc30] sm:$0xff]  ;;  %v548_v7 = vld [vmem:[%s5230_s25 + $0xc38] sm:$0xff] }
  0x74   : > { %541 = vst [vmem:[%s5238_s26 + $0x618] sm:$0xff] %v540_v3  ;;  %543 = vst [vmem:[%s5238_s26 + $0x620] sm:$0xff] %v542_v4  ;;  %v550_v8 = vld [vmem:[%s5230_s25 + $0xc40] sm:$0xff]  ;;  %v552_v9 = vld [vmem:[%s5230_s25 + $0xc48] sm:$0xff] }
  0x75   : > { %545 = vst [vmem:[%s5238_s26 + $0x628] sm:$0xff] %v544_v5  ;;  %547 = vst [vmem:[%s5238_s26 + $0x630] sm:$0xff] %v546_v6  ;;  %v554_v10 = vld [vmem:[%s5230_s25 + $0xc50] sm:$0xff]  ;;  %v556_v11 = vld [vmem:[%s5230_s25 + $0xc58] sm:$0xff] }
  0x76   : > { %549 = vst [vmem:[%s5238_s26 + $0x638] sm:$0xff] %v548_v7  ;;  %551 = vst [vmem:[%s5238_s26 + $0x640] sm:$0xff] %v550_v8  ;;  %v558_v12 = vld [vmem:[%s5230_s25 + $0xc60] sm:$0xff]  ;;  %v560_v13 = vld [vmem:[%s5230_s25 + $0xc68] sm:$0xff] }
  0x77   : > { %553 = vst [vmem:[%s5238_s26 + $0x648] sm:$0xff] %v552_v9  ;;  %555 = vst [vmem:[%s5238_s26 + $0x650] sm:$0xff] %v554_v10  ;;  %v562_v14 = vld [vmem:[%s5230_s25 + $0xc70] sm:$0xff]  ;;  %v564_v15 = vld [vmem:[%s5230_s25 + $0xc78] sm:$0xff] }
  0x78   : > { %557 = vst [vmem:[%s5238_s26 + $0x658] sm:$0xff] %v556_v11  ;;  %559 = vst [vmem:[%s5238_s26 + $0x660] sm:$0xff] %v558_v12  ;;  %v566_v16 = vld [vmem:[%s5230_s25 + $0xd00] sm:$0xff]  ;;  %v568_v17 = vld [vmem:[%s5230_s25 + $0xd08] sm:$0xff] }
  0x79   : > { %561 = vst [vmem:[%s5238_s26 + $0x668] sm:$0xff] %v560_v13  ;;  %563 = vst [vmem:[%s5238_s26 + $0x670] sm:$0xff] %v562_v14  ;;  %v570_v18 = vld [vmem:[%s5230_s25 + $0xd10] sm:$0xff]  ;;  %v572_v19 = vld [vmem:[%s5230_s25 + $0xd18] sm:$0xff] }
  0x7a   : > { %565 = vst [vmem:[%s5238_s26 + $0x678] sm:$0xff] %v564_v15  ;;  %567 = vst [vmem:[%s5238_s26 + $0x680] sm:$0xff] %v566_v16  ;;  %v574_v20 = vld [vmem:[%s5230_s25 + $0xd20] sm:$0xff]  ;;  %v576_v21 = vld [vmem:[%s5230_s25 + $0xd28] sm:$0xff] }
  0x7b   : > { %569 = vst [vmem:[%s5238_s26 + $0x688] sm:$0xff] %v568_v17  ;;  %571 = vst [vmem:[%s5238_s26 + $0x690] sm:$0xff] %v570_v18  ;;  %v578_v22 = vld [vmem:[%s5230_s25 + $0xd30] sm:$0xff]  ;;  %v580_v23 = vld [vmem:[%s5230_s25 + $0xd38] sm:$0xff] }
  0x7c   : > { %573 = vst [vmem:[%s5238_s26 + $0x698] sm:$0xff] %v572_v19  ;;  %575 = vst [vmem:[%s5238_s26 + $0x6a0] sm:$0xff] %v574_v20  ;;  %v582_v24 = vld [vmem:[%s5230_s25 + $0xd40] sm:$0xff]  ;;  %v584_v25 = vld [vmem:[%s5230_s25 + $0xd48] sm:$0xff] }
  0x7d   : > { %577 = vst [vmem:[%s5238_s26 + $0x6a8] sm:$0xff] %v576_v21  ;;  %579 = vst [vmem:[%s5238_s26 + $0x6b0] sm:$0xff] %v578_v22  ;;  %v586_v26 = vld [vmem:[%s5230_s25 + $0xd50] sm:$0xff]  ;;  %v588_v27 = vld [vmem:[%s5230_s25 + $0xd58] sm:$0xff] }
  0x7e   : > { %581 = vst [vmem:[%s5238_s26 + $0x6b8] sm:$0xff] %v580_v23  ;;  %583 = vst [vmem:[%s5238_s26 + $0x6c0] sm:$0xff] %v582_v24  ;;  %v590_v28 = vld [vmem:[%s5230_s25 + $0xd60] sm:$0xff]  ;;  %v592_v29 = vld [vmem:[%s5230_s25 + $0xd68] sm:$0xff] }
  0x7f   : > { %585 = vst [vmem:[%s5238_s26 + $0x6c8] sm:$0xff] %v584_v25  ;;  %587 = vst [vmem:[%s5238_s26 + $0x6d0] sm:$0xff] %v586_v26  ;;  %v594_v30 = vld [vmem:[%s5230_s25 + $0xd70] sm:$0xff]  ;;  %v596_v31 = vld [vmem:[%s5230_s25 + $0xd78] sm:$0xff] }
  0x80   : > { %589 = vst [vmem:[%s5238_s26 + $0x6d8] sm:$0xff] %v588_v27  ;;  %591 = vst [vmem:[%s5238_s26 + $0x6e0] sm:$0xff] %v590_v28  ;;  %v598_v32 = vld [vmem:[%s5230_s25 + $0xe00] sm:$0xff]  ;;  %v600_v33 = vld [vmem:[%s5230_s25 + $0xe08] sm:$0xff] }
  0x81   : > { %593 = vst [vmem:[%s5238_s26 + $0x6e8] sm:$0xff] %v592_v29  ;;  %595 = vst [vmem:[%s5238_s26 + $0x6f0] sm:$0xff] %v594_v30  ;;  %v602_v34 = vld [vmem:[%s5230_s25 + $0xe10] sm:$0xff]  ;;  %v604_v35 = vld [vmem:[%s5230_s25 + $0xe18] sm:$0xff] }
  0x82   : > { %597 = vst [vmem:[%s5238_s26 + $0x6f8] sm:$0xff] %v596_v31  ;;  %599 = vst [vmem:[%s5238_s26 + $0x700] sm:$0xff] %v598_v32  ;;  %v606_v36 = vld [vmem:[%s5230_s25 + $0xe20] sm:$0xff]  ;;  %v608_v37 = vld [vmem:[%s5230_s25 + $0xe28] sm:$0xff] }
  0x83   : > { %601 = vst [vmem:[%s5238_s26 + $0x708] sm:$0xff] %v600_v33  ;;  %603 = vst [vmem:[%s5238_s26 + $0x710] sm:$0xff] %v602_v34  ;;  %v610_v38 = vld [vmem:[%s5230_s25 + $0xe30] sm:$0xff]  ;;  %v612_v39 = vld [vmem:[%s5230_s25 + $0xe38] sm:$0xff] }
  0x84   : > { %605 = vst [vmem:[%s5238_s26 + $0x718] sm:$0xff] %v604_v35  ;;  %607 = vst [vmem:[%s5238_s26 + $0x720] sm:$0xff] %v606_v36  ;;  %v614_v40 = vld [vmem:[%s5230_s25 + $0xe40] sm:$0xff]  ;;  %v616_v41 = vld [vmem:[%s5230_s25 + $0xe48] sm:$0xff] }
  0x85   : > { %609 = vst [vmem:[%s5238_s26 + $0x728] sm:$0xff] %v608_v37  ;;  %611 = vst [vmem:[%s5238_s26 + $0x730] sm:$0xff] %v610_v38  ;;  %v618_v42 = vld [vmem:[%s5230_s25 + $0xe50] sm:$0xff]  ;;  %v620_v43 = vld [vmem:[%s5230_s25 + $0xe58] sm:$0xff] }
  0x86   : > { %613 = vst [vmem:[%s5238_s26 + $0x738] sm:$0xff] %v612_v39  ;;  %615 = vst [vmem:[%s5238_s26 + $0x740] sm:$0xff] %v614_v40  ;;  %v622_v44 = vld [vmem:[%s5230_s25 + $0xe60] sm:$0xff]  ;;  %v624_v45 = vld [vmem:[%s5230_s25 + $0xe68] sm:$0xff] }
  0x87   : > { %617 = vst [vmem:[%s5238_s26 + $0x748] sm:$0xff] %v616_v41  ;;  %619 = vst [vmem:[%s5238_s26 + $0x750] sm:$0xff] %v618_v42  ;;  %v626_v46 = vld [vmem:[%s5230_s25 + $0xe70] sm:$0xff]  ;;  %v628_v47 = vld [vmem:[%s5230_s25 + $0xe78] sm:$0xff] }
  0x88   : > { %621 = vst [vmem:[%s5238_s26 + $0x758] sm:$0xff] %v620_v43  ;;  %623 = vst [vmem:[%s5238_s26 + $0x760] sm:$0xff] %v622_v44  ;;  %v630_v48 = vld [vmem:[%s5230_s25 + $0xf00] sm:$0xff]  ;;  %v632_v49 = vld [vmem:[%s5230_s25 + $0xf08] sm:$0xff] }
  0x89   : > { %625 = vst [vmem:[%s5238_s26 + $0x768] sm:$0xff] %v624_v45  ;;  %627 = vst [vmem:[%s5238_s26 + $0x770] sm:$0xff] %v626_v46  ;;  %v634_v50 = vld [vmem:[%s5230_s25 + $0xf10] sm:$0xff]  ;;  %v636_v51 = vld [vmem:[%s5230_s25 + $0xf18] sm:$0xff] }
  0x8a   : > { %629 = vst [vmem:[%s5238_s26 + $0x778] sm:$0xff] %v628_v47  ;;  %631 = vst [vmem:[%s5238_s26 + $0x780] sm:$0xff] %v630_v48  ;;  %v638_v52 = vld [vmem:[%s5230_s25 + $0xf20] sm:$0xff]  ;;  %v640_v53 = vld [vmem:[%s5230_s25 + $0xf28] sm:$0xff] }
  0x8b   : > { %633 = vst [vmem:[%s5238_s26 + $0x788] sm:$0xff] %v632_v49  ;;  %635 = vst [vmem:[%s5238_s26 + $0x790] sm:$0xff] %v634_v50  ;;  %v642_v54 = vld [vmem:[%s5230_s25 + $0xf30] sm:$0xff]  ;;  %v644_v55 = vld [vmem:[%s5230_s25 + $0xf38] sm:$0xff] }
  0x8c   : > { %637 = vst [vmem:[%s5238_s26 + $0x798] sm:$0xff] %v636_v51  ;;  %639 = vst [vmem:[%s5238_s26 + $0x7a0] sm:$0xff] %v638_v52  ;;  %v646_v56 = vld [vmem:[%s5230_s25 + $0xf40] sm:$0xff]  ;;  %v648_v57 = vld [vmem:[%s5230_s25 + $0xf48] sm:$0xff] }
  0x8d   : > { %641 = vst [vmem:[%s5238_s26 + $0x7a8] sm:$0xff] %v640_v53  ;;  %643 = vst [vmem:[%s5238_s26 + $0x7b0] sm:$0xff] %v642_v54  ;;  %v650_v58 = vld [vmem:[%s5230_s25 + $0xf50] sm:$0xff]  ;;  %v652_v59 = vld [vmem:[%s5230_s25 + $0xf58] sm:$0xff] }
  0x8e   : > { %645 = vst [vmem:[%s5238_s26 + $0x7b8] sm:$0xff] %v644_v55  ;;  %647 = vst [vmem:[%s5238_s26 + $0x7c0] sm:$0xff] %v646_v56  ;;  %v654_v60 = vld [vmem:[%s5230_s25 + $0xf60] sm:$0xff]  ;;  %v656_v61 = vld [vmem:[%s5230_s25 + $0xf68] sm:$0xff] }
  0x8f   : > { %649 = vst [vmem:[%s5238_s26 + $0x7c8] sm:$0xff] %v648_v57  ;;  %651 = vst [vmem:[%s5238_s26 + $0x7d0] sm:$0xff] %v650_v58  ;;  %v658_v62 = vld [vmem:[%s5230_s25 + $0xf70] sm:$0xff]  ;;  %v660_v63 = vld [vmem:[%s5230_s25 + $0xf78] sm:$0xff] }
  0x90   : > { %653 = vst [vmem:[%s5238_s26 + $0x7d8] sm:$0xff] %v652_v59  ;;  %655 = vst [vmem:[%s5238_s26 + $0x7e0] sm:$0xff] %v654_v60  ;;  %v662_v0 = vld [vmem:[%s5230_s25 + $0x1000] sm:$0xff]  ;;  %v664_v1 = vld [vmem:[%s5230_s25 + $0x1008] sm:$0xff] }
  0x91   : > { %657 = vst [vmem:[%s5238_s26 + $0x7e8] sm:$0xff] %v656_v61  ;;  %659 = vst [vmem:[%s5238_s26 + $0x7f0] sm:$0xff] %v658_v62  ;;  %v666_v2 = vld [vmem:[%s5230_s25 + $0x1010] sm:$0xff]  ;;  %v668_v3 = vld [vmem:[%s5230_s25 + $0x1018] sm:$0xff] }
  0x92   : > { %661 = vst [vmem:[%s5238_s26 + $0x7f8] sm:$0xff] %v660_v63  ;;  %663 = vst [vmem:[%s5238_s26 + $0x800] sm:$0xff] %v662_v0  ;;  %v670_v4 = vld [vmem:[%s5230_s25 + $0x1020] sm:$0xff]  ;;  %v672_v5 = vld [vmem:[%s5230_s25 + $0x1028] sm:$0xff] }
  0x93   : > { %665 = vst [vmem:[%s5238_s26 + $0x808] sm:$0xff] %v664_v1  ;;  %667 = vst [vmem:[%s5238_s26 + $0x810] sm:$0xff] %v666_v2  ;;  %v674_v6 = vld [vmem:[%s5230_s25 + $0x1030] sm:$0xff]  ;;  %v676_v7 = vld [vmem:[%s5230_s25 + $0x1038] sm:$0xff] }
  0x94   : > { %669 = vst [vmem:[%s5238_s26 + $0x818] sm:$0xff] %v668_v3  ;;  %671 = vst [vmem:[%s5238_s26 + $0x820] sm:$0xff] %v670_v4  ;;  %v678_v8 = vld [vmem:[%s5230_s25 + $0x1040] sm:$0xff]  ;;  %v680_v9 = vld [vmem:[%s5230_s25 + $0x1048] sm:$0xff] }
  0x95   : > { %673 = vst [vmem:[%s5238_s26 + $0x828] sm:$0xff] %v672_v5  ;;  %675 = vst [vmem:[%s5238_s26 + $0x830] sm:$0xff] %v674_v6  ;;  %v682_v10 = vld [vmem:[%s5230_s25 + $0x1050] sm:$0xff]  ;;  %v684_v11 = vld [vmem:[%s5230_s25 + $0x1058] sm:$0xff] }
  0x96   : > { %677 = vst [vmem:[%s5238_s26 + $0x838] sm:$0xff] %v676_v7  ;;  %679 = vst [vmem:[%s5238_s26 + $0x840] sm:$0xff] %v678_v8  ;;  %v686_v12 = vld [vmem:[%s5230_s25 + $0x1060] sm:$0xff]  ;;  %v688_v13 = vld [vmem:[%s5230_s25 + $0x1068] sm:$0xff] }
  0x97   : > { %681 = vst [vmem:[%s5238_s26 + $0x848] sm:$0xff] %v680_v9  ;;  %683 = vst [vmem:[%s5238_s26 + $0x850] sm:$0xff] %v682_v10  ;;  %v690_v14 = vld [vmem:[%s5230_s25 + $0x1070] sm:$0xff]  ;;  %v692_v15 = vld [vmem:[%s5230_s25 + $0x1078] sm:$0xff] }
  0x98   : > { %685 = vst [vmem:[%s5238_s26 + $0x858] sm:$0xff] %v684_v11  ;;  %687 = vst [vmem:[%s5238_s26 + $0x860] sm:$0xff] %v686_v12  ;;  %v694_v16 = vld [vmem:[%s5230_s25 + $0x1100] sm:$0xff]  ;;  %v696_v17 = vld [vmem:[%s5230_s25 + $0x1108] sm:$0xff] }
  0x99   : > { %689 = vst [vmem:[%s5238_s26 + $0x868] sm:$0xff] %v688_v13  ;;  %691 = vst [vmem:[%s5238_s26 + $0x870] sm:$0xff] %v690_v14  ;;  %v698_v18 = vld [vmem:[%s5230_s25 + $0x1110] sm:$0xff]  ;;  %v700_v19 = vld [vmem:[%s5230_s25 + $0x1118] sm:$0xff] }
  0x9a   : > { %693 = vst [vmem:[%s5238_s26 + $0x878] sm:$0xff] %v692_v15  ;;  %695 = vst [vmem:[%s5238_s26 + $0x880] sm:$0xff] %v694_v16  ;;  %v702_v20 = vld [vmem:[%s5230_s25 + $0x1120] sm:$0xff]  ;;  %v704_v21 = vld [vmem:[%s5230_s25 + $0x1128] sm:$0xff] }
  0x9b   : > { %697 = vst [vmem:[%s5238_s26 + $0x888] sm:$0xff] %v696_v17  ;;  %699 = vst [vmem:[%s5238_s26 + $0x890] sm:$0xff] %v698_v18  ;;  %v706_v22 = vld [vmem:[%s5230_s25 + $0x1130] sm:$0xff]  ;;  %v708_v23 = vld [vmem:[%s5230_s25 + $0x1138] sm:$0xff] }
  0x9c   : > { %701 = vst [vmem:[%s5238_s26 + $0x898] sm:$0xff] %v700_v19  ;;  %703 = vst [vmem:[%s5238_s26 + $0x8a0] sm:$0xff] %v702_v20  ;;  %v710_v24 = vld [vmem:[%s5230_s25 + $0x1140] sm:$0xff]  ;;  %v712_v25 = vld [vmem:[%s5230_s25 + $0x1148] sm:$0xff] }
  0x9d   : > { %705 = vst [vmem:[%s5238_s26 + $0x8a8] sm:$0xff] %v704_v21  ;;  %707 = vst [vmem:[%s5238_s26 + $0x8b0] sm:$0xff] %v706_v22  ;;  %v714_v26 = vld [vmem:[%s5230_s25 + $0x1150] sm:$0xff]  ;;  %v716_v27 = vld [vmem:[%s5230_s25 + $0x1158] sm:$0xff] }
  0x9e   : > { %709 = vst [vmem:[%s5238_s26 + $0x8b8] sm:$0xff] %v708_v23  ;;  %711 = vst [vmem:[%s5238_s26 + $0x8c0] sm:$0xff] %v710_v24  ;;  %v718_v28 = vld [vmem:[%s5230_s25 + $0x1160] sm:$0xff]  ;;  %v720_v29 = vld [vmem:[%s5230_s25 + $0x1168] sm:$0xff] }
  0x9f   : > { %713 = vst [vmem:[%s5238_s26 + $0x8c8] sm:$0xff] %v712_v25  ;;  %715 = vst [vmem:[%s5238_s26 + $0x8d0] sm:$0xff] %v714_v26  ;;  %v722_v30 = vld [vmem:[%s5230_s25 + $0x1170] sm:$0xff]  ;;  %v724_v31 = vld [vmem:[%s5230_s25 + $0x1178] sm:$0xff] }
  0xa0   : > { %717 = vst [vmem:[%s5238_s26 + $0x8d8] sm:$0xff] %v716_v27  ;;  %719 = vst [vmem:[%s5238_s26 + $0x8e0] sm:$0xff] %v718_v28  ;;  %v726_v32 = vld [vmem:[%s5230_s25 + $0x1200] sm:$0xff]  ;;  %v728_v33 = vld [vmem:[%s5230_s25 + $0x1208] sm:$0xff] }
  0xa1   : > { %721 = vst [vmem:[%s5238_s26 + $0x8e8] sm:$0xff] %v720_v29  ;;  %723 = vst [vmem:[%s5238_s26 + $0x8f0] sm:$0xff] %v722_v30  ;;  %v730_v34 = vld [vmem:[%s5230_s25 + $0x1210] sm:$0xff]  ;;  %v732_v35 = vld [vmem:[%s5230_s25 + $0x1218] sm:$0xff] }
  0xa2   : > { %725 = vst [vmem:[%s5238_s26 + $0x8f8] sm:$0xff] %v724_v31  ;;  %727 = vst [vmem:[%s5238_s26 + $0x900] sm:$0xff] %v726_v32  ;;  %v734_v36 = vld [vmem:[%s5230_s25 + $0x1220] sm:$0xff]  ;;  %v736_v37 = vld [vmem:[%s5230_s25 + $0x1228] sm:$0xff] }
  0xa3   : > { %729 = vst [vmem:[%s5238_s26 + $0x908] sm:$0xff] %v728_v33  ;;  %731 = vst [vmem:[%s5238_s26 + $0x910] sm:$0xff] %v730_v34  ;;  %v738_v38 = vld [vmem:[%s5230_s25 + $0x1230] sm:$0xff]  ;;  %v740_v39 = vld [vmem:[%s5230_s25 + $0x1238] sm:$0xff] }
  0xa4   : > { %733 = vst [vmem:[%s5238_s26 + $0x918] sm:$0xff] %v732_v35  ;;  %735 = vst [vmem:[%s5238_s26 + $0x920] sm:$0xff] %v734_v36  ;;  %v742_v40 = vld [vmem:[%s5230_s25 + $0x1240] sm:$0xff]  ;;  %v744_v41 = vld [vmem:[%s5230_s25 + $0x1248] sm:$0xff] }
  0xa5   : > { %737 = vst [vmem:[%s5238_s26 + $0x928] sm:$0xff] %v736_v37  ;;  %739 = vst [vmem:[%s5238_s26 + $0x930] sm:$0xff] %v738_v38  ;;  %v746_v42 = vld [vmem:[%s5230_s25 + $0x1250] sm:$0xff]  ;;  %v748_v43 = vld [vmem:[%s5230_s25 + $0x1258] sm:$0xff] }
  0xa6   : > { %741 = vst [vmem:[%s5238_s26 + $0x938] sm:$0xff] %v740_v39  ;;  %743 = vst [vmem:[%s5238_s26 + $0x940] sm:$0xff] %v742_v40  ;;  %v750_v44 = vld [vmem:[%s5230_s25 + $0x1260] sm:$0xff]  ;;  %v752_v45 = vld [vmem:[%s5230_s25 + $0x1268] sm:$0xff] }
  0xa7   : > { %745 = vst [vmem:[%s5238_s26 + $0x948] sm:$0xff] %v744_v41  ;;  %747 = vst [vmem:[%s5238_s26 + $0x950] sm:$0xff] %v746_v42  ;;  %v754_v46 = vld [vmem:[%s5230_s25 + $0x1270] sm:$0xff]  ;;  %v756_v47 = vld [vmem:[%s5230_s25 + $0x1278] sm:$0xff] }
  0xa8   : > { %749 = vst [vmem:[%s5238_s26 + $0x958] sm:$0xff] %v748_v43  ;;  %751 = vst [vmem:[%s5238_s26 + $0x960] sm:$0xff] %v750_v44  ;;  %v758_v48 = vld [vmem:[%s5230_s25 + $0x1300] sm:$0xff]  ;;  %v760_v49 = vld [vmem:[%s5230_s25 + $0x1308] sm:$0xff] }
  0xa9   : > { %753 = vst [vmem:[%s5238_s26 + $0x968] sm:$0xff] %v752_v45  ;;  %755 = vst [vmem:[%s5238_s26 + $0x970] sm:$0xff] %v754_v46  ;;  %v762_v50 = vld [vmem:[%s5230_s25 + $0x1310] sm:$0xff]  ;;  %v764_v51 = vld [vmem:[%s5230_s25 + $0x1318] sm:$0xff] }
  0xaa   : > { %757 = vst [vmem:[%s5238_s26 + $0x978] sm:$0xff] %v756_v47  ;;  %759 = vst [vmem:[%s5238_s26 + $0x980] sm:$0xff] %v758_v48  ;;  %v766_v52 = vld [vmem:[%s5230_s25 + $0x1320] sm:$0xff]  ;;  %v768_v53 = vld [vmem:[%s5230_s25 + $0x1328] sm:$0xff] }
  0xab   : > { %761 = vst [vmem:[%s5238_s26 + $0x988] sm:$0xff] %v760_v49  ;;  %763 = vst [vmem:[%s5238_s26 + $0x990] sm:$0xff] %v762_v50  ;;  %v770_v54 = vld [vmem:[%s5230_s25 + $0x1330] sm:$0xff]  ;;  %v772_v55 = vld [vmem:[%s5230_s25 + $0x1338] sm:$0xff] }
  0xac   : > { %765 = vst [vmem:[%s5238_s26 + $0x998] sm:$0xff] %v764_v51  ;;  %767 = vst [vmem:[%s5238_s26 + $0x9a0] sm:$0xff] %v766_v52  ;;  %v774_v56 = vld [vmem:[%s5230_s25 + $0x1340] sm:$0xff]  ;;  %v776_v57 = vld [vmem:[%s5230_s25 + $0x1348] sm:$0xff] }
  0xad   : > { %769 = vst [vmem:[%s5238_s26 + $0x9a8] sm:$0xff] %v768_v53  ;;  %771 = vst [vmem:[%s5238_s26 + $0x9b0] sm:$0xff] %v770_v54  ;;  %v778_v58 = vld [vmem:[%s5230_s25 + $0x1350] sm:$0xff]  ;;  %v780_v59 = vld [vmem:[%s5230_s25 + $0x1358] sm:$0xff] }
  0xae   : > { %773 = vst [vmem:[%s5238_s26 + $0x9b8] sm:$0xff] %v772_v55  ;;  %775 = vst [vmem:[%s5238_s26 + $0x9c0] sm:$0xff] %v774_v56  ;;  %v782_v60 = vld [vmem:[%s5230_s25 + $0x1360] sm:$0xff]  ;;  %v784_v61 = vld [vmem:[%s5230_s25 + $0x1368] sm:$0xff] }
  0xaf   : > { %777 = vst [vmem:[%s5238_s26 + $0x9c8] sm:$0xff] %v776_v57  ;;  %779 = vst [vmem:[%s5238_s26 + $0x9d0] sm:$0xff] %v778_v58  ;;  %v786_v62 = vld [vmem:[%s5230_s25 + $0x1370] sm:$0xff]  ;;  %v788_v63 = vld [vmem:[%s5230_s25 + $0x1378] sm:$0xff] }
  0xb0   : > { %781 = vst [vmem:[%s5238_s26 + $0x9d8] sm:$0xff] %v780_v59  ;;  %783 = vst [vmem:[%s5238_s26 + $0x9e0] sm:$0xff] %v782_v60  ;;  %v790_v0 = vld [vmem:[%s5230_s25 + $0x1400] sm:$0xff]  ;;  %v792_v1 = vld [vmem:[%s5230_s25 + $0x1408] sm:$0xff] }
  0xb1   : > { %785 = vst [vmem:[%s5238_s26 + $0x9e8] sm:$0xff] %v784_v61  ;;  %787 = vst [vmem:[%s5238_s26 + $0x9f0] sm:$0xff] %v786_v62  ;;  %v794_v2 = vld [vmem:[%s5230_s25 + $0x1410] sm:$0xff]  ;;  %v796_v3 = vld [vmem:[%s5230_s25 + $0x1418] sm:$0xff] }
  0xb2   : > { %789 = vst [vmem:[%s5238_s26 + $0x9f8] sm:$0xff] %v788_v63  ;;  %791 = vst [vmem:[%s5238_s26 + $0xa00] sm:$0xff] %v790_v0  ;;  %v798_v4 = vld [vmem:[%s5230_s25 + $0x1420] sm:$0xff]  ;;  %v800_v5 = vld [vmem:[%s5230_s25 + $0x1428] sm:$0xff] }
  0xb3   : > { %793 = vst [vmem:[%s5238_s26 + $0xa08] sm:$0xff] %v792_v1  ;;  %795 = vst [vmem:[%s5238_s26 + $0xa10] sm:$0xff] %v794_v2  ;;  %v802_v6 = vld [vmem:[%s5230_s25 + $0x1430] sm:$0xff]  ;;  %v804_v7 = vld [vmem:[%s5230_s25 + $0x1438] sm:$0xff] }
  0xb4   : > { %797 = vst [vmem:[%s5238_s26 + $0xa18] sm:$0xff] %v796_v3  ;;  %799 = vst [vmem:[%s5238_s26 + $0xa20] sm:$0xff] %v798_v4  ;;  %v806_v8 = vld [vmem:[%s5230_s25 + $0x1440] sm:$0xff]  ;;  %v808_v9 = vld [vmem:[%s5230_s25 + $0x1448] sm:$0xff] }
  0xb5   : > { %801 = vst [vmem:[%s5238_s26 + $0xa28] sm:$0xff] %v800_v5  ;;  %803 = vst [vmem:[%s5238_s26 + $0xa30] sm:$0xff] %v802_v6  ;;  %v810_v10 = vld [vmem:[%s5230_s25 + $0x1450] sm:$0xff]  ;;  %v812_v11 = vld [vmem:[%s5230_s25 + $0x1458] sm:$0xff] }
  0xb6   : > { %805 = vst [vmem:[%s5238_s26 + $0xa38] sm:$0xff] %v804_v7  ;;  %807 = vst [vmem:[%s5238_s26 + $0xa40] sm:$0xff] %v806_v8  ;;  %v814_v12 = vld [vmem:[%s5230_s25 + $0x1460] sm:$0xff]  ;;  %v816_v13 = vld [vmem:[%s5230_s25 + $0x1468] sm:$0xff] }
  0xb7   : > { %809 = vst [vmem:[%s5238_s26 + $0xa48] sm:$0xff] %v808_v9  ;;  %811 = vst [vmem:[%s5238_s26 + $0xa50] sm:$0xff] %v810_v10  ;;  %v818_v14 = vld [vmem:[%s5230_s25 + $0x1470] sm:$0xff]  ;;  %v820_v15 = vld [vmem:[%s5230_s25 + $0x1478] sm:$0xff] }
  0xb8   : > { %813 = vst [vmem:[%s5238_s26 + $0xa58] sm:$0xff] %v812_v11  ;;  %815 = vst [vmem:[%s5238_s26 + $0xa60] sm:$0xff] %v814_v12  ;;  %v822_v16 = vld [vmem:[%s5230_s25 + $0x1500] sm:$0xff]  ;;  %v824_v17 = vld [vmem:[%s5230_s25 + $0x1508] sm:$0xff] }
  0xb9   : > { %817 = vst [vmem:[%s5238_s26 + $0xa68] sm:$0xff] %v816_v13  ;;  %819 = vst [vmem:[%s5238_s26 + $0xa70] sm:$0xff] %v818_v14  ;;  %v826_v18 = vld [vmem:[%s5230_s25 + $0x1510] sm:$0xff]  ;;  %v828_v19 = vld [vmem:[%s5230_s25 + $0x1518] sm:$0xff] }
  0xba   : > { %821 = vst [vmem:[%s5238_s26 + $0xa78] sm:$0xff] %v820_v15  ;;  %823 = vst [vmem:[%s5238_s26 + $0xa80] sm:$0xff] %v822_v16  ;;  %v830_v20 = vld [vmem:[%s5230_s25 + $0x1520] sm:$0xff]  ;;  %v832_v21 = vld [vmem:[%s5230_s25 + $0x1528] sm:$0xff] }
  0xbb   : > { %825 = vst [vmem:[%s5238_s26 + $0xa88] sm:$0xff] %v824_v17  ;;  %827 = vst [vmem:[%s5238_s26 + $0xa90] sm:$0xff] %v826_v18  ;;  %v834_v22 = vld [vmem:[%s5230_s25 + $0x1530] sm:$0xff]  ;;  %v836_v23 = vld [vmem:[%s5230_s25 + $0x1538] sm:$0xff] }
  0xbc   : > { %829 = vst [vmem:[%s5238_s26 + $0xa98] sm:$0xff] %v828_v19  ;;  %831 = vst [vmem:[%s5238_s26 + $0xaa0] sm:$0xff] %v830_v20  ;;  %v838_v24 = vld [vmem:[%s5230_s25 + $0x1540] sm:$0xff]  ;;  %v840_v25 = vld [vmem:[%s5230_s25 + $0x1548] sm:$0xff] }
  0xbd   : > { %833 = vst [vmem:[%s5238_s26 + $0xaa8] sm:$0xff] %v832_v21  ;;  %835 = vst [vmem:[%s5238_s26 + $0xab0] sm:$0xff] %v834_v22  ;;  %v842_v26 = vld [vmem:[%s5230_s25 + $0x1550] sm:$0xff]  ;;  %v844_v27 = vld [vmem:[%s5230_s25 + $0x1558] sm:$0xff] }
  0xbe   : > { %837 = vst [vmem:[%s5238_s26 + $0xab8] sm:$0xff] %v836_v23  ;;  %839 = vst [vmem:[%s5238_s26 + $0xac0] sm:$0xff] %v838_v24  ;;  %v846_v28 = vld [vmem:[%s5230_s25 + $0x1560] sm:$0xff]  ;;  %v848_v29 = vld [vmem:[%s5230_s25 + $0x1568] sm:$0xff] }
  0xbf   : > { %841 = vst [vmem:[%s5238_s26 + $0xac8] sm:$0xff] %v840_v25  ;;  %843 = vst [vmem:[%s5238_s26 + $0xad0] sm:$0xff] %v842_v26  ;;  %v850_v30 = vld [vmem:[%s5230_s25 + $0x1570] sm:$0xff]  ;;  %v852_v31 = vld [vmem:[%s5230_s25 + $0x1578] sm:$0xff] }
  0xc0   : > { %845 = vst [vmem:[%s5238_s26 + $0xad8] sm:$0xff] %v844_v27  ;;  %847 = vst [vmem:[%s5238_s26 + $0xae0] sm:$0xff] %v846_v28  ;;  %v854_v32 = vld [vmem:[%s5230_s25 + $0x1600] sm:$0xff]  ;;  %v856_v33 = vld [vmem:[%s5230_s25 + $0x1608] sm:$0xff] }
  0xc1   : > { %849 = vst [vmem:[%s5238_s26 + $0xae8] sm:$0xff] %v848_v29  ;;  %851 = vst [vmem:[%s5238_s26 + $0xaf0] sm:$0xff] %v850_v30  ;;  %v858_v34 = vld [vmem:[%s5230_s25 + $0x1610] sm:$0xff]  ;;  %v860_v35 = vld [vmem:[%s5230_s25 + $0x1618] sm:$0xff] }
  0xc2   : > { %853 = vst [vmem:[%s5238_s26 + $0xaf8] sm:$0xff] %v852_v31  ;;  %855 = vst [vmem:[%s5238_s26 + $0xb00] sm:$0xff] %v854_v32  ;;  %v862_v36 = vld [vmem:[%s5230_s25 + $0x1620] sm:$0xff]  ;;  %v864_v37 = vld [vmem:[%s5230_s25 + $0x1628] sm:$0xff] }
  0xc3   : > { %857 = vst [vmem:[%s5238_s26 + $0xb08] sm:$0xff] %v856_v33  ;;  %859 = vst [vmem:[%s5238_s26 + $0xb10] sm:$0xff] %v858_v34  ;;  %v866_v38 = vld [vmem:[%s5230_s25 + $0x1630] sm:$0xff]  ;;  %v868_v39 = vld [vmem:[%s5230_s25 + $0x1638] sm:$0xff] }
  0xc4   : > { %861 = vst [vmem:[%s5238_s26 + $0xb18] sm:$0xff] %v860_v35  ;;  %863 = vst [vmem:[%s5238_s26 + $0xb20] sm:$0xff] %v862_v36  ;;  %v870_v40 = vld [vmem:[%s5230_s25 + $0x1640] sm:$0xff]  ;;  %v872_v41 = vld [vmem:[%s5230_s25 + $0x1648] sm:$0xff] }
  0xc5   : > { %865 = vst [vmem:[%s5238_s26 + $0xb28] sm:$0xff] %v864_v37  ;;  %867 = vst [vmem:[%s5238_s26 + $0xb30] sm:$0xff] %v866_v38  ;;  %v874_v42 = vld [vmem:[%s5230_s25 + $0x1650] sm:$0xff]  ;;  %v876_v43 = vld [vmem:[%s5230_s25 + $0x1658] sm:$0xff] }
  0xc6   : > { %869 = vst [vmem:[%s5238_s26 + $0xb38] sm:$0xff] %v868_v39  ;;  %871 = vst [vmem:[%s5238_s26 + $0xb40] sm:$0xff] %v870_v40  ;;  %v878_v44 = vld [vmem:[%s5230_s25 + $0x1660] sm:$0xff]  ;;  %v880_v45 = vld [vmem:[%s5230_s25 + $0x1668] sm:$0xff] }
  0xc7   : > { %873 = vst [vmem:[%s5238_s26 + $0xb48] sm:$0xff] %v872_v41  ;;  %875 = vst [vmem:[%s5238_s26 + $0xb50] sm:$0xff] %v874_v42  ;;  %v882_v46 = vld [vmem:[%s5230_s25 + $0x1670] sm:$0xff]  ;;  %v884_v47 = vld [vmem:[%s5230_s25 + $0x1678] sm:$0xff] }
  0xc8   : > { %877 = vst [vmem:[%s5238_s26 + $0xb58] sm:$0xff] %v876_v43  ;;  %879 = vst [vmem:[%s5238_s26 + $0xb60] sm:$0xff] %v878_v44  ;;  %v886_v48 = vld [vmem:[%s5230_s25 + $0x1700] sm:$0xff]  ;;  %v888_v49 = vld [vmem:[%s5230_s25 + $0x1708] sm:$0xff] }
  0xc9   : > { %881 = vst [vmem:[%s5238_s26 + $0xb68] sm:$0xff] %v880_v45  ;;  %883 = vst [vmem:[%s5238_s26 + $0xb70] sm:$0xff] %v882_v46  ;;  %v890_v50 = vld [vmem:[%s5230_s25 + $0x1710] sm:$0xff]  ;;  %v892_v51 = vld [vmem:[%s5230_s25 + $0x1718] sm:$0xff] }
  0xca   : > { %885 = vst [vmem:[%s5238_s26 + $0xb78] sm:$0xff] %v884_v47  ;;  %887 = vst [vmem:[%s5238_s26 + $0xb80] sm:$0xff] %v886_v48  ;;  %v894_v52 = vld [vmem:[%s5230_s25 + $0x1720] sm:$0xff]  ;;  %v896_v53 = vld [vmem:[%s5230_s25 + $0x1728] sm:$0xff] }
  0xcb   : > { %889 = vst [vmem:[%s5238_s26 + $0xb88] sm:$0xff] %v888_v49  ;;  %891 = vst [vmem:[%s5238_s26 + $0xb90] sm:$0xff] %v890_v50  ;;  %v898_v54 = vld [vmem:[%s5230_s25 + $0x1730] sm:$0xff]  ;;  %v900_v55 = vld [vmem:[%s5230_s25 + $0x1738] sm:$0xff] }
  0xcc   : > { %893 = vst [vmem:[%s5238_s26 + $0xb98] sm:$0xff] %v892_v51  ;;  %895 = vst [vmem:[%s5238_s26 + $0xba0] sm:$0xff] %v894_v52  ;;  %v902_v56 = vld [vmem:[%s5230_s25 + $0x1740] sm:$0xff]  ;;  %v904_v57 = vld [vmem:[%s5230_s25 + $0x1748] sm:$0xff] }
  0xcd   : > { %897 = vst [vmem:[%s5238_s26 + $0xba8] sm:$0xff] %v896_v53  ;;  %899 = vst [vmem:[%s5238_s26 + $0xbb0] sm:$0xff] %v898_v54  ;;  %v906_v58 = vld [vmem:[%s5230_s25 + $0x1750] sm:$0xff]  ;;  %v908_v59 = vld [vmem:[%s5230_s25 + $0x1758] sm:$0xff] }
  0xce   : > { %901 = vst [vmem:[%s5238_s26 + $0xbb8] sm:$0xff] %v900_v55  ;;  %903 = vst [vmem:[%s5238_s26 + $0xbc0] sm:$0xff] %v902_v56  ;;  %v910_v60 = vld [vmem:[%s5230_s25 + $0x1760] sm:$0xff]  ;;  %v912_v61 = vld [vmem:[%s5230_s25 + $0x1768] sm:$0xff] }
  0xcf   : > { %905 = vst [vmem:[%s5238_s26 + $0xbc8] sm:$0xff] %v904_v57  ;;  %907 = vst [vmem:[%s5238_s26 + $0xbd0] sm:$0xff] %v906_v58  ;;  %v914_v62 = vld [vmem:[%s5230_s25 + $0x1770] sm:$0xff]  ;;  %v916_v63 = vld [vmem:[%s5230_s25 + $0x1778] sm:$0xff] }
  0xd0   : > { %909 = vst [vmem:[%s5238_s26 + $0xbd8] sm:$0xff] %v908_v59  ;;  %911 = vst [vmem:[%s5238_s26 + $0xbe0] sm:$0xff] %v910_v60  ;;  %v918_v0 = vld [vmem:[%s5230_s25 + $0x1800] sm:$0xff]  ;;  %v920_v1 = vld [vmem:[%s5230_s25 + $0x1808] sm:$0xff] }
  0xd1   : > { %913 = vst [vmem:[%s5238_s26 + $0xbe8] sm:$0xff] %v912_v61  ;;  %915 = vst [vmem:[%s5238_s26 + $0xbf0] sm:$0xff] %v914_v62  ;;  %v922_v2 = vld [vmem:[%s5230_s25 + $0x1810] sm:$0xff]  ;;  %v924_v3 = vld [vmem:[%s5230_s25 + $0x1818] sm:$0xff] }
  0xd2   : > { %917 = vst [vmem:[%s5238_s26 + $0xbf8] sm:$0xff] %v916_v63  ;;  %919 = vst [vmem:[%s5238_s26 + $0xc00] sm:$0xff] %v918_v0  ;;  %v926_v4 = vld [vmem:[%s5230_s25 + $0x1820] sm:$0xff]  ;;  %v928_v5 = vld [vmem:[%s5230_s25 + $0x1828] sm:$0xff] }
  0xd3   : > { %921 = vst [vmem:[%s5238_s26 + $0xc08] sm:$0xff] %v920_v1  ;;  %923 = vst [vmem:[%s5238_s26 + $0xc10] sm:$0xff] %v922_v2  ;;  %v930_v6 = vld [vmem:[%s5230_s25 + $0x1830] sm:$0xff]  ;;  %v932_v7 = vld [vmem:[%s5230_s25 + $0x1838] sm:$0xff] }
  0xd4   : > { %925 = vst [vmem:[%s5238_s26 + $0xc18] sm:$0xff] %v924_v3  ;;  %927 = vst [vmem:[%s5238_s26 + $0xc20] sm:$0xff] %v926_v4  ;;  %v934_v8 = vld [vmem:[%s5230_s25 + $0x1840] sm:$0xff]  ;;  %v936_v9 = vld [vmem:[%s5230_s25 + $0x1848] sm:$0xff] }
  0xd5   : > { %929 = vst [vmem:[%s5238_s26 + $0xc28] sm:$0xff] %v928_v5  ;;  %931 = vst [vmem:[%s5238_s26 + $0xc30] sm:$0xff] %v930_v6  ;;  %v938_v10 = vld [vmem:[%s5230_s25 + $0x1850] sm:$0xff]  ;;  %v940_v11 = vld [vmem:[%s5230_s25 + $0x1858] sm:$0xff] }
  0xd6   : > { %933 = vst [vmem:[%s5238_s26 + $0xc38] sm:$0xff] %v932_v7  ;;  %935 = vst [vmem:[%s5238_s26 + $0xc40] sm:$0xff] %v934_v8  ;;  %v942_v12 = vld [vmem:[%s5230_s25 + $0x1860] sm:$0xff]  ;;  %v944_v13 = vld [vmem:[%s5230_s25 + $0x1868] sm:$0xff] }
  0xd7   : > { %937 = vst [vmem:[%s5238_s26 + $0xc48] sm:$0xff] %v936_v9  ;;  %939 = vst [vmem:[%s5238_s26 + $0xc50] sm:$0xff] %v938_v10  ;;  %v946_v14 = vld [vmem:[%s5230_s25 + $0x1870] sm:$0xff]  ;;  %v948_v15 = vld [vmem:[%s5230_s25 + $0x1878] sm:$0xff] }
  0xd8   : > { %941 = vst [vmem:[%s5238_s26 + $0xc58] sm:$0xff] %v940_v11  ;;  %943 = vst [vmem:[%s5238_s26 + $0xc60] sm:$0xff] %v942_v12  ;;  %v950_v16 = vld [vmem:[%s5230_s25 + $0x1900] sm:$0xff]  ;;  %v952_v17 = vld [vmem:[%s5230_s25 + $0x1908] sm:$0xff] }
  0xd9   : > { %945 = vst [vmem:[%s5238_s26 + $0xc68] sm:$0xff] %v944_v13  ;;  %947 = vst [vmem:[%s5238_s26 + $0xc70] sm:$0xff] %v946_v14  ;;  %v954_v18 = vld [vmem:[%s5230_s25 + $0x1910] sm:$0xff]  ;;  %v956_v19 = vld [vmem:[%s5230_s25 + $0x1918] sm:$0xff] }
  0xda   : > { %949 = vst [vmem:[%s5238_s26 + $0xc78] sm:$0xff] %v948_v15  ;;  %951 = vst [vmem:[%s5238_s26 + $0xc80] sm:$0xff] %v950_v16  ;;  %v958_v20 = vld [vmem:[%s5230_s25 + $0x1920] sm:$0xff]  ;;  %v960_v21 = vld [vmem:[%s5230_s25 + $0x1928] sm:$0xff] }
  0xdb   : > { %953 = vst [vmem:[%s5238_s26 + $0xc88] sm:$0xff] %v952_v17  ;;  %955 = vst [vmem:[%s5238_s26 + $0xc90] sm:$0xff] %v954_v18  ;;  %v962_v22 = vld [vmem:[%s5230_s25 + $0x1930] sm:$0xff]  ;;  %v964_v23 = vld [vmem:[%s5230_s25 + $0x1938] sm:$0xff] }
  0xdc   : > { %957 = vst [vmem:[%s5238_s26 + $0xc98] sm:$0xff] %v956_v19  ;;  %959 = vst [vmem:[%s5238_s26 + $0xca0] sm:$0xff] %v958_v20  ;;  %v966_v24 = vld [vmem:[%s5230_s25 + $0x1940] sm:$0xff]  ;;  %v968_v25 = vld [vmem:[%s5230_s25 + $0x1948] sm:$0xff] }
  0xdd   : > { %961 = vst [vmem:[%s5238_s26 + $0xca8] sm:$0xff] %v960_v21  ;;  %963 = vst [vmem:[%s5238_s26 + $0xcb0] sm:$0xff] %v962_v22  ;;  %v970_v26 = vld [vmem:[%s5230_s25 + $0x1950] sm:$0xff]  ;;  %v972_v27 = vld [vmem:[%s5230_s25 + $0x1958] sm:$0xff] }
  0xde   : > { %965 = vst [vmem:[%s5238_s26 + $0xcb8] sm:$0xff] %v964_v23  ;;  %967 = vst [vmem:[%s5238_s26 + $0xcc0] sm:$0xff] %v966_v24  ;;  %v974_v28 = vld [vmem:[%s5230_s25 + $0x1960] sm:$0xff]  ;;  %v976_v29 = vld [vmem:[%s5230_s25 + $0x1968] sm:$0xff] }
  0xdf   : > { %969 = vst [vmem:[%s5238_s26 + $0xcc8] sm:$0xff] %v968_v25  ;;  %971 = vst [vmem:[%s5238_s26 + $0xcd0] sm:$0xff] %v970_v26  ;;  %v978_v30 = vld [vmem:[%s5230_s25 + $0x1970] sm:$0xff]  ;;  %v980_v31 = vld [vmem:[%s5230_s25 + $0x1978] sm:$0xff] }
  0xe0   : > { %973 = vst [vmem:[%s5238_s26 + $0xcd8] sm:$0xff] %v972_v27  ;;  %975 = vst [vmem:[%s5238_s26 + $0xce0] sm:$0xff] %v974_v28  ;;  %v982_v32 = vld [vmem:[%s5230_s25 + $0x1a00] sm:$0xff]  ;;  %v984_v33 = vld [vmem:[%s5230_s25 + $0x1a08] sm:$0xff] }
  0xe1   : > { %977 = vst [vmem:[%s5238_s26 + $0xce8] sm:$0xff] %v976_v29  ;;  %979 = vst [vmem:[%s5238_s26 + $0xcf0] sm:$0xff] %v978_v30  ;;  %v986_v34 = vld [vmem:[%s5230_s25 + $0x1a10] sm:$0xff]  ;;  %v988_v35 = vld [vmem:[%s5230_s25 + $0x1a18] sm:$0xff] }
  0xe2   : > { %981 = vst [vmem:[%s5238_s26 + $0xcf8] sm:$0xff] %v980_v31  ;;  %983 = vst [vmem:[%s5238_s26 + $0xd00] sm:$0xff] %v982_v32  ;;  %v990_v36 = vld [vmem:[%s5230_s25 + $0x1a20] sm:$0xff]  ;;  %v992_v37 = vld [vmem:[%s5230_s25 + $0x1a28] sm:$0xff] }
  0xe3   : > { %985 = vst [vmem:[%s5238_s26 + $0xd08] sm:$0xff] %v984_v33  ;;  %987 = vst [vmem:[%s5238_s26 + $0xd10] sm:$0xff] %v986_v34  ;;  %v994_v38 = vld [vmem:[%s5230_s25 + $0x1a30] sm:$0xff]  ;;  %v996_v39 = vld [vmem:[%s5230_s25 + $0x1a38] sm:$0xff] }
  0xe4   : > { %989 = vst [vmem:[%s5238_s26 + $0xd18] sm:$0xff] %v988_v35  ;;  %991 = vst [vmem:[%s5238_s26 + $0xd20] sm:$0xff] %v990_v36  ;;  %v998_v40 = vld [vmem:[%s5230_s25 + $0x1a40] sm:$0xff]  ;;  %v1000_v41 = vld [vmem:[%s5230_s25 + $0x1a48] sm:$0xff] }
  0xe5   : > { %993 = vst [vmem:[%s5238_s26 + $0xd28] sm:$0xff] %v992_v37  ;;  %995 = vst [vmem:[%s5238_s26 + $0xd30] sm:$0xff] %v994_v38  ;;  %v1002_v42 = vld [vmem:[%s5230_s25 + $0x1a50] sm:$0xff]  ;;  %v1004_v43 = vld [vmem:[%s5230_s25 + $0x1a58] sm:$0xff] }
  0xe6   : > { %997 = vst [vmem:[%s5238_s26 + $0xd38] sm:$0xff] %v996_v39  ;;  %999 = vst [vmem:[%s5238_s26 + $0xd40] sm:$0xff] %v998_v40  ;;  %v1006_v44 = vld [vmem:[%s5230_s25 + $0x1a60] sm:$0xff]  ;;  %v1008_v45 = vld [vmem:[%s5230_s25 + $0x1a68] sm:$0xff] }
  0xe7   : > { %1001 = vst [vmem:[%s5238_s26 + $0xd48] sm:$0xff] %v1000_v41  ;;  %1003 = vst [vmem:[%s5238_s26 + $0xd50] sm:$0xff] %v1002_v42  ;;  %v1010_v46 = vld [vmem:[%s5230_s25 + $0x1a70] sm:$0xff]  ;;  %v1012_v47 = vld [vmem:[%s5230_s25 + $0x1a78] sm:$0xff] }
  0xe8   : > { %1005 = vst [vmem:[%s5238_s26 + $0xd58] sm:$0xff] %v1004_v43  ;;  %1007 = vst [vmem:[%s5238_s26 + $0xd60] sm:$0xff] %v1006_v44 }
  0xe9   : > { %1009 = vst [vmem:[%s5238_s26 + $0xd68] sm:$0xff] %v1008_v45  ;;  %1011 = vst [vmem:[%s5238_s26 + $0xd70] sm:$0xff] %v1010_v46 }
  0xea   : > { %1013 = vst [vmem:[%s5238_s26 + $0xd78] sm:$0xff] %v1012_v47 }
  0xeb PF: > { %p4602_p5 = scmp.ge.s32.totalorder %s5173_s14, 1  ;;  %p1018_p6 = scmp.lt.s32.totalorder %s5173_s14, 3 }
  0xed   : > { %p1019_p7 = pnand %p4602_p5, %p1018_p6 }
  0xee   : > { %s1025_s27 = sand.u32 (!%p1019_p7), 1, %s5165_s12   ;;  %v6104_v48 = vld.sshfl [vmem:[%s6707_s0] sm:$0x33 pattern:$0x76325410] (!%p1019_p7)  ;;  %vm3665_vm0 = vcmask (!%p1019_p7), 719872  }
  0xef   : > { %1022 = sbr.rel (%p1019_p7) target bundleno = 915 (0x393), region = 51  ;;  %v6108_v49 = vcombine.high (!%p1019_p7), %v6104_v48, %v6104_v48  ;;  %v5175_v28 = vmov (!%p1019_p7), 0   ;;  %vm3669_vm1 = vcmask (!%p1019_p7), 1043456   ;;  %s4603_s9 = sshll.u32 (!%p1019_p7), %s4596_s15, 5 }
  0xf0   : > { %s5090_s30 = smul.u32 (!%p1019_p7), 3456, %s1025_s27  ;;  %5116 = vset.pattern.permute.xlu0 (!%p1019_p7), %v5175_v28  ;;  %v1489_v28 = vld [vmem:[%s6709_s2] sm:$0xf] (!%p1019_p7)  ;;  %p1050_p8 = scmp.lt.s32.totalorder (!%p1019_p7), %s4603_s9, 63 }
  0xf1   : > { %5055 = vmatprep.mubr.msk.bf16.mxu0 (!%p1019_p7), %vm3665_vm0, %v6108_v49  ;;  %5057 = vmatprep.mubr.msk.bf16.mxu1 (!%p1019_p7), %vm3665_vm0, %v6108_v49 }
  0xf2   : > { %s6114_s4 = scalar_lea.vmem (!%p1019_p7), [#allocation2], %s5090_s30  ;;  %1492 = vperm.xlu0 (!%p1019_p7), %5116, %v1489_v28  }
  0xf3   : > { %v1057_v50 = vld [vmem:[%s6114_s4] sm:$0xff] (!%p1019_p7)  ;;  %v1058_v52 = vld [vmem:[%s6114_s4 + $0x8] sm:$0xff] (!%p1019_p7) }
  0xf4   : > { %v1073_v51 = vld [vmem:[%s6114_s4 + $0x80] sm:$0xff] (!%p1019_p7)  ;;  %v1074_v54 = vld [vmem:[%s6114_s4 + $0x88] sm:$0xff] (!%p1019_p7) }
  0xf5   : > { %v4607_v53 = vcombine.high (!%p1019_p7), %v1057_v50, %v1073_v51  ;;  %v4606_v55 = vcombine.low (!%p1019_p7), %v1057_v50, %v1073_v51  ;;  %v1089_v56 = vld [vmem:[%s6114_s4 + $0x100] sm:$0xff] (!%p1019_p7)  ;;  %v4609_v58 = vcombine.high (!%p1019_p7), %v1058_v52, %v1074_v54  ;;  %v4608_v59 = vcombine.low (!%p1019_p7), %v1058_v52, %v1074_v54  ;;  %v1090_v61 = vld [vmem:[%s6114_s4 + $0x108] sm:$0xff] (!%p1019_p7) }
  0xf6   : > { %v1105_v57 = vld [vmem:[%s6114_s4 + $0x180] sm:$0xff]  ;;  %v1106_v62 = vld [vmem:[%s6114_s4 + $0x188] sm:$0xff]  ;;  %s6715_s9 = smov (!%p1050_p8, %s4603_s9), 63 }
  0xf7   : > { %v4639_v60 = vcombine.high %v1089_v56, %v1105_v57  ;;  %v1121_v63 = vld [vmem:[%s6114_s4 + $0x200] sm:$0xff]  ;;  %3766 = vmatprep.subr.bf16.mxu0 %v4607_v53  ;;  %v4641_v0 = vcombine.high %v1090_v61, %v1106_v62  ;;  %v1122_v2 = vld [vmem:[%s6114_s4 + $0x208] sm:$0xff]  ;;  %3807 = vmatprep.subr.bf16.mxu1 %v4609_v58  ;;  %v4638_v4 = vcombine.low %v1089_v56, %v1105_v57  ;;  %s4604_s10 = sshll.u32 %s6715_s9, 2 }
  0xf8   : > { %v1137_v1 = vld [vmem:[%s6114_s4 + $0x280] sm:$0xff]  ;;  %v1138_v3 = vld [vmem:[%s6114_s4 + $0x288] sm:$0xff]  ;;  %3767 = vmatpush1.bf16.msra.mxu0 %v4606_v55  ;;  %3808 = vmatpush1.bf16.msra.mxu1 %v4608_v59  ;;  %v4640_v5 = vcombine.low %v1090_v61, %v1106_v62  ;;  %s6450_s14 = scalar_lea.vmem %s6710_s3, %s4604_s10 }
  0xf9   : > { %3768 = vmatprep.subr.bf16.mxu0 %v4639_v60  ;;  %v4671_v6 = vcombine.high %v1121_v63, %v1137_v1  ;;  %3809 = vmatprep.subr.bf16.mxu1 %v4641_v0  ;;  %v4673_v7 = vcombine.high %v1122_v2, %v1138_v3  ;;  %v1153_v8 = vld [vmem:[%s6114_s4 + $0x300] sm:$0xff]  ;;  %v1154_v10 = vld [vmem:[%s6114_s4 + $0x308] sm:$0xff]  ;;  %v4670_v12 = vcombine.low %v1121_v63, %v1137_v1 }
  0xfa   : > { %v1169_v9 = vld [vmem:[%s6114_s4 + $0x380] sm:$0xff]  ;;  %v1170_v11 = vld [vmem:[%s6114_s4 + $0x388] sm:$0xff]  ;;  %v4672_v13 = vcombine.low %v1122_v2, %v1138_v3 }
  0xfb   : > { %v4703_v14 = vcombine.high %v1153_v8, %v1169_v9  ;;  %v4705_v15 = vcombine.high %v1154_v10, %v1170_v11  ;;  %v1185_v16 = vld [vmem:[%s6114_s4 + $0x400] sm:$0xff]  ;;  %v1186_v18 = vld [vmem:[%s6114_s4 + $0x408] sm:$0xff]  ;;  %v4702_v20 = vcombine.low %v1153_v8, %v1169_v9  ;;  %v4704_v21 = vcombine.low %v1154_v10, %v1170_v11 }
  0xfc   : > { %3769 = vmatpush1.bf16.msra.mxu0 %v4638_v4  ;;  %3810 = vmatpush1.bf16.msra.mxu1 %v4640_v5  ;;  %v1201_v17 = vld [vmem:[%s6114_s4 + $0x480] sm:$0xff]  ;;  %v1202_v19 = vld [vmem:[%s6114_s4 + $0x488] sm:$0xff] }
  0xfd   : > { %3770 = vmatprep.subr.bf16.mxu0 %v4671_v6  ;;  %3811 = vmatprep.subr.bf16.mxu1 %v4673_v7  ;;  %v4735_v22 = vcombine.high %v1185_v16, %v1201_v17  ;;  %v4737_v23 = vcombine.high %v1186_v18, %v1202_v19  ;;  %v1217_v24 = vld [vmem:[%s6114_s4 + $0x500] sm:$0xff]  ;;  %v1218_v26 = vld [vmem:[%s6114_s4 + $0x508] sm:$0xff]  ;;  %v4734_v29 = vcombine.low %v1185_v16, %v1201_v17 }
  0xfe   : > { %v1233_v25 = vld [vmem:[%s6114_s4 + $0x580] sm:$0xff]  ;;  %v1234_v27 = vld [vmem:[%s6114_s4 + $0x588] sm:$0xff]  ;;  %v4736_v30 = vcombine.low %v1186_v18, %v1202_v19 }
  0xff   : > { %v4767_v31 = vcombine.high %v1217_v24, %v1233_v25  ;;  %v4769_v32 = vcombine.high %v1218_v26, %v1234_v27  ;;  %v1249_v33 = vld [vmem:[%s6114_s4 + $0x600] sm:$0xff]  ;;  %v1250_v35 = vld [vmem:[%s6114_s4 + $0x608] sm:$0xff]  ;;  %v4766_v37 = vcombine.low %v1217_v24, %v1233_v25  ;;  %v4768_v38 = vcombine.low %v1218_v26, %v1234_v27 }
 0x100   : > { %3771 = vmatpush1.bf16.msra.mxu0 %v4670_v12  ;;  %3812 = vmatpush1.bf16.msra.mxu1 %v4672_v13  ;;  %v1265_v34 = vld [vmem:[%s6114_s4 + $0x680] sm:$0xff]  ;;  %v1266_v36 = vld [vmem:[%s6114_s4 + $0x688] sm:$0xff] }
 0x101   : > { %3772 = vmatprep.subr.bf16.mxu0 %v4703_v14  ;;  %3813 = vmatprep.subr.bf16.mxu1 %v4705_v15  ;;  %v4799_v39 = vcombine.high %v1249_v33, %v1265_v34  ;;  %v4801_v40 = vcombine.high %v1250_v35, %v1266_v36  ;;  %v1281_v41 = vld [vmem:[%s6114_s4 + $0x700] sm:$0xff]  ;;  %v1282_v43 = vld [vmem:[%s6114_s4 + $0x708] sm:$0xff]  ;;  %v4798_v45 = vcombine.low %v1249_v33, %v1265_v34 }
 0x102   : > { %v1297_v42 = vld [vmem:[%s6114_s4 + $0x780] sm:$0xff]  ;;  %v1298_v44 = vld [vmem:[%s6114_s4 + $0x788] sm:$0xff]  ;;  %v4800_v46 = vcombine.low %v1250_v35, %v1266_v36  ;;  %v1059_v36 = vld [vmem:[%s6114_s4 + $0x10] sm:$0xff] }
 0x103   : > { %v4831_v47 = vcombine.high %v1281_v41, %v1297_v42  ;;  %v4833_v50 = vcombine.high %v1282_v43, %v1298_v44  ;;  %v1313_v51 = vld [vmem:[%s6114_s4 + $0x800] sm:$0xff]  ;;  %v1314_v53 = vld [vmem:[%s6114_s4 + $0x808] sm:$0xff]  ;;  %v4830_v55 = vcombine.low %v1281_v41, %v1297_v42  ;;  %v4832_v56 = vcombine.low %v1282_v43, %v1298_v44  ;;  %v1091_v44 = vld [vmem:[%s6114_s4 + $0x110] sm:$0xff] }
 0x104   : > { %3773 = vmatpush1.bf16.msra.mxu0 %v4702_v20  ;;  %3814 = vmatpush1.bf16.msra.mxu1 %v4704_v21  ;;  %v1329_v52 = vld [vmem:[%s6114_s4 + $0x880] sm:$0xff]  ;;  %v1330_v54 = vld [vmem:[%s6114_s4 + $0x888] sm:$0xff] }
 0x105   : > { %3774 = vmatprep.subr.bf16.mxu0 %v4735_v22  ;;  %3815 = vmatprep.subr.bf16.mxu1 %v4737_v23  ;;  %v4863_v57 = vcombine.high %v1313_v51, %v1329_v52  ;;  %v4865_v58 = vcombine.high %v1314_v53, %v1330_v54  ;;  %v1345_v59 = vld [vmem:[%s6114_s4 + $0x900] sm:$0xff]  ;;  %v1346_v61 = vld [vmem:[%s6114_s4 + $0x908] sm:$0xff]  ;;  %v4862_v63 = vcombine.low %v1313_v51, %v1329_v52 }
 0x106   : > { %v1361_v60 = vld [vmem:[%s6114_s4 + $0x980] sm:$0xff]  ;;  %v1362_v62 = vld [vmem:[%s6114_s4 + $0x988] sm:$0xff]  ;;  %v4864_v0 = vcombine.low %v1314_v53, %v1330_v54  ;;  %v1123_v54 = vld [vmem:[%s6114_s4 + $0x210] sm:$0xff] }
 0x107   : > { %v4895_v1 = vcombine.high %v1345_v59, %v1361_v60  ;;  %v4897_v2 = vcombine.high %v1346_v61, %v1362_v62  ;;  %v1377_v3 = vld [vmem:[%s6114_s4 + $0xa00] sm:$0xff]  ;;  %v1378_v5 = vld [vmem:[%s6114_s4 + $0xa08] sm:$0xff]  ;;  %v4894_v7 = vcombine.low %v1345_v59, %v1361_v60  ;;  %v4896_v8 = vcombine.low %v1346_v61, %v1362_v62  ;;  %v1155_v62 = vld [vmem:[%s6114_s4 + $0x310] sm:$0xff] }
 0x108   : > { %3775 = vmatpush1.bf16.msra.mxu0 %v4734_v29  ;;  %3816 = vmatpush1.bf16.msra.mxu1 %v4736_v30  ;;  %v1393_v4 = vld [vmem:[%s6114_s4 + $0xa80] sm:$0xff]  ;;  %v1394_v6 = vld [vmem:[%s6114_s4 + $0xa88] sm:$0xff] }
 0x109   : > { %3776 = vmatprep.subr.bf16.mxu0 %v4767_v31  ;;  %3817 = vmatprep.subr.bf16.mxu1 %v4769_v32  ;;  %v4927_v9 = vcombine.high %v1377_v3, %v1393_v4  ;;  %v4929_v10 = vcombine.high %v1378_v5, %v1394_v6  ;;  %v1409_v11 = vld [vmem:[%s6114_s4 + $0xb00] sm:$0xff]  ;;  %v1410_v13 = vld [vmem:[%s6114_s4 + $0xb08] sm:$0xff]  ;;  %v4926_v15 = vcombine.low %v1377_v3, %v1393_v4 }
 0x10a   : > { %v1425_v12 = vld [vmem:[%s6114_s4 + $0xb80] sm:$0xff]  ;;  %v1426_v14 = vld [vmem:[%s6114_s4 + $0xb88] sm:$0xff]  ;;  %v4928_v16 = vcombine.low %v1378_v5, %v1394_v6  ;;  %v1187_v6 = vld [vmem:[%s6114_s4 + $0x410] sm:$0xff] }
 0x10b   : > { %v4959_v17 = vcombine.high %v1409_v11, %v1425_v12  ;;  %v4961_v18 = vcombine.high %v1410_v13, %v1426_v14  ;;  %v1441_v19 = vld [vmem:[%s6114_s4 + $0xc00] sm:$0xff]  ;;  %v1442_v21 = vld [vmem:[%s6114_s4 + $0xc08] sm:$0xff]  ;;  %v4958_v23 = vcombine.low %v1409_v11, %v1425_v12  ;;  %v4960_v24 = vcombine.low %v1410_v13, %v1426_v14  ;;  %v1219_v14 = vld [vmem:[%s6114_s4 + $0x510] sm:$0xff] }
 0x10c   : > { %3777 = vmatpush1.bf16.msra.mxu0 %v4766_v37  ;;  %3818 = vmatpush1.bf16.msra.mxu1 %v4768_v38  ;;  %v1457_v20 = vld [vmem:[%s6114_s4 + $0xc80] sm:$0xff]  ;;  %v1458_v22 = vld [vmem:[%s6114_s4 + $0xc88] sm:$0xff]  ;;  %v1075_v37 = vld [vmem:[%s6114_s4 + $0x90] sm:$0xff] }
 0x10d   : > { %3778 = vmatprep.subr.bf16.mxu0 %v4799_v39  ;;  %3819 = vmatprep.subr.bf16.mxu1 %v4801_v40  ;;  %v4991_v25 = vcombine.high %v1441_v19, %v1457_v20  ;;  %v4993_v26 = vcombine.high %v1442_v21, %v1458_v22  ;;  %v1473_v27 = vld [vmem:[%s6114_s4 + $0xd00] sm:$0xff]  ;;  %v1474_v29 = vld [vmem:[%s6114_s4 + $0xd08] sm:$0xff]  ;;  %v4990_v30 = vcombine.low %v1441_v19, %v1457_v20  ;;  %v1060_v38 = vld [vmem:[%s6114_s4 + $0x18] sm:$0xff] }
 0x10e   : > { %v4992_v31 = vcombine.low %v1442_v21, %v1458_v22  ;;  %v5023_v32 = vcombine.high %v1473_v27, %v1473_v27  ;;  %v5022_v33 = vcombine.low %v1473_v27, %v1473_v27  ;;  %v5025_v34 = vcombine.high %v1474_v29, %v1474_v29  ;;  %v1076_v39 = vld [vmem:[%s6114_s4 + $0x98] sm:$0xff]  ;;  %v1251_v22 = vld [vmem:[%s6114_s4 + $0x610] sm:$0xff] }
 0x10f   : > { %v5024_v35 = vcombine.low %v1474_v29, %v1474_v29  ;;  %v4611_v41 = vcombine.high %v1059_v36, %v1075_v37  ;;  %v4613_v43 = vcombine.high %v1060_v38, %v1076_v39  ;;  %v4612_v51 = vcombine.low %v1060_v38, %v1076_v39  ;;  %v1315_v38 = vld [vmem:[%s6114_s4 + $0x810] sm:$0xff] }
 0x110   : > { %3779 = vmatpush1.bf16.msra.mxu0 %v4798_v45  ;;  %3820 = vmatpush1.bf16.msra.mxu1 %v4800_v46  ;;  %v3671_v40 = vsel %vm3669_vm1, %v5022_v33, 0  ;;  %v1107_v45 = vld [vmem:[%s6114_s4 + $0x190] sm:$0xff]  ;;  %v1092_v46 = vld [vmem:[%s6114_s4 + $0x118] sm:$0xff] }
 0x111   : > { %3780 = vmatprep.subr.bf16.mxu0 %v4831_v47  ;;  %3821 = vmatprep.subr.bf16.mxu1 %v4833_v50  ;;  %v3677_v42 = vsel %vm3669_vm1, %v5024_v35, 0  ;;  %v1108_v47 = vld [vmem:[%s6114_s4 + $0x198] sm:$0xff]  ;;  %v4610_v50 = vcombine.low %v1059_v36, %v1075_v37  ;;  %v4643_v52 = vcombine.high %v1091_v44, %v1107_v45  ;;  %v1331_v39 = vld [vmem:[%s6114_s4 + $0x890] sm:$0xff] }
 0x112   : > { %v4645_v53 = vcombine.high %v1092_v46, %v1108_v47  ;;  %v4644_v59 = vcombine.low %v1092_v46, %v1108_v47  ;;  %v1300_v33 = vld [vmem:[%s6114_s4 + $0x798] sm:$0xff]  ;;  %v1347_v46 = vld [vmem:[%s6114_s4 + $0x910] sm:$0xff] }
 0x113   : > { %v1363_v47 = vld [vmem:[%s6114_s4 + $0x990] sm:$0xff] }
 0x114   : > { %3781 = vmatpush1.bf16.msra.mxu0 %v4830_v55  ;;  %3822 = vmatpush1.bf16.msra.mxu1 %v4832_v56  ;;  %v1139_v55 = vld [vmem:[%s6114_s4 + $0x290] sm:$0xff]  ;;  %v1124_v56 = vld [vmem:[%s6114_s4 + $0x218] sm:$0xff] }
 0x115   : > { %3782 = vmatprep.subr.bf16.mxu0 %v4863_v57  ;;  %3823 = vmatprep.subr.bf16.mxu1 %v4865_v58  ;;  %v1140_v57 = vld [vmem:[%s6114_s4 + $0x298] sm:$0xff]  ;;  %v4642_v58 = vcombine.low %v1091_v44, %v1107_v45  ;;  %v4675_v60 = vcombine.high %v1123_v54, %v1139_v55  ;;  %v4867_v44 = vcombine.high %v1315_v38, %v1331_v39 }
 0x116   : > { %v4677_v61 = vcombine.high %v1124_v56, %v1140_v57  ;;  %v4676_v3 = vcombine.low %v1124_v56, %v1140_v57  ;;  %v1379_v56 = vld [vmem:[%s6114_s4 + $0xa10] sm:$0xff] }
 0x117   : > { %v1395_v57 = vld [vmem:[%s6114_s4 + $0xa90] sm:$0xff] }
 0x118   : > { %3783 = vmatpush1.bf16.msra.mxu0 %v4862_v63  ;;  %3824 = vmatpush1.bf16.msra.mxu1 %v4864_v0  ;;  %v1171_v63 = vld [vmem:[%s6114_s4 + $0x390] sm:$0xff]  ;;  %v1156_v0 = vld [vmem:[%s6114_s4 + $0x318] sm:$0xff] }
 0x119   : > { %3784 = vmatprep.subr.bf16.mxu0 %v4895_v1  ;;  %3825 = vmatprep.subr.bf16.mxu1 %v4897_v2  ;;  %v1172_v1 = vld [vmem:[%s6114_s4 + $0x398] sm:$0xff]  ;;  %v4674_v2 = vcombine.low %v1123_v54, %v1139_v55  ;;  %v4707_v4 = vcombine.high %v1155_v62, %v1171_v63  ;;  %v4899_v54 = vcombine.high %v1347_v46, %v1363_v47 }
 0x11a   : > { %v4709_v5 = vcombine.high %v1156_v0, %v1172_v1  ;;  %v4708_v11 = vcombine.low %v1156_v0, %v1172_v1  ;;  %v1411_v0 = vld [vmem:[%s6114_s4 + $0xb10] sm:$0xff] }
 0x11b   : > { %v1427_v1 = vld [vmem:[%s6114_s4 + $0xb90] sm:$0xff] }
 0x11c   : > { %3785 = vmatpush1.bf16.msra.mxu0 %v4894_v7  ;;  %3826 = vmatpush1.bf16.msra.mxu1 %v4896_v8  ;;  %v1203_v7 = vld [vmem:[%s6114_s4 + $0x490] sm:$0xff]  ;;  %v1188_v8 = vld [vmem:[%s6114_s4 + $0x418] sm:$0xff] }
 0x11d   : > { %3786 = vmatprep.subr.bf16.mxu0 %v4927_v9  ;;  %3827 = vmatprep.subr.bf16.mxu1 %v4929_v10  ;;  %v1204_v9 = vld [vmem:[%s6114_s4 + $0x498] sm:$0xff]  ;;  %v4706_v10 = vcombine.low %v1155_v62, %v1171_v63  ;;  %v4739_v12 = vcombine.high %v1187_v6, %v1203_v7  ;;  %v4931_v62 = vcombine.high %v1379_v56, %v1395_v57 }
 0x11e   : > { %v4741_v13 = vcombine.high %v1188_v8, %v1204_v9  ;;  %v4740_v19 = vcombine.low %v1188_v8, %v1204_v9  ;;  %v1443_v8 = vld [vmem:[%s6114_s4 + $0xc10] sm:$0xff] }
 0x11f   : > { %v1459_v9 = vld [vmem:[%s6114_s4 + $0xc90] sm:$0xff] }
 0x120   : > { %3787 = vmatpush1.bf16.msra.mxu0 %v4926_v15  ;;  %3828 = vmatpush1.bf16.msra.mxu1 %v4928_v16  ;;  %v1235_v15 = vld [vmem:[%s6114_s4 + $0x590] sm:$0xff]  ;;  %v1220_v16 = vld [vmem:[%s6114_s4 + $0x518] sm:$0xff] }
 0x121   : > { %3788 = vmatprep.subr.bf16.mxu0 %v4959_v17  ;;  %3829 = vmatprep.subr.bf16.mxu1 %v4961_v18  ;;  %v1236_v17 = vld [vmem:[%s6114_s4 + $0x598] sm:$0xff]  ;;  %v4738_v18 = vcombine.low %v1187_v6, %v1203_v7  ;;  %v4771_v20 = vcombine.high %v1219_v14, %v1235_v15  ;;  %v4963_v6 = vcombine.high %v1411_v0, %v1427_v1 }
 0x122   : > { %v4773_v21 = vcombine.high %v1220_v16, %v1236_v17  ;;  %v4772_v27 = vcombine.low %v1220_v16, %v1236_v17  ;;  %v1475_v16 = vld [vmem:[%s6114_s4 + $0xd10] sm:$0xff]  ;;  %v1476_v17 = vld [vmem:[%s6114_s4 + $0xd18] sm:$0xff] }
 0x124   : > { %3789 = vmatpush1.bf16.msra.mxu0 %v4958_v23  ;;  %3830 = vmatpush1.bf16.msra.mxu1 %v4960_v24  ;;  %v1267_v23 = vld [vmem:[%s6114_s4 + $0x690] sm:$0xff]  ;;  %v1252_v24 = vld [vmem:[%s6114_s4 + $0x618] sm:$0xff] }
 0x125   : > { %3790 = vmatprep.subr.bf16.mxu0 %v4991_v25  ;;  %3831 = vmatprep.subr.bf16.mxu1 %v4993_v26  ;;  %v1268_v25 = vld [vmem:[%s6114_s4 + $0x698] sm:$0xff]  ;;  %v4770_v26 = vcombine.low %v1219_v14, %v1235_v15  ;;  %v4803_v28 = vcombine.high %v1251_v22, %v1267_v23  ;;  %v4995_v14 = vcombine.high %v1443_v8, %v1459_v9 }
 0x126   : > { %v4805_v29 = vcombine.high %v1252_v24, %v1268_v25  ;;  %v4804_v35 = vcombine.low %v1252_v24, %v1268_v25  ;;  %v1061_v24 = vld [vmem:[%s6114_s4 + $0x20] sm:$0xff] }
 0x127   : > { %v1077_v25 = vld [vmem:[%s6114_s4 + $0xa0] sm:$0xff] }
 0x128   : > { %3791 = vmatpush1.bf16.msra.mxu0 %v4990_v30  ;;  %3832 = vmatpush1.bf16.msra.mxu1 %v4992_v31  ;;  %v1283_v30 = vld [vmem:[%s6114_s4 + $0x710] sm:$0xff] }
 0x129   : > { %5054 = vmatprep.subr.msk.bf16.mxu0 %vm3669_vm1, %v5023_v32  ;;  %5056 = vmatprep.subr.msk.bf16.mxu1 %vm3669_vm1, %v5025_v34  ;;  %v1299_v31 = vld [vmem:[%s6114_s4 + $0x790] sm:$0xff]  ;;  %v1284_v32 = vld [vmem:[%s6114_s4 + $0x718] sm:$0xff]  ;;  %v4802_v34 = vcombine.low %v1251_v22, %v1267_v23  ;;  %v5029_v22 = vcombine.high %v1476_v17, %v1476_v17  ;;  %v5028_v23 = vcombine.low %v1476_v17, %v1476_v17  ;;  %v1285_v17 = vld [vmem:[%s6114_s4 + $0x720] sm:$0xff] }
 0x12a   : > { %v4835_v36 = vcombine.high %v1283_v30, %v1299_v31  ;;  %v4837_v37 = vcombine.high %v1284_v32, %v1300_v33 }
 0x12c   : > { %3793 = vmatpush1.bf16.msra.mxu0 %v3671_v40  ;;  %3834 = vmatpush1.bf16.msra.mxu1 %v3677_v42  ;;  %v1316_v40 = vld [vmem:[%s6114_s4 + $0x818] sm:$0xff]  ;;  %v4834_v42 = vcombine.low %v1283_v30, %v1299_v31  ;;  %v3689_v30 = vsel %vm3669_vm1, %v5028_v23, 0 }
 0x12d   : > { %3848 = vmatprep.subr.bf16.mxu0 %v4611_v41  ;;  %3889 = vmatprep.subr.bf16.mxu1 %v4613_v43  ;;  %v1332_v41 = vld [vmem:[%s6114_s4 + $0x898] sm:$0xff]  ;;  %v4836_v43 = vcombine.low %v1284_v32, %v1300_v33  ;;  %v1093_v32 = vld [vmem:[%s6114_s4 + $0x120] sm:$0xff] }
 0x12e   : > { %v4869_v45 = vcombine.high %v1316_v40, %v1332_v41  ;;  %v1109_v33 = vld [vmem:[%s6114_s4 + $0x1a0] sm:$0xff] }
 0x12f   : > { %3799 = vmatmul.mubr.bf16.vlgmr.msra.gmra.mrb[0].mxu0 %v6104_v48  ;;  %3840 = vmatmul.mubr.bf16.vlgmr.msra.gmra.mrb[0].mxu1 %v6104_v48 }
 0x130   : > { %3849 = vmatpush1.bf16.msra.mxu0 %v4610_v50  ;;  %3890 = vmatpush1.bf16.msra.mxu1 %v4612_v51  ;;  %v1348_v50 = vld [vmem:[%s6114_s4 + $0x918] sm:$0xff] }
 0x131   : > { %3850 = vmatprep.subr.bf16.mxu0 %v4643_v52  ;;  %3891 = vmatprep.subr.bf16.mxu1 %v4645_v53  ;;  %v1364_v51 = vld [vmem:[%s6114_s4 + $0x998] sm:$0xff]  ;;  %v4866_v52 = vcombine.low %v1315_v38, %v1331_v39  ;;  %v4868_v53 = vcombine.low %v1316_v40, %v1332_v41  ;;  %v4647_v38 = vcombine.high %v1093_v32, %v1109_v33  ;;  %v1125_v40 = vld [vmem:[%s6114_s4 + $0x220] sm:$0xff] }
 0x132   : > { %5059 = vmatprep.mubr.msk.bf16.mxu0 %vm3665_vm0, %v6108_v49  ;;  %5061 = vmatprep.mubr.msk.bf16.mxu1 %vm3665_vm0, %v6108_v49  ;;  %v4901_v55 = vcombine.high %v1348_v50, %v1364_v51  ;;  %v1141_v41 = vld [vmem:[%s6114_s4 + $0x2a0] sm:$0xff] }
 0x134   : > { %3851 = vmatpush1.bf16.msra.mxu0 %v4642_v58  ;;  %3892 = vmatpush1.bf16.msra.mxu1 %v4644_v59  ;;  %v1380_v58 = vld [vmem:[%s6114_s4 + $0xa18] sm:$0xff] }
 0x135   : > { %3852 = vmatprep.subr.bf16.mxu0 %v4675_v60  ;;  %3893 = vmatprep.subr.bf16.mxu1 %v4677_v61  ;;  %v1396_v59 = vld [vmem:[%s6114_s4 + $0xa98] sm:$0xff]  ;;  %v4898_v60 = vcombine.low %v1347_v46, %v1363_v47  ;;  %v4900_v61 = vcombine.low %v1348_v50, %v1364_v51  ;;  %v4679_v46 = vcombine.high %v1125_v40, %v1141_v41  ;;  %v1157_v50 = vld [vmem:[%s6114_s4 + $0x320] sm:$0xff] }
 0x136   : > { %v4933_v63 = vcombine.high %v1380_v58, %v1396_v59  ;;  %v1173_v51 = vld [vmem:[%s6114_s4 + $0x3a0] sm:$0xff] }
 0x138   : > { %3853 = vmatpush1.bf16.msra.mxu0 %v4674_v2  ;;  %3894 = vmatpush1.bf16.msra.mxu1 %v4676_v3  ;;  %v1412_v2 = vld [vmem:[%s6114_s4 + $0xb18] sm:$0xff] }
 0x139   : > { %3854 = vmatprep.subr.bf16.mxu0 %v4707_v4  ;;  %3895 = vmatprep.subr.bf16.mxu1 %v4709_v5  ;;  %v1428_v3 = vld [vmem:[%s6114_s4 + $0xb98] sm:$0xff]  ;;  %v4930_v4 = vcombine.low %v1379_v56, %v1395_v57  ;;  %v4932_v5 = vcombine.low %v1380_v58, %v1396_v59  ;;  %v1189_v57 = vld [vmem:[%s6114_s4 + $0x420] sm:$0xff]  ;;  %v1190_v59 = vld [vmem:[%s6114_s4 + $0x428] sm:$0xff] }
 0x13a   : > { %v4965_v7 = vcombine.high %v1412_v2, %v1428_v3  ;;  %v1205_v58 = vld [vmem:[%s6114_s4 + $0x4a0] sm:$0xff] }
 0x13c   : > { %3855 = vmatpush1.bf16.msra.mxu0 %v4706_v10  ;;  %3896 = vmatpush1.bf16.msra.mxu1 %v4708_v11  ;;  %v1444_v10 = vld [vmem:[%s6114_s4 + $0xc18] sm:$0xff] }
 0x13d   : > { %3856 = vmatprep.subr.bf16.mxu0 %v4739_v12  ;;  %3897 = vmatprep.subr.bf16.mxu1 %v4741_v13  ;;  %v1460_v11 = vld [vmem:[%s6114_s4 + $0xc98] sm:$0xff]  ;;  %v4962_v12 = vcombine.low %v1411_v0, %v1427_v1  ;;  %v4964_v13 = vcombine.low %v1412_v2, %v1428_v3  ;;  %v1221_v1 = vld [vmem:[%s6114_s4 + $0x520] sm:$0xff]  ;;  %v1222_v3 = vld [vmem:[%s6114_s4 + $0x528] sm:$0xff] }
 0x13e   : > { %v4997_v15 = vcombine.high %v1444_v10, %v1460_v11  ;;  %v1237_v2 = vld [vmem:[%s6114_s4 + $0x5a0] sm:$0xff] }
 0x140   : > { %3857 = vmatpush1.bf16.msra.mxu0 %v4738_v18  ;;  %3898 = vmatpush1.bf16.msra.mxu1 %v4740_v19  ;;  %v4994_v18 = vcombine.low %v1443_v8, %v1459_v9  ;;  %v4996_v19 = vcombine.low %v1444_v10, %v1460_v11  ;;  %v1253_v9 = vld [vmem:[%s6114_s4 + $0x620] sm:$0xff]  ;;  %v1254_v11 = vld [vmem:[%s6114_s4 + $0x628] sm:$0xff] }
 0x141   : > { %3858 = vmatprep.subr.bf16.mxu0 %v4771_v20  ;;  %3899 = vmatprep.subr.bf16.mxu1 %v4773_v21  ;;  %v5027_v20 = vcombine.high %v1475_v16, %v1475_v16  ;;  %v5026_v21 = vcombine.low %v1475_v16, %v1475_v16  ;;  %v1269_v10 = vld [vmem:[%s6114_s4 + $0x6a0] sm:$0xff] }
 0x144   : > { %3859 = vmatpush1.bf16.msra.mxu0 %v4770_v26  ;;  %3900 = vmatpush1.bf16.msra.mxu1 %v4772_v27  ;;  %v1062_v26 = vld [vmem:[%s6114_s4 + $0x28] sm:$0xff] }
 0x145   : > { %3860 = vmatprep.subr.bf16.mxu0 %v4803_v28  ;;  %3901 = vmatprep.subr.bf16.mxu1 %v4805_v29  ;;  %v1078_v27 = vld [vmem:[%s6114_s4 + $0xa8] sm:$0xff]  ;;  %v3683_v28 = vsel %vm3669_vm1, %v5026_v21, 0  ;;  %v4615_v29 = vcombine.high %v1061_v24, %v1077_v25  ;;  %v4806_v21 = vcombine.low %v1253_v9, %v1269_v10 }
 0x146   : > { %v4617_v31 = vcombine.high %v1062_v26, %v1078_v27 }
 0x148   : > { %3861 = vmatpush1.bf16.msra.mxu0 %v4802_v34  ;;  %3902 = vmatpush1.bf16.msra.mxu1 %v4804_v35  ;;  %v1094_v34 = vld [vmem:[%s6114_s4 + $0x128] sm:$0xff] }
 0x149   : > { %3862 = vmatprep.subr.bf16.mxu0 %v4835_v36  ;;  %3903 = vmatprep.subr.bf16.mxu1 %v4837_v37  ;;  %v1110_v35 = vld [vmem:[%s6114_s4 + $0x1a8] sm:$0xff]  ;;  %v4614_v36 = vcombine.low %v1061_v24, %v1077_v25  ;;  %v4616_v37 = vcombine.low %v1062_v26, %v1078_v27  ;;  %v1317_v25 = vld [vmem:[%s6114_s4 + $0x820] sm:$0xff] }
 0x14a   : > { %v4649_v39 = vcombine.high %v1094_v34, %v1110_v35  ;;  %v1333_v26 = vld [vmem:[%s6114_s4 + $0x8a0] sm:$0xff]  ;;  %v1318_v27 = vld [vmem:[%s6114_s4 + $0x828] sm:$0xff] }
 0x14c   : > { %3863 = vmatpush1.bf16.msra.mxu0 %v4834_v42  ;;  %3904 = vmatpush1.bf16.msra.mxu1 %v4836_v43  ;;  %v1126_v42 = vld [vmem:[%s6114_s4 + $0x228] sm:$0xff] }
 0x14d   : > { %3864 = vmatprep.subr.bf16.mxu0 %v4867_v44  ;;  %3905 = vmatprep.subr.bf16.mxu1 %v4869_v45  ;;  %v1142_v43 = vld [vmem:[%s6114_s4 + $0x2a8] sm:$0xff]  ;;  %v4646_v44 = vcombine.low %v1093_v32, %v1109_v33  ;;  %v4648_v45 = vcombine.low %v1094_v34, %v1110_v35  ;;  %v1349_v33 = vld [vmem:[%s6114_s4 + $0x920] sm:$0xff] }
 0x14e   : > { %v4681_v47 = vcombine.high %v1126_v42, %v1142_v43  ;;  %v1365_v34 = vld [vmem:[%s6114_s4 + $0x9a0] sm:$0xff]  ;;  %v1350_v35 = vld [vmem:[%s6114_s4 + $0x928] sm:$0xff] }
 0x150   : > { %3865 = vmatpush1.bf16.msra.mxu0 %v4866_v52  ;;  %3906 = vmatpush1.bf16.msra.mxu1 %v4868_v53  ;;  %v1158_v52 = vld [vmem:[%s6114_s4 + $0x328] sm:$0xff] }
 0x151   : > { %3866 = vmatprep.subr.bf16.mxu0 %v4899_v54  ;;  %3907 = vmatprep.subr.bf16.mxu1 %v4901_v55  ;;  %v1174_v53 = vld [vmem:[%s6114_s4 + $0x3a8] sm:$0xff]  ;;  %v4680_v54 = vcombine.low %v1126_v42, %v1142_v43  ;;  %v4711_v55 = vcombine.high %v1157_v50, %v1173_v51  ;;  %v1397_v42 = vld [vmem:[%s6114_s4 + $0xaa0] sm:$0xff] }
 0x152   : > { %v4713_v56 = vcombine.high %v1158_v52, %v1174_v53  ;;  %v1382_v43 = vld [vmem:[%s6114_s4 + $0xa28] sm:$0xff] }
 0x154   : > { %3867 = vmatpush1.bf16.msra.mxu0 %v4898_v60  ;;  %3908 = vmatpush1.bf16.msra.mxu1 %v4900_v61  ;;  %v1206_v60 = vld [vmem:[%s6114_s4 + $0x4a8] sm:$0xff]  ;;  %v4710_v61 = vcombine.low %v1157_v50, %v1173_v51  ;;  %v1413_v51 = vld [vmem:[%s6114_s4 + $0xb20] sm:$0xff] }
 0x155   : > { %3868 = vmatprep.subr.bf16.mxu0 %v4931_v62  ;;  %3909 = vmatprep.subr.bf16.mxu1 %v4933_v63  ;;  %v4712_v62 = vcombine.low %v1158_v52, %v1174_v53  ;;  %v4743_v63 = vcombine.high %v1189_v57, %v1205_v58  ;;  %v4745_v0 = vcombine.high %v1190_v59, %v1206_v60  ;;  %v1429_v52 = vld [vmem:[%s6114_s4 + $0xba0] sm:$0xff]  ;;  %v1414_v53 = vld [vmem:[%s6114_s4 + $0xb28] sm:$0xff] }
 0x158   : > { %3869 = vmatpush1.bf16.msra.mxu0 %v4930_v4  ;;  %3910 = vmatpush1.bf16.msra.mxu1 %v4932_v5  ;;  %v1238_v4 = vld [vmem:[%s6114_s4 + $0x5a8] sm:$0xff]  ;;  %v4742_v5 = vcombine.low %v1189_v57, %v1205_v58  ;;  %v1445_v58 = vld [vmem:[%s6114_s4 + $0xc20] sm:$0xff] }
 0x159   : > { %3870 = vmatprep.subr.bf16.mxu0 %v4963_v6  ;;  %3911 = vmatprep.subr.bf16.mxu1 %v4965_v7  ;;  %v4744_v6 = vcombine.low %v1190_v59, %v1206_v60  ;;  %v4775_v7 = vcombine.high %v1221_v1, %v1237_v2  ;;  %v4777_v8 = vcombine.high %v1222_v3, %v1238_v4  ;;  %v1461_v59 = vld [vmem:[%s6114_s4 + $0xca0] sm:$0xff]  ;;  %v1446_v60 = vld [vmem:[%s6114_s4 + $0xc28] sm:$0xff] }
 0x15c   : > { %3871 = vmatpush1.bf16.msra.mxu0 %v4962_v12  ;;  %3912 = vmatpush1.bf16.msra.mxu1 %v4964_v13  ;;  %v1270_v12 = vld [vmem:[%s6114_s4 + $0x6a8] sm:$0xff]  ;;  %v4774_v13 = vcombine.low %v1221_v1, %v1237_v2  ;;  %v1477_v2 = vld [vmem:[%s6114_s4 + $0xd20] sm:$0xff] }
 0x15d   : > { %3872 = vmatprep.subr.bf16.mxu0 %v4995_v14  ;;  %3913 = vmatprep.subr.bf16.mxu1 %v4997_v15  ;;  %v4776_v14 = vcombine.low %v1222_v3, %v1238_v4  ;;  %v4807_v15 = vcombine.high %v1253_v9, %v1269_v10  ;;  %v4809_v16 = vcombine.high %v1254_v11, %v1270_v12  ;;  %v1478_v3 = vld [vmem:[%s6114_s4 + $0xd28] sm:$0xff]  ;;  %v1063_v10 = vld [vmem:[%s6114_s4 + $0x30] sm:$0xff] }
 0x15e   : > { %v4998_v4 = vcombine.low %v1445_v58, %v1461_v59  ;;  %v5032_v9 = vcombine.low %v1478_v3, %v1478_v3 }
 0x160   : > { %3873 = vmatpush1.bf16.msra.mxu0 %v4994_v18  ;;  %3914 = vmatpush1.bf16.msra.mxu1 %v4996_v19  ;;  %v1301_v18 = vld [vmem:[%s6114_s4 + $0x7a0] sm:$0xff]  ;;  %v1286_v19 = vld [vmem:[%s6114_s4 + $0x728] sm:$0xff] }
 0x161   : > { %5058 = vmatprep.subr.msk.bf16.mxu0 %vm3669_vm1, %v5027_v20  ;;  %5060 = vmatprep.subr.msk.bf16.mxu1 %vm3669_vm1, %v5029_v22  ;;  %v1302_v20 = vld [vmem:[%s6114_s4 + $0x7a8] sm:$0xff]  ;;  %v4808_v22 = vcombine.low %v1254_v11, %v1270_v12  ;;  %v4839_v23 = vcombine.high %v1285_v17, %v1301_v18  ;;  %v1079_v11 = vld [vmem:[%s6114_s4 + $0xb0] sm:$0xff]  ;;  %v1064_v12 = vld [vmem:[%s6114_s4 + $0x38] sm:$0xff] }
 0x162   : > { %v4841_v24 = vcombine.high %v1286_v19, %v1302_v20 }
 0x164   : > { %3875 = vmatpush1.bf16.msra.mxu0 %v3683_v28  ;;  %3916 = vmatpush1.bf16.msra.mxu1 %v3689_v30  ;;  %v1334_v28 = vld [vmem:[%s6114_s4 + $0x8a8] sm:$0xff]  ;;  %v4840_v30 = vcombine.low %v1286_v19, %v1302_v20  ;;  %v1111_v19 = vld [vmem:[%s6114_s4 + $0x1b0] sm:$0xff]  ;;  %v1096_v20 = vld [vmem:[%s6114_s4 + $0x138] sm:$0xff] }
 0x165   : > { %3930 = vmatprep.subr.bf16.mxu0 %v4615_v29  ;;  %3971 = vmatprep.subr.bf16.mxu1 %v4617_v31  ;;  %v4838_v29 = vcombine.low %v1285_v17, %v1301_v18  ;;  %v4871_v31 = vcombine.high %v1317_v25, %v1333_v26  ;;  %v4873_v32 = vcombine.high %v1318_v27, %v1334_v28  ;;  %v1095_v18 = vld [vmem:[%s6114_s4 + $0x130] sm:$0xff] }
 0x167   : > { %3881 = vmatmul.mubr.bf16.vlgmr.msra.gmra.mrb[4].mxu0 %v6104_v48  ;;  %3922 = vmatmul.mubr.bf16.vlgmr.msra.gmra.mrb[4].mxu1 %v6104_v48  ;;  %v4678_v48 = vcombine.low %v1125_v40, %v1141_v41  ;;  %v1381_v41 = vld [vmem:[%s6114_s4 + $0xa20] sm:$0xff] }
 0x168   : > { %3931 = vmatpush1.bf16.msra.mxu0 %v4614_v36  ;;  %3972 = vmatpush1.bf16.msra.mxu1 %v4616_v37  ;;  %v1366_v36 = vld [vmem:[%s6114_s4 + $0x9a8] sm:$0xff]  ;;  %v4870_v37 = vcombine.low %v1317_v25, %v1333_v26  ;;  %v1127_v26 = vld [vmem:[%s6114_s4 + $0x230] sm:$0xff] }
 0x169   : > { %3932 = vmatprep.subr.bf16.mxu0 %v4647_v38  ;;  %3973 = vmatprep.subr.bf16.mxu1 %v4649_v39  ;;  %v4872_v38 = vcombine.low %v1318_v27, %v1334_v28  ;;  %v4903_v39 = vcombine.high %v1349_v33, %v1365_v34  ;;  %v4905_v40 = vcombine.high %v1350_v35, %v1366_v36  ;;  %v1143_v27 = vld [vmem:[%s6114_s4 + $0x2b0] sm:$0xff]  ;;  %v6318_v28 = vld.sshfl [vmem:[%s6707_s0] sm:$0x33 pattern:$0x76325410] }
 0x16a   : > { %5063 = vmatprep.mubr.msk.bf16.mxu0 %vm3665_vm0, %v6108_v49  ;;  %5065 = vmatprep.mubr.msk.bf16.mxu1 %vm3665_vm0, %v6108_v49 }
 0x16c   : > { %3933 = vmatpush1.bf16.msra.mxu0 %v4646_v44  ;;  %3974 = vmatpush1.bf16.msra.mxu1 %v4648_v45  ;;  %v1398_v44 = vld [vmem:[%s6114_s4 + $0xaa8] sm:$0xff]  ;;  %v4902_v45 = vcombine.low %v1349_v33, %v1365_v34  ;;  %v4683_v33 = vcombine.high %v1127_v26, %v1143_v27 }
 0x16d   : > { %3934 = vmatprep.subr.bf16.mxu0 %v4679_v46  ;;  %3975 = vmatprep.subr.bf16.mxu1 %v4681_v47  ;;  %v4904_v46 = vcombine.low %v1350_v35, %v1366_v36  ;;  %v4935_v47 = vcombine.high %v1381_v41, %v1397_v42  ;;  %v4937_v50 = vcombine.high %v1382_v43, %v1398_v44  ;;  %v1159_v35 = vld [vmem:[%s6114_s4 + $0x330] sm:$0xff] }
 0x16e   : > { %v1175_v36 = vld [vmem:[%s6114_s4 + $0x3b0] sm:$0xff] }
 0x170   : > { %3935 = vmatpush1.bf16.msra.mxu0 %v4678_v48  ;;  %3976 = vmatpush1.bf16.msra.mxu1 %v4680_v54  ;;  %v1430_v48 = vld [vmem:[%s6114_s4 + $0xba8] sm:$0xff]  ;;  %v4934_v54 = vcombine.low %v1381_v41, %v1397_v42  ;;  %v4715_v41 = vcombine.high %v1159_v35, %v1175_v36 }
 0x171   : > { %3936 = vmatprep.subr.bf16.mxu0 %v4711_v55  ;;  %3977 = vmatprep.subr.bf16.mxu1 %v4713_v56  ;;  %v4936_v55 = vcombine.low %v1382_v43, %v1398_v44  ;;  %v4967_v56 = vcombine.high %v1413_v51, %v1429_v52  ;;  %v4969_v57 = vcombine.high %v1414_v53, %v1430_v48  ;;  %v1191_v43 = vld [vmem:[%s6114_s4 + $0x430] sm:$0xff] }
 0x172   : > { %v1207_v44 = vld [vmem:[%s6114_s4 + $0x4b0] sm:$0xff] }
 0x174   : > { %3937 = vmatpush1.bf16.msra.mxu0 %v4710_v61  ;;  %3978 = vmatpush1.bf16.msra.mxu1 %v4712_v62  ;;  %v1462_v61 = vld [vmem:[%s6114_s4 + $0xca8] sm:$0xff]  ;;  %v4966_v62 = vcombine.low %v1413_v51, %v1429_v52  ;;  %v4747_v51 = vcombine.high %v1191_v43, %v1207_v44 }
 0x175   : > { %3938 = vmatprep.subr.bf16.mxu0 %v4743_v63  ;;  %3979 = vmatprep.subr.bf16.mxu1 %v4745_v0  ;;  %v4968_v63 = vcombine.low %v1414_v53, %v1430_v48  ;;  %v4999_v0 = vcombine.high %v1445_v58, %v1461_v59  ;;  %v5001_v1 = vcombine.high %v1446_v60, %v1462_v61  ;;  %v1223_v53 = vld [vmem:[%s6114_s4 + $0x530] sm:$0xff] }
 0x176   : > { %v1239_v48 = vld [vmem:[%s6114_s4 + $0x5b0] sm:$0xff] }
 0x177   : > { %v4779_v58 = vcombine.high %v1223_v53, %v1239_v48 }
 0x178   : > { %3939 = vmatpush1.bf16.msra.mxu0 %v4742_v5  ;;  %3980 = vmatpush1.bf16.msra.mxu1 %v4744_v6  ;;  %v5000_v5 = vcombine.low %v1446_v60, %v1462_v61  ;;  %v5031_v6 = vcombine.high %v1477_v2, %v1477_v2  ;;  %v1255_v60 = vld [vmem:[%s6114_s4 + $0x630] sm:$0xff] }
 0x179   : > { %3940 = vmatprep.subr.bf16.mxu0 %v4775_v7  ;;  %3981 = vmatprep.subr.bf16.mxu1 %v4777_v8  ;;  %v5030_v7 = vcombine.low %v1477_v2, %v1477_v2  ;;  %v5033_v8 = vcombine.high %v1478_v3, %v1478_v3  ;;  %v1271_v61 = vld [vmem:[%s6114_s4 + $0x6b0] sm:$0xff] }
 0x17a   : > { %v4811_v2 = vcombine.high %v1255_v60, %v1271_v61 }
 0x17c   : > { %3941 = vmatpush1.bf16.msra.mxu0 %v4774_v13  ;;  %3982 = vmatpush1.bf16.msra.mxu1 %v4776_v14  ;;  %v1080_v13 = vld [vmem:[%s6114_s4 + $0xb8] sm:$0xff]  ;;  %v3695_v14 = vsel %vm3669_vm1, %v5030_v7, 0 }
 0x17d   : > { %3942 = vmatprep.subr.bf16.mxu0 %v4807_v15  ;;  %3983 = vmatprep.subr.bf16.mxu1 %v4809_v16  ;;  %v4619_v15 = vcombine.high %v1063_v10, %v1079_v11  ;;  %v3701_v16 = vsel %vm3669_vm1, %v5032_v9, 0  ;;  %v4621_v17 = vcombine.high %v1064_v12, %v1080_v13  ;;  %v1304_v7 = vld [vmem:[%s6114_s4 + $0x7b8] sm:$0xff] }
 0x180   : > { %3943 = vmatpush1.bf16.msra.mxu0 %v4806_v21  ;;  %3984 = vmatpush1.bf16.msra.mxu1 %v4808_v22  ;;  %v1112_v21 = vld [vmem:[%s6114_s4 + $0x1b8] sm:$0xff]  ;;  %v4618_v22 = vcombine.low %v1063_v10, %v1079_v11 }
 0x181   : > { %3944 = vmatprep.subr.bf16.mxu0 %v4839_v23  ;;  %3985 = vmatprep.subr.bf16.mxu1 %v4841_v24  ;;  %v4620_v23 = vcombine.low %v1064_v12, %v1080_v13  ;;  %v4651_v24 = vcombine.high %v1095_v18, %v1111_v19  ;;  %v4653_v25 = vcombine.high %v1096_v20, %v1112_v21  ;;  %v1319_v12 = vld [vmem:[%s6114_s4 + $0x830] sm:$0xff] }
 0x182   : > { %v1335_v13 = vld [vmem:[%s6114_s4 + $0x8b0] sm:$0xff] }
 0x184   : > { %3945 = vmatpush1.bf16.msra.mxu0 %v4838_v29  ;;  %3986 = vmatpush1.bf16.msra.mxu1 %v4840_v30  ;;  %v1128_v29 = vld [vmem:[%s6114_s4 + $0x238] sm:$0xff] }
 0x185   : > { %3946 = vmatprep.subr.bf16.mxu0 %v4871_v31  ;;  %3987 = vmatprep.subr.bf16.mxu1 %v4873_v32  ;;  %v1144_v30 = vld [vmem:[%s6114_s4 + $0x2b8] sm:$0xff]  ;;  %v4650_v31 = vcombine.low %v1095_v18, %v1111_v19  ;;  %v4652_v32 = vcombine.low %v1096_v20, %v1112_v21  ;;  %v4875_v18 = vcombine.high %v1319_v12, %v1335_v13  ;;  %v1351_v20 = vld [vmem:[%s6114_s4 + $0x930] sm:$0xff] }
 0x186   : > { %v4685_v34 = vcombine.high %v1128_v29, %v1144_v30  ;;  %v1367_v21 = vld [vmem:[%s6114_s4 + $0x9b0] sm:$0xff] }
 0x188   : > { %3947 = vmatpush1.bf16.msra.mxu0 %v4870_v37  ;;  %3988 = vmatpush1.bf16.msra.mxu1 %v4872_v38  ;;  %v1160_v37 = vld [vmem:[%s6114_s4 + $0x338] sm:$0xff] }
 0x189   : > { %3948 = vmatprep.subr.bf16.mxu0 %v4903_v39  ;;  %3989 = vmatprep.subr.bf16.mxu1 %v4905_v40  ;;  %v1176_v38 = vld [vmem:[%s6114_s4 + $0x3b8] sm:$0xff]  ;;  %v4682_v39 = vcombine.low %v1127_v26, %v1143_v27  ;;  %v4684_v40 = vcombine.low %v1128_v29, %v1144_v30  ;;  %v4907_v26 = vcombine.high %v1351_v20, %v1367_v21  ;;  %v1383_v29 = vld [vmem:[%s6114_s4 + $0xa30] sm:$0xff] }
 0x18a   : > { %v4717_v42 = vcombine.high %v1160_v37, %v1176_v38  ;;  %v1399_v30 = vld [vmem:[%s6114_s4 + $0xab0] sm:$0xff] }
 0x18c   : > { %3949 = vmatpush1.bf16.msra.mxu0 %v4902_v45  ;;  %3990 = vmatpush1.bf16.msra.mxu1 %v4904_v46  ;;  %v1192_v45 = vld [vmem:[%s6114_s4 + $0x438] sm:$0xff] }
 0x18d   : > { %3950 = vmatprep.subr.bf16.mxu0 %v4935_v47  ;;  %3991 = vmatprep.subr.bf16.mxu1 %v4937_v50  ;;  %v1208_v46 = vld [vmem:[%s6114_s4 + $0x4b8] sm:$0xff]  ;;  %v4714_v47 = vcombine.low %v1159_v35, %v1175_v36  ;;  %v4716_v50 = vcombine.low %v1160_v37, %v1176_v38  ;;  %v4939_v35 = vcombine.high %v1383_v29, %v1399_v30  ;;  %v1415_v37 = vld [vmem:[%s6114_s4 + $0xb30] sm:$0xff] }
 0x18e   : > { %v4749_v52 = vcombine.high %v1192_v45, %v1208_v46  ;;  %v1431_v38 = vld [vmem:[%s6114_s4 + $0xbb0] sm:$0xff] }
 0x190   : > { %3951 = vmatpush1.bf16.msra.mxu0 %v4934_v54  ;;  %3992 = vmatpush1.bf16.msra.mxu1 %v4936_v55  ;;  %v1224_v54 = vld [vmem:[%s6114_s4 + $0x538] sm:$0xff] }
 0x191   : > { %3952 = vmatprep.subr.bf16.mxu0 %v4967_v56  ;;  %3993 = vmatprep.subr.bf16.mxu1 %v4969_v57  ;;  %v1240_v55 = vld [vmem:[%s6114_s4 + $0x5b8] sm:$0xff]  ;;  %v4746_v56 = vcombine.low %v1191_v43, %v1207_v44  ;;  %v4748_v57 = vcombine.low %v1192_v45, %v1208_v46  ;;  %v4971_v43 = vcombine.high %v1415_v37, %v1431_v38  ;;  %v1447_v45 = vld [vmem:[%s6114_s4 + $0xc30] sm:$0xff] }
 0x192   : > { %v4781_v59 = vcombine.high %v1224_v54, %v1240_v55  ;;  %v1463_v46 = vld [vmem:[%s6114_s4 + $0xcb0] sm:$0xff] }
 0x194   : > { %3953 = vmatpush1.bf16.msra.mxu0 %v4966_v62  ;;  %3994 = vmatpush1.bf16.msra.mxu1 %v4968_v63  ;;  %v1256_v62 = vld [vmem:[%s6114_s4 + $0x638] sm:$0xff] }
 0x195   : > { %3954 = vmatprep.subr.bf16.mxu0 %v4999_v0  ;;  %3995 = vmatprep.subr.bf16.mxu1 %v5001_v1  ;;  %v1272_v63 = vld [vmem:[%s6114_s4 + $0x6b8] sm:$0xff]  ;;  %v4778_v0 = vcombine.low %v1223_v53, %v1239_v48  ;;  %v4780_v1 = vcombine.low %v1224_v54, %v1240_v55  ;;  %v5003_v53 = vcombine.high %v1447_v45, %v1463_v46  ;;  %v1479_v54 = vld [vmem:[%s6114_s4 + $0xd30] sm:$0xff] }
 0x196   : > { %v4813_v3 = vcombine.high %v1256_v62, %v1272_v63  ;;  %v4812_v9 = vcombine.low %v1256_v62, %v1272_v63  ;;  %v1480_v55 = vld [vmem:[%s6114_s4 + $0xd38] sm:$0xff]  ;;  %v1065_v62 = vld [vmem:[%s6114_s4 + $0x40] sm:$0xff] }
 0x197   : > { %v1081_v63 = vld [vmem:[%s6114_s4 + $0xc0] sm:$0xff] }
 0x198   : > { %3955 = vmatpush1.bf16.msra.mxu0 %v4998_v4  ;;  %3996 = vmatpush1.bf16.msra.mxu1 %v5000_v5  ;;  %v1287_v4 = vld [vmem:[%s6114_s4 + $0x730] sm:$0xff] }
 0x199   : > { %5062 = vmatprep.subr.msk.bf16.mxu0 %vm3669_vm1, %v5031_v6  ;;  %5064 = vmatprep.subr.msk.bf16.mxu1 %vm3669_vm1, %v5033_v8  ;;  %v1303_v5 = vld [vmem:[%s6114_s4 + $0x7b0] sm:$0xff]  ;;  %v1288_v6 = vld [vmem:[%s6114_s4 + $0x738] sm:$0xff]  ;;  %v4810_v8 = vcombine.low %v1255_v60, %v1271_v61  ;;  %v5037_v60 = vcombine.high %v1480_v55, %v1480_v55  ;;  %v5036_v61 = vcombine.low %v1480_v55, %v1480_v55 }
 0x19a   : > { %v4843_v10 = vcombine.high %v1287_v4, %v1303_v5  ;;  %v4845_v11 = vcombine.high %v1288_v6, %v1304_v7 }
 0x19c   : > { %3957 = vmatpush1.bf16.msra.mxu0 %v3695_v14  ;;  %3998 = vmatpush1.bf16.msra.mxu1 %v3701_v16  ;;  %v1320_v14 = vld [vmem:[%s6114_s4 + $0x838] sm:$0xff]  ;;  %v4842_v16 = vcombine.low %v1287_v4, %v1303_v5  ;;  %v3713_v4 = vsel %vm3669_vm1, %v5036_v61, 0 }
 0x19d   : > { %4012 = vmatprep.subr.bf16.mxu0 %v4619_v15  ;;  %4053 = vmatprep.subr.bf16.mxu1 %v4621_v17  ;;  %v1336_v15 = vld [vmem:[%s6114_s4 + $0x8b8] sm:$0xff]  ;;  %v4844_v17 = vcombine.low %v1288_v6, %v1304_v7  ;;  %v1097_v6 = vld [vmem:[%s6114_s4 + $0x140] sm:$0xff] }
 0x19e   : > { %v4877_v19 = vcombine.high %v1320_v14, %v1336_v15  ;;  %v1113_v7 = vld [vmem:[%s6114_s4 + $0x1c0] sm:$0xff] }
 0x19f   : > { %3963 = vmatmul.mubr.bf16.vlgmr.msra.gmra.mrb[8].mxu0 %v6318_v28  ;;  %4004 = vmatmul.mubr.bf16.vlgmr.msra.gmra.mrb[8].mxu1 %v6318_v28 }
 0x1a0   : > { %4013 = vmatpush1.bf16.msra.mxu0 %v4618_v22  ;;  %4054 = vmatpush1.bf16.msra.mxu1 %v4620_v23  ;;  %v1352_v22 = vld [vmem:[%s6114_s4 + $0x938] sm:$0xff] }
 0x1a1   : > { %4014 = vmatprep.subr.bf16.mxu0 %v4651_v24  ;;  %4055 = vmatprep.subr.bf16.mxu1 %v4653_v25  ;;  %v1368_v23 = vld [vmem:[%s6114_s4 + $0x9b8] sm:$0xff]  ;;  %v4874_v24 = vcombine.low %v1319_v12, %v1335_v13  ;;  %v4876_v25 = vcombine.low %v1320_v14, %v1336_v15  ;;  %v4655_v12 = vcombine.high %v1097_v6, %v1113_v7  ;;  %v1129_v14 = vld [vmem:[%s6114_s4 + $0x240] sm:$0xff] }
 0x1a2   : > { %5067 = vmatprep.mubr.msk.bf16.mxu0 %vm3665_vm0, %v6108_v49  ;;  %5069 = vmatprep.mubr.msk.bf16.mxu1 %vm3665_vm0, %v6108_v49  ;;  %v4909_v27 = vcombine.high %v1352_v22, %v1368_v23  ;;  %v1145_v15 = vld [vmem:[%s6114_s4 + $0x2c0] sm:$0xff] }
 0x1a4   : > { %4015 = vmatpush1.bf16.msra.mxu0 %v4650_v31  ;;  %4056 = vmatpush1.bf16.msra.mxu1 %v4652_v32  ;;  %v1384_v31 = vld [vmem:[%s6114_s4 + $0xa38] sm:$0xff] }
 0x1a5   : > { %4016 = vmatprep.subr.bf16.mxu0 %v4683_v33  ;;  %4057 = vmatprep.subr.bf16.mxu1 %v4685_v34  ;;  %v1400_v32 = vld [vmem:[%s6114_s4 + $0xab8] sm:$0xff]  ;;  %v4906_v33 = vcombine.low %v1351_v20, %v1367_v21  ;;  %v4908_v34 = vcombine.low %v1352_v22, %v1368_v23  ;;  %v4687_v20 = vcombine.high %v1129_v14, %v1145_v15  ;;  %v1161_v22 = vld [vmem:[%s6114_s4 + $0x340] sm:$0xff] }
 0x1a6   : > { %v4941_v36 = vcombine.high %v1384_v31, %v1400_v32  ;;  %v1177_v23 = vld [vmem:[%s6114_s4 + $0x3c0] sm:$0xff] }
 0x1a8   : > { %4017 = vmatpush1.bf16.msra.mxu0 %v4682_v39  ;;  %4058 = vmatpush1.bf16.msra.mxu1 %v4684_v40  ;;  %v1416_v39 = vld [vmem:[%s6114_s4 + $0xb38] sm:$0xff] }
 0x1a9   : > { %4018 = vmatprep.subr.bf16.mxu0 %v4715_v41  ;;  %4059 = vmatprep.subr.bf16.mxu1 %v4717_v42  ;;  %v1432_v40 = vld [vmem:[%s6114_s4 + $0xbb8] sm:$0xff]  ;;  %v4938_v41 = vcombine.low %v1383_v29, %v1399_v30  ;;  %v4940_v42 = vcombine.low %v1384_v31, %v1400_v32  ;;  %v4719_v29 = vcombine.high %v1161_v22, %v1177_v23  ;;  %v1193_v31 = vld [vmem:[%s6114_s4 + $0x440] sm:$0xff] }
 0x1aa   : > { %v4973_v44 = vcombine.high %v1416_v39, %v1432_v40  ;;  %v1209_v32 = vld [vmem:[%s6114_s4 + $0x4c0] sm:$0xff] }
 0x1ac   : > { %4019 = vmatpush1.bf16.msra.mxu0 %v4714_v47  ;;  %4060 = vmatpush1.bf16.msra.mxu1 %v4716_v50  ;;  %v1448_v47 = vld [vmem:[%s6114_s4 + $0xc38] sm:$0xff] }
 0x1ad   : > { %4020 = vmatprep.subr.bf16.mxu0 %v4747_v51  ;;  %4061 = vmatprep.subr.bf16.mxu1 %v4749_v52  ;;  %v1464_v50 = vld [vmem:[%s6114_s4 + $0xcb8] sm:$0xff]  ;;  %v4970_v51 = vcombine.low %v1415_v37, %v1431_v38  ;;  %v4972_v52 = vcombine.low %v1416_v39, %v1432_v40  ;;  %v4751_v37 = vcombine.high %v1193_v31, %v1209_v32  ;;  %v1225_v39 = vld [vmem:[%s6114_s4 + $0x540] sm:$0xff] }
 0x1ae   : > { %v5005_v48 = vcombine.high %v1448_v47, %v1464_v50  ;;  %v1241_v40 = vld [vmem:[%s6114_s4 + $0x5c0] sm:$0xff] }
 0x1b0   : > { %4021 = vmatpush1.bf16.msra.mxu0 %v4746_v56  ;;  %4062 = vmatpush1.bf16.msra.mxu1 %v4748_v57  ;;  %v5002_v56 = vcombine.low %v1447_v45, %v1463_v46  ;;  %v5004_v57 = vcombine.low %v1448_v47, %v1464_v50  ;;  %v4783_v45 = vcombine.high %v1225_v39, %v1241_v40  ;;  %v1257_v47 = vld [vmem:[%s6114_s4 + $0x640] sm:$0xff] }
 0x1b1   : > { %4022 = vmatprep.subr.bf16.mxu0 %v4779_v58  ;;  %4063 = vmatprep.subr.bf16.mxu1 %v4781_v59  ;;  %v5035_v58 = vcombine.high %v1479_v54, %v1479_v54  ;;  %v5034_v59 = vcombine.low %v1479_v54, %v1479_v54  ;;  %v1273_v50 = vld [vmem:[%s6114_s4 + $0x6c0] sm:$0xff] }
 0x1b2   : > { %v4815_v54 = vcombine.high %v1257_v47, %v1273_v50 }
 0x1b4   : > { %4023 = vmatpush1.bf16.msra.mxu0 %v4778_v0  ;;  %4064 = vmatpush1.bf16.msra.mxu1 %v4780_v1  ;;  %v1066_v0 = vld [vmem:[%s6114_s4 + $0x48] sm:$0xff] }
 0x1b5   : > { %4024 = vmatprep.subr.bf16.mxu0 %v4811_v2  ;;  %4065 = vmatprep.subr.bf16.mxu1 %v4813_v3  ;;  %v1082_v1 = vld [vmem:[%s6114_s4 + $0xc8] sm:$0xff]  ;;  %v3707_v2 = vsel %vm3669_vm1, %v5034_v59, 0  ;;  %v4623_v3 = vcombine.high %v1065_v62, %v1081_v63 }
 0x1b6   : > { %v4625_v5 = vcombine.high %v1066_v0, %v1082_v1  ;;  %v1306_v59 = vld [vmem:[%s6114_s4 + $0x7c8] sm:$0xff] }
 0x1b8   : > { %4025 = vmatpush1.bf16.msra.mxu0 %v4810_v8  ;;  %4066 = vmatpush1.bf16.msra.mxu1 %v4812_v9  ;;  %v1098_v8 = vld [vmem:[%s6114_s4 + $0x148] sm:$0xff] }
 0x1b9   : > { %4026 = vmatprep.subr.bf16.mxu0 %v4843_v10  ;;  %4067 = vmatprep.subr.bf16.mxu1 %v4845_v11  ;;  %v1114_v9 = vld [vmem:[%s6114_s4 + $0x1c8] sm:$0xff]  ;;  %v4622_v10 = vcombine.low %v1065_v62, %v1081_v63  ;;  %v4624_v11 = vcombine.low %v1066_v0, %v1082_v1  ;;  %v1321_v0 = vld [vmem:[%s6114_s4 + $0x840] sm:$0xff] }
 0x1ba   : > { %v4657_v13 = vcombine.high %v1098_v8, %v1114_v9  ;;  %v1337_v1 = vld [vmem:[%s6114_s4 + $0x8c0] sm:$0xff] }
 0x1bc   : > { %4027 = vmatpush1.bf16.msra.mxu0 %v4842_v16  ;;  %4068 = vmatpush1.bf16.msra.mxu1 %v4844_v17  ;;  %v1130_v16 = vld [vmem:[%s6114_s4 + $0x248] sm:$0xff] }
 0x1bd   : > { %4028 = vmatprep.subr.bf16.mxu0 %v4875_v18  ;;  %4069 = vmatprep.subr.bf16.mxu1 %v4877_v19  ;;  %v1146_v17 = vld [vmem:[%s6114_s4 + $0x2c8] sm:$0xff]  ;;  %v4654_v18 = vcombine.low %v1097_v6, %v1113_v7  ;;  %v4656_v19 = vcombine.low %v1098_v8, %v1114_v9  ;;  %v4879_v6 = vcombine.high %v1321_v0, %v1337_v1  ;;  %v1353_v8 = vld [vmem:[%s6114_s4 + $0x940] sm:$0xff] }
 0x1be   : > { %v4689_v21 = vcombine.high %v1130_v16, %v1146_v17  ;;  %v1369_v9 = vld [vmem:[%s6114_s4 + $0x9c0] sm:$0xff] }
 0x1c0   : > { %4029 = vmatpush1.bf16.msra.mxu0 %v4874_v24  ;;  %4070 = vmatpush1.bf16.msra.mxu1 %v4876_v25  ;;  %v1162_v24 = vld [vmem:[%s6114_s4 + $0x348] sm:$0xff] }
 0x1c1   : > { %4030 = vmatprep.subr.bf16.mxu0 %v4907_v26  ;;  %4071 = vmatprep.subr.bf16.mxu1 %v4909_v27  ;;  %v1178_v25 = vld [vmem:[%s6114_s4 + $0x3c8] sm:$0xff]  ;;  %v4686_v26 = vcombine.low %v1129_v14, %v1145_v15  ;;  %v4688_v27 = vcombine.low %v1130_v16, %v1146_v17  ;;  %v4911_v14 = vcombine.high %v1353_v8, %v1369_v9  ;;  %v1385_v16 = vld [vmem:[%s6114_s4 + $0xa40] sm:$0xff] }
 0x1c2   : > { %v4721_v30 = vcombine.high %v1162_v24, %v1178_v25  ;;  %v1401_v17 = vld [vmem:[%s6114_s4 + $0xac0] sm:$0xff] }
 0x1c4   : > { %4031 = vmatpush1.bf16.msra.mxu0 %v4906_v33  ;;  %4072 = vmatpush1.bf16.msra.mxu1 %v4908_v34  ;;  %v1194_v33 = vld [vmem:[%s6114_s4 + $0x448] sm:$0xff] }
 0x1c5   : > { %4032 = vmatprep.subr.bf16.mxu0 %v4939_v35  ;;  %4073 = vmatprep.subr.bf16.mxu1 %v4941_v36  ;;  %v1210_v34 = vld [vmem:[%s6114_s4 + $0x4c8] sm:$0xff]  ;;  %v4718_v35 = vcombine.low %v1161_v22, %v1177_v23  ;;  %v4720_v36 = vcombine.low %v1162_v24, %v1178_v25  ;;  %v4943_v22 = vcombine.high %v1385_v16, %v1401_v17  ;;  %v1417_v24 = vld [vmem:[%s6114_s4 + $0xb40] sm:$0xff] }
 0x1c6   : > { %v4753_v38 = vcombine.high %v1194_v33, %v1210_v34  ;;  %v1433_v25 = vld [vmem:[%s6114_s4 + $0xbc0] sm:$0xff] }
 0x1c8   : > { %4033 = vmatpush1.bf16.msra.mxu0 %v4938_v41  ;;  %4074 = vmatpush1.bf16.msra.mxu1 %v4940_v42  ;;  %v1226_v41 = vld [vmem:[%s6114_s4 + $0x548] sm:$0xff] }
 0x1c9   : > { %4034 = vmatprep.subr.bf16.mxu0 %v4971_v43  ;;  %4075 = vmatprep.subr.bf16.mxu1 %v4973_v44  ;;  %v1242_v42 = vld [vmem:[%s6114_s4 + $0x5c8] sm:$0xff]  ;;  %v4750_v43 = vcombine.low %v1193_v31, %v1209_v32  ;;  %v4752_v44 = vcombine.low %v1194_v33, %v1210_v34  ;;  %v4975_v31 = vcombine.high %v1417_v24, %v1433_v25  ;;  %v1449_v33 = vld [vmem:[%s6114_s4 + $0xc40] sm:$0xff] }
 0x1ca   : > { %v4785_v46 = vcombine.high %v1226_v41, %v1242_v42  ;;  %v1465_v34 = vld [vmem:[%s6114_s4 + $0xcc0] sm:$0xff] }
 0x1cc   : > { %4035 = vmatpush1.bf16.msra.mxu0 %v4970_v51  ;;  %4076 = vmatpush1.bf16.msra.mxu1 %v4972_v52  ;;  %v1258_v51 = vld [vmem:[%s6114_s4 + $0x648] sm:$0xff] }
 0x1cd   : > { %4036 = vmatprep.subr.bf16.mxu0 %v5003_v53  ;;  %4077 = vmatprep.subr.bf16.mxu1 %v5005_v48  ;;  %v1274_v52 = vld [vmem:[%s6114_s4 + $0x6c8] sm:$0xff]  ;;  %v4782_v53 = vcombine.low %v1225_v39, %v1241_v40  ;;  %v4784_v48 = vcombine.low %v1226_v41, %v1242_v42  ;;  %v5007_v40 = vcombine.high %v1449_v33, %v1465_v34 }
 0x1ce   : > { %v4817_v55 = vcombine.high %v1258_v51, %v1274_v52  ;;  %v4816_v61 = vcombine.low %v1258_v51, %v1274_v52 }
 0x1d0   : > { %4037 = vmatpush1.bf16.msra.mxu0 %v5002_v56  ;;  %4078 = vmatpush1.bf16.msra.mxu1 %v5004_v57  ;;  %v1289_v56 = vld [vmem:[%s6114_s4 + $0x740] sm:$0xff] }
 0x1d1   : > { %5066 = vmatprep.subr.msk.bf16.mxu0 %vm3669_vm1, %v5035_v58  ;;  %5068 = vmatprep.subr.msk.bf16.mxu1 %vm3669_vm1, %v5037_v60  ;;  %v1305_v57 = vld [vmem:[%s6114_s4 + $0x7c0] sm:$0xff]  ;;  %v1290_v58 = vld [vmem:[%s6114_s4 + $0x748] sm:$0xff]  ;;  %v4814_v60 = vcombine.low %v1257_v47, %v1273_v50 }
 0x1d2   : > { %v4847_v62 = vcombine.high %v1289_v56, %v1305_v57  ;;  %v4849_v63 = vcombine.high %v1290_v58, %v1306_v59  ;;  %v1482_v47 = vld [vmem:[%s6114_s4 + $0xd48] sm:$0xff] }
 0x1d4   : > { %4039 = vmatpush1.bf16.msra.mxu0 %v3707_v2  ;;  %4080 = vmatpush1.bf16.msra.mxu1 %v3713_v4  ;;  %v1322_v2 = vld [vmem:[%s6114_s4 + $0x848] sm:$0xff]  ;;  %v4846_v4 = vcombine.low %v1289_v56, %v1305_v57 }
 0x1d5   : > { %4094 = vmatprep.subr.bf16.mxu0 %v4623_v3  ;;  %4135 = vmatprep.subr.bf16.mxu1 %v4625_v5  ;;  %v1338_v3 = vld [vmem:[%s6114_s4 + $0x8c8] sm:$0xff]  ;;  %v4848_v5 = vcombine.low %v1290_v58, %v1306_v59 }
 0x1d6   : > { %v4881_v7 = vcombine.high %v1322_v2, %v1338_v3 }
 0x1d7   : > { %4045 = vmatmul.mubr.bf16.vlgmr.msra.gmra.mrb[12].mxu0 %v6318_v28  ;;  %4086 = vmatmul.mubr.bf16.vlgmr.msra.gmra.mrb[12].mxu1 %v6318_v28 }
 0x1d8   : > { %4095 = vmatpush1.bf16.msra.mxu0 %v4622_v10  ;;  %4136 = vmatpush1.bf16.msra.mxu1 %v4624_v11  ;;  %v1354_v10 = vld [vmem:[%s6114_s4 + $0x948] sm:$0xff] }
 0x1d9   : > { %4096 = vmatprep.subr.bf16.mxu0 %v4655_v12  ;;  %4137 = vmatprep.subr.bf16.mxu1 %v4657_v13  ;;  %v1370_v11 = vld [vmem:[%s6114_s4 + $0x9c8] sm:$0xff]  ;;  %v4878_v12 = vcombine.low %v1321_v0, %v1337_v1  ;;  %v4880_v13 = vcombine.low %v1322_v2, %v1338_v3  ;;  %v5041_v0 = vcombine.high %v1482_v47, %v1482_v47  ;;  %v1067_v2 = vld [vmem:[%s6114_s4 + $0x50] sm:$0xff] }
 0x1da   : > { %5071 = vmatprep.mubr.msk.bf16.mxu0 %vm3665_vm0, %v6108_v49  ;;  %5073 = vmatprep.mubr.msk.bf16.mxu1 %vm3665_vm0, %v6108_v49  ;;  %v4913_v15 = vcombine.high %v1354_v10, %v1370_v11  ;;  %v5040_v1 = vcombine.low %v1482_v47, %v1482_v47  ;;  %v1083_v3 = vld [vmem:[%s6114_s4 + $0xd0] sm:$0xff] }
 0x1db   : > { %v1243_v47 = vld [vmem:[%s6114_s4 + $0x5d0] sm:$0xff] }
 0x1dc   : > { %4097 = vmatpush1.bf16.msra.mxu0 %v4654_v18  ;;  %4138 = vmatpush1.bf16.msra.mxu1 %v4656_v19  ;;  %v1386_v18 = vld [vmem:[%s6114_s4 + $0xa48] sm:$0xff] }
 0x1dd   : > { %4098 = vmatprep.subr.bf16.mxu0 %v4687_v20  ;;  %4139 = vmatprep.subr.bf16.mxu1 %v4689_v21  ;;  %v1402_v19 = vld [vmem:[%s6114_s4 + $0xac8] sm:$0xff]  ;;  %v4910_v20 = vcombine.low %v1353_v8, %v1369_v9  ;;  %v4912_v21 = vcombine.low %v1354_v10, %v1370_v11  ;;  %v4627_v10 = vcombine.high %v1067_v2, %v1083_v3  ;;  %v3725_v11 = vsel %vm3669_vm1, %v5040_v1, 0  ;;  %v1292_v1 = vld [vmem:[%s6114_s4 + $0x758] sm:$0xff] }
 0x1de   : > { %v4945_v23 = vcombine.high %v1386_v18, %v1402_v19 }
 0x1e0   : > { %4099 = vmatpush1.bf16.msra.mxu0 %v4686_v26  ;;  %4140 = vmatpush1.bf16.msra.mxu1 %v4688_v27  ;;  %v1418_v26 = vld [vmem:[%s6114_s4 + $0xb48] sm:$0xff] }
 0x1e1   : > { %4100 = vmatprep.subr.bf16.mxu0 %v4719_v29  ;;  %4141 = vmatprep.subr.bf16.mxu1 %v4721_v30  ;;  %v1434_v27 = vld [vmem:[%s6114_s4 + $0xbc8] sm:$0xff]  ;;  %v4942_v29 = vcombine.low %v1385_v16, %v1401_v17  ;;  %v4944_v30 = vcombine.low %v1386_v18, %v1402_v19  ;;  %v1116_v16 = vld [vmem:[%s6114_s4 + $0x1d8] sm:$0xff]  ;;  %v4626_v17 = vcombine.low %v1067_v2, %v1083_v3 }
 0x1e2   : > { %v4977_v32 = vcombine.high %v1418_v26, %v1434_v27  ;;  %v4976_v39 = vcombine.low %v1418_v26, %v1434_v27  ;;  %v1308_v2 = vld [vmem:[%s6114_s4 + $0x7d8] sm:$0xff] }
 0x1e4   : > { %4101 = vmatpush1.bf16.msra.mxu0 %v4718_v35  ;;  %4142 = vmatpush1.bf16.msra.mxu1 %v4720_v36  ;;  %v1450_v35 = vld [vmem:[%s6114_s4 + $0xc48] sm:$0xff] }
 0x1e5   : > { %4102 = vmatprep.subr.bf16.mxu0 %v4751_v37  ;;  %4143 = vmatprep.subr.bf16.mxu1 %v4753_v38  ;;  %v1466_v36 = vld [vmem:[%s6114_s4 + $0xcc8] sm:$0xff]  ;;  %v6434_v37 = vpop.permute.xlu0 %1492  ;;  %v4974_v38 = vcombine.low %v1417_v24, %v1433_v25  ;;  %v1148_v24 = vld [vmem:[%s6114_s4 + $0x2d8] sm:$0xff] }
 0x1e6   : > { %v5009_v42 = vcombine.high %v1450_v35, %v1466_v36 }
 0x1e8   : > { %4103 = vmatpush1.bf16.msra.mxu0 %v4750_v43  ;;  %4144 = vmatpush1.bf16.msra.mxu1 %v4752_v44  ;;  %v1481_v43 = vld [vmem:[%s6114_s4 + $0xd40] sm:$0xff] }
 0x1e9   : > { %4104 = vmatprep.subr.bf16.mxu0 %v4783_v45  ;;  %4145 = vmatprep.subr.bf16.mxu1 %v4785_v46  ;;  %v5039_v59 = vcombine.high %v1481_v43, %v1481_v43 }
 0x1ec   : > { %4105 = vmatpush1.bf16.msra.mxu0 %v4782_v53  ;;  %4146 = vmatpush1.bf16.msra.mxu1 %v4784_v48  ;;  %v5006_v48 = vcombine.low %v1449_v33, %v1465_v34  ;;  %v1180_v33 = vld [vmem:[%s6114_s4 + $0x3d8] sm:$0xff] }
 0x1ed   : > { %4106 = vmatprep.subr.bf16.mxu0 %v4815_v54  ;;  %4147 = vmatprep.subr.bf16.mxu1 %v4817_v55  ;;  %v5008_v54 = vcombine.low %v1450_v35, %v1466_v36 }
 0x1f0   : > { %4107 = vmatpush1.bf16.msra.mxu0 %v4814_v60  ;;  %4148 = vmatpush1.bf16.msra.mxu1 %v4816_v61  ;;  %v5038_v60 = vcombine.low %v1481_v43, %v1481_v43 }
 0x1f1   : > { %4108 = vmatprep.subr.bf16.mxu0 %v4847_v62  ;;  %4149 = vmatprep.subr.bf16.mxu1 %v4849_v63 }
 0x1f2   : > { %v3719_v9 = vsel %vm3669_vm1, %v5038_v60, 0 }
 0x1f4   : > { %4109 = vmatpush1.bf16.msra.mxu0 %v4846_v4  ;;  %4150 = vmatpush1.bf16.msra.mxu1 %v4848_v5  ;;  %v1068_v5 = vld [vmem:[%s6114_s4 + $0x58] sm:$0xff] }
 0x1f5   : > { %4110 = vmatprep.subr.bf16.mxu0 %v4879_v6  ;;  %4151 = vmatprep.subr.bf16.mxu1 %v4881_v7  ;;  %v1084_v6 = vld [vmem:[%s6114_s4 + $0xd8] sm:$0xff] }
 0x1f6   : > { %v4628_v18 = vcombine.low %v1068_v5, %v1084_v6 }
 0x1f8   : > { %4111 = vmatpush1.bf16.msra.mxu0 %v4878_v12  ;;  %4152 = vmatpush1.bf16.msra.mxu1 %v4880_v13  ;;  %v4629_v12 = vcombine.high %v1068_v5, %v1084_v6  ;;  %v1099_v13 = vld [vmem:[%s6114_s4 + $0x150] sm:$0xff]  ;;  %v4853_v6 = vcombine.high %v1292_v1, %v1308_v2 }
 0x1f9   : > { %4112 = vmatprep.subr.bf16.mxu0 %v4911_v14  ;;  %4153 = vmatprep.subr.bf16.mxu1 %v4913_v15  ;;  %v1115_v14 = vld [vmem:[%s6114_s4 + $0x1d0] sm:$0xff]  ;;  %v1100_v15 = vld [vmem:[%s6114_s4 + $0x158] sm:$0xff] }
 0x1fa   : > { %v4659_v19 = vcombine.high %v1099_v13, %v1115_v14  ;;  %v4658_v25 = vcombine.low %v1099_v13, %v1115_v14  ;;  %v4660_v26 = vcombine.low %v1100_v15, %v1116_v16 }
 0x1fc   : > { %4113 = vmatpush1.bf16.msra.mxu0 %v4910_v20  ;;  %4154 = vmatpush1.bf16.msra.mxu1 %v4912_v21  ;;  %v4661_v20 = vcombine.high %v1100_v15, %v1116_v16  ;;  %v1131_v21 = vld [vmem:[%s6114_s4 + $0x250] sm:$0xff] }
 0x1fd   : > { %4114 = vmatprep.subr.bf16.mxu0 %v4943_v22  ;;  %4155 = vmatprep.subr.bf16.mxu1 %v4945_v23  ;;  %v1147_v22 = vld [vmem:[%s6114_s4 + $0x2d0] sm:$0xff]  ;;  %v1132_v23 = vld [vmem:[%s6114_s4 + $0x258] sm:$0xff] }
 0x1fe   : > { %v4691_v27 = vcombine.high %v1131_v21, %v1147_v22  ;;  %v4692_v34 = vcombine.low %v1132_v23, %v1148_v24  ;;  %v1355_v15 = vld [vmem:[%s6114_s4 + $0x950] sm:$0xff] }
 0x1ff   : > { %v1371_v16 = vld [vmem:[%s6114_s4 + $0x9d0] sm:$0xff] }
 0x200   : > { %4115 = vmatpush1.bf16.msra.mxu0 %v4942_v29  ;;  %4156 = vmatpush1.bf16.msra.mxu1 %v4944_v30  ;;  %v4693_v29 = vcombine.high %v1132_v23, %v1148_v24  ;;  %v1163_v30 = vld [vmem:[%s6114_s4 + $0x350] sm:$0xff] }
 0x201   : > { %4116 = vmatprep.subr.bf16.mxu0 %v4975_v31  ;;  %4157 = vmatprep.subr.bf16.mxu1 %v4977_v32  ;;  %v1179_v31 = vld [vmem:[%s6114_s4 + $0x3d0] sm:$0xff]  ;;  %v1164_v32 = vld [vmem:[%s6114_s4 + $0x358] sm:$0xff] }
 0x202   : > { %v3800_v41 = vpop.f32.mrb[0].mxu0  ;;  %v3841_v44 = vpop.f32.mrb[0].mxu1  ;;  %v4723_v35 = vcombine.high %v1163_v30, %v1179_v31  ;;  %v4725_v36 = vcombine.high %v1164_v32, %v1180_v33  ;;  %v4724_v43 = vcombine.low %v1164_v32, %v1180_v33  ;;  %v1387_v23 = vld [vmem:[%s6114_s4 + $0xa50] sm:$0xff] }
 0x203   : > { %v3801_v45 = vadd.f32 %v3800_v41, %v6434_v37  ;;  %v3802_v46 = vpop.f32.mrb[1].mxu0  ;;  %v3842_v51 = vadd.f32 %v3841_v44, %v6434_v37  ;;  %v3843_v52 = vpop.f32.mrb[1].mxu1  ;;  %v1212_v41 = vld [vmem:[%s6114_s4 + $0x4d8] sm:$0xff]  ;;  %v1403_v24 = vld [vmem:[%s6114_s4 + $0xad0] sm:$0xff] }
 0x204   : > { %v3803_v50 = vadd.f32 %v3802_v46, %v6434_v37  ;;  %v3804_v53 = vpop.f32.mrb[2].mxu0  ;;  %4117 = vmatpush1.bf16.msra.mxu0 %v4974_v38  ;;  %v3844_v56 = vadd.f32 %v3843_v52, %v6434_v37  ;;  %v3845_v57 = vpop.f32.mrb[2].mxu1  ;;  %4158 = vmatpush1.bf16.msra.mxu1 %v4976_v39  ;;  %v1195_v38 = vld [vmem:[%s6114_s4 + $0x450] sm:$0xff] }
 0x205   : > { %v4422_v55 = vmax.f32 %v3801_v45, 0.0  ;;  %v3805_v58 = vpop.f32.mrb[3].mxu0  ;;  %4118 = vmatprep.subr.bf16.mxu0 %v5007_v40  ;;  %v4424_v62 = vmax.f32 %v3842_v51, 0.0  ;;  %v3846_v63 = vpop.f32.mrb[3].mxu1  ;;  %4159 = vmatprep.subr.bf16.mxu1 %v5009_v42  ;;  %v1211_v39 = vld [vmem:[%s6114_s4 + $0x4d0] sm:$0xff]  ;;  %v1196_v40 = vld [vmem:[%s6114_s4 + $0x458] sm:$0xff]  ;;  %v4722_v42 = vcombine.low %v1163_v30, %v1179_v31  ;;  %v4947_v30 = vcombine.high %v1387_v23, %v1403_v24 }
 0x206   : > { %v4423_v61 = vmax.f32 %v3803_v50, 0.0  ;;  %v4425_v4 = vmax.f32 %v3844_v56, 0.0  ;;  %v4755_v44 = vcombine.high %v1195_v38, %v1211_v39  ;;  %v4757_v45 = vcombine.high %v1196_v40, %v1212_v41  ;;  %v1227_v46 = vld [vmem:[%s6114_s4 + $0x550] sm:$0xff]  ;;  %v1228_v50 = vld [vmem:[%s6114_s4 + $0x558] sm:$0xff] }
 0x207   : > { %v1244_v51 = vld [vmem:[%s6114_s4 + $0x5d8] sm:$0xff]  ;;  %v4754_v52 = vcombine.low %v1195_v38, %v1211_v39  ;;  %v4756_v53 = vcombine.low %v1196_v40, %v1212_v41  ;;  %v1275_v56 = vld [vmem:[%s6114_s4 + $0x6d0] sm:$0xff] }
 0x208   : > { %v4486_v7 = vcombine.low %v4422_v55, %v4423_v61  ;;  %4119 = vmatpush1.bf16.msra.mxu0 %v5006_v48  ;;  %v4487_v8 = vcombine.low %v4424_v62, %v4425_v4  ;;  %4160 = vmatpush1.bf16.msra.mxu1 %v5008_v54  ;;  %v4787_v48 = vcombine.high %v1227_v46, %v1243_v47  ;;  %v1259_v55 = vld [vmem:[%s6114_s4 + $0x650] sm:$0xff]  ;;  %v1260_v57 = vld [vmem:[%s6114_s4 + $0x658] sm:$0xff] }
 0x209   : > { %5070 = vmatprep.subr.msk.bf16.mxu0 %vm3669_vm1, %v5039_v59  ;;  %5072 = vmatprep.subr.msk.bf16.mxu1 %vm3669_vm1, %v5041_v0  ;;  %v4789_v54 = vcombine.high %v1228_v50, %v1244_v51  ;;  %v1276_v58 = vld [vmem:[%s6114_s4 + $0x6d8] sm:$0xff]  ;;  %v4786_v59 = vcombine.low %v1227_v46, %v1243_v47  ;;  %v4788_v60 = vcombine.low %v1228_v50, %v1244_v51  ;;  %v1291_v63 = vld [vmem:[%s6114_s4 + $0x750] sm:$0xff] }
 0x20a   : > { %4518 = vst [vmem:[%s6450_s14] sm:$0xff] %v4486_v7  ;;  %4519 = vst [vmem:[%s6450_s14 + $0x8] sm:$0xff] %v4487_v8  ;;  %v4819_v61 = vcombine.high %v1259_v55, %v1275_v56  ;;  %v4821_v62 = vcombine.high %v1260_v57, %v1276_v58  ;;  %v1307_v0 = vld [vmem:[%s6114_s4 + $0x7d0] sm:$0xff]  ;;  %v4818_v3 = vcombine.low %v1259_v55, %v1275_v56 }
 0x20b   : > { %v4820_v4 = vcombine.low %v1260_v57, %v1276_v58  ;;  %v4851_v5 = vcombine.high %v1291_v63, %v1307_v0  ;;  %v1323_v7 = vld [vmem:[%s6114_s4 + $0x850] sm:$0xff] }
 0x20c   : > { %4121 = vmatpush1.bf16.msra.mxu0 %v3719_v9  ;;  %4162 = vmatpush1.bf16.msra.mxu1 %v3725_v11  ;;  %v1339_v8 = vld [vmem:[%s6114_s4 + $0x8d0] sm:$0xff]  ;;  %v1324_v9 = vld [vmem:[%s6114_s4 + $0x858] sm:$0xff]  ;;  %v4850_v11 = vcombine.low %v1291_v63, %v1307_v0 }
 0x20d   : > { %4176 = vmatprep.subr.bf16.mxu0 %v4627_v10  ;;  %4217 = vmatprep.subr.bf16.mxu1 %v4629_v12  ;;  %v1340_v10 = vld [vmem:[%s6114_s4 + $0x8d8] sm:$0xff]  ;;  %v4852_v12 = vcombine.low %v1292_v1, %v1308_v2  ;;  %v4883_v13 = vcombine.high %v1323_v7, %v1339_v8  ;;  %v1419_v32 = vld [vmem:[%s6114_s4 + $0xb50] sm:$0xff] }
 0x20e   : > { %v4885_v14 = vcombine.high %v1324_v9, %v1340_v10  ;;  %v1435_v33 = vld [vmem:[%s6114_s4 + $0xbd0] sm:$0xff] }
 0x20f   : > { %4127 = vmatmul.mubr.bf16.vlgmr.msra.gmra.mrb[16].mxu0 %v6318_v28  ;;  %4168 = vmatmul.mubr.bf16.vlgmr.msra.gmra.mrb[16].mxu1 %v6318_v28  ;;  %v4690_v28 = vcombine.low %v1131_v21, %v1147_v22  ;;  %v4915_v21 = vcombine.high %v1355_v15, %v1371_v16  ;;  %v4979_v38 = vcombine.high %v1419_v32, %v1435_v33  ;;  %v1451_v40 = vld [vmem:[%s6114_s4 + $0xc50] sm:$0xff] }
 0x210   : > { %4177 = vmatpush1.bf16.msra.mxu0 %v4626_v17  ;;  %4218 = vmatpush1.bf16.msra.mxu1 %v4628_v18  ;;  %v1356_v17 = vld [vmem:[%s6114_s4 + $0x958] sm:$0xff]  ;;  %v1467_v41 = vld [vmem:[%s6114_s4 + $0xcd0] sm:$0xff] }
 0x211   : > { %4178 = vmatprep.subr.bf16.mxu0 %v4659_v19  ;;  %4219 = vmatprep.subr.bf16.mxu1 %v4661_v20  ;;  %v1372_v18 = vld [vmem:[%s6114_s4 + $0x9d8] sm:$0xff]  ;;  %v4882_v19 = vcombine.low %v1323_v7, %v1339_v8  ;;  %v4884_v20 = vcombine.low %v1324_v9, %v1340_v10  ;;  %v5011_v46 = vcombine.high %v1451_v40, %v1467_v41  ;;  %v1483_v51 = vld [vmem:[%s6114_s4 + $0xd50] sm:$0xff]  ;;  %v1069_v8 = vld [vmem:[%s6114_s4 + $0x60] sm:$0xff] }
 0x212   : > { %5075 = vmatprep.mubr.msk.bf16.mxu0 %vm3665_vm0, %v6108_v49  ;;  %5077 = vmatprep.mubr.msk.bf16.mxu1 %vm3665_vm0, %v6108_v49  ;;  %v4917_v22 = vcombine.high %v1356_v17, %v1372_v18  ;;  %v5043_v1 = vcombine.high %v1483_v51, %v1483_v51  ;;  %v5042_v2 = vcombine.low %v1483_v51, %v1483_v51  ;;  %v1085_v9 = vld [vmem:[%s6114_s4 + $0xe0] sm:$0xff] }
 0x214   : > { %4179 = vmatpush1.bf16.msra.mxu0 %v4658_v25  ;;  %4220 = vmatpush1.bf16.msra.mxu1 %v4660_v26  ;;  %v1388_v25 = vld [vmem:[%s6114_s4 + $0xa58] sm:$0xff] }
 0x215   : > { %4180 = vmatprep.subr.bf16.mxu0 %v4691_v27  ;;  %4221 = vmatprep.subr.bf16.mxu1 %v4693_v29  ;;  %v1404_v26 = vld [vmem:[%s6114_s4 + $0xad8] sm:$0xff]  ;;  %v4914_v27 = vcombine.low %v1355_v15, %v1371_v16  ;;  %v4916_v29 = vcombine.low %v1356_v17, %v1372_v18  ;;  %v3731_v15 = vsel %vm3669_vm1, %v5042_v2, 0  ;;  %v4631_v16 = vcombine.high %v1069_v8, %v1085_v9 }
 0x216   : > { %v4949_v31 = vcombine.high %v1388_v25, %v1404_v26 }
 0x218   : > { %4181 = vmatpush1.bf16.msra.mxu0 %v4690_v28  ;;  %4222 = vmatpush1.bf16.msra.mxu1 %v4692_v34  ;;  %v1420_v28 = vld [vmem:[%s6114_s4 + $0xb58] sm:$0xff] }
 0x219   : > { %4182 = vmatprep.subr.bf16.mxu0 %v4723_v35  ;;  %4223 = vmatprep.subr.bf16.mxu1 %v4725_v36  ;;  %v1436_v34 = vld [vmem:[%s6114_s4 + $0xbd8] sm:$0xff]  ;;  %v4946_v35 = vcombine.low %v1387_v23, %v1403_v24  ;;  %v4948_v36 = vcombine.low %v1388_v25, %v1404_v26  ;;  %v4630_v23 = vcombine.low %v1069_v8, %v1085_v9  ;;  %v1294_v8 = vld [vmem:[%s6114_s4 + $0x768] sm:$0xff] }
 0x21a   : > { %v4981_v39 = vcombine.high %v1420_v28, %v1436_v34  ;;  %v1310_v9 = vld [vmem:[%s6114_s4 + $0x7e8] sm:$0xff] }
 0x21c   : > { %4183 = vmatpush1.bf16.msra.mxu0 %v4722_v42  ;;  %4224 = vmatpush1.bf16.msra.mxu1 %v4724_v43  ;;  %v1452_v42 = vld [vmem:[%s6114_s4 + $0xc58] sm:$0xff] }
 0x21d   : > { %4184 = vmatprep.subr.bf16.mxu0 %v4755_v44  ;;  %4225 = vmatprep.subr.bf16.mxu1 %v4757_v45  ;;  %v1468_v43 = vld [vmem:[%s6114_s4 + $0xcd8] sm:$0xff]  ;;  %v4978_v44 = vcombine.low %v1419_v32, %v1435_v33  ;;  %v4980_v45 = vcombine.low %v1420_v28, %v1436_v34  ;;  %v1150_v32 = vld [vmem:[%s6114_s4 + $0x2e8] sm:$0xff] }
 0x21e   : > { %v5013_v50 = vcombine.high %v1452_v42, %v1468_v43 }
 0x220   : > { %4185 = vmatpush1.bf16.msra.mxu0 %v4754_v52  ;;  %4226 = vmatpush1.bf16.msra.mxu1 %v4756_v53 }
 0x221   : > { %4186 = vmatprep.subr.bf16.mxu0 %v4787_v48  ;;  %4227 = vmatprep.subr.bf16.mxu1 %v4789_v54  ;;  %v1484_v54 = vld [vmem:[%s6114_s4 + $0xd58] sm:$0xff] }
 0x222   : > { %v5044_v7 = vcombine.low %v1484_v54, %v1484_v54 }
 0x224   : > { %4187 = vmatpush1.bf16.msra.mxu0 %v4786_v59  ;;  %4228 = vmatpush1.bf16.msra.mxu1 %v4788_v60  ;;  %v5010_v59 = vcombine.low %v1451_v40, %v1467_v41  ;;  %v5012_v60 = vcombine.low %v1452_v42, %v1468_v43  ;;  %v3737_v17 = vsel %vm3669_vm1, %v5044_v7, 0  ;;  %v1182_v40 = vld [vmem:[%s6114_s4 + $0x3e8] sm:$0xff]  ;;  %v1309_v7 = vld [vmem:[%s6114_s4 + $0x7e0] sm:$0xff] }
 0x225   : > { %4188 = vmatprep.subr.bf16.mxu0 %v4819_v61  ;;  %4229 = vmatprep.subr.bf16.mxu1 %v4821_v62 }
 0x228   : > { %4189 = vmatpush1.bf16.msra.mxu0 %v4818_v3  ;;  %4230 = vmatpush1.bf16.msra.mxu1 %v4820_v4 }
 0x229   : > { %4190 = vmatprep.subr.bf16.mxu0 %v4851_v5  ;;  %4231 = vmatprep.subr.bf16.mxu1 %v4853_v6  ;;  %v5045_v6 = vcombine.high %v1484_v54, %v1484_v54  ;;  %v1229_v54 = vld [vmem:[%s6114_s4 + $0x560] sm:$0xff] }
 0x22c   : > { %4191 = vmatpush1.bf16.msra.mxu0 %v4850_v11  ;;  %4232 = vmatpush1.bf16.msra.mxu1 %v4852_v12  ;;  %v1070_v11 = vld [vmem:[%s6114_s4 + $0x68] sm:$0xff] }
 0x22d   : > { %4192 = vmatprep.subr.bf16.mxu0 %v4883_v13  ;;  %4233 = vmatprep.subr.bf16.mxu1 %v4885_v14  ;;  %v1086_v12 = vld [vmem:[%s6114_s4 + $0xe8] sm:$0xff] }
 0x22e   : > { %v4633_v18 = vcombine.high %v1070_v11, %v1086_v12  ;;  %v4632_v24 = vcombine.low %v1070_v11, %v1086_v12 }
 0x230   : > { %4193 = vmatpush1.bf16.msra.mxu0 %v4882_v19  ;;  %4234 = vmatpush1.bf16.msra.mxu1 %v4884_v20  ;;  %v1101_v19 = vld [vmem:[%s6114_s4 + $0x160] sm:$0xff] }
 0x231   : > { %4194 = vmatprep.subr.bf16.mxu0 %v4915_v21  ;;  %4235 = vmatprep.subr.bf16.mxu1 %v4917_v22  ;;  %v1117_v20 = vld [vmem:[%s6114_s4 + $0x1e0] sm:$0xff]  ;;  %v1102_v21 = vld [vmem:[%s6114_s4 + $0x168] sm:$0xff] }
 0x232   : > { %v1118_v22 = vld [vmem:[%s6114_s4 + $0x1e8] sm:$0xff]  ;;  %v4663_v25 = vcombine.high %v1101_v19, %v1117_v20  ;;  %v4662_v33 = vcombine.low %v1101_v19, %v1117_v20  ;;  %v4856_v19 = vcombine.low %v1294_v8, %v1310_v9 }
 0x233   : > { %v4665_v26 = vcombine.high %v1102_v21, %v1118_v22  ;;  %v4664_v28 = vcombine.low %v1102_v21, %v1118_v22  ;;  %v1357_v22 = vld [vmem:[%s6114_s4 + $0x960] sm:$0xff] }
 0x234   : > { %4195 = vmatpush1.bf16.msra.mxu0 %v4914_v27  ;;  %4236 = vmatpush1.bf16.msra.mxu1 %v4916_v29  ;;  %v1133_v27 = vld [vmem:[%s6114_s4 + $0x260] sm:$0xff] }
 0x235   : > { %4196 = vmatprep.subr.bf16.mxu0 %v4947_v30  ;;  %4237 = vmatprep.subr.bf16.mxu1 %v4949_v31  ;;  %v1149_v29 = vld [vmem:[%s6114_s4 + $0x2e0] sm:$0xff]  ;;  %v1134_v31 = vld [vmem:[%s6114_s4 + $0x268] sm:$0xff] }
 0x236   : > { %v6539_v30 = vld.sshfl [vmem:[%s6707_s0] sm:$0x33 pattern:$0x76325410]  ;;  %v4695_v34 = vcombine.high %v1133_v27, %v1149_v29  ;;  %v4694_v41 = vcombine.low %v1133_v27, %v1149_v29  ;;  %v4696_v42 = vcombine.low %v1134_v31, %v1150_v32 }
 0x238   : > { %4197 = vmatpush1.bf16.msra.mxu0 %v4946_v35  ;;  %4238 = vmatpush1.bf16.msra.mxu1 %v4948_v36  ;;  %v4697_v35 = vcombine.high %v1134_v31, %v1150_v32  ;;  %v1165_v36 = vld [vmem:[%s6114_s4 + $0x360] sm:$0xff] }
 0x239   : > { %4198 = vmatprep.subr.bf16.mxu0 %v4979_v38  ;;  %4239 = vmatprep.subr.bf16.mxu1 %v4981_v39  ;;  %v1181_v38 = vld [vmem:[%s6114_s4 + $0x3e0] sm:$0xff]  ;;  %v1166_v39 = vld [vmem:[%s6114_s4 + $0x368] sm:$0xff] }
 0x23a   : > { %v3882_v47 = vpop.f32.mrb[4].mxu0  ;;  %v3923_v53 = vpop.f32.mrb[4].mxu1  ;;  %v4727_v43 = vcombine.high %v1165_v36, %v1181_v38  ;;  %v4726_v51 = vcombine.low %v1165_v36, %v1181_v38  ;;  %v1389_v32 = vld [vmem:[%s6114_s4 + $0xa60] sm:$0xff] }
 0x23b   : > { %v3883_v52 = vadd.f32 %v3882_v47, %v6434_v37  ;;  %v3884_v48 = vpop.f32.mrb[5].mxu0  ;;  %v3924_v55 = vadd.f32 %v3923_v53, %v6434_v37  ;;  %v3925_v57 = vpop.f32.mrb[5].mxu1  ;;  %v1198_v47 = vld [vmem:[%s6114_s4 + $0x468] sm:$0xff] }
 0x23c   : > { %v3885_v56 = vadd.f32 %v3884_v48, %v6434_v37  ;;  %v3886_v58 = vpop.f32.mrb[6].mxu0  ;;  %4199 = vmatpush1.bf16.msra.mxu0 %v4978_v44  ;;  %v3926_v62 = vadd.f32 %v3925_v57, %v6434_v37  ;;  %v3927_v63 = vpop.f32.mrb[6].mxu1  ;;  %4240 = vmatpush1.bf16.msra.mxu1 %v4980_v45  ;;  %v4729_v44 = vcombine.high %v1166_v39, %v1182_v40  ;;  %v1197_v45 = vld [vmem:[%s6114_s4 + $0x460] sm:$0xff]  ;;  %v1246_v57 = vld [vmem:[%s6114_s4 + $0x5e8] sm:$0xff] }
 0x23d   : > { %v4426_v61 = vmax.f32 %v3883_v52, 0.0  ;;  %v3887_v0 = vpop.f32.mrb[7].mxu0  ;;  %4200 = vmatprep.subr.bf16.mxu0 %v5011_v46  ;;  %v4428_v3 = vmax.f32 %v3924_v55, 0.0  ;;  %v3928_v5 = vpop.f32.mrb[7].mxu1  ;;  %4241 = vmatprep.subr.bf16.mxu1 %v5013_v50  ;;  %v1213_v46 = vld [vmem:[%s6114_s4 + $0x4e0] sm:$0xff]  ;;  %v1214_v50 = vld [vmem:[%s6114_s4 + $0x4e8] sm:$0xff]  ;;  %v4728_v52 = vcombine.low %v1166_v39, %v1182_v40 }
 0x23e   : > { %v4427_v4 = vmax.f32 %v3885_v56, 0.0  ;;  %v4429_v10 = vmax.f32 %v3926_v62, 0.0  ;;  %v4759_v53 = vcombine.high %v1197_v45, %v1213_v46  ;;  %v4761_v48 = vcombine.high %v1198_v47, %v1214_v50  ;;  %v1245_v55 = vld [vmem:[%s6114_s4 + $0x5e0] sm:$0xff]  ;;  %v1230_v56 = vld [vmem:[%s6114_s4 + $0x568] sm:$0xff] }
 0x23f   : > { %v4758_v58 = vcombine.low %v1197_v45, %v1213_v46  ;;  %v1261_v62 = vld [vmem:[%s6114_s4 + $0x660] sm:$0xff]  ;;  %v1262_v0 = vld [vmem:[%s6114_s4 + $0x668] sm:$0xff]  ;;  %v4790_v2 = vcombine.low %v1229_v54, %v1245_v55 }
 0x240   : > { %v4488_v13 = vcombine.low %v4426_v61, %v4427_v4  ;;  %4201 = vmatpush1.bf16.msra.mxu0 %v5010_v59  ;;  %v4489_v14 = vcombine.low %v4428_v3, %v4429_v10  ;;  %4242 = vmatpush1.bf16.msra.mxu1 %v5012_v60  ;;  %v4760_v59 = vcombine.low %v1198_v47, %v1214_v50  ;;  %v1277_v63 = vld [vmem:[%s6114_s4 + $0x6e0] sm:$0xff] }
 0x241   : > { %5074 = vmatprep.subr.msk.bf16.mxu0 %vm3669_vm1, %v5043_v1  ;;  %5076 = vmatprep.subr.msk.bf16.mxu1 %vm3669_vm1, %v5045_v6  ;;  %v4791_v60 = vcombine.high %v1229_v54, %v1245_v55  ;;  %v4793_v61 = vcombine.high %v1230_v56, %v1246_v57  ;;  %v1278_v1 = vld [vmem:[%s6114_s4 + $0x6e8] sm:$0xff]  ;;  %v4792_v3 = vcombine.low %v1230_v56, %v1246_v57  ;;  %v1293_v6 = vld [vmem:[%s6114_s4 + $0x760] sm:$0xff] }
 0x242   : > { %4520 = vst [vmem:[%s6450_s14 + $0x10] sm:$0xff] %v4488_v13  ;;  %4521 = vst [vmem:[%s6450_s14 + $0x18] sm:$0xff] %v4489_v14  ;;  %v4823_v4 = vcombine.high %v1261_v62, %v1277_v63  ;;  %v4825_v5 = vcombine.high %v1262_v0, %v1278_v1  ;;  %v4822_v10 = vcombine.low %v1261_v62, %v1277_v63  ;;  %v1325_v14 = vld [vmem:[%s6114_s4 + $0x860] sm:$0xff]  ;;  %v1486_v62 = vld [vmem:[%s6114_s4 + $0xd68] sm:$0xff] }
 0x243   : > { %v4824_v11 = vcombine.low %v1262_v0, %v1278_v1  ;;  %v4855_v12 = vcombine.high %v1293_v6, %v1309_v7  ;;  %v4857_v13 = vcombine.high %v1294_v8, %v1310_v9  ;;  %v1421_v40 = vld [vmem:[%s6114_s4 + $0xb60] sm:$0xff] }
 0x244   : > { %4203 = vmatpush1.bf16.msra.mxu0 %v3731_v15  ;;  %4244 = vmatpush1.bf16.msra.mxu1 %v3737_v17  ;;  %v1341_v15 = vld [vmem:[%s6114_s4 + $0x8e0] sm:$0xff]  ;;  %v1342_v17 = vld [vmem:[%s6114_s4 + $0x8e8] sm:$0xff] }
 0x245   : > { %4258 = vmatprep.subr.bf16.mxu0 %v4631_v16  ;;  %4299 = vmatprep.subr.bf16.mxu1 %v4633_v18  ;;  %v1326_v16 = vld [vmem:[%s6114_s4 + $0x868] sm:$0xff]  ;;  %v4854_v18 = vcombine.low %v1293_v6, %v1309_v7  ;;  %v4887_v20 = vcombine.high %v1325_v14, %v1341_v15  ;;  %v1453_v50 = vld [vmem:[%s6114_s4 + $0xc60] sm:$0xff] }
 0x246   : > { %v4889_v21 = vcombine.high %v1326_v16, %v1342_v17  ;;  %v4888_v27 = vcombine.low %v1326_v16, %v1342_v17  ;;  %v1071_v16 = vld [vmem:[%s6114_s4 + $0x70] sm:$0xff] }
 0x247   : > { %4209 = vmatmul.mubr.bf16.vlgmr.msra.gmra.mrb[20].mxu0 %v6539_v30  ;;  %4250 = vmatmul.mubr.bf16.vlgmr.msra.gmra.mrb[20].mxu1 %v6539_v30  ;;  %v1087_v17 = vld [vmem:[%s6114_s4 + $0xf0] sm:$0xff] }
 0x248   : > { %4259 = vmatpush1.bf16.msra.mxu0 %v4630_v23  ;;  %4300 = vmatpush1.bf16.msra.mxu1 %v4632_v24  ;;  %v1373_v23 = vld [vmem:[%s6114_s4 + $0x9e0] sm:$0xff]  ;;  %v1358_v24 = vld [vmem:[%s6114_s4 + $0x968] sm:$0xff] }
 0x249   : > { %4260 = vmatprep.subr.bf16.mxu0 %v4663_v25  ;;  %4301 = vmatprep.subr.bf16.mxu1 %v4665_v26  ;;  %v1374_v25 = vld [vmem:[%s6114_s4 + $0x9e8] sm:$0xff]  ;;  %v4886_v26 = vcombine.low %v1325_v14, %v1341_v15  ;;  %v4919_v29 = vcombine.high %v1357_v22, %v1373_v23  ;;  %v5049_v14 = vcombine.high %v1486_v62, %v1486_v62 }
 0x24a   : > { %5079 = vmatprep.mubr.msk.bf16.mxu0 %vm3665_vm0, %v6108_v49  ;;  %5081 = vmatprep.mubr.msk.bf16.mxu1 %vm3665_vm0, %v6108_v49  ;;  %v4921_v31 = vcombine.high %v1358_v24, %v1374_v25  ;;  %v4920_v36 = vcombine.low %v1358_v24, %v1374_v25  ;;  %v5048_v15 = vcombine.low %v1486_v62, %v1486_v62  ;;  %v1247_v62 = vld [vmem:[%s6114_s4 + $0x5f0] sm:$0xff] }
 0x24b   : > { %v4635_v24 = vcombine.high %v1071_v16, %v1087_v17 }
 0x24c   : > { %4261 = vmatpush1.bf16.msra.mxu0 %v4662_v33  ;;  %4302 = vmatpush1.bf16.msra.mxu1 %v4664_v28  ;;  %v1405_v33 = vld [vmem:[%s6114_s4 + $0xae0] sm:$0xff]  ;;  %v1390_v28 = vld [vmem:[%s6114_s4 + $0xa68] sm:$0xff]  ;;  %v3749_v25 = vsel %vm3669_vm1, %v5048_v15, 0  ;;  %v1296_v15 = vld [vmem:[%s6114_s4 + $0x778] sm:$0xff] }
 0x24d   : > { %4262 = vmatprep.subr.bf16.mxu0 %v4695_v34  ;;  %4303 = vmatprep.subr.bf16.mxu1 %v4697_v35  ;;  %v1406_v34 = vld [vmem:[%s6114_s4 + $0xae8] sm:$0xff]  ;;  %v4918_v35 = vcombine.low %v1357_v22, %v1373_v23  ;;  %v4951_v38 = vcombine.high %v1389_v32, %v1405_v33 }
 0x24e   : > { %v4953_v39 = vcombine.high %v1390_v28, %v1406_v34  ;;  %v4952_v45 = vcombine.low %v1390_v28, %v1406_v34 }
 0x250   : > { %4263 = vmatpush1.bf16.msra.mxu0 %v4694_v41  ;;  %4304 = vmatpush1.bf16.msra.mxu1 %v4696_v42  ;;  %v1437_v41 = vld [vmem:[%s6114_s4 + $0xbe0] sm:$0xff]  ;;  %v1422_v42 = vld [vmem:[%s6114_s4 + $0xb68] sm:$0xff] }
 0x251   : > { %4264 = vmatprep.subr.bf16.mxu0 %v4727_v43  ;;  %4305 = vmatprep.subr.bf16.mxu1 %v4729_v44  ;;  %v1438_v43 = vld [vmem:[%s6114_s4 + $0xbe8] sm:$0xff]  ;;  %v4950_v44 = vcombine.low %v1389_v32, %v1405_v33  ;;  %v4983_v46 = vcombine.high %v1421_v40, %v1437_v41  ;;  %v1120_v32 = vld [vmem:[%s6114_s4 + $0x1f8] sm:$0xff]  ;;  %v4634_v33 = vcombine.low %v1071_v16, %v1087_v17 }
 0x252   : > { %v4985_v47 = vcombine.high %v1422_v42, %v1438_v43  ;;  %v4984_v54 = vcombine.low %v1422_v42, %v1438_v43  ;;  %v1312_v16 = vld [vmem:[%s6114_s4 + $0x7f8] sm:$0xff] }
 0x254   : > { %4265 = vmatpush1.bf16.msra.mxu0 %v4726_v51  ;;  %4306 = vmatpush1.bf16.msra.mxu1 %v4728_v52  ;;  %v1469_v51 = vld [vmem:[%s6114_s4 + $0xce0] sm:$0xff]  ;;  %v1454_v52 = vld [vmem:[%s6114_s4 + $0xc68] sm:$0xff] }
 0x255   : > { %4266 = vmatprep.subr.bf16.mxu0 %v4759_v53  ;;  %4307 = vmatprep.subr.bf16.mxu1 %v4761_v48  ;;  %v1470_v53 = vld [vmem:[%s6114_s4 + $0xce8] sm:$0xff]  ;;  %v4982_v48 = vcombine.low %v1421_v40, %v1437_v41  ;;  %v5015_v55 = vcombine.high %v1453_v50, %v1469_v51  ;;  %v1152_v40 = vld [vmem:[%s6114_s4 + $0x2f8] sm:$0xff] }
 0x256   : > { %v5017_v57 = vcombine.high %v1454_v52, %v1470_v53 }
 0x258   : > { %4267 = vmatpush1.bf16.msra.mxu0 %v4758_v58  ;;  %4308 = vmatpush1.bf16.msra.mxu1 %v4760_v59  ;;  %v1485_v58 = vld [vmem:[%s6114_s4 + $0xd60] sm:$0xff] }
 0x259   : > { %4268 = vmatprep.subr.bf16.mxu0 %v4791_v60  ;;  %4309 = vmatprep.subr.bf16.mxu1 %v4793_v61  ;;  %v5047_v9 = vcombine.high %v1485_v58, %v1485_v58 }
 0x25c   : > { %4269 = vmatpush1.bf16.msra.mxu0 %v4790_v2  ;;  %4310 = vmatpush1.bf16.msra.mxu1 %v4792_v3  ;;  %v5014_v3 = vcombine.low %v1453_v50, %v1469_v51  ;;  %v1184_v50 = vld [vmem:[%s6114_s4 + $0x3f8] sm:$0xff] }
 0x25d   : > { %4270 = vmatprep.subr.bf16.mxu0 %v4823_v4  ;;  %4311 = vmatprep.subr.bf16.mxu1 %v4825_v5  ;;  %v5016_v4 = vcombine.low %v1454_v52, %v1470_v53 }
 0x260   : > { %4271 = vmatpush1.bf16.msra.mxu0 %v4822_v10  ;;  %4312 = vmatpush1.bf16.msra.mxu1 %v4824_v11  ;;  %v5046_v10 = vcombine.low %v1485_v58, %v1485_v58 }
 0x261   : > { %4272 = vmatprep.subr.bf16.mxu0 %v4855_v12  ;;  %4313 = vmatprep.subr.bf16.mxu1 %v4857_v13 }
 0x262   : > { %v3743_v23 = vsel %vm3669_vm1, %v5046_v10, 0 }
 0x264   : > { %4273 = vmatpush1.bf16.msra.mxu0 %v4854_v18  ;;  %4314 = vmatpush1.bf16.msra.mxu1 %v4856_v19  ;;  %v1072_v19 = vld [vmem:[%s6114_s4 + $0x78] sm:$0xff] }
 0x265   : > { %4274 = vmatprep.subr.bf16.mxu0 %v4887_v20  ;;  %4315 = vmatprep.subr.bf16.mxu1 %v4889_v21  ;;  %v1088_v20 = vld [vmem:[%s6114_s4 + $0xf8] sm:$0xff] }
 0x266   : > { %v4636_v28 = vcombine.low %v1072_v19, %v1088_v20 }
 0x268   : > { %4275 = vmatpush1.bf16.msra.mxu0 %v4886_v26  ;;  %4316 = vmatpush1.bf16.msra.mxu1 %v4888_v27  ;;  %v4637_v26 = vcombine.high %v1072_v19, %v1088_v20  ;;  %v1103_v27 = vld [vmem:[%s6114_s4 + $0x170] sm:$0xff]  ;;  %v4861_v20 = vcombine.high %v1296_v15, %v1312_v16 }
 0x269   : > { %4276 = vmatprep.subr.bf16.mxu0 %v4919_v29  ;;  %4317 = vmatprep.subr.bf16.mxu1 %v4921_v31  ;;  %v1119_v29 = vld [vmem:[%s6114_s4 + $0x1f0] sm:$0xff]  ;;  %v1104_v31 = vld [vmem:[%s6114_s4 + $0x178] sm:$0xff] }
 0x26a   : > { %v4667_v34 = vcombine.high %v1103_v27, %v1119_v29  ;;  %v4666_v41 = vcombine.low %v1103_v27, %v1119_v29  ;;  %v4668_v42 = vcombine.low %v1104_v31, %v1120_v32 }
 0x26c   : > { %4277 = vmatpush1.bf16.msra.mxu0 %v4918_v35  ;;  %4318 = vmatpush1.bf16.msra.mxu1 %v4920_v36  ;;  %v4669_v35 = vcombine.high %v1104_v31, %v1120_v32  ;;  %v1135_v36 = vld [vmem:[%s6114_s4 + $0x270] sm:$0xff] }
 0x26d   : > { %4278 = vmatprep.subr.bf16.mxu0 %v4951_v38  ;;  %4319 = vmatprep.subr.bf16.mxu1 %v4953_v39  ;;  %v1151_v38 = vld [vmem:[%s6114_s4 + $0x2f0] sm:$0xff]  ;;  %v1136_v39 = vld [vmem:[%s6114_s4 + $0x278] sm:$0xff] }
 0x26e   : > { %v4699_v43 = vcombine.high %v1135_v36, %v1151_v38  ;;  %v4698_v51 = vcombine.low %v1135_v36, %v1151_v38  ;;  %v4700_v52 = vcombine.low %v1136_v39, %v1152_v40  ;;  %v1359_v31 = vld [vmem:[%s6114_s4 + $0x970] sm:$0xff] }
 0x26f   : > { %v1375_v32 = vld [vmem:[%s6114_s4 + $0x9f0] sm:$0xff] }
 0x270   : > { %4279 = vmatpush1.bf16.msra.mxu0 %v4950_v44  ;;  %4320 = vmatpush1.bf16.msra.mxu1 %v4952_v45  ;;  %v4701_v44 = vcombine.high %v1136_v39, %v1152_v40  ;;  %v1167_v45 = vld [vmem:[%s6114_s4 + $0x370] sm:$0xff]  ;;  %v4923_v36 = vcombine.high %v1359_v31, %v1375_v32 }
 0x271   : > { %4280 = vmatprep.subr.bf16.mxu0 %v4983_v46  ;;  %4321 = vmatprep.subr.bf16.mxu1 %v4985_v47  ;;  %v1183_v46 = vld [vmem:[%s6114_s4 + $0x3f0] sm:$0xff]  ;;  %v1168_v47 = vld [vmem:[%s6114_s4 + $0x378] sm:$0xff] }
 0x272   : > { %v3964_v56 = vpop.f32.mrb[8].mxu0  ;;  %v4005_v60 = vpop.f32.mrb[8].mxu1  ;;  %v4731_v53 = vcombine.high %v1167_v45, %v1183_v46  ;;  %v4730_v58 = vcombine.low %v1167_v45, %v1183_v46  ;;  %v1391_v39 = vld [vmem:[%s6114_s4 + $0xa70] sm:$0xff] }
 0x273   : > { %v3965_v59 = vadd.f32 %v3964_v56, %v6434_v37  ;;  %v3966_v61 = vpop.f32.mrb[9].mxu0  ;;  %v4006_v63 = vadd.f32 %v4005_v60, %v6434_v37  ;;  %v4007_v1 = vpop.f32.mrb[9].mxu1  ;;  %v1200_v56 = vld [vmem:[%s6114_s4 + $0x478] sm:$0xff]  ;;  %v1407_v40 = vld [vmem:[%s6114_s4 + $0xaf0] sm:$0xff] }
 0x274   : > { %v3967_v0 = vadd.f32 %v3966_v61, %v6434_v37  ;;  %v3968_v2 = vpop.f32.mrb[10].mxu0  ;;  %4281 = vmatpush1.bf16.msra.mxu0 %v4982_v48  ;;  %v4008_v6 = vadd.f32 %v4007_v1, %v6434_v37  ;;  %v4009_v7 = vpop.f32.mrb[10].mxu1  ;;  %4322 = vmatpush1.bf16.msra.mxu1 %v4984_v54  ;;  %v4733_v48 = vcombine.high %v1168_v47, %v1184_v50  ;;  %v1199_v54 = vld [vmem:[%s6114_s4 + $0x470] sm:$0xff] }
 0x275   : > { %v4430_v5 = vmax.f32 %v3965_v59, 0.0  ;;  %v3969_v8 = vpop.f32.mrb[11].mxu0  ;;  %4282 = vmatprep.subr.bf16.mxu0 %v5015_v55  ;;  %v4432_v11 = vmax.f32 %v4006_v63, 0.0  ;;  %v4010_v13 = vpop.f32.mrb[11].mxu1  ;;  %4323 = vmatprep.subr.bf16.mxu1 %v5017_v57  ;;  %v1215_v55 = vld [vmem:[%s6114_s4 + $0x4f0] sm:$0xff]  ;;  %v1216_v57 = vld [vmem:[%s6114_s4 + $0x4f8] sm:$0xff]  ;;  %v4955_v45 = vcombine.high %v1391_v39, %v1407_v40 }
 0x276   : > { %v4431_v12 = vmax.f32 %v3967_v0, 0.0  ;;  %v4433_v18 = vmax.f32 %v4008_v6, 0.0  ;;  %v4763_v59 = vcombine.high %v1199_v54, %v1215_v55  ;;  %v4765_v60 = vcombine.high %v1200_v56, %v1216_v57  ;;  %v1231_v61 = vld [vmem:[%s6114_s4 + $0x570] sm:$0xff]  ;;  %v1232_v63 = vld [vmem:[%s6114_s4 + $0x578] sm:$0xff] }
 0x277   : > { %v1248_v0 = vld [vmem:[%s6114_s4 + $0x5f8] sm:$0xff]  ;;  %v4762_v1 = vcombine.low %v1199_v54, %v1215_v55  ;;  %v4764_v2 = vcombine.low %v1200_v56, %v1216_v57  ;;  %v1279_v6 = vld [vmem:[%s6114_s4 + $0x6f0] sm:$0xff] }
 0x278   : > { %v4490_v21 = vcombine.low %v4430_v5, %v4431_v12  ;;  %4283 = vmatpush1.bf16.msra.mxu0 %v5014_v3  ;;  %v4491_v22 = vcombine.low %v4432_v11, %v4433_v18  ;;  %4324 = vmatpush1.bf16.msra.mxu1 %v5016_v4  ;;  %v4795_v3 = vcombine.high %v1231_v61, %v1247_v62  ;;  %v1263_v5 = vld [vmem:[%s6114_s4 + $0x670] sm:$0xff]  ;;  %v1264_v7 = vld [vmem:[%s6114_s4 + $0x678] sm:$0xff] }
 0x279   : > { %5078 = vmatprep.subr.msk.bf16.mxu0 %vm3669_vm1, %v5047_v9  ;;  %5080 = vmatprep.subr.msk.bf16.mxu1 %vm3669_vm1, %v5049_v14  ;;  %v4797_v4 = vcombine.high %v1232_v63, %v1248_v0  ;;  %v1280_v8 = vld [vmem:[%s6114_s4 + $0x6f8] sm:$0xff]  ;;  %v4794_v9 = vcombine.low %v1231_v61, %v1247_v62  ;;  %v4796_v10 = vcombine.low %v1232_v63, %v1248_v0  ;;  %v1295_v13 = vld [vmem:[%s6114_s4 + $0x770] sm:$0xff] }
 0x27a   : > { %4522 = vst [vmem:[%s6450_s14 + $0x20] sm:$0xff] %v4490_v21  ;;  %4523 = vst [vmem:[%s6450_s14 + $0x28] sm:$0xff] %v4491_v22  ;;  %v4827_v11 = vcombine.high %v1263_v5, %v1279_v6  ;;  %v4829_v12 = vcombine.high %v1264_v7, %v1280_v8  ;;  %v1311_v14 = vld [vmem:[%s6114_s4 + $0x7f0] sm:$0xff]  ;;  %v4826_v17 = vcombine.low %v1263_v5, %v1279_v6 }
 0x27b   : > { %v4828_v18 = vcombine.low %v1264_v7, %v1280_v8  ;;  %v4859_v19 = vcombine.high %v1295_v13, %v1311_v14  ;;  %v1327_v21 = vld [vmem:[%s6114_s4 + $0x870] sm:$0xff] }
 0x27c   : > { %4285 = vmatpush1.bf16.msra.mxu0 %v3743_v23  ;;  %4326 = vmatpush1.bf16.msra.mxu1 %v3749_v25  ;;  %v1343_v22 = vld [vmem:[%s6114_s4 + $0x8f0] sm:$0xff]  ;;  %v1328_v23 = vld [vmem:[%s6114_s4 + $0x878] sm:$0xff]  ;;  %v4858_v25 = vcombine.low %v1295_v13, %v1311_v14 }
 0x27d   : > { %4340 = vmatprep.subr.bf16.mxu0 %v4635_v24  ;;  %4381 = vmatprep.subr.bf16.mxu1 %v4637_v26  ;;  %v1344_v24 = vld [vmem:[%s6114_s4 + $0x8f8] sm:$0xff]  ;;  %v4860_v26 = vcombine.low %v1296_v15, %v1312_v16  ;;  %v4891_v27 = vcombine.high %v1327_v21, %v1343_v22  ;;  %v1455_v56 = vld [vmem:[%s6114_s4 + $0xc70] sm:$0xff] }
 0x27e   : > { %v4893_v29 = vcombine.high %v1328_v23, %v1344_v24  ;;  %v1471_v57 = vld [vmem:[%s6114_s4 + $0xcf0] sm:$0xff] }
 0x27f   : > { %4291 = vmatmul.mubr.bf16.vlgmr.msra.gmra.mrb[24].mxu0 %v6539_v30  ;;  %4332 = vmatmul.mubr.bf16.vlgmr.msra.gmra.mrb[24].mxu1 %v6539_v30  ;;  %v5019_v61 = vcombine.high %v1455_v56, %v1471_v57  ;;  %v1487_v0 = vld [vmem:[%s6114_s4 + $0xd70] sm:$0xff] }
 0x280   : > { %4341 = vmatpush1.bf16.msra.mxu0 %v4634_v33  ;;  %4382 = vmatpush1.bf16.msra.mxu1 %v4636_v28  ;;  %v1360_v33 = vld [vmem:[%s6114_s4 + $0x978] sm:$0xff]  ;;  %v5051_v15 = vcombine.high %v1487_v0, %v1487_v0  ;;  %v5050_v16 = vcombine.low %v1487_v0, %v1487_v0 }
 0x281   : > { %4342 = vmatprep.subr.bf16.mxu0 %v4667_v34  ;;  %4383 = vmatprep.subr.bf16.mxu1 %v4669_v35  ;;  %v1376_v28 = vld [vmem:[%s6114_s4 + $0x9f8] sm:$0xff]  ;;  %v4890_v34 = vcombine.low %v1327_v21, %v1343_v22  ;;  %v4892_v35 = vcombine.low %v1328_v23, %v1344_v24 }
 0x282   : > { %5083 = vmatprep.mubr.msk.bf16.mxu0 %vm3665_vm0, %v6108_v49  ;;  %5085 = vmatprep.mubr.msk.bf16.mxu1 %vm3665_vm0, %v6108_v49  ;;  %v4732_v49 = vcombine.low %v1168_v47, %v1184_v50  ;;  %v4925_v38 = vcombine.high %v1360_v33, %v1376_v28  ;;  %v1423_v47 = vld [vmem:[%s6114_s4 + $0xb70] sm:$0xff] }
 0x283   : > { %v1439_v50 = vld [vmem:[%s6114_s4 + $0xbf0] sm:$0xff] }
 0x284   : > { %4343 = vmatpush1.bf16.msra.mxu0 %v4666_v41  ;;  %4384 = vmatpush1.bf16.msra.mxu1 %v4668_v42  ;;  %v1392_v41 = vld [vmem:[%s6114_s4 + $0xa78] sm:$0xff]  ;;  %v4987_v54 = vcombine.high %v1423_v47, %v1439_v50 }
 0x285   : > { %4344 = vmatprep.subr.bf16.mxu0 %v4699_v43  ;;  %4385 = vmatprep.subr.bf16.mxu1 %v4701_v44  ;;  %v1408_v42 = vld [vmem:[%s6114_s4 + $0xaf8] sm:$0xff]  ;;  %v4922_v43 = vcombine.low %v1359_v31, %v1375_v32  ;;  %v4924_v44 = vcombine.low %v1360_v33, %v1376_v28 }
 0x286   : > { %v4957_v46 = vcombine.high %v1392_v41, %v1408_v42 }
 0x288   : > { %4345 = vmatpush1.bf16.msra.mxu0 %v4698_v51  ;;  %4386 = vmatpush1.bf16.msra.mxu1 %v4700_v52  ;;  %v1424_v51 = vld [vmem:[%s6114_s4 + $0xb78] sm:$0xff] }
 0x289   : > { %4346 = vmatprep.subr.bf16.mxu0 %v4731_v53  ;;  %4387 = vmatprep.subr.bf16.mxu1 %v4733_v48  ;;  %v1440_v52 = vld [vmem:[%s6114_s4 + $0xbf8] sm:$0xff]  ;;  %v4954_v53 = vcombine.low %v1391_v39, %v1407_v40  ;;  %v4956_v48 = vcombine.low %v1392_v41, %v1408_v42 }
 0x28a   : > { %v4989_v55 = vcombine.high %v1424_v51, %v1440_v52 }
 0x28c   : > { %4347 = vmatpush1.bf16.msra.mxu0 %v4730_v58  ;;  %4388 = vmatpush1.bf16.msra.mxu1 %v4732_v49  ;;  %v1456_v58 = vld [vmem:[%s6114_s4 + $0xc78] sm:$0xff] }
 0x28d   : > { %4348 = vmatprep.subr.bf16.mxu0 %v4763_v59  ;;  %4389 = vmatprep.subr.bf16.mxu1 %v4765_v60  ;;  %v1472_v49 = vld [vmem:[%s6114_s4 + $0xcf8] sm:$0xff]  ;;  %v4986_v59 = vcombine.low %v1423_v47, %v1439_v50  ;;  %v4988_v60 = vcombine.low %v1424_v51, %v1440_v52 }
 0x28e   : > { %v5021_v63 = vcombine.high %v1456_v58, %v1472_v49 }
 0x290   : > { %4349 = vmatpush1.bf16.msra.mxu0 %v4762_v1  ;;  %4390 = vmatpush1.bf16.msra.mxu1 %v4764_v2 }
 0x291   : > { %4350 = vmatprep.subr.bf16.mxu0 %v4795_v3  ;;  %4391 = vmatprep.subr.bf16.mxu1 %v4797_v4  ;;  %v1488_v4 = vld [vmem:[%s6114_s4 + $0xd78] sm:$0xff] }
 0x292   : > { %v5052_v21 = vcombine.low %v1488_v4, %v1488_v4 }
 0x294   : > { %4351 = vmatpush1.bf16.msra.mxu0 %v4794_v9  ;;  %4392 = vmatpush1.bf16.msra.mxu1 %v4796_v10  ;;  %v5018_v9 = vcombine.low %v1455_v56, %v1471_v57  ;;  %v5020_v10 = vcombine.low %v1456_v58, %v1472_v49 }
 0x295   : > { %4352 = vmatprep.subr.bf16.mxu0 %v4827_v11  ;;  %4393 = vmatprep.subr.bf16.mxu1 %v4829_v12 }
 0x298   : > { %4353 = vmatpush1.bf16.msra.mxu0 %v4826_v17  ;;  %4394 = vmatpush1.bf16.msra.mxu1 %v4828_v18 }
 0x299   : > { %4354 = vmatprep.subr.bf16.mxu0 %v4859_v19  ;;  %4395 = vmatprep.subr.bf16.mxu1 %v4861_v20  ;;  %v5053_v20 = vcombine.high %v1488_v4, %v1488_v4 }
 0x29c   : > { %4355 = vmatpush1.bf16.msra.mxu0 %v4858_v25  ;;  %4396 = vmatpush1.bf16.msra.mxu1 %v4860_v26  ;;  %v3755_v25 = vsel %vm3669_vm1, %v5050_v16, 0  ;;  %v3761_v26 = vsel %vm3669_vm1, %v5052_v21, 0 }
 0x29d   : > { %4356 = vmatprep.subr.bf16.mxu0 %v4891_v27  ;;  %4397 = vmatprep.subr.bf16.mxu1 %v4893_v29 }
 0x2a0   : > { %4357 = vmatpush1.bf16.msra.mxu0 %v4890_v34  ;;  %4398 = vmatpush1.bf16.msra.mxu1 %v4892_v35 }
 0x2a1   : > { %4358 = vmatprep.subr.bf16.mxu0 %v4923_v36  ;;  %4399 = vmatprep.subr.bf16.mxu1 %v4925_v38 }
 0x2a4   : > { %4359 = vmatpush1.bf16.msra.mxu0 %v4922_v43  ;;  %4400 = vmatpush1.bf16.msra.mxu1 %v4924_v44 }
 0x2a5   : > { %4360 = vmatprep.subr.bf16.mxu0 %v4955_v45  ;;  %4401 = vmatprep.subr.bf16.mxu1 %v4957_v46 }
 0x2a8   : > { %4361 = vmatpush1.bf16.msra.mxu0 %v4954_v53  ;;  %4402 = vmatpush1.bf16.msra.mxu1 %v4956_v48 }
 0x2a9   : > { %4362 = vmatprep.subr.bf16.mxu0 %v4987_v54  ;;  %4403 = vmatprep.subr.bf16.mxu1 %v4989_v55 }
 0x2aa   : > { %v4046_v62 = vpop.f32.mrb[12].mxu0  ;;  %v4087_v2 = vpop.f32.mrb[12].mxu1 }
 0x2ab   : > { %v4047_v1 = vadd.f32 %v4046_v62, %v6434_v37  ;;  %v4048_v3 = vpop.f32.mrb[13].mxu0  ;;  %v4088_v5 = vadd.f32 %v4087_v2, %v6434_v37  ;;  %v4089_v7 = vpop.f32.mrb[13].mxu1 }
 0x2ac   : > { %v4049_v6 = vadd.f32 %v4048_v3, %v6434_v37  ;;  %v4050_v8 = vpop.f32.mrb[14].mxu0  ;;  %4363 = vmatpush1.bf16.msra.mxu0 %v4986_v59  ;;  %v4090_v12 = vadd.f32 %v4089_v7, %v6434_v37  ;;  %v4091_v13 = vpop.f32.mrb[14].mxu1  ;;  %4404 = vmatpush1.bf16.msra.mxu1 %v4988_v60 }
 0x2ad   : > { %v4434_v11 = vmax.f32 %v4047_v1, 0.0  ;;  %v4051_v14 = vpop.f32.mrb[15].mxu0  ;;  %4364 = vmatprep.subr.bf16.mxu0 %v5019_v61  ;;  %v4436_v17 = vmax.f32 %v4088_v5, 0.0  ;;  %v4092_v19 = vpop.f32.mrb[15].mxu1  ;;  %4405 = vmatprep.subr.bf16.mxu1 %v5021_v63 }
 0x2ae   : > { %v4435_v18 = vmax.f32 %v4049_v6, 0.0  ;;  %v4437_v22 = vmax.f32 %v4090_v12, 0.0 }
 0x2b0   : > { %v4492_v23 = vcombine.low %v4434_v11, %v4435_v18  ;;  %4365 = vmatpush1.bf16.msra.mxu0 %v5018_v9  ;;  %v4493_v24 = vcombine.low %v4436_v17, %v4437_v22  ;;  %4406 = vmatpush1.bf16.msra.mxu1 %v5020_v10 }
 0x2b1   : > { %5082 = vmatprep.subr.msk.bf16.mxu0 %vm3669_vm1, %v5051_v15  ;;  %5084 = vmatprep.subr.msk.bf16.mxu1 %vm3669_vm1, %v5053_v20 }
 0x2b2   : > { %4524 = vst [vmem:[%s6450_s14 + $0x30] sm:$0xff] %v4492_v23  ;;  %4525 = vst [vmem:[%s6450_s14 + $0x38] sm:$0xff] %v4493_v24 }
 0x2b4   : > { %4367 = vmatpush1.bf16.msra.mxu0 %v3755_v25  ;;  %4408 = vmatpush1.bf16.msra.mxu1 %v3761_v26 }
 0x2b7   : > { %4373 = vmatmul.mubr.bf16.vlgmr.msra.gmra.mrb[28].mxu0 %v6539_v30  ;;  %4414 = vmatmul.mubr.bf16.vlgmr.msra.gmra.mrb[28].mxu1 %v6539_v30 }
 0x2e2   : > { %v4128_v27 = vpop.f32.mrb[16].mxu0  ;;  %v4169_v31 = vpop.f32.mrb[16].mxu1 }
 0x2e3   : > { %v4129_v29 = vadd.f32 %v4128_v27, %v6434_v37  ;;  %v4130_v32 = vpop.f32.mrb[17].mxu0  ;;  %v4170_v33 = vadd.f32 %v4169_v31, %v6434_v37  ;;  %v4171_v34 = vpop.f32.mrb[17].mxu1 }
 0x2e4   : > { %v4131_v28 = vadd.f32 %v4130_v32, %v6434_v37  ;;  %v4132_v35 = vpop.f32.mrb[18].mxu0  ;;  %v4172_v38 = vadd.f32 %v4171_v34, %v6434_v37  ;;  %v4173_v39 = vpop.f32.mrb[18].mxu1 }
 0x2e5   : > { %v4438_v36 = vmax.f32 %v4129_v29, 0.0  ;;  %v4133_v40 = vpop.f32.mrb[19].mxu0  ;;  %v4440_v41 = vmax.f32 %v4170_v33, 0.0  ;;  %v4174_v42 = vpop.f32.mrb[19].mxu1 }
 0x2e6   : > { %v4439_v30 = vmax.f32 %v4131_v28, 0.0  ;;  %v4441_v43 = vmax.f32 %v4172_v38, 0.0 }
 0x2e8   : > { %v4494_v44 = vcombine.low %v4438_v36, %v4439_v30  ;;  %v4495_v45 = vcombine.low %v4440_v41, %v4441_v43 }
 0x2ea   : > { %4526 = vst [vmem:[%s6450_s14 + $0x40] sm:$0xff] %v4494_v44  ;;  %4527 = vst [vmem:[%s6450_s14 + $0x48] sm:$0xff] %v4495_v45 }
 0x31a   : > { %v4210_v46 = vpop.f32.mrb[20].mxu0  ;;  %v4251_v50 = vpop.f32.mrb[20].mxu1 }
 0x31b   : > { %v4211_v47 = vadd.f32 %v4210_v46, %v6434_v37  ;;  %v4212_v51 = vpop.f32.mrb[21].mxu0  ;;  %v4252_v52 = vadd.f32 %v4251_v50, %v6434_v37  ;;  %v4253_v48 = vpop.f32.mrb[21].mxu1 }
 0x31c   : > { %v4213_v53 = vadd.f32 %v4212_v51, %v6434_v37  ;;  %v4214_v54 = vpop.f32.mrb[22].mxu0  ;;  %v4254_v56 = vadd.f32 %v4253_v48, %v6434_v37  ;;  %v4255_v57 = vpop.f32.mrb[22].mxu1 }
 0x31d   : > { %v4442_v55 = vmax.f32 %v4211_v47, 0.0  ;;  %v4215_v58 = vpop.f32.mrb[23].mxu0  ;;  %v4444_v49 = vmax.f32 %v4252_v52, 0.0  ;;  %v4256_v60 = vpop.f32.mrb[23].mxu1 }
 0x31e   : > { %v4443_v59 = vmax.f32 %v4213_v53, 0.0  ;;  %v4445_v61 = vmax.f32 %v4254_v56, 0.0 }
 0x320   : > { %v4496_v62 = vcombine.low %v4442_v55, %v4443_v59  ;;  %v4497_v63 = vcombine.low %v4444_v49, %v4445_v61 }
 0x322   : > { %4528 = vst [vmem:[%s6450_s14 + $0x50] sm:$0xff] %v4496_v62  ;;  %4529 = vst [vmem:[%s6450_s14 + $0x58] sm:$0xff] %v4497_v63 }
 0x352   : > { %v4292_v0 = vpop.f32.mrb[24].mxu0  ;;  %v4333_v2 = vpop.f32.mrb[24].mxu1 }
 0x353   : > { %v4293_v1 = vadd.f32 %v4292_v0, %v6434_v37  ;;  %v4294_v3 = vpop.f32.mrb[25].mxu0  ;;  %v4334_v4 = vadd.f32 %v4333_v2, %v6434_v37  ;;  %v4335_v6 = vpop.f32.mrb[25].mxu1 }
 0x354   : > { %v4295_v5 = vadd.f32 %v4294_v3, %v6434_v37  ;;  %v4296_v7 = vpop.f32.mrb[26].mxu0  ;;  %v4336_v9 = vadd.f32 %v4335_v6, %v6434_v37  ;;  %v4337_v10 = vpop.f32.mrb[26].mxu1 }
 0x355   : > { %v4446_v8 = vmax.f32 %v4293_v1, 0.0  ;;  %v4297_v11 = vpop.f32.mrb[27].mxu0  ;;  %v4448_v12 = vmax.f32 %v4334_v4, 0.0  ;;  %v4338_v14 = vpop.f32.mrb[27].mxu1 }
 0x356   : > { %v4447_v13 = vmax.f32 %v4295_v5, 0.0  ;;  %v4449_v15 = vmax.f32 %v4336_v9, 0.0 }
 0x358   : > { %v4498_v16 = vcombine.low %v4446_v8, %v4447_v13  ;;  %v4499_v17 = vcombine.low %v4448_v12, %v4449_v15 }
 0x35a   : > { %4530 = vst [vmem:[%s6450_s14 + $0x60] sm:$0xff] %v4498_v16  ;;  %4531 = vst [vmem:[%s6450_s14 + $0x68] sm:$0xff] %v4499_v17 }
 0x38a   : > { %v4374_v18 = vpop.f32.mrb[28].mxu0  ;;  %v4415_v20 = vpop.f32.mrb[28].mxu1 }
 0x38b   : > { %v4375_v19 = vadd.f32 %v4374_v18, %v6434_v37  ;;  %v4376_v21 = vpop.f32.mrb[29].mxu0  ;;  %v4416_v22 = vadd.f32 %v4415_v20, %v6434_v37  ;;  %v4417_v24 = vpop.f32.mrb[29].mxu1 }
 0x38c   : > { %v4377_v23 = vadd.f32 %v4376_v21, %v6434_v37  ;;  %v4378_v25 = vpop.f32.mrb[30].mxu0  ;;  %v4418_v27 = vadd.f32 %v4417_v24, %v6434_v37  ;;  %v4419_v29 = vpop.f32.mrb[30].mxu1 }
 0x38d   : > { %v4450_v26 = vmax.f32 %v4375_v19, 0.0  ;;  %v4379_v31 = vpop.f32.mrb[31].mxu0  ;;  %v4452_v32 = vmax.f32 %v4416_v22, 0.0  ;;  %v4420_v28 = vpop.f32.mrb[31].mxu1 }
 0x38e   : > { %v4451_v33 = vmax.f32 %v4377_v23, 0.0  ;;  %v4453_v34 = vmax.f32 %v4418_v27, 0.0 }
 0x390   : > { %v4500_v35 = vcombine.low %v4450_v26, %v4451_v33  ;;  %v4501_v36 = vcombine.low %v4452_v32, %v4453_v34 }
 0x392   : > { %4532 = vst [vmem:[%s6450_s14 + $0x70] sm:$0xff] %v4500_v35  ;;  %4533 = vst [vmem:[%s6450_s14 + $0x78] sm:$0xff] %v4501_v36 }
 0x393 PF: > { %p10_p9 = scmp.ge.s32.totalorder %s5213_s16, 4   ;;  %s6711_s12 = smov %s5169_s13 }
 0x394   : > { %s6712_s13 = smov %s5222_s19  ;;  %s6713_s14 = smov %s5213_s16 }
 0x395   :  { %12 = sbr.rel (!%p10_p9) target bundleno = 2 (0x2), region = 90 }

// kernel: unet_forward.17
= control target key start
LH: loop header
LB: loop body
LE: loop exit
PB: predicated region body
PF: predicated region fallthrough
CT: control target
= control target key end

     0   :  { %s1360_s12 = smov 0   ;;  %s1554_s0 = inlined_call_operand.vmem [shape: bf16[3,2], index: 0, kind: input, shape index: {}]   ;;  %s1555_s1 = inlined_call_operand.vmem [shape: bf16[2,8192], index: 1, kind: input, shape index: {}]   ;;  %s1556_s2 = inlined_call_operand.vmem [shape: f32[3,1], index: 2, kind: input, shape index: {}]   ;;  %s1557_s3 = inlined_call_operand.vmem [shape: f32[3,8192], index: 3, kind: output, shape index: {}]  }
   0x1 LB: > { %s1273_s13 = sadd.s32 4294967295, %s1336_s12   ;;  %p1277_p0 = scmp.ge.s32.totalorder %s1336_s12, 1  ;;  %s1336_s12 = sphi %s1360_s12, %s13_s12  }
   0x2   : > { %p137_p1 = scmp.lt.s32.totalorder %s1336_s12, 3 }
   0x4   : > { %p138_p2 = pnand %p1277_p0, %p137_p1 }
   0x5   : > { %s1278_s14 = sshll.u32 (!%p138_p2), %s1273_s13, 5  ;;  %v191_v0 = vlaneseq (!%p138_p2)  ;;  %v1338_v1 = vmov (!%p138_p2), 1966171168   ;;  %v1339_v3 = vmov (!%p138_p2), 0   ;;  %v177_v4 = vld [vmem:[%s1556_s2] sm:$0x7] (!%p138_p2) }
   0x6   : > { %141 = sbr.rel (%p138_p2) target bundleno = 302 (0x12e), region = 32  ;;  %p161_p3 = scmp.lt.s32.totalorder (!%p138_p2), %s1278_s14, 63  ;;  %v189_v2 = vunpack.c.l.s4 (!%p138_p2), %v1338_v1  ;;  %516 = vmatprep.mubr.bf16.mxu0 (!%p138_p2), %v1339_v3  ;;  %557 = vmatprep.mubr.bf16.mxu1 (!%p138_p2), %v1339_v3  ;;  %vm387_vm0 = vcmask (!%p138_p2), 1040384   ;;  %v1401_v28 = vld [vmem:[%s1554_s0] sm:$0x3] (!%p138_p2)  ;;  %vm383_vm1 = vcmask (!%p138_p2), 15360  }
   0x7   : > { %v192_v5 = vshrl.u32 (!%p138_p2), %v191_v0, 7  ;;  %1325 = vset.pattern.permute.xlu0 (!%p138_p2), %v1339_v3 }
   0x8   : > { %v190_v6 = vunpack.c.0.s8 (!%p138_p2), %v189_v2  ;;  %180 = vperm.xlu0 (!%p138_p2), %1325, %v177_v4  }
   0xa   : > { %v1382_v7 = vsub.s32 (!%p138_p2), %v190_v6, %v192_v5 }
   0xd   : > { %s1559_s14 = smov (!%p161_p3, %s1278_s14), 63 }
   0xe   : > { %s1380_s19 = scalar_lea.vmem %s1555_s1, %s1559_s14  ;;  %s1280_s22 = sshll.u32 %s1559_s14, 2 }
   0xf   : > { %v173_v8 = vld [vmem:[%s1380_s19] sm:$0xff]  ;;  %v174_v9 = vld [vmem:[%s1380_s19 + $0x8] sm:$0xff]  ;;  %v175_v36 = vld [vmem:[%s1380_s19 + $0x10] sm:$0xff]  ;;  %s1503_s25 = scalar_lea.vmem %s1557_s3, %s1280_s22 }
  0x10   : > { %v187_v10 = vcombine.high %v173_v8, %v173_v8  ;;  %v194_v11 = vrot.slane %v173_v8, %v1382_v7  ;;  %v243_v12 = vrot.slane %v174_v9, %v1382_v7  ;;  %v236_v13 = vcombine.high %v174_v9, %v174_v9  ;;  %v176_v54 = vld [vmem:[%s1380_s19 + $0x18] sm:$0xff] }
  0x11   : > { %v292_v39 = vrot.slane %v175_v36, %v1382_v7  ;;  %v285_v41 = vcombine.high %v175_v36, %v175_v36  ;;  %v341_v57 = vrot.slane %v176_v54, %v1382_v7  ;;  %v334_v59 = vcombine.high %v176_v54, %v176_v54 }
  0x12   : > { %v201_v14 = vrot.slane %v187_v10, %v1382_v7  ;;  %v202_v15 = vcombine.high %v194_v11, %v194_v11  ;;  %v210_v16 = vrot.slane %v194_v11, %v1382_v7  ;;  %v251_v17 = vcombine.high %v243_v12, %v243_v12 }
  0x13   : > { %v250_v23 = vrot.slane %v236_v13, %v1382_v7  ;;  %v259_v34 = vrot.slane %v243_v12, %v1382_v7  ;;  %v300_v45 = vcombine.high %v292_v39, %v292_v39  ;;  %v299_v48 = vrot.slane %v285_v41, %v1382_v7 }
  0x14   : > { %v224_v18 = vrot.slane %v202_v15, %v1382_v7  ;;  %v389_v19 = vsel %vm387_vm0, %v210_v16, 0  ;;  %v232_v20 = vcombine.high %v210_v16, %v210_v16  ;;  %v203_v21 = vcombine.high %v201_v14, %v201_v14 }
  0x15   : > { %v217_v22 = vrot.slane %v201_v14, %v1382_v7  ;;  %v273_v27 = vrot.slane %v251_v17, %v1382_v7  ;;  %v252_v35 = vcombine.high %v250_v23, %v250_v23  ;;  %v281_v37 = vcombine.high %v259_v34, %v259_v34 }
  0x16   : > { %1281 = vmatprep.subr.msk.bf16.mxu0 %vm387_vm0, %v224_v18  ;;  %v234_v24 = vcombine.high %v224_v18, %v224_v18  ;;  %v395_v25 = vsel %vm387_vm0, %v232_v20, 0  ;;  %v231_v26 = vrot.slane %v203_v21, %v1382_v7  ;;  %v413_v40 = vsel %vm387_vm0, %v259_v34, 0 }
  0x17   : > { %485 = vmatpush1.bf16.msra.mxu0 %v389_v19  ;;  %v233_v29 = vcombine.high %v217_v22, %v217_v22  ;;  %v401_v31 = vsel %vm387_vm0, %v217_v22, 0  ;;  %v283_v33 = vcombine.high %v273_v27, %v273_v27  ;;  %v280_v38 = vrot.slane %v252_v35, %v1382_v7 }
  0x18   : > { %1283 = vmatprep.subr.msk.bf16.mxu1 %vm387_vm0, %v234_v24  ;;  %1285 = vmatprep.subr.msk.bf16.mxu0 %vm387_vm0, %v231_v26  ;;  %v235_v30 = vcombine.high %v231_v26, %v231_v26  ;;  %v419_v42 = vsel %vm387_vm0, %v281_v37, 0  ;;  %v266_v44 = vrot.slane %v250_v23, %v1382_v7  ;;  %v322_v47 = vrot.slane %v300_v45, %v1382_v7 }
  0x19   : > { %526 = vmatpush1.bf16.msra.mxu1 %v395_v25  ;;  %v407_v32 = vsel %vm387_vm0, %v233_v29, 0  ;;  %v284_v43 = vcombine.high %v280_v38, %v280_v38  ;;  %v308_v52 = vrot.slane %v292_v39, %v1382_v7  ;;  %v301_v53 = vcombine.high %v299_v48, %v299_v48 }
  0x1a   : > { %1282 = vmatmul.mubr.msk.bf16.vlgmr.msra.gmra.mrb[0].mxu0 %vm383_vm1, %v1401_v28  ;;  %1287 = vmatprep.subr.msk.bf16.mxu1 %vm387_vm0, %v235_v30  ;;  %v282_v46 = vcombine.high %v266_v44, %v266_v44  ;;  %v425_v49 = vsel %vm387_vm0, %v266_v44, 0  ;;  %v332_v51 = vcombine.high %v322_v47, %v322_v47  ;;  %v315_v62 = vrot.slane %v299_v48, %v1382_v7 }
  0x1b   : > { %567 = vmatpush1.bf16.msra.mxu0 %v401_v31  ;;  %598 = vmatprep.mubr.bf16.mxu0 %v1339_v3  ;;  %v330_v55 = vcombine.high %v308_v52, %v308_v52  ;;  %v329_v56 = vrot.slane %v301_v53, %v1382_v7  ;;  %v437_v58 = vsel %vm387_vm0, %v308_v52, 0  ;;  %v349_v63 = vcombine.high %v341_v57, %v341_v57 }
  0x1c   : > { %1284 = vmatmul.mubr.msk.bf16.vlgmr.msra.gmra.mrb[0].mxu1 %vm383_vm1, %v1401_v28  ;;  %1289 = vmatprep.subr.msk.bf16.mxu0 %vm387_vm0, %v273_v27  ;;  %v431_v50 = vsel %vm387_vm0, %v282_v46, 0  ;;  %v331_v0 = vcombine.high %v315_v62, %v315_v62  ;;  %v348_v2 = vrot.slane %v334_v59, %v1382_v7  ;;  %v449_v4 = vsel %vm387_vm0, %v315_v62, 0 }
  0x1d   : > { %608 = vmatpush1.bf16.msra.mxu1 %v407_v32  ;;  %639 = vmatprep.mubr.bf16.mxu1 %v1339_v3  ;;  %v443_v60 = vsel %vm387_vm0, %v330_v55, 0  ;;  %v333_v61 = vcombine.high %v329_v56, %v329_v56  ;;  %v371_v1 = vrot.slane %v349_v63, %v1382_v7  ;;  %v357_v8 = vrot.slane %v341_v57, %v1382_v7 }
  0x1e   : > { %1291 = vmatprep.subr.msk.bf16.mxu1 %vm387_vm0, %v283_v33  ;;  %v455_v5 = vsel %vm387_vm0, %v331_v0, 0  ;;  %v350_v9 = vcombine.high %v348_v2, %v348_v2  ;;  %v364_v15 = vrot.slane %v348_v2, %v1382_v7 }
  0x1f   : > { %v381_v6 = vcombine.high %v371_v1, %v371_v1  ;;  %v379_v10 = vcombine.high %v357_v8, %v357_v8  ;;  %v461_v12 = vsel %vm387_vm0, %v357_v8, 0 }
  0x20   : > { %v378_v11 = vrot.slane %v350_v9, %v1382_v7  ;;  %v380_v16 = vcombine.high %v364_v15, %v364_v15  ;;  %v473_v17 = vsel %vm387_vm0, %v364_v15, 0 }
  0x21   : > { %v467_v13 = vsel %vm387_vm0, %v379_v10, 0 }
  0x22   : > { %1286 = vmatmul.mubr.msk.bf16.vlgmr.msra.gmra.mrb[4].mxu0 %vm383_vm1, %v1401_v28  ;;  %v382_v14 = vcombine.high %v378_v11, %v378_v11  ;;  %v479_v7 = vsel %vm387_vm0, %v380_v16, 0 }
  0x23   : > { %649 = vmatpush1.bf16.msra.mxu0 %v413_v40  ;;  %680 = vmatprep.mubr.bf16.mxu0 %v1339_v3 }
  0x24   : > { %1288 = vmatmul.mubr.msk.bf16.vlgmr.msra.gmra.mrb[4].mxu1 %vm383_vm1, %v1401_v28  ;;  %1293 = vmatprep.subr.msk.bf16.mxu0 %vm387_vm0, %v280_v38 }
  0x25   : > { %690 = vmatpush1.bf16.msra.mxu1 %v419_v42  ;;  %721 = vmatprep.mubr.bf16.mxu1 %v1339_v3 }
  0x26   : > { %1295 = vmatprep.subr.msk.bf16.mxu1 %vm387_vm0, %v284_v43 }
  0x2a   : > { %1290 = vmatmul.mubr.msk.bf16.vlgmr.msra.gmra.mrb[8].mxu0 %vm383_vm1, %v1401_v28 }
  0x2b   : > { %731 = vmatpush1.bf16.msra.mxu0 %v425_v49  ;;  %762 = vmatprep.mubr.bf16.mxu0 %v1339_v3 }
  0x2c   : > { %1292 = vmatmul.mubr.msk.bf16.vlgmr.msra.gmra.mrb[8].mxu1 %vm383_vm1, %v1401_v28  ;;  %1297 = vmatprep.subr.msk.bf16.mxu0 %vm387_vm0, %v322_v47 }
  0x2d   : > { %772 = vmatpush1.bf16.msra.mxu1 %v431_v50  ;;  %803 = vmatprep.mubr.bf16.mxu1 %v1339_v3 }
  0x2e   : > { %1299 = vmatprep.subr.msk.bf16.mxu1 %vm387_vm0, %v332_v51 }
  0x32   : > { %1294 = vmatmul.mubr.msk.bf16.vlgmr.msra.gmra.mrb[12].mxu0 %vm383_vm1, %v1401_v28 }
  0x33   : > { %813 = vmatpush1.bf16.msra.mxu0 %v437_v58  ;;  %844 = vmatprep.mubr.bf16.mxu0 %v1339_v3 }
  0x34   : > { %1296 = vmatmul.mubr.msk.bf16.vlgmr.msra.gmra.mrb[12].mxu1 %vm383_vm1, %v1401_v28  ;;  %1301 = vmatprep.subr.msk.bf16.mxu0 %vm387_vm0, %v329_v56 }
  0x35   : > { %854 = vmatpush1.bf16.msra.mxu1 %v443_v60  ;;  %885 = vmatprep.mubr.bf16.mxu1 %v1339_v3 }
  0x36   : > { %1303 = vmatprep.subr.msk.bf16.mxu1 %vm387_vm0, %v333_v61 }
  0x3a   : > { %1298 = vmatmul.mubr.msk.bf16.vlgmr.msra.gmra.mrb[16].mxu0 %vm383_vm1, %v1401_v28 }
  0x3b   : > { %895 = vmatpush1.bf16.msra.mxu0 %v449_v4  ;;  %926 = vmatprep.mubr.bf16.mxu0 %v1339_v3 }
  0x3c   : > { %1300 = vmatmul.mubr.msk.bf16.vlgmr.msra.gmra.mrb[16].mxu1 %vm383_vm1, %v1401_v28  ;;  %1305 = vmatprep.subr.msk.bf16.mxu0 %vm387_vm0, %v371_v1 }
  0x3d   : > { %936 = vmatpush1.bf16.msra.mxu1 %v455_v5  ;;  %967 = vmatprep.mubr.bf16.mxu1 %v1339_v3 }
  0x3e   : > { %1307 = vmatprep.subr.msk.bf16.mxu1 %vm387_vm0, %v381_v6 }
  0x42   : > { %1302 = vmatmul.mubr.msk.bf16.vlgmr.msra.gmra.mrb[20].mxu0 %vm383_vm1, %v1401_v28 }
  0x43   : > { %977 = vmatpush1.bf16.msra.mxu0 %v461_v12  ;;  %1008 = vmatprep.mubr.bf16.mxu0 %v1339_v3 }
  0x44   : > { %1304 = vmatmul.mubr.msk.bf16.vlgmr.msra.gmra.mrb[20].mxu1 %vm383_vm1, %v1401_v28  ;;  %1309 = vmatprep.subr.msk.bf16.mxu0 %vm387_vm0, %v378_v11 }
  0x45   : > { %1018 = vmatpush1.bf16.msra.mxu1 %v467_v13  ;;  %1049 = vmatprep.mubr.bf16.mxu1 %v1339_v3 }
  0x46   : > { %1311 = vmatprep.subr.msk.bf16.mxu1 %vm387_vm0, %v382_v14 }
  0x4a   : > { %1306 = vmatmul.mubr.msk.bf16.vlgmr.msra.gmra.mrb[24].mxu0 %vm383_vm1, %v1401_v28 }
  0x4b   : > { %1059 = vmatpush1.bf16.msra.mxu0 %v473_v17  ;;  %1090 = vmatprep.mubr.bf16.mxu0 %v1339_v3 }
  0x4c   : > { %1308 = vmatmul.mubr.msk.bf16.vlgmr.msra.gmra.mrb[24].mxu1 %vm383_vm1, %v1401_v28 }
  0x4d   : > { %1100 = vmatpush1.bf16.msra.mxu1 %v479_v7  ;;  %1131 = vmatprep.mubr.bf16.mxu1 %v1339_v3 }
  0x52   : > { %1310 = vmatmul.mubr.msk.bf16.vlgmr.msra.gmra.mrb[28].mxu0 %vm383_vm1, %v1401_v28 }
  0x54   : > { %1312 = vmatmul.mubr.msk.bf16.vlgmr.msra.gmra.mrb[28].mxu1 %vm383_vm1, %v1401_v28 }
  0x87   : > { %v1495_v18 = vpop.permute.xlu0 %180 }
  0xed   : > { %v518_v19 = vpop.f32.mrb[0].mxu0 }
  0xee   : > { %v520_v20 = vpop.f32.mrb[1].mxu0  ;;  %v519_v21 = vadd.f32 %v518_v19, %v1495_v18 }
  0xef   : > { %v522_v22 = vpop.f32.mrb[2].mxu0  ;;  %v559_v23 = vpop.f32.mrb[0].mxu1  ;;  %v521_v24 = vadd.f32 %v520_v20, %v1495_v18 }
  0xf0   : > { %v523_v3 = vpop.f32.mrb[3].mxu0  ;;  %v560_v25 = vadd.f32 %v559_v23, %v1495_v18  ;;  %v561_v26 = vpop.f32.mrb[1].mxu1 }
  0xf1   : > { %v1172_v27 = vcombine.low %v519_v21, %v521_v24  ;;  %v562_v28 = vadd.f32 %v561_v26, %v1495_v18  ;;  %v563_v29 = vpop.f32.mrb[2].mxu1 }
  0xf2   : > { %v564_v30 = vpop.f32.mrb[3].mxu1 }
  0xf3   : > { %1204 = vst [vmem:[%s1503_s25] sm:$0x77] %v1172_v27  ;;  %v1173_v31 = vcombine.low %v560_v25, %v562_v28 }
  0xf5   : > { %1205 = vst [vmem:[%s1503_s25 + $0x8] sm:$0x77] %v1173_v31  ;;  %v600_v32 = vpop.f32.mrb[4].mxu0 }
  0xf6   : > { %v601_v33 = vadd.f32 %v600_v32, %v1495_v18  ;;  %v602_v34 = vpop.f32.mrb[5].mxu0 }
  0xf7   : > { %v603_v35 = vadd.f32 %v602_v34, %v1495_v18  ;;  %v604_v36 = vpop.f32.mrb[6].mxu0  ;;  %v641_v37 = vpop.f32.mrb[4].mxu1 }
  0xf8   : > { %v642_v38 = vadd.f32 %v641_v37, %v1495_v18  ;;  %v605_v39 = vpop.f32.mrb[7].mxu0  ;;  %v643_v40 = vpop.f32.mrb[5].mxu1 }
  0xf9   : > { %v1174_v41 = vcombine.low %v601_v33, %v603_v35  ;;  %v644_v42 = vadd.f32 %v643_v40, %v1495_v18  ;;  %v645_v43 = vpop.f32.mrb[6].mxu1 }
  0xfa   : > { %v646_v44 = vpop.f32.mrb[7].mxu1 }
  0xfb   : > { %1206 = vst [vmem:[%s1503_s25 + $0x10] sm:$0x77] %v1174_v41  ;;  %v1175_v45 = vcombine.low %v642_v38, %v644_v42 }
  0xfd   : > { %1207 = vst [vmem:[%s1503_s25 + $0x18] sm:$0x77] %v1175_v45  ;;  %v682_v46 = vpop.f32.mrb[8].mxu0 }
  0xfe   : > { %v683_v47 = vadd.f32 %v682_v46, %v1495_v18  ;;  %v684_v48 = vpop.f32.mrb[9].mxu0 }
  0xff   : > { %v685_v49 = vadd.f32 %v684_v48, %v1495_v18  ;;  %v686_v50 = vpop.f32.mrb[10].mxu0  ;;  %v723_v51 = vpop.f32.mrb[8].mxu1 }
 0x100   : > { %v724_v52 = vadd.f32 %v723_v51, %v1495_v18  ;;  %v687_v53 = vpop.f32.mrb[11].mxu0  ;;  %v725_v54 = vpop.f32.mrb[9].mxu1 }
 0x101   : > { %v1176_v55 = vcombine.low %v683_v47, %v685_v49  ;;  %v726_v56 = vadd.f32 %v725_v54, %v1495_v18  ;;  %v727_v57 = vpop.f32.mrb[10].mxu1 }
 0x102   : > { %v728_v58 = vpop.f32.mrb[11].mxu1 }
 0x103   : > { %1208 = vst [vmem:[%s1503_s25 + $0x20] sm:$0x77] %v1176_v55  ;;  %v1177_v59 = vcombine.low %v724_v52, %v726_v56 }
 0x105   : > { %1209 = vst [vmem:[%s1503_s25 + $0x28] sm:$0x77] %v1177_v59  ;;  %v764_v60 = vpop.f32.mrb[12].mxu0 }
 0x106   : > { %v765_v61 = vadd.f32 %v764_v60, %v1495_v18  ;;  %v766_v62 = vpop.f32.mrb[13].mxu0 }
 0x107   : > { %v767_v63 = vadd.f32 %v766_v62, %v1495_v18  ;;  %v768_v0 = vpop.f32.mrb[14].mxu0  ;;  %v805_v1 = vpop.f32.mrb[12].mxu1 }
 0x108   : > { %v806_v2 = vadd.f32 %v805_v1, %v1495_v18  ;;  %v769_v4 = vpop.f32.mrb[15].mxu0  ;;  %v807_v5 = vpop.f32.mrb[13].mxu1 }
 0x109   : > { %v1178_v6 = vcombine.low %v765_v61, %v767_v63  ;;  %v808_v8 = vadd.f32 %v807_v5, %v1495_v18  ;;  %v809_v9 = vpop.f32.mrb[14].mxu1 }
 0x10a   : > { %v810_v10 = vpop.f32.mrb[15].mxu1 }
 0x10b   : > { %1210 = vst [vmem:[%s1503_s25 + $0x30] sm:$0x77] %v1178_v6  ;;  %v1179_v11 = vcombine.low %v806_v2, %v808_v8 }
 0x10d   : > { %1211 = vst [vmem:[%s1503_s25 + $0x38] sm:$0x77] %v1179_v11  ;;  %v846_v12 = vpop.f32.mrb[16].mxu0 }
 0x10e   : > { %v847_v13 = vadd.f32 %v846_v12, %v1495_v18  ;;  %v848_v14 = vpop.f32.mrb[17].mxu0 }
 0x10f   : > { %v849_v15 = vadd.f32 %v848_v14, %v1495_v18  ;;  %v850_v16 = vpop.f32.mrb[18].mxu0  ;;  %v887_v17 = vpop.f32.mrb[16].mxu1 }
 0x110   : > { %v888_v7 = vadd.f32 %v887_v17, %v1495_v18  ;;  %v851_v19 = vpop.f32.mrb[19].mxu0  ;;  %v889_v20 = vpop.f32.mrb[17].mxu1 }
 0x111   : > { %v1180_v21 = vcombine.low %v847_v13, %v849_v15  ;;  %v890_v22 = vadd.f32 %v889_v20, %v1495_v18  ;;  %v891_v23 = vpop.f32.mrb[18].mxu1 }
 0x112   : > { %v892_v24 = vpop.f32.mrb[19].mxu1 }
 0x113   : > { %1212 = vst [vmem:[%s1503_s25 + $0x40] sm:$0x77] %v1180_v21  ;;  %v1181_v3 = vcombine.low %v888_v7, %v890_v22 }
 0x115   : > { %1213 = vst [vmem:[%s1503_s25 + $0x48] sm:$0x77] %v1181_v3  ;;  %v928_v25 = vpop.f32.mrb[20].mxu0 }
 0x116   : > { %v929_v26 = vadd.f32 %v928_v25, %v1495_v18  ;;  %v930_v27 = vpop.f32.mrb[21].mxu0 }
 0x117   : > { %v931_v28 = vadd.f32 %v930_v27, %v1495_v18  ;;  %v932_v29 = vpop.f32.mrb[22].mxu0  ;;  %v969_v30 = vpop.f32.mrb[20].mxu1 }
 0x118   : > { %v970_v31 = vadd.f32 %v969_v30, %v1495_v18  ;;  %v933_v32 = vpop.f32.mrb[23].mxu0  ;;  %v971_v33 = vpop.f32.mrb[21].mxu1 }
 0x119   : > { %v1182_v34 = vcombine.low %v929_v26, %v931_v28  ;;  %v972_v35 = vadd.f32 %v971_v33, %v1495_v18  ;;  %v973_v36 = vpop.f32.mrb[22].mxu1 }
 0x11a   : > { %v974_v37 = vpop.f32.mrb[23].mxu1 }
 0x11b   : > { %1214 = vst [vmem:[%s1503_s25 + $0x50] sm:$0x77] %v1182_v34  ;;  %v1183_v38 = vcombine.low %v970_v31, %v972_v35 }
 0x11d   : > { %1215 = vst [vmem:[%s1503_s25 + $0x58] sm:$0x77] %v1183_v38  ;;  %v1010_v39 = vpop.f32.mrb[24].mxu0 }
 0x11e   : > { %v1011_v40 = vadd.f32 %v1010_v39, %v1495_v18  ;;  %v1012_v41 = vpop.f32.mrb[25].mxu0 }
 0x11f   : > { %v1013_v42 = vadd.f32 %v1012_v41, %v1495_v18  ;;  %v1014_v43 = vpop.f32.mrb[26].mxu0  ;;  %v1051_v44 = vpop.f32.mrb[24].mxu1 }
 0x120   : > { %v1052_v45 = vadd.f32 %v1051_v44, %v1495_v18  ;;  %v1015_v46 = vpop.f32.mrb[27].mxu0  ;;  %v1053_v47 = vpop.f32.mrb[25].mxu1 }
 0x121   : > { %v1184_v48 = vcombine.low %v1011_v40, %v1013_v42  ;;  %v1054_v49 = vadd.f32 %v1053_v47, %v1495_v18  ;;  %v1055_v50 = vpop.f32.mrb[26].mxu1 }
 0x122   : > { %v1056_v51 = vpop.f32.mrb[27].mxu1 }
 0x123   : > { %1216 = vst [vmem:[%s1503_s25 + $0x60] sm:$0x77] %v1184_v48  ;;  %v1185_v52 = vcombine.low %v1052_v45, %v1054_v49 }
 0x125   : > { %1217 = vst [vmem:[%s1503_s25 + $0x68] sm:$0x77] %v1185_v52  ;;  %v1092_v53 = vpop.f32.mrb[28].mxu0 }
 0x126   : > { %v1093_v54 = vadd.f32 %v1092_v53, %v1495_v18  ;;  %v1094_v55 = vpop.f32.mrb[29].mxu0 }
 0x127   : > { %v1095_v56 = vadd.f32 %v1094_v55, %v1495_v18  ;;  %v1096_v57 = vpop.f32.mrb[30].mxu0  ;;  %v1133_v58 = vpop.f32.mrb[28].mxu1 }
 0x128   : > { %v1134_v59 = vadd.f32 %v1133_v58, %v1495_v18  ;;  %v1097_v60 = vpop.f32.mrb[31].mxu0  ;;  %v1135_v61 = vpop.f32.mrb[29].mxu1 }
 0x129   : > { %v1186_v62 = vcombine.low %v1093_v54, %v1095_v56  ;;  %v1136_v63 = vadd.f32 %v1135_v61, %v1495_v18  ;;  %v1137_v0 = vpop.f32.mrb[30].mxu1 }
 0x12a   : > { %v1138_v1 = vpop.f32.mrb[31].mxu1 }
 0x12b   : > { %1218 = vst [vmem:[%s1503_s25 + $0x70] sm:$0x77] %v1186_v62  ;;  %v1187_v2 = vcombine.low %v1134_v59, %v1136_v63 }
 0x12d   : > { %1219 = vst [vmem:[%s1503_s25 + $0x78] sm:$0x77] %v1187_v2 }
 0x12e PF: > { %s13_s12 = sadd.s32 1, %s1336_s12  }
 0x12f   : > { %p10_p4 = scmp.ge.s32.totalorder %s13_s12, 4  }
 0x131   :  { %12 = sbr.rel (!%p10_p4) target bundleno = 1 (0x1), region = 62 }

</bundles_post_ra>
